<compile_context>
chip_gen: v5e
topology: v5e:2x2
jax: 0.10.0
libtpu: 0.0.40
codegen_flags: <defaults>
</compile_context>

<pallas_src>
import functools

import jax
import jax.numpy as jnp
from jax.experimental import pallas as pl
from jax.experimental.pallas import tpu as pltpu

DISCR_FILTERS = 64
INPUT_CHANNELS = 3
IMAGE_SIZE = 64          # architecture requires 64x64 input (final 4x4 valid conv)
BN_EPS = 1e-5
COUT_PAD_LAST = 128      # lane-dense padding for the Cout=1 final layer

# (Cin, Cout, K, stride, pad, has_bn, act)
LAYER_CFGS = (
    (INPUT_CHANNELS,    DISCR_FILTERS,     4, 2, 1, False, "relu"),
    (DISCR_FILTERS,     DISCR_FILTERS * 2, 4, 2, 1, True,  "relu"),
    (DISCR_FILTERS * 2, DISCR_FILTERS * 4, 4, 2, 1, True,  "relu"),
    (DISCR_FILTERS * 4, DISCR_FILTERS * 8, 4, 2, 1, True,  "relu"),
    (DISCR_FILTERS * 8, 1,                 4, 1, 0, False, "sigmoid"),
)


def _pick_tile(n, candidates):
    for c in candidates:
        if n >= c and n % c == 0:
            return c
    return n  # fall back to the full extent (always legal for a BlockSpec)


# ----------------------------------------------------------------------------
# Kernel 1: tiled GEMM (im2col conv) + bias + optional activation.
# grid = (row_tiles, k_tiles); output block is resident across the k axis and the
# f32 accumulator lives in VMEM scratch (bounded, no vreg spills).
# ----------------------------------------------------------------------------
def _gemm_kernel(x_ref, w_ref, b_ref, o_ref, acc_ref, *, act):
    k = pl.program_id(1)

    @pl.when(k == 0)
    def _():
        acc_ref[...] = jnp.zeros_like(acc_ref)

    acc_ref[...] += jnp.dot(x_ref[...], w_ref[...],
                            preferred_element_type=jnp.float32)

    @pl.when(k == pl.num_programs(1) - 1)
    def _():
        y = acc_ref[...] + b_ref[...]
        if act == "relu":
            y = jnp.maximum(y, 0.0)
        elif act == "sigmoid":
            y = 1.0 / (1.0 + jnp.exp(-y))
        o_ref[...] = y.astype(o_ref.dtype)


def _gemm_bias_act(patches, w, bias, *, act, out_dtype):
    """patches: (R, C) bf16, w: (C, Cout) bf16, bias: (1, Cout) f32."""
    R, C = patches.shape
    Cout = w.shape[1]
    TM = _pick_tile(R, (256, 128, 64, 32, 16, 8))
    TK = _pick_tile(C, (512, 256, 128))
    n_m, n_k = R // TM, C // TK

    kern = functools.partial(_gemm_kernel, act=act)
    return pl.pallas_call(
        kern,
        out_shape=jax.ShapeDtypeStruct((R, Cout), out_dtype),
        grid_spec=pltpu.PrefetchScalarGridSpec(
            num_scalar_prefetch=0,
            grid=(n_m, n_k),
            in_specs=[
                pl.BlockSpec((TM, TK), lambda i, k: (i, k)),
                pl.BlockSpec((TK, Cout), lambda i, k: (k, 0)),
                pl.BlockSpec((1, Cout), lambda i, k: (0, 0)),
            ],
            out_specs=pl.BlockSpec((TM, Cout), lambda i, k: (i, 0)),
            scratch_shapes=[pltpu.VMEM((TM, Cout), jnp.float32)],
        ),
        compiler_params=pltpu.CompilerParams(
            dimension_semantics=("parallel", "arbitrary"),
            vmem_limit_bytes=32 * 1024 * 1024,  # well within v7x's 64 MiB / TC
        ),
    )(patches, w, bias)


# ----------------------------------------------------------------------------
# Kernel 2: per-channel scale/shift (folded BatchNorm) + ReLU, tiled over rows.
# ----------------------------------------------------------------------------
def _scale_shift_relu_kernel(x_ref, s_ref, t_ref, o_ref):
    y = x_ref[...] * s_ref[...] + t_ref[...]
    o_ref[...] = jnp.maximum(y, 0.0).astype(o_ref.dtype)


def _scale_shift_relu(x, scale, shift, out_dtype=jnp.bfloat16):
    R, Cout = x.shape
    TM = _pick_tile(R, (512, 256, 128, 64, 32, 16, 8))
    return pl.pallas_call(
        _scale_shift_relu_kernel,
        out_shape=jax.ShapeDtypeStruct((R, Cout), out_dtype),
        grid_spec=pltpu.PrefetchScalarGridSpec(
            num_scalar_prefetch=0,
            grid=(R // TM,),
            in_specs=[
                pl.BlockSpec((TM, Cout), lambda i: (i, 0)),
                pl.BlockSpec((1, Cout), lambda i: (0, 0)),
                pl.BlockSpec((1, Cout), lambda i: (0, 0)),
            ],
            out_specs=pl.BlockSpec((TM, Cout), lambda i: (i, 0)),
        ),
        compiler_params=pltpu.CompilerParams(
            dimension_semantics=("parallel",),
        ),
    )(x, scale, shift)


# ----------------------------------------------------------------------------
# Wrapper-side layout glue.
# ----------------------------------------------------------------------------
def _im2col(x, K, stride, pad):
    """x: (B, H, W, Cin) -> patches (B*Ho*Wo, K*K*Cin), plus (Ho, Wo).

    Contraction index order is (kh, kw, cin), matching the weight conversion in
    init_params.  No zero-dilation anywhere: every MXU MAC uses real data.
    """
    B, H, W, Cin = x.shape
    Ho = (H + 2 * pad - K) // stride + 1
    Wo = (W + 2 * pad - K) // stride + 1
    if pad:
        x = jnp.pad(x, ((0, 0), (pad, pad), (pad, pad), (0, 0)))
    taps = []
    for kh in range(K):
        for kw in range(K):
            taps.append(x[:, kh:kh + stride * (Ho - 1) + 1:stride,
                           kw:kw + stride * (Wo - 1) + 1:stride, :])
    patches = jnp.concatenate(taps, axis=-1)          # (B, Ho, Wo, K*K*Cin)
    return patches.reshape(B * Ho * Wo, K * K * Cin), Ho, Wo


def init_params(key):
    """Deterministic synthetic params; layout conversion hoisted here (done once)."""
    params = []
    for (cin, cout, K, _s, _p, has_bn, _act) in LAYER_CFGS:
        key, kw_, kb_ = jax.random.split(key, 3)
        fan = cin * K * K
        w_pt = jax.random.normal(kw_, (cout, cin, K, K), jnp.float32) / jnp.sqrt(float(fan))
        b_pt = jax.random.normal(kb_, (cout,), jnp.float32) * 0.01
        # PyTorch Conv2d weight (Cout, Cin, Kh, Kw) -> GEMM weight (Kh*Kw*Cin, Cout)
        w_g = jnp.transpose(w_pt, (2, 3, 1, 0)).reshape(K * K * cin, cout)
        if cout == 1:  # final layer: lane-dense output (pad Cout 1 -> 128 with zeros)
            w_g = jnp.pad(w_g, ((0, 0), (0, COUT_PAD_LAST - 1)))
            b_pt = jnp.pad(b_pt, (0, COUT_PAD_LAST - 1))
        layer = {
            "w": w_g.astype(jnp.bfloat16),
            "b": b_pt.reshape(1, -1).astype(jnp.float32),
        }
        if has_bn:
            layer["gamma"] = jnp.ones((1, cout), jnp.float32)   # BatchNorm weight init
            layer["beta"] = jnp.zeros((1, cout), jnp.float32)   # BatchNorm bias init
        params.append(layer)
    return params


@jax.jit
def discriminator_forward(x_nchw, params):
    """PyTorch Discriminator.forward: (B, 3, 64, 64) NCHW -> (B,) sigmoid probs."""
    B = x_nchw.shape[0]
    x = jnp.transpose(x_nchw, (0, 2, 3, 1)).astype(jnp.bfloat16)   # NHWC, bf16 operands
    for cfg, p in zip(LAYER_CFGS, params):
        _cin, _cout, K, s, pad, has_bn, act = cfg
        patches, Ho, Wo = _im2col(x, K, s, pad)
        if has_bn:
            # Pass 1 (Pallas): conv + bias in f32.
            y = _gemm_bias_act(patches, p["w"], p["b"], act="none",
                               out_dtype=jnp.float32)
            # Tiny per-channel batch-stats reduction between the two pallas_calls
            # (train-mode BatchNorm: biased stats over N*H*W per channel).
            mean = jnp.mean(y, axis=0, keepdims=True)
            var = jnp.mean(jnp.square(y - mean), axis=0, keepdims=True)
            scale = p["gamma"] * jax.lax.rsqrt(var + BN_EPS)
            shift = p["beta"] - mean * scale
            # Pass 2 (Pallas): normalize + ReLU, cast to bf16 for the next layer.
            y = _scale_shift_relu(y, scale, shift, out_dtype=jnp.bfloat16)
        else:
            out_dtype = jnp.bfloat16 if act == "relu" else jnp.float32
            y = _gemm_bias_act(patches, p["w"], p["b"], act=act, out_dtype=out_dtype)
        x = y.reshape(B, Ho, Wo, -1)
    # Final layer: Ho=Wo=1, 128 padded output lanes; channel 0 is the real output.
    # Matches conv_out.view(-1, 1).squeeze(dim=1) -> shape (B,).
    return x.reshape(B, -1)[:, 0]


# TODO(synk): BatchNorm running_mean/running_var buffer updates (training-time side
# effect of the PyTorch module) are not modeled; they do not affect forward output.

if __name__ == "__main__":
    key = jax.random.PRNGKey(0)
    kx, kp = jax.random.split(key)
    B = 2
    x = jax.random.normal(kx, (B, INPUT_CHANNELS, IMAGE_SIZE, IMAGE_SIZE), jnp.float32)
    params = init_params(kp)

    y = discriminator_forward(x, params)
    y = jax.block_until_ready(y)

    assert y.shape == (B,), y.shape
    assert bool(jnp.all(jnp.isfinite(y)))
    assert bool(jnp.all((y > 0.0) & (y < 1.0)))   # sigmoid output range
    print("KERNEL_OK")
</pallas_src>

<mosaic_0001>
module attributes {stable_mosaic.version = 11 : i64} {
  func.func @_gemm_kernel(%arg0: i32, %arg1: i32, %arg2: memref<256x48xbf16, #tpu.memory_space<vmem>>, %arg3: memref<48x64xbf16, #tpu.memory_space<vmem>>, %arg4: memref<1x64xf32, #tpu.memory_space<vmem>>, %arg5: memref<256x64xbf16, #tpu.memory_space<vmem>>, %arg6: memref<256x64xf32, #tpu.memory_space<vmem>>) attributes {dimension_semantics = [#tpu.dimension_semantics<parallel>, #tpu.dimension_semantics<arbitrary>], iteration_bounds = array<i64: 8, 1>, scalar_prefetch = 0 : i64, scratch_operands = 1 : i64, tpu.core_type = #tpu.core_type<tc>, window_params = [{transform_indices = @transform_0, window_bounds = array<i64: 256, 48>}, {transform_indices = @transform_1, window_bounds = array<i64: 48, 64>}, {pipeline_mode = #tpu.pipeline_mode<synchronous>, transform_indices = @transform_2, window_bounds = array<i64: 1, 64>}, {transform_indices = @transform_3, window_bounds = array<i64: 256, 64>}]} {
    %c0_i32 = arith.constant 0 : i32
    %0 = arith.cmpi eq, %arg1, %c0_i32 : i32
    %1 = arith.extui %0 : i1 to i32
    %c0_i32_0 = arith.constant 0 : i32
    %2 = arith.cmpi ne, %1, %c0_i32_0 : i32
    scf.if %2 {
      %cst_10 = arith.constant 0.000000e+00 : f32
      %12 = vector.broadcast %cst_10 : f32 to vector<256x64xf32>
      %c0_11 = arith.constant 0 : index
      %c0_12 = arith.constant 0 : index
      %13 = vector.load %arg6[%c0_11, %c0_12] : memref<256x64xf32, #tpu.memory_space<vmem>>, vector<256x64xf32>
      tpu.vector_store %arg6[%c0_11, %c0_12], %12 {strides = array<i32>} : memref<256x64xf32, #tpu.memory_space<vmem>>, vector<256x64xf32>,
    } else {
    }
    %c0 = arith.constant 0 : index
    %c0_1 = arith.constant 0 : index
    %3 = vector.load %arg6[%c0, %c0_1] : memref<256x64xf32, #tpu.memory_space<vmem>>, vector<256x64xf32>
    %c0_2 = arith.constant 0 : index
    %c0_3 = arith.constant 0 : index
    %4 = vector.load %arg2[%c0_2, %c0_3] : memref<256x48xbf16, #tpu.memory_space<vmem>>, vector<256x48xbf16>
    %c0_4 = arith.constant 0 : index
    %c0_5 = arith.constant 0 : index
    %5 = vector.load %arg3[%c0_4, %c0_5] : memref<48x64xbf16, #tpu.memory_space<vmem>>, vector<48x64xbf16>
    %cst = arith.constant dense<0.000000e+00> : vector<256x64xf32>
    %6 = tpu.matmul %4, %5, %cst {dimension_numbers = #tpu.dot_dimension_numbers<[1], [0], [0], [1], [0, 0, 1, 1], [], []>} : vector<256x48xbf16>, vector<48x64xbf16>, vector<256x64xf32> -> vector<256x64xf32>
    %7 = arith.addf %3, %6 : vector<256x64xf32>
    %c0_6 = arith.constant 0 : index
    %c0_7 = arith.constant 0 : index
    %8 = vector.load %arg6[%c0_6, %c0_7] : memref<256x64xf32, #tpu.memory_space<vmem>>, vector<256x64xf32>
    tpu.vector_store %arg6[%c0_6, %c0_7], %7 {strides = array<i32>} : memref<256x64xf32, #tpu.memory_space<vmem>>, vector<256x64xf32>,
    %c0_i32_8 = arith.constant 0 : i32
    %9 = arith.cmpi eq, %arg1, %c0_i32_8 : i32
    %10 = arith.extui %9 : i1 to i32
    %c0_i32_9 = arith.constant 0 : i32
    %11 = arith.cmpi ne, %10, %c0_i32_9 : i32
    scf.if %11 {
      %c0_10 = arith.constant 0 : index
      %c0_11 = arith.constant 0 : index
      %12 = vector.load %arg6[%c0_10, %c0_11] : memref<256x64xf32, #tpu.memory_space<vmem>>, vector<256x64xf32>
      %c0_12 = arith.constant 0 : index
      %c0_13 = arith.constant 0 : index
      %13 = vector.load %arg4[%c0_12, %c0_13] : memref<1x64xf32, #tpu.memory_space<vmem>>, vector<1x64xf32>
      %14 = vector.broadcast %13 : vector<1x64xf32> to vector<256x64xf32>
      %15 = arith.addf %12, %14 : vector<256x64xf32>
      %cst_14 = arith.constant 0.000000e+00 : f32
      %16 = vector.broadcast %cst_14 : f32 to vector<256x64xf32>
      %17 = arith.maximumf %15, %16 : vector<256x64xf32>
      %18 = arith.truncf %17 : vector<256x64xf32> to vector<256x64xbf16>
      %c0_15 = arith.constant 0 : index
      %c0_16 = arith.constant 0 : index
      %19 = vector.load %arg5[%c0_15, %c0_16] : memref<256x64xbf16, #tpu.memory_space<vmem>>, vector<256x64xbf16>
      tpu.vector_store %arg5[%c0_15, %c0_16], %18 {strides = array<i32>} : memref<256x64xbf16, #tpu.memory_space<vmem>>, vector<256x64xbf16>,
    } else {
    }
    return
  }
  func.func @transform_0(%arg0: i32, %arg1: i32) -> (i32, i32) {
    %c0_i32 = arith.constant 0 : i32
    return %arg0, %arg1 : i32, i32
  }
  func.func @transform_1(%arg0: i32, %arg1: i32) -> (i32, i32) {
    %c0_i32 = arith.constant 0 : i32
    %c0_i32_0 = arith.constant 0 : i32
    return %arg1, %c0_i32 : i32, i32
  }
  func.func @transform_2(%arg0: i32, %arg1: i32) -> (i32, i32) {
    %c0_i32 = arith.constant 0 : i32
    %c0_i32_0 = arith.constant 0 : i32
    %c0_i32_1 = arith.constant 0 : i32
    return %c0_i32, %c0_i32_0 : i32, i32
  }
  func.func @transform_3(%arg0: i32, %arg1: i32) -> (i32, i32) {
    %c0_i32 = arith.constant 0 : i32
    %c0_i32_0 = arith.constant 0 : i32
    return %arg0, %c0_i32 : i32, i32
  }
}

module attributes {stable_mosaic.version = 11 : i64} {
  func.func @_gemm_kernel(%arg0: i32, %arg1: i32, %arg2: memref<256x512xbf16, #tpu.memory_space<vmem>>, %arg3: memref<512x128xbf16, #tpu.memory_space<vmem>>, %arg4: memref<1x128xf32, #tpu.memory_space<vmem>>, %arg5: memref<256x128xf32, #tpu.memory_space<vmem>>, %arg6: memref<256x128xf32, #tpu.memory_space<vmem>>) attributes {dimension_semantics = [#tpu.dimension_semantics<parallel>, #tpu.dimension_semantics<arbitrary>], iteration_bounds = array<i64: 2, 2>, scalar_prefetch = 0 : i64, scratch_operands = 1 : i64, tpu.core_type = #tpu.core_type<tc>, window_params = [{transform_indices = @transform_0, window_bounds = array<i64: 256, 512>}, {transform_indices = @transform_1, window_bounds = array<i64: 512, 128>}, {pipeline_mode = #tpu.pipeline_mode<synchronous>, transform_indices = @transform_2, window_bounds = array<i64: 1, 128>}, {transform_indices = @transform_3, window_bounds = array<i64: 256, 128>}]} {
    %c0_i32 = arith.constant 0 : i32
    %0 = arith.cmpi eq, %arg1, %c0_i32 : i32
    %1 = arith.extui %0 : i1 to i32
    %c0_i32_0 = arith.constant 0 : i32
    %2 = arith.cmpi ne, %1, %c0_i32_0 : i32
    scf.if %2 {
      %cst_9 = arith.constant 0.000000e+00 : f32
      %12 = vector.broadcast %cst_9 : f32 to vector<256x128xf32>
      %c0_10 = arith.constant 0 : index
      %c0_11 = arith.constant 0 : index
      %13 = vector.load %arg6[%c0_10, %c0_11] : memref<256x128xf32, #tpu.memory_space<vmem>>, vector<256x128xf32>
      tpu.vector_store %arg6[%c0_10, %c0_11], %12 {strides = array<i32>} : memref<256x128xf32, #tpu.memory_space<vmem>>, vector<256x128xf32>,
    } else {
    }
    %c0 = arith.constant 0 : index
    %c0_1 = arith.constant 0 : index
    %3 = vector.load %arg6[%c0, %c0_1] : memref<256x128xf32, #tpu.memory_space<vmem>>, vector<256x128xf32>
    %c0_2 = arith.constant 0 : index
    %c0_3 = arith.constant 0 : index
    %4 = vector.load %arg2[%c0_2, %c0_3] : memref<256x512xbf16, #tpu.memory_space<vmem>>, vector<256x512xbf16>
    %c0_4 = arith.constant 0 : index
    %c0_5 = arith.constant 0 : index
    %5 = vector.load %arg3[%c0_4, %c0_5] : memref<512x128xbf16, #tpu.memory_space<vmem>>, vector<512x128xbf16>
    %cst = arith.constant dense<0.000000e+00> : vector<256x128xf32>
    %6 = tpu.matmul %4, %5, %cst {dimension_numbers = #tpu.dot_dimension_numbers<[1], [0], [0], [1], [0, 0, 1, 1], [], []>} : vector<256x512xbf16>, vector<512x128xbf16>, vector<256x128xf32> -> vector<256x128xf32>
    %7 = arith.addf %3, %6 : vector<256x128xf32>
    %c0_6 = arith.constant 0 : index
    %c0_7 = arith.constant 0 : index
    %8 = vector.load %arg6[%c0_6, %c0_7] : memref<256x128xf32, #tpu.memory_space<vmem>>, vector<256x128xf32>
    tpu.vector_store %arg6[%c0_6, %c0_7], %7 {strides = array<i32>} : memref<256x128xf32, #tpu.memory_space<vmem>>, vector<256x128xf32>,
    %c1_i32 = arith.constant 1 : i32
    %9 = arith.cmpi eq, %arg1, %c1_i32 : i32
    %10 = arith.extui %9 : i1 to i32
    %c0_i32_8 = arith.constant 0 : i32
    %11 = arith.cmpi ne, %10, %c0_i32_8 : i32
    scf.if %11 {
      %c0_9 = arith.constant 0 : index
      %c0_10 = arith.constant 0 : index
      %12 = vector.load %arg6[%c0_9, %c0_10] : memref<256x128xf32, #tpu.memory_space<vmem>>, vector<256x128xf32>
      %c0_11 = arith.constant 0 : index
      %c0_12 = arith.constant 0 : index
      %13 = vector.load %arg4[%c0_11, %c0_12] : memref<1x128xf32, #tpu.memory_space<vmem>>, vector<1x128xf32>
      %14 = vector.broadcast %13 : vector<1x128xf32> to vector<256x128xf32>
      %15 = arith.addf %12, %14 : vector<256x128xf32>
      %c0_13 = arith.constant 0 : index
      %c0_14 = arith.constant 0 : index
      %16 = vector.load %arg5[%c0_13, %c0_14] : memref<256x128xf32, #tpu.memory_space<vmem>>, vector<256x128xf32>
      tpu.vector_store %arg5[%c0_13, %c0_14], %15 {strides = array<i32>} : memref<256x128xf32, #tpu.memory_space<vmem>>, vector<256x128xf32>,
    } else {
    }
    return
  }
  func.func @transform_0(%arg0: i32, %arg1: i32) -> (i32, i32) {
    %c0_i32 = arith.constant 0 : i32
    return %arg0, %arg1 : i32, i32
  }
  func.func @transform_1(%arg0: i32, %arg1: i32) -> (i32, i32) {
    %c0_i32 = arith.constant 0 : i32
    %c0_i32_0 = arith.constant 0 : i32
    return %arg1, %c0_i32 : i32, i32
  }
  func.func @transform_2(%arg0: i32, %arg1: i32) -> (i32, i32) {
    %c0_i32 = arith.constant 0 : i32
    %c0_i32_0 = arith.constant 0 : i32
    %c0_i32_1 = arith.constant 0 : i32
    return %c0_i32, %c0_i32_0 : i32, i32
  }
  func.func @transform_3(%arg0: i32, %arg1: i32) -> (i32, i32) {
    %c0_i32 = arith.constant 0 : i32
    %c0_i32_0 = arith.constant 0 : i32
    return %arg0, %c0_i32 : i32, i32
  }
}

module attributes {stable_mosaic.version = 11 : i64} {
  func.func @_scale_shift_relu_kernel(%arg0: i32, %arg1: memref<512x128xf32, #tpu.memory_space<vmem>>, %arg2: memref<1x128xf32, #tpu.memory_space<vmem>>, %arg3: memref<1x128xf32, #tpu.memory_space<vmem>>, %arg4: memref<512x128xbf16, #tpu.memory_space<vmem>>) attributes {dimension_semantics = [#tpu.dimension_semantics<parallel>], iteration_bounds = array<i64: 1>, scalar_prefetch = 0 : i64, scratch_operands = 0 : i64, tpu.core_type = #tpu.core_type<tc>, window_params = [{transform_indices = @transform_0, window_bounds = array<i64: 512, 128>}, {pipeline_mode = #tpu.pipeline_mode<synchronous>, transform_indices = @transform_1, window_bounds = array<i64: 1, 128>}, {pipeline_mode = #tpu.pipeline_mode<synchronous>, transform_indices = @transform_2, window_bounds = array<i64: 1, 128>}, {transform_indices = @transform_3, window_bounds = array<i64: 512, 128>}]} {
    %c0 = arith.constant 0 : index
    %c0_0 = arith.constant 0 : index
    %0 = vector.load %arg1[%c0, %c0_0] : memref<512x128xf32, #tpu.memory_space<vmem>>, vector<512x128xf32>
    %c0_1 = arith.constant 0 : index
    %c0_2 = arith.constant 0 : index
    %1 = vector.load %arg2[%c0_1, %c0_2] : memref<1x128xf32, #tpu.memory_space<vmem>>, vector<1x128xf32>
    %2 = vector.broadcast %1 : vector<1x128xf32> to vector<512x128xf32>
    %3 = arith.mulf %0, %2 : vector<512x128xf32>
    %c0_3 = arith.constant 0 : index
    %c0_4 = arith.constant 0 : index
    %4 = vector.load %arg3[%c0_3, %c0_4] : memref<1x128xf32, #tpu.memory_space<vmem>>, vector<1x128xf32>
    %5 = vector.broadcast %4 : vector<1x128xf32> to vector<512x128xf32>
    %6 = arith.addf %3, %5 : vector<512x128xf32>
    %cst = arith.constant 0.000000e+00 : f32
    %7 = vector.broadcast %cst : f32 to vector<512x128xf32>
    %8 = arith.maximumf %6, %7 : vector<512x128xf32>
    %9 = arith.truncf %8 : vector<512x128xf32> to vector<512x128xbf16>
    %c0_5 = arith.constant 0 : index
    %c0_6 = arith.constant 0 : index
    %10 = vector.load %arg4[%c0_5, %c0_6] : memref<512x128xbf16, #tpu.memory_space<vmem>>, vector<512x128xbf16>
    tpu.vector_store %arg4[%c0_5, %c0_6], %9 {strides = array<i32>} : memref<512x128xbf16, #tpu.memory_space<vmem>>, vector<512x128xbf16>,
    return
  }
  func.func @transform_0(%arg0: i32) -> (i32, i32) {
    %c0_i32 = arith.constant 0 : i32
    %c0_i32_0 = arith.constant 0 : i32
    return %arg0, %c0_i32 : i32, i32
  }
  func.func @transform_1(%arg0: i32) -> (i32, i32) {
    %c0_i32 = arith.constant 0 : i32
    %c0_i32_0 = arith.constant 0 : i32
    %c0_i32_1 = arith.constant 0 : i32
    return %c0_i32, %c0_i32_0 : i32, i32
  }
  func.func @transform_2(%arg0: i32) -> (i32, i32) {
    %c0_i32 = arith.constant 0 : i32
    %c0_i32_0 = arith.constant 0 : i32
    %c0_i32_1 = arith.constant 0 : i32
    return %c0_i32, %c0_i32_0 : i32, i32
  }
  func.func @transform_3(%arg0: i32) -> (i32, i32) {
    %c0_i32 = arith.constant 0 : i32
    %c0_i32_0 = arith.constant 0 : i32
    return %arg0, %c0_i32 : i32, i32
  }
}

module attributes {stable_mosaic.version = 11 : i64} {
  func.func @_scale_shift_relu_kernel(%arg0: i32, %arg1: memref<128x256xf32, #tpu.memory_space<vmem>>, %arg2: memref<1x256xf32, #tpu.memory_space<vmem>>, %arg3: memref<1x256xf32, #tpu.memory_space<vmem>>, %arg4: memref<128x256xbf16, #tpu.memory_space<vmem>>) attributes {dimension_semantics = [#tpu.dimension_semantics<parallel>], iteration_bounds = array<i64: 1>, scalar_prefetch = 0 : i64, scratch_operands = 0 : i64, tpu.core_type = #tpu.core_type<tc>, window_params = [{transform_indices = @transform_0, window_bounds = array<i64: 128, 256>}, {pipeline_mode = #tpu.pipeline_mode<synchronous>, transform_indices = @transform_1, window_bounds = array<i64: 1, 256>}, {pipeline_mode = #tpu.pipeline_mode<synchronous>, transform_indices = @transform_2, window_bounds = array<i64: 1, 256>}, {transform_indices = @transform_3, window_bounds = array<i64: 128, 256>}]} {
    %c0 = arith.constant 0 : index
    %c0_0 = arith.constant 0 : index
    %0 = vector.load %arg1[%c0, %c0_0] : memref<128x256xf32, #tpu.memory_space<vmem>>, vector<128x256xf32>
    %c0_1 = arith.constant 0 : index
    %c0_2 = arith.constant 0 : index
    %1 = vector.load %arg2[%c0_1, %c0_2] : memref<1x256xf32, #tpu.memory_space<vmem>>, vector<1x256xf32>
    %2 = vector.broadcast %1 : vector<1x256xf32> to vector<128x256xf32>
    %3 = arith.mulf %0, %2 : vector<128x256xf32>
    %c0_3 = arith.constant 0 : index
    %c0_4 = arith.constant 0 : index
    %4 = vector.load %arg3[%c0_3, %c0_4] : memref<1x256xf32, #tpu.memory_space<vmem>>, vector<1x256xf32>
    %5 = vector.broadcast %4 : vector<1x256xf32> to vector<128x256xf32>
    %6 = arith.addf %3, %5 : vector<128x256xf32>
    %cst = arith.constant 0.000000e+00 : f32
    %7 = vector.broadcast %cst : f32 to vector<128x256xf32>
    %8 = arith.maximumf %6, %7 : vector<128x256xf32>
    %9 = arith.truncf %8 : vector<128x256xf32> to vector<128x256xbf16>
    %c0_5 = arith.constant 0 : index
    %c0_6 = arith.constant 0 : index
    %10 = vector.load %arg4[%c0_5, %c0_6] : memref<128x256xbf16, #tpu.memory_space<vmem>>, vector<128x256xbf16>
    tpu.vector_store %arg4[%c0_5, %c0_6], %9 {strides = array<i32>} : memref<128x256xbf16, #tpu.memory_space<vmem>>, vector<128x256xbf16>,
    return
  }
  func.func @transform_0(%arg0: i32) -> (i32, i32) {
    %c0_i32 = arith.constant 0 : i32
    %c0_i32_0 = arith.constant 0 : i32
    return %arg0, %c0_i32 : i32, i32
  }
  func.func @transform_1(%arg0: i32) -> (i32, i32) {
    %c0_i32 = arith.constant 0 : i32
    %c0_i32_0 = arith.constant 0 : i32
    %c0_i32_1 = arith.constant 0 : i32
    return %c0_i32, %c0_i32_0 : i32, i32
  }
  func.func @transform_2(%arg0: i32) -> (i32, i32) {
    %c0_i32 = arith.constant 0 : i32
    %c0_i32_0 = arith.constant 0 : i32
    %c0_i32_1 = arith.constant 0 : i32
    return %c0_i32, %c0_i32_0 : i32, i32
  }
  func.func @transform_3(%arg0: i32) -> (i32, i32) {
    %c0_i32 = arith.constant 0 : i32
    %c0_i32_0 = arith.constant 0 : i32
    return %arg0, %c0_i32 : i32, i32
  }
}

module attributes {stable_mosaic.version = 11 : i64} {
  func.func @_gemm_kernel(%arg0: i32, %arg1: i32, %arg2: memref<128x512xbf16, #tpu.memory_space<vmem>>, %arg3: memref<512x256xbf16, #tpu.memory_space<vmem>>, %arg4: memref<1x256xf32, #tpu.memory_space<vmem>>, %arg5: memref<128x256xf32, #tpu.memory_space<vmem>>, %arg6: memref<128x256xf32, #tpu.memory_space<vmem>>) attributes {dimension_semantics = [#tpu.dimension_semantics<parallel>, #tpu.dimension_semantics<arbitrary>], iteration_bounds = array<i64: 1, 4>, scalar_prefetch = 0 : i64, scratch_operands = 1 : i64, tpu.core_type = #tpu.core_type<tc>, window_params = [{transform_indices = @transform_0, window_bounds = array<i64: 128, 512>}, {transform_indices = @transform_1, window_bounds = array<i64: 512, 256>}, {pipeline_mode = #tpu.pipeline_mode<synchronous>, transform_indices = @transform_2, window_bounds = array<i64: 1, 256>}, {transform_indices = @transform_3, window_bounds = array<i64: 128, 256>}]} {
    %c0_i32 = arith.constant 0 : i32
    %0 = arith.cmpi eq, %arg1, %c0_i32 : i32
    %1 = arith.extui %0 : i1 to i32
    %c0_i32_0 = arith.constant 0 : i32
    %2 = arith.cmpi ne, %1, %c0_i32_0 : i32
    scf.if %2 {
      %cst_9 = arith.constant 0.000000e+00 : f32
      %12 = vector.broadcast %cst_9 : f32 to vector<128x256xf32>
      %c0_10 = arith.constant 0 : index
      %c0_11 = arith.constant 0 : index
      %13 = vector.load %arg6[%c0_10, %c0_11] : memref<128x256xf32, #tpu.memory_space<vmem>>, vector<128x256xf32>
      tpu.vector_store %arg6[%c0_10, %c0_11], %12 {strides = array<i32>} : memref<128x256xf32, #tpu.memory_space<vmem>>, vector<128x256xf32>,
    } else {
    }
    %c0 = arith.constant 0 : index
    %c0_1 = arith.constant 0 : index
    %3 = vector.load %arg6[%c0, %c0_1] : memref<128x256xf32, #tpu.memory_space<vmem>>, vector<128x256xf32>
    %c0_2 = arith.constant 0 : index
    %c0_3 = arith.constant 0 : index
    %4 = vector.load %arg2[%c0_2, %c0_3] : memref<128x512xbf16, #tpu.memory_space<vmem>>, vector<128x512xbf16>
    %c0_4 = arith.constant 0 : index
    %c0_5 = arith.constant 0 : index
    %5 = vector.load %arg3[%c0_4, %c0_5] : memref<512x256xbf16, #tpu.memory_space<vmem>>, vector<512x256xbf16>
    %cst = arith.constant dense<0.000000e+00> : vector<128x256xf32>
    %6 = tpu.matmul %4, %5, %cst {dimension_numbers = #tpu.dot_dimension_numbers<[1], [0], [0], [1], [0, 0, 1, 1], [], []>} : vector<128x512xbf16>, vector<512x256xbf16>, vector<128x256xf32> -> vector<128x256xf32>
    %7 = arith.addf %3, %6 : vector<128x256xf32>
    %c0_6 = arith.constant 0 : index
    %c0_7 = arith.constant 0 : index
    %8 = vector.load %arg6[%c0_6, %c0_7] : memref<128x256xf32, #tpu.memory_space<vmem>>, vector<128x256xf32>
    tpu.vector_store %arg6[%c0_6, %c0_7], %7 {strides = array<i32>} : memref<128x256xf32, #tpu.memory_space<vmem>>, vector<128x256xf32>,
    %c3_i32 = arith.constant 3 : i32
    %9 = arith.cmpi eq, %arg1, %c3_i32 : i32
    %10 = arith.extui %9 : i1 to i32
    %c0_i32_8 = arith.constant 0 : i32
    %11 = arith.cmpi ne, %10, %c0_i32_8 : i32
    scf.if %11 {
      %c0_9 = arith.constant 0 : index
      %c0_10 = arith.constant 0 : index
      %12 = vector.load %arg6[%c0_9, %c0_10] : memref<128x256xf32, #tpu.memory_space<vmem>>, vector<128x256xf32>
      %c0_11 = arith.constant 0 : index
      %c0_12 = arith.constant 0 : index
      %13 = vector.load %arg4[%c0_11, %c0_12] : memref<1x256xf32, #tpu.memory_space<vmem>>, vector<1x256xf32>
      %14 = vector.broadcast %13 : vector<1x256xf32> to vector<128x256xf32>
      %15 = arith.addf %12, %14 : vector<128x256xf32>
      %c0_13 = arith.constant 0 : index
      %c0_14 = arith.constant 0 : index
      %16 = vector.load %arg5[%c0_13, %c0_14] : memref<128x256xf32, #tpu.memory_space<vmem>>, vector<128x256xf32>
      tpu.vector_store %arg5[%c0_13, %c0_14], %15 {strides = array<i32>} : memref<128x256xf32, #tpu.memory_space<vmem>>, vector<128x256xf32>,
    } else {
    }
    return
  }
  func.func @transform_0(%arg0: i32, %arg1: i32) -> (i32, i32) {
    %c0_i32 = arith.constant 0 : i32
    return %arg0, %arg1 : i32, i32
  }
  func.func @transform_1(%arg0: i32, %arg1: i32) -> (i32, i32) {
    %c0_i32 = arith.constant 0 : i32
    %c0_i32_0 = arith.constant 0 : i32
    return %arg1, %c0_i32 : i32, i32
  }
  func.func @transform_2(%arg0: i32, %arg1: i32) -> (i32, i32) {
    %c0_i32 = arith.constant 0 : i32
    %c0_i32_0 = arith.constant 0 : i32
    %c0_i32_1 = arith.constant 0 : i32
    return %c0_i32, %c0_i32_0 : i32, i32
  }
  func.func @transform_3(%arg0: i32, %arg1: i32) -> (i32, i32) {
    %c0_i32 = arith.constant 0 : i32
    %c0_i32_0 = arith.constant 0 : i32
    return %arg0, %c0_i32 : i32, i32
  }
}

module attributes {stable_mosaic.version = 11 : i64} {
  func.func @_gemm_kernel(%arg0: i32, %arg1: i32, %arg2: memref<32x512xbf16, #tpu.memory_space<vmem>>, %arg3: memref<512x512xbf16, #tpu.memory_space<vmem>>, %arg4: memref<1x512xf32, #tpu.memory_space<vmem>>, %arg5: memref<32x512xf32, #tpu.memory_space<vmem>>, %arg6: memref<32x512xf32, #tpu.memory_space<vmem>>) attributes {dimension_semantics = [#tpu.dimension_semantics<parallel>, #tpu.dimension_semantics<arbitrary>], iteration_bounds = array<i64: 1, 8>, scalar_prefetch = 0 : i64, scratch_operands = 1 : i64, tpu.core_type = #tpu.core_type<tc>, window_params = [{transform_indices = @transform_0, window_bounds = array<i64: 32, 512>}, {transform_indices = @transform_1, window_bounds = array<i64: 512, 512>}, {pipeline_mode = #tpu.pipeline_mode<synchronous>, transform_indices = @transform_2, window_bounds = array<i64: 1, 512>}, {transform_indices = @transform_3, window_bounds = array<i64: 32, 512>}]} {
    %c0_i32 = arith.constant 0 : i32
    %0 = arith.cmpi eq, %arg1, %c0_i32 : i32
    %1 = arith.extui %0 : i1 to i32
    %c0_i32_0 = arith.constant 0 : i32
    %2 = arith.cmpi ne, %1, %c0_i32_0 : i32
    scf.if %2 {
      %cst_9 = arith.constant 0.000000e+00 : f32
      %12 = vector.broadcast %cst_9 : f32 to vector<32x512xf32>
      %c0_10 = arith.constant 0 : index
      %c0_11 = arith.constant 0 : index
      %13 = vector.load %arg6[%c0_10, %c0_11] : memref<32x512xf32, #tpu.memory_space<vmem>>, vector<32x512xf32>
      tpu.vector_store %arg6[%c0_10, %c0_11], %12 {strides = array<i32>} : memref<32x512xf32, #tpu.memory_space<vmem>>, vector<32x512xf32>,
    } else {
    }
    %c0 = arith.constant 0 : index
    %c0_1 = arith.constant 0 : index
    %3 = vector.load %arg6[%c0, %c0_1] : memref<32x512xf32, #tpu.memory_space<vmem>>, vector<32x512xf32>
    %c0_2 = arith.constant 0 : index
    %c0_3 = arith.constant 0 : index
    %4 = vector.load %arg2[%c0_2, %c0_3] : memref<32x512xbf16, #tpu.memory_space<vmem>>, vector<32x512xbf16>
    %c0_4 = arith.constant 0 : index
    %c0_5 = arith.constant 0 : index
    %5 = vector.load %arg3[%c0_4, %c0_5] : memref<512x512xbf16, #tpu.memory_space<vmem>>, vector<512x512xbf16>
    %cst = arith.constant dense<0.000000e+00> : vector<32x512xf32>
    %6 = tpu.matmul %4, %5, %cst {dimension_numbers = #tpu.dot_dimension_numbers<[1], [0], [0], [1], [0, 0, 1, 1], [], []>} : vector<32x512xbf16>, vector<512x512xbf16>, vector<32x512xf32> -> vector<32x512xf32>
    %7 = arith.addf %3, %6 : vector<32x512xf32>
    %c0_6 = arith.constant 0 : index
    %c0_7 = arith.constant 0 : index
    %8 = vector.load %arg6[%c0_6, %c0_7] : memref<32x512xf32, #tpu.memory_space<vmem>>, vector<32x512xf32>
    tpu.vector_store %arg6[%c0_6, %c0_7], %7 {strides = array<i32>} : memref<32x512xf32, #tpu.memory_space<vmem>>, vector<32x512xf32>,
    %c7_i32 = arith.constant 7 : i32
    %9 = arith.cmpi eq, %arg1, %c7_i32 : i32
    %10 = arith.extui %9 : i1 to i32
    %c0_i32_8 = arith.constant 0 : i32
    %11 = arith.cmpi ne, %10, %c0_i32_8 : i32
    scf.if %11 {
      %c0_9 = arith.constant 0 : index
      %c0_10 = arith.constant 0 : index
      %12 = vector.load %arg6[%c0_9, %c0_10] : memref<32x512xf32, #tpu.memory_space<vmem>>, vector<32x512xf32>
      %c0_11 = arith.constant 0 : index
      %c0_12 = arith.constant 0 : index
      %13 = vector.load %arg4[%c0_11, %c0_12] : memref<1x512xf32, #tpu.memory_space<vmem>>, vector<1x512xf32>
      %14 = vector.broadcast %13 : vector<1x512xf32> to vector<32x512xf32>
      %15 = arith.addf %12, %14 : vector<32x512xf32>
      %c0_13 = arith.constant 0 : index
      %c0_14 = arith.constant 0 : index
      %16 = vector.load %arg5[%c0_13, %c0_14] : memref<32x512xf32, #tpu.memory_space<vmem>>, vector<32x512xf32>
      tpu.vector_store %arg5[%c0_13, %c0_14], %15 {strides = array<i32>} : memref<32x512xf32, #tpu.memory_space<vmem>>, vector<32x512xf32>,
    } else {
    }
    return
  }
  func.func @transform_0(%arg0: i32, %arg1: i32) -> (i32, i32) {
    %c0_i32 = arith.constant 0 : i32
    return %arg0, %arg1 : i32, i32
  }
  func.func @transform_1(%arg0: i32, %arg1: i32) -> (i32, i32) {
    %c0_i32 = arith.constant 0 : i32
    %c0_i32_0 = arith.constant 0 : i32
    return %arg1, %c0_i32 : i32, i32
  }
  func.func @transform_2(%arg0: i32, %arg1: i32) -> (i32, i32) {
    %c0_i32 = arith.constant 0 : i32
    %c0_i32_0 = arith.constant 0 : i32
    %c0_i32_1 = arith.constant 0 : i32
    return %c0_i32, %c0_i32_0 : i32, i32
  }
  func.func @transform_3(%arg0: i32, %arg1: i32) -> (i32, i32) {
    %c0_i32 = arith.constant 0 : i32
    %c0_i32_0 = arith.constant 0 : i32
    return %arg0, %c0_i32 : i32, i32
  }
}

module attributes {stable_mosaic.version = 11 : i64} {
  func.func @_scale_shift_relu_kernel(%arg0: i32, %arg1: memref<32x512xf32, #tpu.memory_space<vmem>>, %arg2: memref<1x512xf32, #tpu.memory_space<vmem>>, %arg3: memref<1x512xf32, #tpu.memory_space<vmem>>, %arg4: memref<32x512xbf16, #tpu.memory_space<vmem>>) attributes {dimension_semantics = [#tpu.dimension_semantics<parallel>], iteration_bounds = array<i64: 1>, scalar_prefetch = 0 : i64, scratch_operands = 0 : i64, tpu.core_type = #tpu.core_type<tc>, window_params = [{transform_indices = @transform_0, window_bounds = array<i64: 32, 512>}, {pipeline_mode = #tpu.pipeline_mode<synchronous>, transform_indices = @transform_1, window_bounds = array<i64: 1, 512>}, {pipeline_mode = #tpu.pipeline_mode<synchronous>, transform_indices = @transform_2, window_bounds = array<i64: 1, 512>}, {transform_indices = @transform_3, window_bounds = array<i64: 32, 512>}]} {
    %c0 = arith.constant 0 : index
    %c0_0 = arith.constant 0 : index
    %0 = vector.load %arg1[%c0, %c0_0] : memref<32x512xf32, #tpu.memory_space<vmem>>, vector<32x512xf32>
    %c0_1 = arith.constant 0 : index
    %c0_2 = arith.constant 0 : index
    %1 = vector.load %arg2[%c0_1, %c0_2] : memref<1x512xf32, #tpu.memory_space<vmem>>, vector<1x512xf32>
    %2 = vector.broadcast %1 : vector<1x512xf32> to vector<32x512xf32>
    %3 = arith.mulf %0, %2 : vector<32x512xf32>
    %c0_3 = arith.constant 0 : index
    %c0_4 = arith.constant 0 : index
    %4 = vector.load %arg3[%c0_3, %c0_4] : memref<1x512xf32, #tpu.memory_space<vmem>>, vector<1x512xf32>
    %5 = vector.broadcast %4 : vector<1x512xf32> to vector<32x512xf32>
    %6 = arith.addf %3, %5 : vector<32x512xf32>
    %cst = arith.constant 0.000000e+00 : f32
    %7 = vector.broadcast %cst : f32 to vector<32x512xf32>
    %8 = arith.maximumf %6, %7 : vector<32x512xf32>
    %9 = arith.truncf %8 : vector<32x512xf32> to vector<32x512xbf16>
    %c0_5 = arith.constant 0 : index
    %c0_6 = arith.constant 0 : index
    %10 = vector.load %arg4[%c0_5, %c0_6] : memref<32x512xbf16, #tpu.memory_space<vmem>>, vector<32x512xbf16>
    tpu.vector_store %arg4[%c0_5, %c0_6], %9 {strides = array<i32>} : memref<32x512xbf16, #tpu.memory_space<vmem>>, vector<32x512xbf16>,
    return
  }
  func.func @transform_0(%arg0: i32) -> (i32, i32) {
    %c0_i32 = arith.constant 0 : i32
    %c0_i32_0 = arith.constant 0 : i32
    return %arg0, %c0_i32 : i32, i32
  }
  func.func @transform_1(%arg0: i32) -> (i32, i32) {
    %c0_i32 = arith.constant 0 : i32
    %c0_i32_0 = arith.constant 0 : i32
    %c0_i32_1 = arith.constant 0 : i32
    return %c0_i32, %c0_i32_0 : i32, i32
  }
  func.func @transform_2(%arg0: i32) -> (i32, i32) {
    %c0_i32 = arith.constant 0 : i32
    %c0_i32_0 = arith.constant 0 : i32
    %c0_i32_1 = arith.constant 0 : i32
    return %c0_i32, %c0_i32_0 : i32, i32
  }
  func.func @transform_3(%arg0: i32) -> (i32, i32) {
    %c0_i32 = arith.constant 0 : i32
    %c0_i32_0 = arith.constant 0 : i32
    return %arg0, %c0_i32 : i32, i32
  }
}

module attributes {stable_mosaic.version = 11 : i64} {
  func.func @_gemm_kernel(%arg0: i32, %arg1: i32, %arg2: memref<2x512xbf16, #tpu.memory_space<vmem>>, %arg3: memref<512x128xbf16, #tpu.memory_space<vmem>>, %arg4: memref<1x128xf32, #tpu.memory_space<vmem>>, %arg5: memref<2x128xf32, #tpu.memory_space<vmem>>, %arg6: memref<2x128xf32, #tpu.memory_space<vmem>>) attributes {dimension_semantics = [#tpu.dimension_semantics<parallel>, #tpu.dimension_semantics<arbitrary>], iteration_bounds = array<i64: 1, 16>, scalar_prefetch = 0 : i64, scratch_operands = 1 : i64, tpu.core_type = #tpu.core_type<tc>, window_params = [{transform_indices = @transform_0, window_bounds = array<i64: 2, 512>}, {transform_indices = @transform_1, window_bounds = array<i64: 512, 128>}, {pipeline_mode = #tpu.pipeline_mode<synchronous>, transform_indices = @transform_2, window_bounds = array<i64: 1, 128>}, {transform_indices = @transform_3, window_bounds = array<i64: 2, 128>}]} {
    %c0_i32 = arith.constant 0 : i32
    %0 = arith.cmpi eq, %arg1, %c0_i32 : i32
    %1 = arith.extui %0 : i1 to i32
    %c0_i32_0 = arith.constant 0 : i32
    %2 = arith.cmpi ne, %1, %c0_i32_0 : i32
    scf.if %2 {
      %cst_9 = arith.constant 0.000000e+00 : f32
      %12 = vector.broadcast %cst_9 : f32 to vector<2x128xf32>
      %c0_10 = arith.constant 0 : index
      %c0_11 = arith.constant 0 : index
      %13 = vector.load %arg6[%c0_10, %c0_11] : memref<2x128xf32, #tpu.memory_space<vmem>>, vector<2x128xf32>
      tpu.vector_store %arg6[%c0_10, %c0_11], %12 {strides = array<i32>} : memref<2x128xf32, #tpu.memory_space<vmem>>, vector<2x128xf32>,
    } else {
    }
    %c0 = arith.constant 0 : index
    %c0_1 = arith.constant 0 : index
    %3 = vector.load %arg6[%c0, %c0_1] : memref<2x128xf32, #tpu.memory_space<vmem>>, vector<2x128xf32>
    %c0_2 = arith.constant 0 : index
    %c0_3 = arith.constant 0 : index
    %4 = vector.load %arg2[%c0_2, %c0_3] : memref<2x512xbf16, #tpu.memory_space<vmem>>, vector<2x512xbf16>
    %c0_4 = arith.constant 0 : index
    %c0_5 = arith.constant 0 : index
    %5 = vector.load %arg3[%c0_4, %c0_5] : memref<512x128xbf16, #tpu.memory_space<vmem>>, vector<512x128xbf16>
    %cst = arith.constant dense<0.000000e+00> : vector<2x128xf32>
    %6 = tpu.matmul %4, %5, %cst {dimension_numbers = #tpu.dot_dimension_numbers<[1], [0], [0], [1], [0, 0, 1, 1], [], []>} : vector<2x512xbf16>, vector<512x128xbf16>, vector<2x128xf32> -> vector<2x128xf32>
    %7 = arith.addf %3, %6 : vector<2x128xf32>
    %c0_6 = arith.constant 0 : index
    %c0_7 = arith.constant 0 : index
    %8 = vector.load %arg6[%c0_6, %c0_7] : memref<2x128xf32, #tpu.memory_space<vmem>>, vector<2x128xf32>
    tpu.vector_store %arg6[%c0_6, %c0_7], %7 {strides = array<i32>} : memref<2x128xf32, #tpu.memory_space<vmem>>, vector<2x128xf32>,
    %c15_i32 = arith.constant 15 : i32
    %9 = arith.cmpi eq, %arg1, %c15_i32 : i32
    %10 = arith.extui %9 : i1 to i32
    %c0_i32_8 = arith.constant 0 : i32
    %11 = arith.cmpi ne, %10, %c0_i32_8 : i32
    scf.if %11 {
      %c0_9 = arith.constant 0 : index
      %c0_10 = arith.constant 0 : index
      %12 = vector.load %arg6[%c0_9, %c0_10] : memref<2x128xf32, #tpu.memory_space<vmem>>, vector<2x128xf32>
      %c0_11 = arith.constant 0 : index
      %c0_12 = arith.constant 0 : index
      %13 = vector.load %arg4[%c0_11, %c0_12] : memref<1x128xf32, #tpu.memory_space<vmem>>, vector<1x128xf32>
      %14 = vector.broadcast %13 : vector<1x128xf32> to vector<2x128xf32>
      %15 = arith.addf %12, %14 : vector<2x128xf32>
      %cst_13 = arith.constant 0.000000e+00 : f32
      %16 = vector.broadcast %cst_13 : f32 to vector<2x128xf32>
      %17 = arith.subf %16, %15 : vector<2x128xf32>
      %18 = math.exp %17 : vector<2x128xf32>
      %cst_14 = arith.constant 1.000000e+00 : f32
      %19 = vector.broadcast %cst_14 : f32 to vector<2x128xf32>
      %20 = arith.addf %19, %18 : vector<2x128xf32>
      %cst_15 = arith.constant 1.000000e+00 : f32
      %21 = vector.broadcast %cst_15 : f32 to vector<2x128xf32>
      %22 = arith.divf %21, %20 : vector<2x128xf32>
      %c0_16 = arith.constant 0 : index
      %c0_17 = arith.constant 0 : index
      %23 = vector.load %arg5[%c0_16, %c0_17] : memref<2x128xf32, #tpu.memory_space<vmem>>, vector<2x128xf32>
      tpu.vector_store %arg5[%c0_16, %c0_17], %22 {strides = array<i32>} : memref<2x128xf32, #tpu.memory_space<vmem>>, vector<2x128xf32>,
    } else {
    }
    return
  }
  func.func @transform_0(%arg0: i32, %arg1: i32) -> (i32, i32) {
    %c0_i32 = arith.constant 0 : i32
    return %arg0, %arg1 : i32, i32
  }
  func.func @transform_1(%arg0: i32, %arg1: i32) -> (i32, i32) {
    %c0_i32 = arith.constant 0 : i32
    %c0_i32_0 = arith.constant 0 : i32
    return %arg1, %c0_i32 : i32, i32
  }
  func.func @transform_2(%arg0: i32, %arg1: i32) -> (i32, i32) {
    %c0_i32 = arith.constant 0 : i32
    %c0_i32_0 = arith.constant 0 : i32
    %c0_i32_1 = arith.constant 0 : i32
    return %c0_i32, %c0_i32_0 : i32, i32
  }
  func.func @transform_3(%arg0: i32, %arg1: i32) -> (i32, i32) {
    %c0_i32 = arith.constant 0 : i32
    %c0_i32_0 = arith.constant 0 : i32
    return %arg0, %c0_i32 : i32, i32
  }
}

</mosaic_0001>

<bundles_post_ra>
// kernel: discriminator_forward.8
= control target key start
LH: loop header
LB: loop body
LE: loop exit
PB: predicated region body
PF: predicated region fallthrough
CT: control target
= control target key end

     0   :  { %s1082_s12 = smov 0   ;;  %s1084_s13 = smov 0   ;;  %s1332_s0 = inlined_call_operand.vmem [shape: bf16[2048,48], index: 0, kind: input, shape index: {}]   ;;  %s1333_s1 = inlined_call_operand.vmem [shape: bf16[48,64], index: 1, kind: input, shape index: {}]   ;;  %s1334_s2 = inlined_call_operand.vmem [shape: f32[1,64], index: 2, kind: input, shape index: {}]   ;;  %s1335_s3 = inlined_call_operand.vmem [shape: bf16[2048,64], index: 3, kind: output, shape index: {}]  }
   0x1   :  { %s1086_s14 = smov 0  }
   0x2 LB: > { %s25_s15 = sadd.s32 1, %s1055_s13  ;;  %p884_p0 = scmp.ge.s32.totalorder %s1059_s14, 1  ;;  %s1059_s14 = sphi %s1086_s14, %s13_s14   ;;  %s1055_s13 = sphi %s1084_s13, %s1337_s13   ;;  %s1051_s12 = sphi %s1082_s12, %s1336_s12  }
   0x3   : > { %p27_p1 = scmp.ge.s32.totalorder %s25_s15, 8  ;;  %p166_p2 = scmp.lt.s32.totalorder %s1059_s14, 9 }
   0x5   : > { %s1339_s15 = smov (%p27_p1, %s25_s15), 0  ;;  %p167_p3 = pnand %p884_p0, %p166_p2 }
   0x6   : > { %s885_s18 = sshll.u32 (!%p167_p3), %s1051_s12, 5 }
   0x7   : > { %170 = sbr.rel (%p167_p3) target bundleno = 232 (0xe8), region = 32  ;;  %p199_p4 = scmp.lt.s32.totalorder (!%p167_p3), %s885_s18, 255 }
   0xc   : > { %v1001_v0 = vld [vmem:[%s1333_s1 + $0x10] sm:$0xff]  ;;  %v1000_v1 = vld [vmem:[%s1333_s1 + $0x8] sm:$0xff]  ;;  %s1341_s18 = smov (!%p199_p4, %s885_s18), 255  ;;  %v999_v2 = vld [vmem:[%s1333_s1] sm:$0xff]  ;;  %vm425_vm0 = vcmask 392192   ;;  %vm224_vm1 = vcmask 523264  }
   0xd   : > { %479 = vmatpush.bf16.msra.mxu0 %v1001_v0  ;;  %1002 = vmatpush.bf16.msra.mxu1 %v1001_v0  ;;  %s886_s21 = sshll.u32 %s1341_s18, 2  ;;  %v1061_v11 = vmov 0.0   ;;  %v1188_v30 = vld [vmem:[%s1334_s2] ss:$0 sm:$0xff]  ;;  %vm763_vm2 = vcmask 519168  }
   0xe   : > { %1003 = vmatpush.bf16.msra.mxu2 %v1001_v0  ;;  %1004 = vmatpush.bf16.msra.mxu3 %v1001_v0  ;;  %s1117_s26 = scalar_lea.vmem %s1332_s0, %s886_s21  ;;  %225 = vst.msk [vmem:[#allocation2] sm:$0xff] %vm224_vm1, %v1061_v11  ;;  %s1201_s4 = scalar_lea.vmem %s1335_s3, %s886_s21 }
   0xf   : > { %v983_v3 = vld [vmem:[%s1117_s26] sm:$0xff]  ;;  %v984_v7 = vld [vmem:[%s1117_s26 + $0x8] sm:$0xff]  ;;  %226 = vst.msk [vmem:[#allocation2 + $0x8] sm:$0xff] %vm224_vm1, %v1061_v11  ;;  %v985_v12 = vld [vmem:[%s1117_s26 + $0x10] sm:$0xff] }
  0x10   : > { %v987_v4 = vld [vmem:[%s1117_s26 + $0x20] sm:$0xff]  ;;  %v988_v8 = vld [vmem:[%s1117_s26 + $0x28] sm:$0xff]  ;;  %227 = vst.msk [vmem:[#allocation2 + $0x10] sm:$0xff] %vm224_vm1, %v1061_v11  ;;  %v989_v13 = vld [vmem:[%s1117_s26 + $0x30] sm:$0xff] }
  0x11   : > { %480 = vmatpush.bf16.msra.mxu0 %v1000_v1  ;;  %1005 = vmatpush.bf16.msra.mxu1 %v1000_v1  ;;  %v991_v5 = vld [vmem:[%s1117_s26 + $0x40] sm:$0xff]  ;;  %v992_v9 = vld [vmem:[%s1117_s26 + $0x48] sm:$0xff]  ;;  %228 = vst.msk [vmem:[#allocation2 + $0x18] sm:$0xff] %vm224_vm1, %v1061_v11  ;;  %v993_v14 = vld [vmem:[%s1117_s26 + $0x50] sm:$0xff] }
  0x12   : > { %1006 = vmatpush.bf16.msra.mxu2 %v1000_v1  ;;  %1007 = vmatpush.bf16.msra.mxu3 %v1000_v1  ;;  %v995_v6 = vld [vmem:[%s1117_s26 + $0x60] sm:$0xff]  ;;  %v996_v10 = vld [vmem:[%s1117_s26 + $0x68] sm:$0xff]  ;;  %229 = vst.msk [vmem:[#allocation2 + $0x20] sm:$0xff] %vm224_vm1, %v1061_v11  ;;  %v997_v15 = vld [vmem:[%s1117_s26 + $0x70] sm:$0xff] }
  0x13   : > { %230 = vst.msk [vmem:[#allocation2 + $0x28] sm:$0xff] %vm224_vm1, %v1061_v11  ;;  %v986_v16 = vld [vmem:[%s1117_s26 + $0x18] sm:$0xff] }
  0x14   : > { %231 = vst.msk [vmem:[#allocation2 + $0x30] sm:$0xff] %vm224_vm1, %v1061_v11  ;;  %v990_v17 = vld [vmem:[%s1117_s26 + $0x38] sm:$0xff] }
  0x15   : > { %481 = vmatpush.bf16.msra.mxu0 %v999_v2  ;;  %1008 = vmatpush.bf16.msra.mxu1 %v999_v2  ;;  %232 = vst.msk [vmem:[#allocation2 + $0x38] sm:$0xff] %vm224_vm1, %v1061_v11  ;;  %v994_v18 = vld [vmem:[%s1117_s26 + $0x58] sm:$0xff]  ;;  %v257_v20 = vld [vmem:[#allocation2] sm:$0xff] }
  0x16   : > { %1009 = vmatpush.bf16.msra.mxu2 %v999_v2  ;;  %1010 = vmatpush.bf16.msra.mxu3 %v999_v2  ;;  %233 = vst.msk [vmem:[#allocation2 + $0x40] sm:$0xff] %vm224_vm1, %v1061_v11  ;;  %v998_v19 = vld [vmem:[%s1117_s26 + $0x78] sm:$0xff]  ;;  %v258_v28 = vld [vmem:[#allocation2 + $0x8] sm:$0xff] }
  0x17   : > { %234 = vst.msk [vmem:[#allocation2 + $0x48] sm:$0xff] %vm224_vm1, %v1061_v11  ;;  %v259_v47 = vld [vmem:[#allocation2 + $0x10] sm:$0xff] }
  0x18   : > { %965 = vmatmul.msk.bf16.vlgmr.msra.gmra.mxu0 %vm425_vm0, %v983_v3  ;;  %969 = vmatmul.msk.bf16.vlgmr.msra.gmra.mxu1 %vm425_vm0, %v987_v4  ;;  %235 = vst.msk [vmem:[#allocation2 + $0x50] sm:$0xff] %vm224_vm1, %v1061_v11 }
  0x19   : > { %973 = vmatmul.msk.bf16.vlgmr.msra.gmra.mxu2 %vm425_vm0, %v991_v5  ;;  %977 = vmatmul.msk.bf16.vlgmr.msra.gmra.mxu3 %vm425_vm0, %v995_v6  ;;  %236 = vst.msk [vmem:[#allocation2 + $0x58] sm:$0xff] %vm224_vm1, %v1061_v11 }
  0x1a   : > { %237 = vst.msk [vmem:[#allocation2 + $0x60] sm:$0xff] %vm224_vm1, %v1061_v11 }
  0x1b   : > { %238 = vst.msk [vmem:[#allocation2 + $0x68] sm:$0xff] %vm224_vm1, %v1061_v11 }
  0x1c   : > { %239 = vst.msk [vmem:[#allocation2 + $0x70] sm:$0xff] %vm224_vm1, %v1061_v11 }
  0x1d   : > { %240 = vst.msk [vmem:[#allocation2 + $0x78] sm:$0xff] %vm224_vm1, %v1061_v11  ;;  %v265_v21 = vld [vmem:[#allocation2 + $0x40] sm:$0xff] }
  0x1e   : > { %241 = vst.msk [vmem:[#allocation2 + $0x80] sm:$0xff] %vm224_vm1, %v1061_v11  ;;  %v266_v29 = vld [vmem:[#allocation2 + $0x48] sm:$0xff] }
  0x1f   : > { %242 = vst.msk [vmem:[#allocation2 + $0x88] sm:$0xff] %vm224_vm1, %v1061_v11  ;;  %v267_v51 = vld [vmem:[#allocation2 + $0x50] sm:$0xff] }
  0x20   : > { %243 = vst.msk [vmem:[#allocation2 + $0x90] sm:$0xff] %vm224_vm1, %v1061_v11 }
  0x21   : > { %244 = vst.msk [vmem:[#allocation2 + $0x98] sm:$0xff] %vm224_vm1, %v1061_v11 }
  0x22   : > { %245 = vst.msk [vmem:[#allocation2 + $0xa0] sm:$0xff] %vm224_vm1, %v1061_v11 }
  0x23   : > { %246 = vst.msk [vmem:[#allocation2 + $0xa8] sm:$0xff] %vm224_vm1, %v1061_v11 }
  0x24   : > { %247 = vst.msk [vmem:[#allocation2 + $0xb0] sm:$0xff] %vm224_vm1, %v1061_v11 }
  0x25   : > { %248 = vst.msk [vmem:[#allocation2 + $0xb8] sm:$0xff] %vm224_vm1, %v1061_v11  ;;  %v273_v26 = vld [vmem:[#allocation2 + $0x80] sm:$0xff] }
  0x26   : > { %249 = vst.msk [vmem:[#allocation2 + $0xc0] sm:$0xff] %vm224_vm1, %v1061_v11  ;;  %v274_v44 = vld [vmem:[#allocation2 + $0x88] sm:$0xff] }
  0x27   : > { %250 = vst.msk [vmem:[#allocation2 + $0xc8] sm:$0xff] %vm224_vm1, %v1061_v11  ;;  %v275_v5 = vld [vmem:[#allocation2 + $0x90] sm:$0xff] }
  0x28   : > { %966 = vmatmul.msk.bf16.gmra.mxu0 %vm425_vm0, %v984_v7  ;;  %970 = vmatmul.msk.bf16.gmra.mxu1 %vm425_vm0, %v988_v8  ;;  %251 = vst.msk [vmem:[#allocation2 + $0xd0] sm:$0xff] %vm224_vm1, %v1061_v11 }
  0x29   : > { %974 = vmatmul.msk.bf16.gmra.mxu2 %vm425_vm0, %v992_v9  ;;  %978 = vmatmul.msk.bf16.gmra.mxu3 %vm425_vm0, %v996_v10  ;;  %252 = vst.msk [vmem:[#allocation2 + $0xd8] sm:$0xff] %vm224_vm1, %v1061_v11 }
  0x2a   : > { %253 = vst.msk [vmem:[#allocation2 + $0xe0] sm:$0xff] %vm224_vm1, %v1061_v11 }
  0x2b   : > { %254 = vst.msk [vmem:[#allocation2 + $0xe8] sm:$0xff] %vm224_vm1, %v1061_v11 }
  0x2c   : > { %255 = vst.msk [vmem:[#allocation2 + $0xf0] sm:$0xff] %vm224_vm1, %v1061_v11 }
  0x2d   : > { %256 = vst.msk [vmem:[#allocation2 + $0xf8] sm:$0xff] %vm224_vm1, %v1061_v11  ;;  %v281_v27 = vld [vmem:[#allocation2 + $0xc0] sm:$0xff] }
  0x2e   : > { %v282_v45 = vld [vmem:[#allocation2 + $0xc8] sm:$0xff] }
  0x2f   : > { %v283_v8 = vld [vmem:[#allocation2 + $0xd0] sm:$0xff] }
  0x38   : > { %967 = vmatmul.msk.bf16.gmra.mxu0 %vm425_vm0, %v985_v12  ;;  %971 = vmatmul.msk.bf16.gmra.mxu1 %vm425_vm0, %v989_v13  ;;  %v260_v13 = vld [vmem:[#allocation2 + $0x18] sm:$0xff] }
  0x39   : > { %975 = vmatmul.msk.bf16.gmra.mxu2 %vm425_vm0, %v993_v14  ;;  %979 = vmatmul.msk.bf16.gmra.mxu3 %vm425_vm0, %v997_v15 }
  0x48   : > { %968 = vmatmul.msk.bf16.gmra.mxu0 %vm425_vm0, %v986_v16  ;;  %972 = vmatmul.msk.bf16.gmra.mxu1 %vm425_vm0, %v990_v17  ;;  %v268_v17 = vld [vmem:[#allocation2 + $0x58] sm:$0xff] }
  0x49   : > { %976 = vmatmul.msk.bf16.gmra.mxu2 %vm425_vm0, %v994_v18  ;;  %980 = vmatmul.msk.bf16.gmra.mxu3 %vm425_vm0, %v998_v19 }
  0x95   : > { %v483_v22 = vpop.f32.mrf.mxu0  ;;  %v503_v23 = vpop.f32.mrf.mxu1 }
  0x96   : > { %v563_v24 = vadd.f32 %v483_v22, %v257_v20  ;;  %v571_v25 = vadd.f32 %v503_v23, %v265_v21 }
  0x98   : > { %596 = vst.msk [vmem:[#allocation2] sm:$0xff] %vm224_vm1, %v563_v24 }
  0x99   : > { %604 = vst.msk [vmem:[#allocation2 + $0x40] sm:$0xff] %vm224_vm1, %v571_v25 }
  0x9c   : > { %v523_v31 = vpop.f32.mrf.mxu2  ;;  %v543_v32 = vpop.f32.mrf.mxu3 }
  0x9d   : > { %v579_v33 = vadd.f32 %v523_v31, %v273_v26  ;;  %v587_v34 = vadd.f32 %v543_v32, %v281_v27  ;;  %v485_v35 = vpop.f32.mrf.mxu0  ;;  %v505_v36 = vpop.f32.mrf.mxu1 }
  0x9e   : > { %v564_v37 = vadd.f32 %v485_v35, %v258_v28  ;;  %v572_v38 = vadd.f32 %v505_v36, %v266_v29 }
  0x9f   : > { %v631_v39 = vld [vmem:[#allocation2] sm:$0xff]  ;;  %612 = vst.msk [vmem:[#allocation2 + $0x80] sm:$0xff] %vm224_vm1, %v579_v33 }
  0xa0   : > { %v667_v40 = vadd.f32 %v1188_v30, %v631_v39  ;;  %v639_v41 = vld [vmem:[#allocation2 + $0x40] sm:$0xff]  ;;  %620 = vst.msk [vmem:[#allocation2 + $0xc0] sm:$0xff] %vm224_vm1, %v587_v34  ;;  %v276_v34 = vld [vmem:[#allocation2 + $0x98] sm:$0xff] }
  0xa1   : > { %v675_v42 = vadd.f32 %v1188_v30, %v639_v41  ;;  %597 = vst.msk [vmem:[#allocation2 + $0x8] sm:$0xff] %vm224_vm1, %v564_v37 }
  0xa2   : > { %v699_v43 = vmax.f32 %v667_v40, 0.0  ;;  %605 = vst.msk [vmem:[#allocation2 + $0x48] sm:$0xff] %vm224_vm1, %v572_v38  ;;  %v284_v38 = vld [vmem:[#allocation2 + $0xd8] sm:$0xff] }
  0xa3   : > { %v707_v46 = vmax.f32 %v675_v42, 0.0  ;;  %v261_v42 = vld [vmem:[#allocation2 + $0x20] sm:$0xff] }
  0xa4   : > { %v731_v48 = vpack.c.bf16 %v699_v43, %v699_v43  ;;  %v525_v49 = vpop.f32.mrf.mxu2  ;;  %v545_v50 = vpop.f32.mrf.mxu3 }
  0xa5   : > { %v739_v52 = vpack.c.bf16 %v707_v46, %v707_v46  ;;  %v580_v53 = vadd.f32 %v525_v49, %v274_v44  ;;  %v588_v54 = vadd.f32 %v545_v50, %v282_v45  ;;  %v488_v55 = vpop.f32.mrf.mxu0  ;;  %v508_v56 = vpop.f32.mrf.mxu1 }
  0xa6   : > { %764 = vst.msk [vmem:[%s1201_s4] sm:$0xf] %vm763_vm2, %v731_v48  ;;  %v647_v57 = vld [vmem:[#allocation2 + $0x80] sm:$0xff]  ;;  %v565_v58 = vadd.f32 %v488_v55, %v259_v47  ;;  %v573_v61 = vadd.f32 %v508_v56, %v267_v51 }
  0xa7   : > { %772 = vst.msk [vmem:[%s1201_s4 + $0x20] sm:$0xf] %vm763_vm2, %v739_v52  ;;  %v683_v59 = vadd.f32 %v1188_v30, %v647_v57  ;;  %v655_v60 = vld [vmem:[#allocation2 + $0xc0] sm:$0xff] }
  0xa8   : > { %v691_v62 = vadd.f32 %v1188_v30, %v655_v60  ;;  %v632_v63 = vld [vmem:[#allocation2 + $0x8] sm:$0xff]  ;;  %613 = vst.msk [vmem:[#allocation2 + $0x88] sm:$0xff] %vm224_vm1, %v580_v53  ;;  %v269_v47 = vld [vmem:[#allocation2 + $0x60] sm:$0xff] }
  0xa9   : > { %v715_v0 = vmax.f32 %v683_v59, 0.0  ;;  %v668_v1 = vadd.f32 %v1188_v30, %v632_v63  ;;  %v640_v2 = vld [vmem:[#allocation2 + $0x48] sm:$0xff]  ;;  %621 = vst.msk [vmem:[#allocation2 + $0xc8] sm:$0xff] %vm224_vm1, %v588_v54 }
  0xaa   : > { %v723_v3 = vmax.f32 %v691_v62, 0.0  ;;  %v676_v4 = vadd.f32 %v1188_v30, %v640_v2  ;;  %598 = vst.msk [vmem:[#allocation2 + $0x10] sm:$0xff] %vm224_vm1, %v565_v58  ;;  %v277_v62 = vld [vmem:[#allocation2 + $0xa0] sm:$0xff] }
  0xab   : > { %v747_v6 = vpack.c.bf16 %v715_v0, %v715_v0  ;;  %v700_v7 = vmax.f32 %v668_v1, 0.0  ;;  %606 = vst.msk [vmem:[#allocation2 + $0x50] sm:$0xff] %vm224_vm1, %v573_v61 }
  0xac   : > { %v755_v9 = vpack.c.bf16 %v723_v3, %v723_v3  ;;  %v708_v10 = vmax.f32 %v676_v4, 0.0  ;;  %v528_v11 = vpop.f32.mrf.mxu2  ;;  %v548_v12 = vpop.f32.mrf.mxu3  ;;  %v285_v3 = vld [vmem:[#allocation2 + $0xe0] sm:$0xff] }
  0xad   : > { %780 = vst.msk [vmem:[%s1201_s4 + $0x40] sm:$0xf] %vm763_vm2, %v747_v6  ;;  %v732_v14 = vpack.c.bf16 %v700_v7, %v700_v7  ;;  %v581_v15 = vadd.f32 %v528_v11, %v275_v5  ;;  %v490_v16 = vpop.f32.mrf.mxu0  ;;  %v510_v18 = vpop.f32.mrf.mxu1  ;;  %v589_v20 = vadd.f32 %v548_v12, %v283_v8  ;;  %v262_v8 = vld [vmem:[#allocation2 + $0x28] sm:$0xff] }
  0xae   : > { %788 = vst.msk [vmem:[%s1201_s4 + $0x60] sm:$0xf] %vm763_vm2, %v755_v9  ;;  %v740_v19 = vpack.c.bf16 %v708_v10, %v708_v10  ;;  %v566_v22 = vadd.f32 %v490_v16, %v260_v13  ;;  %v574_v25 = vadd.f32 %v510_v18, %v268_v17  ;;  %v270_v11 = vld [vmem:[#allocation2 + $0x68] sm:$0xff] }
  0xaf   : > { %765 = vst.msk [vmem:[%s1201_s4 + $0x4] sm:$0xf] %vm763_vm2, %v732_v14  ;;  %v648_v21 = vld [vmem:[#allocation2 + $0x88] sm:$0xff] }
  0xb0   : > { %773 = vst.msk [vmem:[%s1201_s4 + $0x24] sm:$0xf] %vm763_vm2, %v740_v19  ;;  %v684_v23 = vadd.f32 %v1188_v30, %v648_v21  ;;  %v656_v24 = vld [vmem:[#allocation2 + $0xc8] sm:$0xff] }
  0xb1   : > { %v692_v26 = vadd.f32 %v1188_v30, %v656_v24  ;;  %v633_v27 = vld [vmem:[#allocation2 + $0x10] sm:$0xff]  ;;  %614 = vst.msk [vmem:[#allocation2 + $0x90] sm:$0xff] %vm224_vm1, %v581_v15  ;;  %v278_v19 = vld [vmem:[#allocation2 + $0xa8] sm:$0xff] }
  0xb2   : > { %v716_v28 = vmax.f32 %v684_v23, 0.0  ;;  %v669_v29 = vadd.f32 %v1188_v30, %v633_v27  ;;  %v641_v31 = vld [vmem:[#allocation2 + $0x50] sm:$0xff]  ;;  %622 = vst.msk [vmem:[#allocation2 + $0xd0] sm:$0xff] %vm224_vm1, %v589_v20 }
  0xb3   : > { %v724_v32 = vmax.f32 %v692_v26, 0.0  ;;  %v677_v33 = vadd.f32 %v1188_v30, %v641_v31  ;;  %599 = vst.msk [vmem:[#allocation2 + $0x18] sm:$0xff] %vm224_vm1, %v566_v22  ;;  %v286_v31 = vld [vmem:[#allocation2 + $0xe8] sm:$0xff] }
  0xb4   : > { %v748_v35 = vpack.c.bf16 %v716_v28, %v716_v28  ;;  %v701_v36 = vmax.f32 %v669_v29, 0.0  ;;  %607 = vst.msk [vmem:[#allocation2 + $0x58] sm:$0xff] %vm224_vm1, %v574_v25  ;;  %v530_v37 = vpop.f32.mrf.mxu2  ;;  %v550_v39 = vpop.f32.mrf.mxu3 }
  0xb5   : > { %v756_v40 = vpack.c.bf16 %v724_v32, %v724_v32  ;;  %v709_v41 = vmax.f32 %v677_v33, 0.0  ;;  %v493_v43 = vpop.f32.mrf.mxu0  ;;  %v513_v44 = vpop.f32.mrf.mxu1  ;;  %v582_v46 = vadd.f32 %v530_v37, %v276_v34  ;;  %v590_v49 = vadd.f32 %v550_v39, %v284_v38  ;;  %v271_v39 = vld [vmem:[#allocation2 + $0x70] sm:$0xff] }
  0xb6   : > { %781 = vst.msk [vmem:[%s1201_s4 + $0x44] sm:$0xf] %vm763_vm2, %v748_v35  ;;  %v733_v45 = vpack.c.bf16 %v701_v36, %v701_v36  ;;  %v567_v51 = vadd.f32 %v493_v43, %v261_v42  ;;  %v575_v54 = vadd.f32 %v513_v44, %v269_v47  ;;  %v263_v35 = vld [vmem:[#allocation2 + $0x30] sm:$0xff] }
  0xb7   : > { %789 = vst.msk [vmem:[%s1201_s4 + $0x64] sm:$0xf] %vm763_vm2, %v756_v40  ;;  %v741_v48 = vpack.c.bf16 %v709_v41, %v709_v41  ;;  %v287_v47 = vld [vmem:[#allocation2 + $0xf0] sm:$0xff] }
  0xb8   : > { %766 = vst.msk [vmem:[%s1201_s4 + $0x8] sm:$0xf] %vm763_vm2, %v733_v45  ;;  %v649_v50 = vld [vmem:[#allocation2 + $0x90] sm:$0xff] }
  0xb9   : > { %774 = vst.msk [vmem:[%s1201_s4 + $0x28] sm:$0xf] %vm763_vm2, %v741_v48  ;;  %v685_v52 = vadd.f32 %v1188_v30, %v649_v50  ;;  %v657_v53 = vld [vmem:[#allocation2 + $0xd0] sm:$0xff] }
  0xba   : > { %v693_v55 = vadd.f32 %v1188_v30, %v657_v53  ;;  %v634_v56 = vld [vmem:[#allocation2 + $0x18] sm:$0xff]  ;;  %615 = vst.msk [vmem:[#allocation2 + $0x98] sm:$0xff] %vm224_vm1, %v582_v46  ;;  %v279_v46 = vld [vmem:[#allocation2 + $0xb0] sm:$0xff] }
  0xbb   : > { %v717_v57 = vmax.f32 %v685_v52, 0.0  ;;  %v670_v58 = vadd.f32 %v1188_v30, %v634_v56  ;;  %v642_v59 = vld [vmem:[#allocation2 + $0x58] sm:$0xff]  ;;  %623 = vst.msk [vmem:[#allocation2 + $0xd8] sm:$0xff] %vm224_vm1, %v590_v49 }
  0xbc   : > { %v725_v60 = vmax.f32 %v693_v55, 0.0  ;;  %v678_v61 = vadd.f32 %v1188_v30, %v642_v59  ;;  %600 = vst.msk [vmem:[#allocation2 + $0x20] sm:$0xff] %vm224_vm1, %v567_v51  ;;  %v533_v63 = vpop.f32.mrf.mxu2  ;;  %v553_v0 = vpop.f32.mrf.mxu3 }
  0xbd   : > { %v749_v1 = vpack.c.bf16 %v717_v57, %v717_v57  ;;  %v702_v2 = vmax.f32 %v670_v58, 0.0  ;;  %608 = vst.msk [vmem:[#allocation2 + $0x60] sm:$0xff] %vm224_vm1, %v575_v54  ;;  %v495_v4 = vpop.f32.mrf.mxu0  ;;  %v515_v5 = vpop.f32.mrf.mxu1  ;;  %v583_v10 = vadd.f32 %v533_v63, %v277_v62  ;;  %v591_v13 = vadd.f32 %v553_v0, %v285_v3 }
  0xbe   : > { %v757_v6 = vpack.c.bf16 %v725_v60, %v725_v60  ;;  %v710_v7 = vmax.f32 %v678_v61, 0.0  ;;  %v568_v15 = vadd.f32 %v495_v4, %v262_v8  ;;  %v576_v18 = vadd.f32 %v515_v5, %v270_v11  ;;  %v272_v5 = vld [vmem:[#allocation2 + $0x78] sm:$0xff] }
  0xbf   : > { %782 = vst.msk [vmem:[%s1201_s4 + $0x48] sm:$0xf] %vm763_vm2, %v749_v1  ;;  %v734_v9 = vpack.c.bf16 %v702_v2, %v702_v2  ;;  %v264_v1 = vld [vmem:[#allocation2 + $0x38] sm:$0xff] }
  0xc0   : > { %790 = vst.msk [vmem:[%s1201_s4 + $0x68] sm:$0xf] %vm763_vm2, %v757_v6  ;;  %v742_v12 = vpack.c.bf16 %v710_v7, %v710_v7  ;;  %v280_v11 = vld [vmem:[#allocation2 + $0xb8] sm:$0xff] }
  0xc1   : > { %767 = vst.msk [vmem:[%s1201_s4 + $0xc] sm:$0xf] %vm763_vm2, %v734_v9  ;;  %v650_v14 = vld [vmem:[#allocation2 + $0x98] sm:$0xff] }
  0xc2   : > { %775 = vst.msk [vmem:[%s1201_s4 + $0x2c] sm:$0xf] %vm763_vm2, %v742_v12  ;;  %v686_v16 = vadd.f32 %v1188_v30, %v650_v14  ;;  %v658_v17 = vld [vmem:[#allocation2 + $0xd8] sm:$0xff] }
  0xc3   : > { %v694_v20 = vadd.f32 %v1188_v30, %v658_v17  ;;  %v635_v21 = vld [vmem:[#allocation2 + $0x20] sm:$0xff]  ;;  %616 = vst.msk [vmem:[#allocation2 + $0xa0] sm:$0xff] %vm224_vm1, %v583_v10  ;;  %v288_v12 = vld [vmem:[#allocation2 + $0xf8] sm:$0xff] }
  0xc4   : > { %v718_v22 = vmax.f32 %v686_v16, 0.0  ;;  %v671_v23 = vadd.f32 %v1188_v30, %v635_v21  ;;  %v643_v24 = vld [vmem:[#allocation2 + $0x60] sm:$0xff]  ;;  %624 = vst.msk [vmem:[#allocation2 + $0xe0] sm:$0xff] %vm224_vm1, %v591_v13  ;;  %v535_v25 = vpop.f32.mrf.mxu2  ;;  %v555_v26 = vpop.f32.mrf.mxu3 }
  0xc5   : > { %v726_v27 = vmax.f32 %v694_v20, 0.0  ;;  %v679_v28 = vadd.f32 %v1188_v30, %v643_v24  ;;  %601 = vst.msk [vmem:[#allocation2 + $0x28] sm:$0xff] %vm224_vm1, %v568_v15  ;;  %v584_v29 = vadd.f32 %v535_v25, %v278_v19  ;;  %v498_v32 = vpop.f32.mrf.mxu0  ;;  %v518_v36 = vpop.f32.mrf.mxu1  ;;  %v592_v41 = vadd.f32 %v555_v26, %v286_v31 }
  0xc6   : > { %v750_v33 = vpack.c.bf16 %v718_v22, %v718_v22  ;;  %v703_v34 = vmax.f32 %v671_v23, 0.0  ;;  %609 = vst.msk [vmem:[#allocation2 + $0x68] sm:$0xff] %vm224_vm1, %v576_v18  ;;  %v569_v43 = vadd.f32 %v498_v32, %v263_v35  ;;  %v577_v45 = vadd.f32 %v518_v36, %v271_v39 }
  0xc7   : > { %v758_v37 = vpack.c.bf16 %v726_v27, %v726_v27  ;;  %v711_v38 = vmax.f32 %v679_v28, 0.0  ;;  %617 = vst.msk [vmem:[#allocation2 + $0xa8] sm:$0xff] %vm224_vm1, %v584_v29 }
  0xc8   : > { %783 = vst.msk [vmem:[%s1201_s4 + $0x4c] sm:$0xf] %vm763_vm2, %v750_v33  ;;  %v735_v40 = vpack.c.bf16 %v703_v34, %v703_v34 }
  0xc9   : > { %791 = vst.msk [vmem:[%s1201_s4 + $0x6c] sm:$0xf] %vm763_vm2, %v758_v37  ;;  %v743_v42 = vpack.c.bf16 %v711_v38, %v711_v38 }
  0xca   : > { %768 = vst.msk [vmem:[%s1201_s4 + $0x10] sm:$0xf] %vm763_vm2, %v735_v40  ;;  %v651_v44 = vld [vmem:[#allocation2 + $0xa0] sm:$0xff] }
  0xcb   : > { %776 = vst.msk [vmem:[%s1201_s4 + $0x30] sm:$0xf] %vm763_vm2, %v743_v42  ;;  %v687_v48 = vadd.f32 %v1188_v30, %v651_v44  ;;  %v659_v49 = vld [vmem:[#allocation2 + $0xe0] sm:$0xff] }
  0xcc   : > { %v695_v50 = vadd.f32 %v1188_v30, %v659_v49  ;;  %v636_v51 = vld [vmem:[#allocation2 + $0x28] sm:$0xff]  ;;  %625 = vst.msk [vmem:[#allocation2 + $0xe8] sm:$0xff] %vm224_vm1, %v592_v41  ;;  %v538_v52 = vpop.f32.mrf.mxu2  ;;  %v558_v53 = vpop.f32.mrf.mxu3 }
  0xcd   : > { %v719_v54 = vmax.f32 %v687_v48, 0.0  ;;  %v672_v55 = vadd.f32 %v1188_v30, %v636_v51  ;;  %v644_v56 = vld [vmem:[#allocation2 + $0x68] sm:$0xff]  ;;  %602 = vst.msk [vmem:[#allocation2 + $0x30] sm:$0xff] %vm224_vm1, %v569_v43  ;;  %v585_v57 = vadd.f32 %v538_v52, %v279_v46  ;;  %v593_v58 = vadd.f32 %v558_v53, %v287_v47  ;;  %v500_v2 = vpop.f32.mrf.mxu0  ;;  %v520_v6 = vpop.f32.mrf.mxu1 }
  0xce   : > { %v727_v59 = vmax.f32 %v695_v50, 0.0  ;;  %v680_v60 = vadd.f32 %v1188_v30, %v644_v56  ;;  %v652_v61 = vld [vmem:[#allocation2 + $0xa8] sm:$0xff]  ;;  %610 = vst.msk [vmem:[#allocation2 + $0x70] sm:$0xff] %vm224_vm1, %v577_v45  ;;  %v570_v10 = vadd.f32 %v500_v2, %v264_v1  ;;  %v578_v15 = vadd.f32 %v520_v6, %v272_v5 }
  0xcf   : > { %v751_v62 = vpack.c.bf16 %v719_v54, %v719_v54  ;;  %v704_v63 = vmax.f32 %v672_v55, 0.0  ;;  %v688_v0 = vadd.f32 %v1188_v30, %v652_v61  ;;  %618 = vst.msk [vmem:[#allocation2 + $0xb0] sm:$0xff] %vm224_vm1, %v585_v57 }
  0xd0   : > { %v759_v3 = vpack.c.bf16 %v727_v59, %v727_v59  ;;  %v712_v4 = vmax.f32 %v680_v60, 0.0  ;;  %626 = vst.msk [vmem:[#allocation2 + $0xf0] sm:$0xff] %vm224_vm1, %v593_v58 }
  0xd1   : > { %784 = vst.msk [vmem:[%s1201_s4 + $0x50] sm:$0xf] %vm763_vm2, %v751_v62  ;;  %v736_v7 = vpack.c.bf16 %v704_v63, %v704_v63  ;;  %v720_v8 = vmax.f32 %v688_v0, 0.0 }
  0xd2   : > { %792 = vst.msk [vmem:[%s1201_s4 + $0x70] sm:$0xf] %vm763_vm2, %v759_v3  ;;  %v744_v9 = vpack.c.bf16 %v712_v4, %v712_v4 }
  0xd3   : > { %769 = vst.msk [vmem:[%s1201_s4 + $0x14] sm:$0xf] %vm763_vm2, %v736_v7  ;;  %v752_v13 = vpack.c.bf16 %v720_v8, %v720_v8  ;;  %v660_v14 = vld [vmem:[#allocation2 + $0xe8] sm:$0xff] }
  0xd4   : > { %777 = vst.msk [vmem:[%s1201_s4 + $0x34] sm:$0xf] %vm763_vm2, %v744_v9  ;;  %v696_v16 = vadd.f32 %v1188_v30, %v660_v14  ;;  %v637_v17 = vld [vmem:[#allocation2 + $0x30] sm:$0xff]  ;;  %v540_v18 = vpop.f32.mrf.mxu2  ;;  %v560_v19 = vpop.f32.mrf.mxu3 }
  0xd5   : > { %785 = vst.msk [vmem:[%s1201_s4 + $0x54] sm:$0xf] %vm763_vm2, %v752_v13  ;;  %v673_v20 = vadd.f32 %v1188_v30, %v637_v17  ;;  %v645_v21 = vld [vmem:[#allocation2 + $0x70] sm:$0xff]  ;;  %v586_v22 = vadd.f32 %v540_v18, %v280_v11  ;;  %v594_v23 = vadd.f32 %v560_v19, %v288_v12 }
  0xd6   : > { %v728_v24 = vmax.f32 %v696_v16, 0.0  ;;  %v681_v25 = vadd.f32 %v1188_v30, %v645_v21  ;;  %v653_v26 = vld [vmem:[#allocation2 + $0xb0] sm:$0xff]  ;;  %603 = vst.msk [vmem:[#allocation2 + $0x38] sm:$0xff] %vm224_vm1, %v570_v10 }
  0xd7   : > { %v705_v27 = vmax.f32 %v673_v20, 0.0  ;;  %v689_v28 = vadd.f32 %v1188_v30, %v653_v26  ;;  %v661_v29 = vld [vmem:[#allocation2 + $0xf0] sm:$0xff]  ;;  %611 = vst.msk [vmem:[#allocation2 + $0x78] sm:$0xff] %vm224_vm1, %v578_v15 }
  0xd8   : > { %v760_v31 = vpack.c.bf16 %v728_v24, %v728_v24  ;;  %v713_v32 = vmax.f32 %v681_v25, 0.0  ;;  %v697_v33 = vadd.f32 %v1188_v30, %v661_v29  ;;  %619 = vst.msk [vmem:[#allocation2 + $0xb8] sm:$0xff] %vm224_vm1, %v586_v22 }
  0xd9   : > { %v737_v34 = vpack.c.bf16 %v705_v27, %v705_v27  ;;  %v721_v35 = vmax.f32 %v689_v28, 0.0  ;;  %627 = vst.msk [vmem:[#allocation2 + $0xf8] sm:$0xff] %vm224_vm1, %v594_v23 }
  0xda   : > { %793 = vst.msk [vmem:[%s1201_s4 + $0x74] sm:$0xf] %vm763_vm2, %v760_v31  ;;  %v745_v36 = vpack.c.bf16 %v713_v32, %v713_v32  ;;  %v729_v37 = vmax.f32 %v697_v33, 0.0 }
  0xdb   : > { %770 = vst.msk [vmem:[%s1201_s4 + $0x18] sm:$0xf] %vm763_vm2, %v737_v34  ;;  %v753_v38 = vpack.c.bf16 %v721_v35, %v721_v35 }
  0xdc   : > { %778 = vst.msk [vmem:[%s1201_s4 + $0x38] sm:$0xf] %vm763_vm2, %v745_v36  ;;  %v761_v39 = vpack.c.bf16 %v729_v37, %v729_v37 }
  0xdd   : > { %786 = vst.msk [vmem:[%s1201_s4 + $0x58] sm:$0xf] %vm763_vm2, %v753_v38  ;;  %v638_v40 = vld [vmem:[#allocation2 + $0x38] sm:$0xff] }
  0xde   : > { %794 = vst.msk [vmem:[%s1201_s4 + $0x78] sm:$0xf] %vm763_vm2, %v761_v39  ;;  %v674_v41 = vadd.f32 %v1188_v30, %v638_v40  ;;  %v646_v42 = vld [vmem:[#allocation2 + $0x78] sm:$0xff] }
  0xdf   : > { %v682_v43 = vadd.f32 %v1188_v30, %v646_v42  ;;  %v654_v44 = vld [vmem:[#allocation2 + $0xb8] sm:$0xff] }
  0xe0   : > { %v706_v45 = vmax.f32 %v674_v41, 0.0  ;;  %v690_v46 = vadd.f32 %v1188_v30, %v654_v44  ;;  %v662_v47 = vld [vmem:[#allocation2 + $0xf8] sm:$0xff] }
  0xe1   : > { %v714_v48 = vmax.f32 %v682_v43, 0.0  ;;  %v698_v49 = vadd.f32 %v1188_v30, %v662_v47 }
  0xe2   : > { %v738_v50 = vpack.c.bf16 %v706_v45, %v706_v45  ;;  %v722_v51 = vmax.f32 %v690_v46, 0.0 }
  0xe3   : > { %v746_v52 = vpack.c.bf16 %v714_v48, %v714_v48  ;;  %v730_v53 = vmax.f32 %v698_v49, 0.0 }
  0xe4   : > { %771 = vst.msk [vmem:[%s1201_s4 + $0x1c] sm:$0xf] %vm763_vm2, %v738_v50  ;;  %v754_v54 = vpack.c.bf16 %v722_v51, %v722_v51 }
  0xe5   : > { %779 = vst.msk [vmem:[%s1201_s4 + $0x3c] sm:$0xf] %vm763_vm2, %v746_v52  ;;  %v762_v55 = vpack.c.bf16 %v730_v53, %v730_v53 }
  0xe6   : > { %787 = vst.msk [vmem:[%s1201_s4 + $0x5c] sm:$0xf] %vm763_vm2, %v754_v54 }
  0xe7   : > { %795 = vst.msk [vmem:[%s1201_s4 + $0x7c] sm:$0xf] %vm763_vm2, %v762_v55 }
  0xe8 PF: > { %s13_s14 = sadd.s32 1, %s1059_s14   ;;  %s1336_s12 = smov %s1055_s13 }
  0xe9   : > { %p10_p5 = scmp.ge.s32.totalorder %s13_s14, 10   ;;  %s1337_s13 = smov %s1339_s15 }
  0xeb   :  { %12 = sbr.rel (!%p10_p5) target bundleno = 2 (0x2), region = 73 }

// kernel: discriminator_forward.9
= control target key start
LH: loop header
LB: loop body
LE: loop exit
PB: predicated region body
PF: predicated region fallthrough
CT: control target
= control target key end

     0   :  { %s2315_s12 = smov 0   ;;  %s2317_s13 = smov 0   ;;  %s2776_s0 = inlined_call_operand.vmem [shape: bf16[512,1024], index: 0, kind: input, shape index: {}]   ;;  %s2777_s1 = inlined_call_operand.vmem [shape: bf16[1024,128], index: 1, kind: input, shape index: {}]   ;;  %s2778_s2 = inlined_call_operand.vmem [shape: f32[1,128], index: 2, kind: input, shape index: {}]   ;;  %s2779_s3 = inlined_call_operand.vmem [shape: f32[512,128], index: 3, kind: output, shape index: {}]  }
   0x1   :  { %s2319_s14 = smov 0   ;;  %s2321_s15 = smov 0  }
   0x2   :  { %s2323_s16 = smov 0   ;;  %s2325_s17 = smov 0  }
   0x3   :  { %s2327_s18 = smov 0  }
   0x4 LB: > { %s22_s19 = sadd.s32 1, %s2284_s16  ;;  %s25_s20 = sadd.s32 1, %s2288_s17  ;;  %s2292_s18 = sphi %s2327_s18, %s13_s18   ;;  %s2288_s17 = sphi %s2325_s17, %s2785_s17   ;;  %s2284_s16 = sphi %s2323_s16, %s2784_s16   ;;  %s2280_s15 = sphi %s2321_s15, %s2783_s15   ;;  %s2276_s14 = sphi %s2319_s14, %s2782_s14   ;;  %s2272_s13 = sphi %s2317_s13, %s2781_s13   ;;  %s2268_s12 = sphi %s2315_s12, %s2780_s12  }
   0x5   : > { %p23_p0 = scmp.ge.s32.totalorder %s22_s19, 2  ;;  %p41_p1 = scmp.ne.s32.totalorder %s2272_s13, %s2268_s12 }
   0x6   : > { %p42_p2 = scmp.eq.s32.totalorder %s2292_s18, 0  ;;  %s34_s24 = sadd.s32 1, %s2272_s13 }
   0x7   : > { %s2787_s19 = smov (%p23_p0, %s22_s19), 0  ;;  %s2789_s20 = smov (!%p23_p0, %s25_s20), %s2288_s17 }
   0x8   : > { %p43_p3 = por %p42_p2, %p41_p1  ;;  %p27_p4 = scmp.ge.s32.totalorder %s2789_s20, 2 }
   0x9   : > { %s30_s21 = ssub.s32 %s2284_s16, %s2787_s19  ;;  %p1683_p6 = scmp.ge.s32.totalorder %s2292_s18, 4 }
   0xa   : > { %s2791_s20 = smov (%p27_p4, %s2789_s20), 0 }
   0xb   : > { %s29_s22 = ssub.s32 %s2288_s17, %s2791_s20  ;;  %143 = sbr.rel (%p1683_p6) target bundleno = 87 (0x57), region = 20 }
   0xc   : > { %s31_s23 = sor.u32 %s30_s21, %s29_s22 }
   0xd   : > { %p32_p5 = scmp.eq.s32.totalorder %s31_s23, 0 }
   0xf   : > { %s2366_s25 = scalar_select %p32_p5, %s2272_s13, %s34_s24  }
  0x10   : > { %146 = sbr.rel (!%p43_p3) target bundleno = 87 (0x57), region = 24  ;;  %s148_s26 = sand.u32 (%p43_p3), 1, %s2272_s13  }
  0x11   : > { %s1686_s27 = sshll.u32 (%p43_p3), %s2284_s16, 2  ;;  %s1684_s28 = sshll.u32 (%p43_p3), %s148_s26, 9 }
  0x12   : > { %s2083_s29 = sshll.u32 (%p43_p3), %s2288_s17, 8  ;;  %s2380_s8 = scalar_lea.vmem (%p43_p3), [#allocation3], %s1684_s28 }
  0x13   : > { %s154_s30 = sadd.s32 (%p43_p3), %s2083_s29, %s1686_s27 }
  0x14   : > { %s1688_s4 = sshll.u32 (%p43_p3), %s154_s30, 2 }
  0x15   : > { %s2375_s7 = scalar_lea.vmem %s2776_s0, %s1688_s4 }
  0x16   : > { %v169_v0 = vld [vmem:[%s2375_s7] sm:$0xff]  ;;  %v171_v1 = vld [vmem:[%s2375_s7 + $0x8] sm:$0xff] }
  0x17   : > { %v173_v2 = vld [vmem:[%s2375_s7 + $0x20] sm:$0xff]  ;;  %170 = vst [vmem:[%s2380_s8] sm:$0xff] %v169_v0  ;;  %v175_v3 = vld [vmem:[%s2375_s7 + $0x28] sm:$0xff] }
  0x18   : > { %172 = vst [vmem:[%s2380_s8 + $0x8] sm:$0xff] %v171_v1  ;;  %v177_v4 = vld [vmem:[%s2375_s7 + $0x40] sm:$0xff]  ;;  %v179_v5 = vld [vmem:[%s2375_s7 + $0x48] sm:$0xff] }
  0x19   : > { %174 = vst [vmem:[%s2380_s8 + $0x10] sm:$0xff] %v173_v2  ;;  %v181_v6 = vld [vmem:[%s2375_s7 + $0x60] sm:$0xff]  ;;  %v183_v7 = vld [vmem:[%s2375_s7 + $0x68] sm:$0xff] }
  0x1a   : > { %176 = vst [vmem:[%s2380_s8 + $0x18] sm:$0xff] %v175_v3  ;;  %v185_v8 = vld [vmem:[%s2375_s7 + $0x80] sm:$0xff]  ;;  %v187_v9 = vld [vmem:[%s2375_s7 + $0x88] sm:$0xff] }
  0x1b   : > { %178 = vst [vmem:[%s2380_s8 + $0x20] sm:$0xff] %v177_v4  ;;  %v189_v10 = vld [vmem:[%s2375_s7 + $0xa0] sm:$0xff]  ;;  %v191_v11 = vld [vmem:[%s2375_s7 + $0xa8] sm:$0xff] }
  0x1c   : > { %180 = vst [vmem:[%s2380_s8 + $0x28] sm:$0xff] %v179_v5  ;;  %v193_v12 = vld [vmem:[%s2375_s7 + $0xc0] sm:$0xff]  ;;  %v195_v13 = vld [vmem:[%s2375_s7 + $0xc8] sm:$0xff] }
  0x1d   : > { %182 = vst [vmem:[%s2380_s8 + $0x30] sm:$0xff] %v181_v6  ;;  %v197_v14 = vld [vmem:[%s2375_s7 + $0xe0] sm:$0xff]  ;;  %v199_v15 = vld [vmem:[%s2375_s7 + $0xe8] sm:$0xff] }
  0x1e   : > { %184 = vst [vmem:[%s2380_s8 + $0x38] sm:$0xff] %v183_v7  ;;  %v201_v16 = vld [vmem:[%s2375_s7 + $0x100] sm:$0xff]  ;;  %v203_v17 = vld [vmem:[%s2375_s7 + $0x108] sm:$0xff] }
  0x1f   : > { %186 = vst [vmem:[%s2380_s8 + $0x40] sm:$0xff] %v185_v8  ;;  %v205_v18 = vld [vmem:[%s2375_s7 + $0x120] sm:$0xff]  ;;  %v207_v19 = vld [vmem:[%s2375_s7 + $0x128] sm:$0xff] }
  0x20   : > { %188 = vst [vmem:[%s2380_s8 + $0x48] sm:$0xff] %v187_v9  ;;  %v209_v20 = vld [vmem:[%s2375_s7 + $0x140] sm:$0xff]  ;;  %v211_v21 = vld [vmem:[%s2375_s7 + $0x148] sm:$0xff] }
  0x21   : > { %190 = vst [vmem:[%s2380_s8 + $0x50] sm:$0xff] %v189_v10  ;;  %v213_v22 = vld [vmem:[%s2375_s7 + $0x160] sm:$0xff]  ;;  %v215_v23 = vld [vmem:[%s2375_s7 + $0x168] sm:$0xff] }
  0x22   : > { %192 = vst [vmem:[%s2380_s8 + $0x58] sm:$0xff] %v191_v11  ;;  %v217_v24 = vld [vmem:[%s2375_s7 + $0x180] sm:$0xff]  ;;  %v219_v25 = vld [vmem:[%s2375_s7 + $0x188] sm:$0xff] }
  0x23   : > { %194 = vst [vmem:[%s2380_s8 + $0x60] sm:$0xff] %v193_v12  ;;  %v221_v26 = vld [vmem:[%s2375_s7 + $0x1a0] sm:$0xff]  ;;  %v223_v27 = vld [vmem:[%s2375_s7 + $0x1a8] sm:$0xff] }
  0x24   : > { %196 = vst [vmem:[%s2380_s8 + $0x68] sm:$0xff] %v195_v13  ;;  %v225_v28 = vld [vmem:[%s2375_s7 + $0x1c0] sm:$0xff]  ;;  %v227_v29 = vld [vmem:[%s2375_s7 + $0x1c8] sm:$0xff] }
  0x25   : > { %198 = vst [vmem:[%s2380_s8 + $0x70] sm:$0xff] %v197_v14  ;;  %v229_v30 = vld [vmem:[%s2375_s7 + $0x1e0] sm:$0xff]  ;;  %v231_v31 = vld [vmem:[%s2375_s7 + $0x1e8] sm:$0xff] }
  0x26   : > { %200 = vst [vmem:[%s2380_s8 + $0x78] sm:$0xff] %v199_v15  ;;  %v233_v32 = vld [vmem:[%s2375_s7 + $0x200] sm:$0xff]  ;;  %v235_v33 = vld [vmem:[%s2375_s7 + $0x208] sm:$0xff] }
  0x27   : > { %202 = vst [vmem:[%s2380_s8 + $0x80] sm:$0xff] %v201_v16  ;;  %v237_v34 = vld [vmem:[%s2375_s7 + $0x220] sm:$0xff]  ;;  %v239_v35 = vld [vmem:[%s2375_s7 + $0x228] sm:$0xff] }
  0x28   : > { %204 = vst [vmem:[%s2380_s8 + $0x88] sm:$0xff] %v203_v17  ;;  %v241_v36 = vld [vmem:[%s2375_s7 + $0x240] sm:$0xff]  ;;  %v243_v37 = vld [vmem:[%s2375_s7 + $0x248] sm:$0xff] }
  0x29   : > { %206 = vst [vmem:[%s2380_s8 + $0x90] sm:$0xff] %v205_v18  ;;  %v245_v38 = vld [vmem:[%s2375_s7 + $0x260] sm:$0xff]  ;;  %v247_v39 = vld [vmem:[%s2375_s7 + $0x268] sm:$0xff] }
  0x2a   : > { %208 = vst [vmem:[%s2380_s8 + $0x98] sm:$0xff] %v207_v19  ;;  %v249_v40 = vld [vmem:[%s2375_s7 + $0x280] sm:$0xff]  ;;  %v251_v41 = vld [vmem:[%s2375_s7 + $0x288] sm:$0xff] }
  0x2b   : > { %210 = vst [vmem:[%s2380_s8 + $0xa0] sm:$0xff] %v209_v20  ;;  %v253_v42 = vld [vmem:[%s2375_s7 + $0x2a0] sm:$0xff]  ;;  %v255_v43 = vld [vmem:[%s2375_s7 + $0x2a8] sm:$0xff] }
  0x2c   : > { %212 = vst [vmem:[%s2380_s8 + $0xa8] sm:$0xff] %v211_v21  ;;  %v257_v44 = vld [vmem:[%s2375_s7 + $0x2c0] sm:$0xff]  ;;  %v259_v45 = vld [vmem:[%s2375_s7 + $0x2c8] sm:$0xff] }
  0x2d   : > { %214 = vst [vmem:[%s2380_s8 + $0xb0] sm:$0xff] %v213_v22  ;;  %v261_v46 = vld [vmem:[%s2375_s7 + $0x2e0] sm:$0xff]  ;;  %v263_v47 = vld [vmem:[%s2375_s7 + $0x2e8] sm:$0xff] }
  0x2e   : > { %216 = vst [vmem:[%s2380_s8 + $0xb8] sm:$0xff] %v215_v23  ;;  %v265_v48 = vld [vmem:[%s2375_s7 + $0x300] sm:$0xff]  ;;  %v267_v49 = vld [vmem:[%s2375_s7 + $0x308] sm:$0xff] }
  0x2f   : > { %218 = vst [vmem:[%s2380_s8 + $0xc0] sm:$0xff] %v217_v24  ;;  %v269_v50 = vld [vmem:[%s2375_s7 + $0x320] sm:$0xff]  ;;  %v271_v51 = vld [vmem:[%s2375_s7 + $0x328] sm:$0xff] }
  0x30   : > { %220 = vst [vmem:[%s2380_s8 + $0xc8] sm:$0xff] %v219_v25  ;;  %v273_v52 = vld [vmem:[%s2375_s7 + $0x340] sm:$0xff]  ;;  %v275_v53 = vld [vmem:[%s2375_s7 + $0x348] sm:$0xff] }
  0x31   : > { %222 = vst [vmem:[%s2380_s8 + $0xd0] sm:$0xff] %v221_v26  ;;  %v277_v54 = vld [vmem:[%s2375_s7 + $0x360] sm:$0xff]  ;;  %v279_v55 = vld [vmem:[%s2375_s7 + $0x368] sm:$0xff] }
  0x32   : > { %224 = vst [vmem:[%s2380_s8 + $0xd8] sm:$0xff] %v223_v27  ;;  %v281_v56 = vld [vmem:[%s2375_s7 + $0x380] sm:$0xff]  ;;  %v283_v57 = vld [vmem:[%s2375_s7 + $0x388] sm:$0xff] }
  0x33   : > { %226 = vst [vmem:[%s2380_s8 + $0xe0] sm:$0xff] %v225_v28  ;;  %v285_v58 = vld [vmem:[%s2375_s7 + $0x3a0] sm:$0xff]  ;;  %v287_v59 = vld [vmem:[%s2375_s7 + $0x3a8] sm:$0xff] }
  0x34   : > { %228 = vst [vmem:[%s2380_s8 + $0xe8] sm:$0xff] %v227_v29  ;;  %v289_v60 = vld [vmem:[%s2375_s7 + $0x3c0] sm:$0xff]  ;;  %v291_v61 = vld [vmem:[%s2375_s7 + $0x3c8] sm:$0xff] }
  0x35   : > { %230 = vst [vmem:[%s2380_s8 + $0xf0] sm:$0xff] %v229_v30  ;;  %v293_v62 = vld [vmem:[%s2375_s7 + $0x3e0] sm:$0xff]  ;;  %v295_v63 = vld [vmem:[%s2375_s7 + $0x3e8] sm:$0xff] }
  0x36   : > { %232 = vst [vmem:[%s2380_s8 + $0xf8] sm:$0xff] %v231_v31 }
  0x37   : > { %234 = vst [vmem:[%s2380_s8 + $0x100] sm:$0xff] %v233_v32 }
  0x38   : > { %236 = vst [vmem:[%s2380_s8 + $0x108] sm:$0xff] %v235_v33 }
  0x39   : > { %238 = vst [vmem:[%s2380_s8 + $0x110] sm:$0xff] %v237_v34 }
  0x3a   : > { %240 = vst [vmem:[%s2380_s8 + $0x118] sm:$0xff] %v239_v35 }
  0x3b   : > { %242 = vst [vmem:[%s2380_s8 + $0x120] sm:$0xff] %v241_v36 }
  0x3c   : > { %244 = vst [vmem:[%s2380_s8 + $0x128] sm:$0xff] %v243_v37 }
  0x3d   : > { %246 = vst [vmem:[%s2380_s8 + $0x130] sm:$0xff] %v245_v38 }
  0x3e   : > { %248 = vst [vmem:[%s2380_s8 + $0x138] sm:$0xff] %v247_v39 }
  0x3f   : > { %250 = vst [vmem:[%s2380_s8 + $0x140] sm:$0xff] %v249_v40 }
  0x40   : > { %252 = vst [vmem:[%s2380_s8 + $0x148] sm:$0xff] %v251_v41 }
  0x41   : > { %254 = vst [vmem:[%s2380_s8 + $0x150] sm:$0xff] %v253_v42 }
  0x42   : > { %256 = vst [vmem:[%s2380_s8 + $0x158] sm:$0xff] %v255_v43 }
  0x43   : > { %258 = vst [vmem:[%s2380_s8 + $0x160] sm:$0xff] %v257_v44 }
  0x44   : > { %260 = vst [vmem:[%s2380_s8 + $0x168] sm:$0xff] %v259_v45 }
  0x45   : > { %262 = vst [vmem:[%s2380_s8 + $0x170] sm:$0xff] %v261_v46 }
  0x46   : > { %264 = vst [vmem:[%s2380_s8 + $0x178] sm:$0xff] %v263_v47 }
  0x47   : > { %266 = vst [vmem:[%s2380_s8 + $0x180] sm:$0xff] %v265_v48 }
  0x48   : > { %268 = vst [vmem:[%s2380_s8 + $0x188] sm:$0xff] %v267_v49 }
  0x49   : > { %270 = vst [vmem:[%s2380_s8 + $0x190] sm:$0xff] %v269_v50 }
  0x4a   : > { %272 = vst [vmem:[%s2380_s8 + $0x198] sm:$0xff] %v271_v51 }
  0x4b   : > { %274 = vst [vmem:[%s2380_s8 + $0x1a0] sm:$0xff] %v273_v52 }
  0x4c   : > { %276 = vst [vmem:[%s2380_s8 + $0x1a8] sm:$0xff] %v275_v53 }
  0x4d   : > { %278 = vst [vmem:[%s2380_s8 + $0x1b0] sm:$0xff] %v277_v54 }
  0x4e   : > { %280 = vst [vmem:[%s2380_s8 + $0x1b8] sm:$0xff] %v279_v55 }
  0x4f   : > { %282 = vst [vmem:[%s2380_s8 + $0x1c0] sm:$0xff] %v281_v56 }
  0x50   : > { %284 = vst [vmem:[%s2380_s8 + $0x1c8] sm:$0xff] %v283_v57 }
  0x51   : > { %286 = vst [vmem:[%s2380_s8 + $0x1d0] sm:$0xff] %v285_v58 }
  0x52   : > { %288 = vst [vmem:[%s2380_s8 + $0x1d8] sm:$0xff] %v287_v59 }
  0x53   : > { %290 = vst [vmem:[%s2380_s8 + $0x1e0] sm:$0xff] %v289_v60 }
  0x54   : > { %292 = vst [vmem:[%s2380_s8 + $0x1e8] sm:$0xff] %v291_v61 }
  0x55   : > { %294 = vst [vmem:[%s2380_s8 + $0x1f0] sm:$0xff] %v293_v62 }
  0x56   : > { %296 = vst [vmem:[%s2380_s8 + $0x1f8] sm:$0xff] %v295_v63 }
  0x57 PF: > { %p1689_p7 = scmp.ge.s32.totalorder %s2292_s18, 1  ;;  %p310_p8 = scmp.lt.s32.totalorder %s2292_s18, 5 }
  0x59   : > { %p311_p9 = pnand %p1689_p7, %p310_p8 }
  0x5a   : > { %s317_s9 = sand.u32 (!%p311_p9), 1, %s2268_s12   ;;  %s1691_s10 = sshll.u32 (!%p311_p9), %s2276_s14, 6 }
  0x5b   : > { %314 = sbr.rel (%p311_p9) target bundleno = 593 (0x251), region = 51  ;;  %s1690_s11 = sshll.u32 (!%p311_p9), %s317_s9, 9 }
  0x5c   : > { %p348_p10 = scmp.lt.s32.totalorder (!%p311_p9), %s1691_s10, 127  ;;  %s1693_s21 = sshll.u32 (!%p311_p9), %s2280_s15, 5 }
  0x5d   : > { %p354_p11 = scmp.lt.s32.totalorder (!%p311_p9), %s1693_s21, 63  ;;  %s2522_s12 = scalar_lea.vmem (!%p311_p9), [#allocation3], %s1690_s11 }
  0x5e   : > { %p1695_p12 = scmp.ne.s32.totalorder (!%p311_p9), %s2276_s14, 0 }
  0x60   : > { %s2793_s10 = smov (!%p348_p10, %s1691_s10), 127  ;;  %s2795_s21 = smov (!%p354_p11, %s1693_s21), 63 }
  0x61   : > { %s1692_s22 = sshll.u32 %s2793_s10, 2  ;;  %s1694_s27 = sshll.u32 %s2795_s21, 3 }
  0x62   : > { %s2515_s26 = scalar_lea.vmem %s2777_s1, %s1692_s22  ;;  %s2520_s30 = scalar_lea.vmem %s2779_s3, %s1694_s27 }
  0x63   : > { %362 = sbr.rel (%p1695_p12) target bundleno = 137 (0x89), region = 59 }
  0x68   : > { %v2294_v0 = vmov 0.0  }
  0x69   : > { %363 = vst [vmem:[#allocation2 + $0xb0] sm:$0xff] %v2294_v0 }
  0x6a   : > { %364 = vst [vmem:[#allocation2] sm:$0xff] %v2294_v0 }
  0x6b   : > { %365 = vst [vmem:[#allocation2 + $0xd8] sm:$0xff] %v2294_v0 }
  0x6c   : > { %366 = vst [vmem:[#allocation2 + $0x18] sm:$0xff] %v2294_v0 }
  0x6d   : > { %367 = vst [vmem:[#allocation2 + $0x50] sm:$0xff] %v2294_v0 }
  0x6e   : > { %368 = vst [vmem:[#allocation2 + $0x68] sm:$0xff] %v2294_v0 }
  0x6f   : > { %369 = vst [vmem:[#allocation2 + $0x30] sm:$0xff] %v2294_v0 }
  0x70   : > { %370 = vst [vmem:[#allocation2 + $0x48] sm:$0xff] %v2294_v0 }
  0x71   : > { %371 = vst [vmem:[#allocation2 + $0x80] sm:$0xff] %v2294_v0 }
  0x72   : > { %372 = vst [vmem:[#allocation2 + $0x88] sm:$0xff] %v2294_v0 }
  0x73   : > { %373 = vst [vmem:[#allocation2 + $0xe8] sm:$0xff] %v2294_v0 }
  0x74   : > { %374 = vst [vmem:[#allocation2 + $0xb8] sm:$0xff] %v2294_v0 }
  0x75   : > { %375 = vst [vmem:[#allocation2 + $0x60] sm:$0xff] %v2294_v0 }
  0x76   : > { %376 = vst [vmem:[#allocation2 + $0xf0] sm:$0xff] %v2294_v0 }
  0x77   : > { %377 = vst [vmem:[#allocation2 + $0x8] sm:$0xff] %v2294_v0 }
  0x78   : > { %378 = vst [vmem:[#allocation2 + $0x78] sm:$0xff] %v2294_v0 }
  0x79   : > { %379 = vst [vmem:[#allocation2 + $0x38] sm:$0xff] %v2294_v0 }
  0x7a   : > { %380 = vst [vmem:[#allocation2 + $0x58] sm:$0xff] %v2294_v0 }
  0x7b   : > { %381 = vst [vmem:[#allocation2 + $0x40] sm:$0xff] %v2294_v0 }
  0x7c   : > { %382 = vst [vmem:[#allocation2 + $0xc8] sm:$0xff] %v2294_v0 }
  0x7d   : > { %383 = vst [vmem:[#allocation2 + $0xe0] sm:$0xff] %v2294_v0 }
  0x7e   : > { %384 = vst [vmem:[#allocation2 + $0x90] sm:$0xff] %v2294_v0 }
  0x7f   : > { %385 = vst [vmem:[#allocation2 + $0x70] sm:$0xff] %v2294_v0 }
  0x80   : > { %386 = vst [vmem:[#allocation2 + $0xc0] sm:$0xff] %v2294_v0 }
  0x81   : > { %387 = vst [vmem:[#allocation2 + $0xa8] sm:$0xff] %v2294_v0 }
  0x82   : > { %388 = vst [vmem:[#allocation2 + $0xd0] sm:$0xff] %v2294_v0 }
  0x83   : > { %389 = vst [vmem:[#allocation2 + $0x10] sm:$0xff] %v2294_v0 }
  0x84   : > { %390 = vst [vmem:[#allocation2 + $0x28] sm:$0xff] %v2294_v0 }
  0x85   : > { %391 = vst [vmem:[#allocation2 + $0xa0] sm:$0xff] %v2294_v0 }
  0x86   : > { %392 = vst [vmem:[#allocation2 + $0xf8] sm:$0xff] %v2294_v0 }
  0x87   : > { %393 = vst [vmem:[#allocation2 + $0x20] sm:$0xff] %v2294_v0 }
  0x88   : > { %394 = vst [vmem:[#allocation2 + $0x98] sm:$0xff] %v2294_v0 }
  0x89 PF: > { %v2155_v1 = vld [vmem:[%s2515_s26 + $0x38] sm:$0xff]  ;;  %v2154_v5 = vld [vmem:[%s2515_s26 + $0x30] sm:$0xff]  ;;  %v2153_v9 = vld [vmem:[%s2515_s26 + $0x28] sm:$0xff]  ;;  %p2080_p13 = scmp.ne.s32.totalorder %s2276_s14, 1 }
  0x8a   : > { %v2163_v2 = vld [vmem:[%s2515_s26 + $0x78] sm:$0xff]  ;;  %1067 = vmatpush.bf16.msra.mxu0 %v2155_v1  ;;  %v2162_v6 = vld [vmem:[%s2515_s26 + $0x70] sm:$0xff]  ;;  %v2161_v10 = vld [vmem:[%s2515_s26 + $0x68] sm:$0xff] }
  0x8b   : > { %v2171_v3 = vld [vmem:[%s2515_s26 + $0xb8] sm:$0xff]  ;;  %1156 = vmatpush.bf16.msra.mxu1 %v2163_v2  ;;  %v2170_v7 = vld [vmem:[%s2515_s26 + $0xb0] sm:$0xff]  ;;  %v2169_v11 = vld [vmem:[%s2515_s26 + $0xa8] sm:$0xff] }
  0x8c   : > { %v2179_v4 = vld [vmem:[%s2515_s26 + $0xf8] sm:$0xff]  ;;  %1245 = vmatpush.bf16.msra.mxu2 %v2171_v3  ;;  %v2178_v8 = vld [vmem:[%s2515_s26 + $0xf0] sm:$0xff]  ;;  %v2177_v12 = vld [vmem:[%s2515_s26 + $0xe8] sm:$0xff] }
  0x8d   : > { %1334 = vmatpush.bf16.msra.mxu3 %v2179_v4  ;;  %v2152_v13 = vld [vmem:[%s2515_s26 + $0x20] sm:$0xff]  ;;  %v2151_v17 = vld [vmem:[%s2515_s26 + $0x18] sm:$0xff]  ;;  %v2150_v21 = vld [vmem:[%s2515_s26 + $0x10] sm:$0xff] }
  0x8e   : > { %1068 = vmatpush.bf16.msra.mxu0 %v2154_v5  ;;  %v2160_v14 = vld [vmem:[%s2515_s26 + $0x60] sm:$0xff]  ;;  %v2159_v18 = vld [vmem:[%s2515_s26 + $0x58] sm:$0xff]  ;;  %v2158_v22 = vld [vmem:[%s2515_s26 + $0x50] sm:$0xff] }
  0x8f   : > { %1157 = vmatpush.bf16.msra.mxu1 %v2162_v6  ;;  %v2168_v15 = vld [vmem:[%s2515_s26 + $0xa0] sm:$0xff]  ;;  %v2167_v19 = vld [vmem:[%s2515_s26 + $0x98] sm:$0xff]  ;;  %v2166_v23 = vld [vmem:[%s2515_s26 + $0x90] sm:$0xff] }
  0x90   : > { %1246 = vmatpush.bf16.msra.mxu2 %v2170_v7  ;;  %v2176_v16 = vld [vmem:[%s2515_s26 + $0xe0] sm:$0xff]  ;;  %v2175_v20 = vld [vmem:[%s2515_s26 + $0xd8] sm:$0xff]  ;;  %v2174_v24 = vld [vmem:[%s2515_s26 + $0xd0] sm:$0xff] }
  0x91   : > { %1335 = vmatpush.bf16.msra.mxu3 %v2178_v8  ;;  %v2149_v25 = vld [vmem:[%s2515_s26 + $0x8] sm:$0xff]  ;;  %v2148_v29 = vld [vmem:[%s2515_s26] sm:$0xff]  ;;  %v2086_v34 = vld [vmem:[%s2522_s12 + $0xc] sm:$0xf0] }
  0x92   : > { %1069 = vmatpush.bf16.msra.mxu0 %v2153_v9  ;;  %v2157_v26 = vld [vmem:[%s2515_s26 + $0x48] sm:$0xff]  ;;  %v2156_v30 = vld [vmem:[%s2515_s26 + $0x40] sm:$0xff]  ;;  %v1700_v36 = vld [vmem:[%s2522_s12 + $0x10] sm:$0xf0] }
  0x93   : > { %1158 = vmatpush.bf16.msra.mxu1 %v2161_v10  ;;  %v2165_v27 = vld [vmem:[%s2515_s26 + $0x88] sm:$0xff]  ;;  %v2164_v31 = vld [vmem:[%s2515_s26 + $0x80] sm:$0xff]  ;;  %v2087_v38 = vld [vmem:[%s2522_s12 + $0x14] sm:$0xf0] }
  0x94   : > { %1247 = vmatpush.bf16.msra.mxu2 %v2169_v11  ;;  %v2173_v28 = vld [vmem:[%s2515_s26 + $0xc8] sm:$0xff]  ;;  %v2172_v32 = vld [vmem:[%s2515_s26 + $0xc0] sm:$0xff]  ;;  %v1708_v40 = vld [vmem:[%s2522_s12 + $0x18] sm:$0xf0] }
  0x95   : > { %1336 = vmatpush.bf16.msra.mxu3 %v2177_v12  ;;  %v1698_v33 = vld [vmem:[%s2522_s12] sm:$0xf]  ;;  %v2084_v35 = vld [vmem:[%s2522_s12 + $0x4] sm:$0xf]  ;;  %v1706_v37 = vld [vmem:[%s2522_s12 + $0x8] sm:$0xf] }
  0x96   : > { %1070 = vmatpush.bf16.msra.mxu0 %v2152_v13  ;;  %v2085_v39 = vld [vmem:[%s2522_s12 + $0xc] sm:$0xf]  ;;  %v1699_v41 = vor.u32 %v2086_v34, %v1698_v33  ;;  %v1703_v42 = vor.u32 %v2084_v35, %v1700_v36  ;;  %v1707_v43 = vor.u32 %v2087_v38, %v1706_v37  ;;  %v1714_v45 = vld [vmem:[%s2522_s12 + $0x20] sm:$0xf]  ;;  %v2090_v46 = vld [vmem:[%s2522_s12 + $0x2c] sm:$0xf0] }
  0x97   : > { %1159 = vmatpush.bf16.msra.mxu1 %v2160_v14  ;;  %v1711_v44 = vor.u32 %v2085_v39, %v1708_v40  ;;  %v2088_v47 = vld [vmem:[%s2522_s12 + $0x24] sm:$0xf]  ;;  %v1716_v48 = vld [vmem:[%s2522_s12 + $0x30] sm:$0xf0]  ;;  %v1722_v49 = vld [vmem:[%s2522_s12 + $0x28] sm:$0xf]  ;;  %v1715_v53 = vor.u32 %v2090_v46, %v1714_v45 }
  0x98   : > { %1248 = vmatpush.bf16.msra.mxu2 %v2168_v15  ;;  %v2091_v50 = vld [vmem:[%s2522_s12 + $0x34] sm:$0xf0]  ;;  %v2089_v51 = vld [vmem:[%s2522_s12 + $0x2c] sm:$0xf]  ;;  %v1724_v52 = vld [vmem:[%s2522_s12 + $0x38] sm:$0xf0]  ;;  %v1719_v54 = vor.u32 %v2088_v47, %v1716_v48 }
  0x99   : > { %1337 = vmatpush.bf16.msra.mxu3 %v2176_v16  ;;  %v1723_v55 = vor.u32 %v2091_v50, %v1722_v49  ;;  %v1727_v56 = vor.u32 %v2089_v51, %v1724_v52  ;;  %v1730_v57 = vld [vmem:[%s2522_s12 + $0x40] sm:$0xf]  ;;  %v2094_v58 = vld [vmem:[%s2522_s12 + $0x4c] sm:$0xf0]  ;;  %v2092_v59 = vld [vmem:[%s2522_s12 + $0x44] sm:$0xf] }
  0x9a   : > { %1071 = vmatpush.bf16.msra.mxu0 %v2151_v17  ;;  %v1732_v60 = vld [vmem:[%s2522_s12 + $0x50] sm:$0xf0]  ;;  %v1738_v61 = vld [vmem:[%s2522_s12 + $0x48] sm:$0xf]  ;;  %v2095_v62 = vld [vmem:[%s2522_s12 + $0x54] sm:$0xf0]  ;;  %v1731_v1 = vor.u32 %v2094_v58, %v1730_v57 }
  0x9b   : > { %1160 = vmatpush.bf16.msra.mxu1 %v2159_v18  ;;  %v2093_v63 = vld [vmem:[%s2522_s12 + $0x4c] sm:$0xf]  ;;  %v1740_v0 = vld [vmem:[%s2522_s12 + $0x58] sm:$0xf0]  ;;  %v1735_v2 = vor.u32 %v2092_v59, %v1732_v60  ;;  %v1739_v3 = vor.u32 %v2095_v62, %v1738_v61  ;;  %v1746_v5 = vld [vmem:[%s2522_s12 + $0x60] sm:$0xf] }
  0x9c   : > { %1249 = vmatpush.bf16.msra.mxu2 %v2167_v19  ;;  %v1743_v4 = vor.u32 %v2093_v63, %v1740_v0  ;;  %v2098_v6 = vld [vmem:[%s2522_s12 + $0x6c] sm:$0xf0]  ;;  %v2096_v7 = vld [vmem:[%s2522_s12 + $0x64] sm:$0xf]  ;;  %v1748_v8 = vld [vmem:[%s2522_s12 + $0x70] sm:$0xf0] }
  0x9d   : > { %1338 = vmatpush.bf16.msra.mxu3 %v2175_v20  ;;  %v1754_v9 = vld [vmem:[%s2522_s12 + $0x68] sm:$0xf]  ;;  %v2099_v10 = vld [vmem:[%s2522_s12 + $0x74] sm:$0xf0]  ;;  %v2097_v11 = vld [vmem:[%s2522_s12 + $0x6c] sm:$0xf]  ;;  %v1747_v13 = vor.u32 %v2098_v6, %v1746_v5  ;;  %v1751_v14 = vor.u32 %v2096_v7, %v1748_v8 }
  0x9e   : > { %1072 = vmatpush.bf16.msra.mxu0 %v2150_v21  ;;  %v1756_v12 = vld [vmem:[%s2522_s12 + $0x78] sm:$0xf0]  ;;  %v1755_v15 = vor.u32 %v2099_v10, %v1754_v9  ;;  %v1762_v17 = vld [vmem:[%s2522_s12 + $0x80] sm:$0xf]  ;;  %v2102_v18 = vld [vmem:[%s2522_s12 + $0x8c] sm:$0xf0] }
  0x9f   : > { %1161 = vmatpush.bf16.msra.mxu1 %v2158_v22  ;;  %v1759_v16 = vor.u32 %v2097_v11, %v1756_v12  ;;  %v2100_v19 = vld [vmem:[%s2522_s12 + $0x84] sm:$0xf]  ;;  %v1764_v20 = vld [vmem:[%s2522_s12 + $0x90] sm:$0xf0]  ;;  %v1770_v21 = vld [vmem:[%s2522_s12 + $0x88] sm:$0xf] }
  0xa0   : > { %1250 = vmatpush.bf16.msra.mxu2 %v2166_v23  ;;  %v2103_v22 = vld [vmem:[%s2522_s12 + $0x94] sm:$0xf0]  ;;  %v2101_v23 = vld [vmem:[%s2522_s12 + $0x8c] sm:$0xf]  ;;  %v1786_v33 = vld [vmem:[%s2522_s12 + $0xa8] sm:$0xf] }
  0xa1   : > { %1339 = vmatpush.bf16.msra.mxu3 %v2174_v24  ;;  %v1772_v24 = vld [vmem:[%s2522_s12 + $0x98] sm:$0xf0]  ;;  %v2107_v34 = vld [vmem:[%s2522_s12 + $0xb4] sm:$0xf0]  ;;  %v2105_v35 = vld [vmem:[%s2522_s12 + $0xac] sm:$0xf] }
  0xa2   : > { %1073 = vmatpush.bf16.msra.mxu0 %v2149_v25  ;;  %v1763_v25 = vor.u32 %v2102_v18, %v1762_v17  ;;  %v1788_v36 = vld [vmem:[%s2522_s12 + $0xb8] sm:$0xf0]  ;;  %v1787_v39 = vor.u32 %v2107_v34, %v1786_v33  ;;  %v1802_v45 = vld [vmem:[%s2522_s12 + $0xc8] sm:$0xf]  ;;  %v2111_v46 = vld [vmem:[%s2522_s12 + $0xd4] sm:$0xf0] }
  0xa3   : > { %1162 = vmatpush.bf16.msra.mxu1 %v2157_v26  ;;  %v1767_v26 = vor.u32 %v2100_v19, %v1764_v20  ;;  %v1791_v40 = vor.u32 %v2105_v35, %v1788_v36  ;;  %v2109_v47 = vld [vmem:[%s2522_s12 + $0xcc] sm:$0xf]  ;;  %v1804_v48 = vld [vmem:[%s2522_s12 + $0xd8] sm:$0xf0]  ;;  %v1803_v51 = vor.u32 %v2111_v46, %v1802_v45  ;;  %v1818_v57 = vld [vmem:[%s2522_s12 + $0xe8] sm:$0xf] }
  0xa4   : > { %1251 = vmatpush.bf16.msra.mxu2 %v2165_v27  ;;  %v1771_v27 = vor.u32 %v2103_v22, %v1770_v21  ;;  %v1807_v52 = vor.u32 %v2109_v47, %v1804_v48  ;;  %v2115_v58 = vld [vmem:[%s2522_s12 + $0xf4] sm:$0xf0]  ;;  %v2113_v59 = vld [vmem:[%s2522_s12 + $0xec] sm:$0xf]  ;;  %v1820_v60 = vld [vmem:[%s2522_s12 + $0xf8] sm:$0xf0] }
  0xa5   : > { %1340 = vmatpush.bf16.msra.mxu3 %v2173_v28  ;;  %v1775_v28 = vor.u32 %v2101_v23, %v1772_v24  ;;  %v1819_v63 = vor.u32 %v2115_v58, %v1818_v57  ;;  %v1823_v0 = vor.u32 %v2113_v59, %v1820_v60  ;;  %v1834_v5 = vld [vmem:[%s2522_s12 + $0x108] sm:$0xf]  ;;  %v2119_v6 = vld [vmem:[%s2522_s12 + $0x114] sm:$0xf0]  ;;  %v2117_v7 = vld [vmem:[%s2522_s12 + $0x10c] sm:$0xf] }
  0xa6   : > { %1074 = vmatpush.bf16.msra.mxu0 %v2148_v29  ;;  %v1778_v29 = vld [vmem:[%s2522_s12 + $0xa0] sm:$0xf]  ;;  %v1836_v8 = vld [vmem:[%s2522_s12 + $0x118] sm:$0xf0]  ;;  %v395_v21 = vld [vmem:[#allocation2 + $0xb0] sm:$0xff] }
  0xa7   : > { %1163 = vmatpush.bf16.msra.mxu1 %v2156_v30  ;;  %v2106_v30 = vld [vmem:[%s2522_s12 + $0xac] sm:$0xf0]  ;;  %v1842_v23 = vld [vmem:[%s2522_s12 + $0x120] sm:$0xf]  ;;  %v1860_v57 = vld [vmem:[%s2522_s12 + $0x150] sm:$0xf0] }
  0xa8   : > { %1252 = vmatpush.bf16.msra.mxu2 %v2164_v31  ;;  %v2104_v31 = vld [vmem:[%s2522_s12 + $0xa4] sm:$0xf]  ;;  %v1779_v37 = vor.u32 %v2106_v30, %v1778_v29  ;;  %v2122_v24 = vld [vmem:[%s2522_s12 + $0x12c] sm:$0xf0]  ;;  %v2123_v29 = vld [vmem:[%s2522_s12 + $0x134] sm:$0xf0] }
  0xa9   : > { %1341 = vmatpush.bf16.msra.mxu3 %v2172_v32  ;;  %1075 = vmatmul.bf16.vlgmr.msra.gmra.mxu0 %v1699_v41  ;;  %v1780_v32 = vld [vmem:[%s2522_s12 + $0xb0] sm:$0xf0]  ;;  %v1794_v41 = vld [vmem:[%s2522_s12 + $0xc0] sm:$0xf]  ;;  %v2121_v30 = vld [vmem:[%s2522_s12 + $0x12c] sm:$0xf]  ;;  %v1843_v35 = vor.u32 %v2122_v24, %v1842_v23 }
  0xaa   : > { %1164 = vmatmul.bf16.vlgmr.msra.gmra.mxu1 %v1703_v42  ;;  %v1783_v38 = vor.u32 %v2104_v31, %v1780_v32  ;;  %v2110_v42 = vld [vmem:[%s2522_s12 + $0xcc] sm:$0xf0]  ;;  %v1852_v31 = vld [vmem:[%s2522_s12 + $0x138] sm:$0xf0]  ;;  %v1866_v58 = vld [vmem:[%s2522_s12 + $0x148] sm:$0xf] }
  0xab   : > { %1253 = vmatmul.bf16.vlgmr.msra.gmra.mxu2 %v1707_v43  ;;  %v2108_v43 = vld [vmem:[%s2522_s12 + $0xc4] sm:$0xf]  ;;  %v1795_v49 = vor.u32 %v2110_v42, %v1794_v41  ;;  %v1855_v41 = vor.u32 %v2121_v30, %v1852_v31  ;;  %v2127_v59 = vld [vmem:[%s2522_s12 + $0x154] sm:$0xf0]  ;;  %v2125_v60 = vld [vmem:[%s2522_s12 + $0x14c] sm:$0xf] }
  0xac   : > { %1342 = vmatmul.bf16.vlgmr.msra.gmra.mxu3 %v1711_v44  ;;  %v1796_v44 = vld [vmem:[%s2522_s12 + $0xd0] sm:$0xf0]  ;;  %v396_v42 = vld [vmem:[#allocation2] sm:$0xff]  ;;  %v1882_v24 = vld [vmem:[%s2522_s12 + $0x168] sm:$0xf] }
  0xad   : > { %v1799_v50 = vor.u32 %v2108_v43, %v1796_v44  ;;  %v1876_v23 = vld [vmem:[%s2522_s12 + $0x170] sm:$0xf0] }
  0xb9   : > { %1080 = vmatmul.bf16.gmra.mxu0 %v1715_v53  ;;  %v1810_v53 = vld [vmem:[%s2522_s12 + $0xe0] sm:$0xf] }
  0xba   : > { %1169 = vmatmul.bf16.gmra.mxu1 %v1719_v54  ;;  %v2114_v54 = vld [vmem:[%s2522_s12 + $0xec] sm:$0xf0] }
  0xbb   : > { %1258 = vmatmul.bf16.gmra.mxu2 %v1723_v55  ;;  %v2112_v55 = vld [vmem:[%s2522_s12 + $0xe4] sm:$0xf]  ;;  %v1811_v61 = vor.u32 %v2114_v54, %v1810_v53  ;;  %v1858_v53 = vld [vmem:[%s2522_s12 + $0x140] sm:$0xf]  ;;  %v2126_v54 = vld [vmem:[%s2522_s12 + $0x14c] sm:$0xf0] }
  0xbc   : > { %1347 = vmatmul.bf16.gmra.mxu3 %v1727_v56  ;;  %v1812_v56 = vld [vmem:[%s2522_s12 + $0xf0] sm:$0xf0] }
  0xbd   : > { %v1815_v62 = vor.u32 %v2112_v55, %v1812_v56  ;;  %v2124_v56 = vld [vmem:[%s2522_s12 + $0x144] sm:$0xf] }
  0xc9   : > { %1085 = vmatmul.bf16.gmra.mxu0 %v1731_v1  ;;  %v1826_v1 = vld [vmem:[%s2522_s12 + $0x100] sm:$0xf] }
  0xca   : > { %1174 = vmatmul.bf16.gmra.mxu1 %v1735_v2  ;;  %v2118_v2 = vld [vmem:[%s2522_s12 + $0x10c] sm:$0xf0] }
  0xcb   : > { %1263 = vmatmul.bf16.gmra.mxu2 %v1739_v3  ;;  %v2116_v3 = vld [vmem:[%s2522_s12 + $0x104] sm:$0xf]  ;;  %v1827_v9 = vor.u32 %v2118_v2, %v1826_v1  ;;  %v1859_v1 = vor.u32 %v2126_v54, %v1858_v53  ;;  %v1863_v2 = vor.u32 %v2124_v56, %v1860_v57  ;;  %v1892_v53 = vld [vmem:[%s2522_s12 + $0x190] sm:$0xf0]  ;;  %v1898_v54 = vld [vmem:[%s2522_s12 + $0x188] sm:$0xf] }
  0xcc   : > { %1352 = vmatmul.bf16.gmra.mxu3 %v1743_v4  ;;  %v1828_v4 = vld [vmem:[%s2522_s12 + $0x110] sm:$0xf0]  ;;  %v2133_v56 = vld [vmem:[%s2522_s12 + $0x18c] sm:$0xf]  ;;  %v1900_v57 = vld [vmem:[%s2522_s12 + $0x198] sm:$0xf0] }
  0xcd   : > { %v1831_v10 = vor.u32 %v2116_v3, %v1828_v4 }
  0xd9   : > { %1090 = vmatmul.bf16.gmra.mxu0 %v1747_v13  ;;  %v1835_v13 = vor.u32 %v2119_v6, %v1834_v5  ;;  %v1867_v6 = vor.u32 %v2127_v59, %v1866_v58 }
  0xda   : > { %1179 = vmatmul.bf16.gmra.mxu1 %v1751_v14  ;;  %v1839_v14 = vor.u32 %v2117_v7, %v1836_v8  ;;  %v398_v8 = vld [vmem:[#allocation2 + $0x18] sm:$0xff] }
  0xdb   : > { %1268 = vmatmul.bf16.gmra.mxu2 %v1755_v15 }
  0xdc   : > { %1357 = vmatmul.bf16.gmra.mxu3 %v1759_v16 }
  0xe9   : > { %1095 = vmatmul.bf16.gmra.mxu0 %v1763_v25 }
  0xea   : > { %1184 = vmatmul.bf16.gmra.mxu1 %v1767_v26  ;;  %v2120_v26 = vld [vmem:[%s2522_s12 + $0x124] sm:$0xf] }
  0xeb   : > { %1273 = vmatmul.bf16.gmra.mxu2 %v1771_v27  ;;  %v1844_v27 = vld [vmem:[%s2522_s12 + $0x130] sm:$0xf0] }
  0xec   : > { %1362 = vmatmul.bf16.gmra.mxu3 %v1775_v28  ;;  %v1850_v28 = vld [vmem:[%s2522_s12 + $0x128] sm:$0xf]  ;;  %v1847_v36 = vor.u32 %v2120_v26, %v1844_v27  ;;  %v2129_v26 = vld [vmem:[%s2522_s12 + $0x16c] sm:$0xf]  ;;  %v1884_v27 = vld [vmem:[%s2522_s12 + $0x178] sm:$0xf0] }
  0xf9   : > { %1100 = vmatmul.bf16.gmra.mxu0 %v1779_v37 }
  0xfa   : > { %1189 = vmatmul.bf16.gmra.mxu1 %v1783_v38 }
  0xfb   : > { %1278 = vmatmul.bf16.gmra.mxu2 %v1787_v39 }
  0xfc   : > { %1367 = vmatmul.bf16.gmra.mxu3 %v1791_v40  ;;  %v1851_v40 = vor.u32 %v2123_v29, %v1850_v28 }
 0x109   : > { %1105 = vmatmul.bf16.gmra.mxu0 %v1795_v49 }
 0x10a   : > { %1194 = vmatmul.bf16.gmra.mxu1 %v1799_v50 }
 0x10b   : > { %1283 = vmatmul.bf16.gmra.mxu2 %v1803_v51  ;;  %v397_v51 = vld [vmem:[#allocation2 + $0xd8] sm:$0xff] }
 0x10c   : > { %1372 = vmatmul.bf16.gmra.mxu3 %v1807_v52 }
 0x119   : > { %1110 = vmatmul.bf16.gmra.mxu0 %v1811_v61  ;;  %v1868_v61 = vld [vmem:[%s2522_s12 + $0x158] sm:$0xf0] }
 0x11a   : > { %1199 = vmatmul.bf16.gmra.mxu1 %v1815_v62  ;;  %v1871_v7 = vor.u32 %v2125_v60, %v1868_v61 }
 0x11b   : > { %1288 = vmatmul.bf16.gmra.mxu2 %v1819_v63 }
 0x11c   : > { %1377 = vmatmul.bf16.gmra.mxu3 %v1823_v0 }
 0x126   : > { %v1076_v11 = vpop.f32.mrf.mxu0 }
 0x127   : > { %v1165_v12 = vpop.f32.mrf.mxu1 }
 0x128   : > { %v1166_v15 = vadd.f32 %v1165_v12, %v1076_v11 }
 0x129   : > { %1115 = vmatmul.bf16.gmra.mxu0 %v1827_v9 }
 0x12a   : > { %1204 = vmatmul.bf16.gmra.mxu1 %v1831_v10 }
 0x12b   : > { %1293 = vmatmul.bf16.gmra.mxu2 %v1835_v13 }
 0x12c   : > { %1382 = vmatmul.bf16.gmra.mxu3 %v1839_v14 }
 0x12e   : > { %v1254_v16 = vpop.f32.mrf.mxu2  ;;  %v1078_v19 = vpop.f32.mrf.mxu0 }
 0x12f   : > { %v1343_v17 = vpop.f32.mrf.mxu3  ;;  %v1255_v18 = vadd.f32 %v1254_v16, %v1166_v15  ;;  %v1167_v20 = vpop.f32.mrf.mxu1 }
 0x130   : > { %v1168_v32 = vadd.f32 %v1167_v20, %v1078_v19  ;;  %v1874_v19 = vld [vmem:[%s2522_s12 + $0x160] sm:$0xf]  ;;  %v2130_v20 = vld [vmem:[%s2522_s12 + $0x16c] sm:$0xf0] }
 0x131   : > { %v1344_v22 = vadd.f32 %v1343_v17, %v1255_v18  ;;  %v399_v17 = vld [vmem:[#allocation2 + $0x50] sm:$0xff]  ;;  %v1875_v31 = vor.u32 %v2130_v20, %v1874_v19  ;;  %v1914_v20 = vld [vmem:[%s2522_s12 + $0x1a8] sm:$0xf] }
 0x132   : > { %v1908_v19 = vld [vmem:[%s2522_s12 + $0x1b0] sm:$0xf0] }
 0x133   : > { %v1423_v25 = vadd.f32 %v1344_v22, %v395_v21  ;;  %v2128_v22 = vld [vmem:[%s2522_s12 + $0x164] sm:$0xf] }
 0x135   : > { %1455 = vst [vmem:[#allocation2 + $0xb0] sm:$0xff] %v1423_v25  ;;  %v2131_v25 = vld [vmem:[%s2522_s12 + $0x174] sm:$0xf0] }
 0x136   : > { %v1256_v33 = vpop.f32.mrf.mxu2  ;;  %v1081_v38 = vpop.f32.mrf.mxu0 }
 0x137   : > { %v1345_v34 = vpop.f32.mrf.mxu3  ;;  %v1257_v37 = vadd.f32 %v1256_v33, %v1168_v32  ;;  %v1170_v39 = vpop.f32.mrf.mxu1  ;;  %v1879_v32 = vor.u32 %v2128_v22, %v1876_v23  ;;  %v2137_v22 = vld [vmem:[%s2522_s12 + $0x1ac] sm:$0xf]  ;;  %v1916_v23 = vld [vmem:[%s2522_s12 + $0x1b8] sm:$0xf0] }
 0x138   : > { %v1171_v45 = vadd.f32 %v1170_v39, %v1081_v38  ;;  %v400_v38 = vld [vmem:[#allocation2 + $0x68] sm:$0xff] }
 0x139   : > { %v1346_v43 = vadd.f32 %v1345_v34, %v1257_v37  ;;  %1120 = vmatmul.bf16.gmra.mxu0 %v1843_v35  ;;  %v1887_v37 = vor.u32 %v2129_v26, %v1884_v27 }
 0x13a   : > { %1209 = vmatmul.bf16.gmra.mxu1 %v1847_v36  ;;  %v1883_v36 = vor.u32 %v2131_v25, %v1882_v24 }
 0x13b   : > { %v1424_v44 = vadd.f32 %v1346_v43, %v396_v42  ;;  %1298 = vmatmul.bf16.gmra.mxu2 %v1851_v40 }
 0x13c   : > { %1387 = vmatmul.bf16.gmra.mxu3 %v1855_v41 }
 0x13d   : > { %1456 = vst [vmem:[#allocation2] sm:$0xff] %v1424_v44 }
 0x13e   : > { %v1259_v46 = vpop.f32.mrf.mxu2  ;;  %v1083_v49 = vpop.f32.mrf.mxu0 }
 0x13f   : > { %v1348_v47 = vpop.f32.mrf.mxu3  ;;  %v1260_v48 = vadd.f32 %v1259_v46, %v1171_v45  ;;  %v1172_v50 = vpop.f32.mrf.mxu1 }
 0x140   : > { %v1173_v62 = vadd.f32 %v1172_v50, %v1083_v49  ;;  %v1890_v49 = vld [vmem:[%s2522_s12 + $0x180] sm:$0xf]  ;;  %v2134_v50 = vld [vmem:[%s2522_s12 + $0x18c] sm:$0xf0] }
 0x141   : > { %v1349_v52 = vadd.f32 %v1348_v47, %v1260_v48  ;;  %v401_v47 = vld [vmem:[#allocation2 + $0x30] sm:$0xff]  ;;  %v1891_v61 = vor.u32 %v2134_v50, %v1890_v49  ;;  %v1930_v50 = vld [vmem:[%s2522_s12 + $0x1c8] sm:$0xf] }
 0x142   : > { %v1924_v49 = vld [vmem:[%s2522_s12 + $0x1d0] sm:$0xf0] }
 0x143   : > { %v1425_v55 = vadd.f32 %v1349_v52, %v397_v51  ;;  %v2132_v52 = vld [vmem:[%s2522_s12 + $0x184] sm:$0xf] }
 0x145   : > { %1457 = vst [vmem:[#allocation2 + $0xd8] sm:$0xff] %v1425_v55  ;;  %v2135_v55 = vld [vmem:[%s2522_s12 + $0x194] sm:$0xf0] }
 0x146   : > { %v1261_v63 = vpop.f32.mrf.mxu2  ;;  %v1086_v4 = vpop.f32.mrf.mxu0 }
 0x147   : > { %v1350_v0 = vpop.f32.mrf.mxu3  ;;  %v1262_v3 = vadd.f32 %v1261_v63, %v1173_v62  ;;  %v1175_v5 = vpop.f32.mrf.mxu1  ;;  %v1895_v62 = vor.u32 %v2132_v52, %v1892_v53  ;;  %v2141_v52 = vld [vmem:[%s2522_s12 + $0x1cc] sm:$0xf]  ;;  %v1932_v53 = vld [vmem:[%s2522_s12 + $0x1d8] sm:$0xf0] }
 0x148   : > { %v1176_v11 = vadd.f32 %v1175_v5, %v1086_v4  ;;  %v402_v4 = vld [vmem:[#allocation2 + $0x48] sm:$0xff] }
 0x149   : > { %v1351_v9 = vadd.f32 %v1350_v0, %v1262_v3  ;;  %1125 = vmatmul.bf16.gmra.mxu0 %v1859_v1  ;;  %v1903_v3 = vor.u32 %v2133_v56, %v1900_v57 }
 0x14a   : > { %1214 = vmatmul.bf16.gmra.mxu1 %v1863_v2  ;;  %v1899_v2 = vor.u32 %v2135_v55, %v1898_v54 }
 0x14b   : > { %v1426_v10 = vadd.f32 %v1351_v9, %v398_v8  ;;  %1303 = vmatmul.bf16.gmra.mxu2 %v1867_v6 }
 0x14c   : > { %1392 = vmatmul.bf16.gmra.mxu3 %v1871_v7 }
 0x14d   : > { %1458 = vst [vmem:[#allocation2 + $0x18] sm:$0xff] %v1426_v10 }
 0x14e   : > { %v1264_v12 = vpop.f32.mrf.mxu2  ;;  %v1088_v15 = vpop.f32.mrf.mxu0 }
 0x14f   : > { %v1353_v13 = vpop.f32.mrf.mxu3  ;;  %v1265_v14 = vadd.f32 %v1264_v12, %v1176_v11  ;;  %v1177_v16 = vpop.f32.mrf.mxu1 }
 0x150   : > { %v1178_v28 = vadd.f32 %v1177_v16, %v1088_v15  ;;  %v1906_v15 = vld [vmem:[%s2522_s12 + $0x1a0] sm:$0xf]  ;;  %v2138_v16 = vld [vmem:[%s2522_s12 + $0x1ac] sm:$0xf0] }
 0x151   : > { %v1354_v18 = vadd.f32 %v1353_v13, %v1265_v14  ;;  %v403_v13 = vld [vmem:[#allocation2 + $0x80] sm:$0xff]  ;;  %v1907_v27 = vor.u32 %v2138_v16, %v1906_v15  ;;  %v1940_v15 = vld [vmem:[%s2522_s12 + $0x1f0] sm:$0xf0]  ;;  %v1946_v16 = vld [vmem:[%s2522_s12 + $0x1e8] sm:$0xf] }
 0x153   : > { %v1427_v21 = vadd.f32 %v1354_v18, %v399_v17  ;;  %v2136_v18 = vld [vmem:[%s2522_s12 + $0x1a4] sm:$0xf] }
 0x155   : > { %1459 = vst [vmem:[#allocation2 + $0x50] sm:$0xff] %v1427_v21  ;;  %v2139_v21 = vld [vmem:[%s2522_s12 + $0x1b4] sm:$0xf0] }
 0x156   : > { %v1266_v29 = vpop.f32.mrf.mxu2  ;;  %v1091_v34 = vpop.f32.mrf.mxu0 }
 0x157   : > { %v1355_v30 = vpop.f32.mrf.mxu3  ;;  %v1267_v33 = vadd.f32 %v1266_v29, %v1178_v28  ;;  %v1180_v35 = vpop.f32.mrf.mxu1  ;;  %v1911_v28 = vor.u32 %v2136_v18, %v1908_v19  ;;  %v2145_v18 = vld [vmem:[%s2522_s12 + $0x1ec] sm:$0xf]  ;;  %v1948_v19 = vld [vmem:[%s2522_s12 + $0x1f8] sm:$0xf0] }
 0x158   : > { %v1181_v41 = vadd.f32 %v1180_v35, %v1091_v34  ;;  %v404_v34 = vld [vmem:[#allocation2 + $0x88] sm:$0xff] }
 0x159   : > { %v1356_v39 = vadd.f32 %v1355_v30, %v1267_v33  ;;  %1130 = vmatmul.bf16.gmra.mxu0 %v1875_v31  ;;  %v1919_v33 = vor.u32 %v2137_v22, %v1916_v23 }
 0x15a   : > { %1219 = vmatmul.bf16.gmra.mxu1 %v1879_v32  ;;  %v1915_v32 = vor.u32 %v2139_v21, %v1914_v20 }
 0x15b   : > { %v1428_v40 = vadd.f32 %v1356_v39, %v400_v38  ;;  %1308 = vmatmul.bf16.gmra.mxu2 %v1883_v36 }
 0x15c   : > { %1397 = vmatmul.bf16.gmra.mxu3 %v1887_v37 }
 0x15d   : > { %1460 = vst [vmem:[#allocation2 + $0x68] sm:$0xff] %v1428_v40 }
 0x15e   : > { %v1269_v42 = vpop.f32.mrf.mxu2  ;;  %v1093_v45 = vpop.f32.mrf.mxu0 }
 0x15f   : > { %v1358_v43 = vpop.f32.mrf.mxu3  ;;  %v1270_v44 = vadd.f32 %v1269_v42, %v1181_v41  ;;  %v1182_v46 = vpop.f32.mrf.mxu1 }
 0x160   : > { %v1183_v58 = vadd.f32 %v1182_v46, %v1093_v45  ;;  %v1922_v45 = vld [vmem:[%s2522_s12 + $0x1c0] sm:$0xf]  ;;  %v2142_v46 = vld [vmem:[%s2522_s12 + $0x1cc] sm:$0xf0] }
 0x161   : > { %v1359_v48 = vadd.f32 %v1358_v43, %v1270_v44  ;;  %v405_v43 = vld [vmem:[#allocation2 + $0xe8] sm:$0xff]  ;;  %v1923_v57 = vor.u32 %v2142_v46, %v1922_v45 }
 0x163   : > { %v1429_v51 = vadd.f32 %v1359_v48, %v401_v47  ;;  %v2140_v48 = vld [vmem:[%s2522_s12 + $0x1c4] sm:$0xf] }
 0x165   : > { %1461 = vst [vmem:[#allocation2 + $0x30] sm:$0xff] %v1429_v51  ;;  %v2143_v51 = vld [vmem:[%s2522_s12 + $0x1d4] sm:$0xf0] }
 0x166   : > { %v1271_v59 = vpop.f32.mrf.mxu2  ;;  %v1096_v0 = vpop.f32.mrf.mxu0 }
 0x167   : > { %v1360_v60 = vpop.f32.mrf.mxu3  ;;  %v1272_v63 = vadd.f32 %v1271_v59, %v1183_v58  ;;  %v1185_v1 = vpop.f32.mrf.mxu1  ;;  %v1927_v58 = vor.u32 %v2140_v48, %v1924_v49  ;;  %v410_v48 = vld [vmem:[#allocation2 + $0x78] sm:$0xff] }
 0x168   : > { %v1186_v7 = vadd.f32 %v1185_v1, %v1096_v0  ;;  %v406_v0 = vld [vmem:[#allocation2 + $0xb8] sm:$0xff] }
 0x169   : > { %v1361_v5 = vadd.f32 %v1360_v60, %v1272_v63  ;;  %1135 = vmatmul.bf16.gmra.mxu0 %v1891_v61  ;;  %v1935_v63 = vor.u32 %v2141_v52, %v1932_v53 }
 0x16a   : > { %1224 = vmatmul.bf16.gmra.mxu1 %v1895_v62  ;;  %v1931_v62 = vor.u32 %v2143_v51, %v1930_v50 }
 0x16b   : > { %v1430_v6 = vadd.f32 %v1361_v5, %v402_v4  ;;  %1313 = vmatmul.bf16.gmra.mxu2 %v1899_v2 }
 0x16c   : > { %1402 = vmatmul.bf16.gmra.mxu3 %v1903_v3 }
 0x16d   : > { %1462 = vst [vmem:[#allocation2 + $0x48] sm:$0xff] %v1430_v6 }
 0x16e   : > { %v1274_v8 = vpop.f32.mrf.mxu2  ;;  %v1098_v11 = vpop.f32.mrf.mxu0 }
 0x16f   : > { %v1363_v9 = vpop.f32.mrf.mxu3  ;;  %v1275_v10 = vadd.f32 %v1274_v8, %v1186_v7  ;;  %v1187_v12 = vpop.f32.mrf.mxu1 }
 0x170   : > { %v1188_v24 = vadd.f32 %v1187_v12, %v1098_v11  ;;  %v1938_v11 = vld [vmem:[%s2522_s12 + $0x1e0] sm:$0xf]  ;;  %v2146_v12 = vld [vmem:[%s2522_s12 + $0x1ec] sm:$0xf0] }
 0x171   : > { %v1364_v14 = vadd.f32 %v1363_v9, %v1275_v10  ;;  %v407_v9 = vld [vmem:[#allocation2 + $0x60] sm:$0xff]  ;;  %v1939_v23 = vor.u32 %v2146_v12, %v1938_v11 }
 0x172   : > { %v413_v11 = vld [vmem:[#allocation2 + $0x40] sm:$0xff] }
 0x173   : > { %v1431_v17 = vadd.f32 %v1364_v14, %v403_v13  ;;  %v2144_v14 = vld [vmem:[%s2522_s12 + $0x1e4] sm:$0xf] }
 0x175   : > { %1463 = vst [vmem:[#allocation2 + $0x80] sm:$0xff] %v1431_v17  ;;  %v2147_v17 = vld [vmem:[%s2522_s12 + $0x1f4] sm:$0xf0] }
 0x176   : > { %v1276_v25 = vpop.f32.mrf.mxu2  ;;  %v1101_v30 = vpop.f32.mrf.mxu0 }
 0x177   : > { %v1365_v26 = vpop.f32.mrf.mxu3  ;;  %v1277_v29 = vadd.f32 %v1276_v25, %v1188_v24  ;;  %v1190_v31 = vpop.f32.mrf.mxu1  ;;  %v1943_v24 = vor.u32 %v2144_v14, %v1940_v15 }
 0x178   : > { %v1191_v37 = vadd.f32 %v1190_v31, %v1101_v30  ;;  %v408_v30 = vld [vmem:[#allocation2 + $0xf0] sm:$0xff] }
 0x179   : > { %v1366_v35 = vadd.f32 %v1365_v26, %v1277_v29  ;;  %1140 = vmatmul.bf16.gmra.mxu0 %v1907_v27  ;;  %v1951_v29 = vor.u32 %v2145_v18, %v1948_v19 }
 0x17a   : > { %1229 = vmatmul.bf16.gmra.mxu1 %v1911_v28  ;;  %v1947_v28 = vor.u32 %v2147_v17, %v1946_v16 }
 0x17b   : > { %v1432_v36 = vadd.f32 %v1366_v35, %v404_v34  ;;  %1318 = vmatmul.bf16.gmra.mxu2 %v1915_v32 }
 0x17c   : > { %1407 = vmatmul.bf16.gmra.mxu3 %v1919_v33 }
 0x17d   : > { %1464 = vst [vmem:[#allocation2 + $0x88] sm:$0xff] %v1432_v36 }
 0x17e   : > { %v1279_v38 = vpop.f32.mrf.mxu2  ;;  %v1103_v41 = vpop.f32.mrf.mxu0 }
 0x17f   : > { %v1368_v39 = vpop.f32.mrf.mxu3  ;;  %v1280_v40 = vadd.f32 %v1279_v38, %v1191_v37  ;;  %v1192_v42 = vpop.f32.mrf.mxu1 }
 0x180   : > { %v1193_v54 = vadd.f32 %v1192_v42, %v1103_v41 }
 0x181   : > { %v1369_v44 = vadd.f32 %v1368_v39, %v1280_v40  ;;  %v409_v39 = vld [vmem:[#allocation2 + $0x8] sm:$0xff] }
 0x183   : > { %v1433_v47 = vadd.f32 %v1369_v44, %v405_v43 }
 0x185   : > { %1465 = vst [vmem:[#allocation2 + $0xe8] sm:$0xff] %v1433_v47 }
 0x186   : > { %v1281_v55 = vpop.f32.mrf.mxu2  ;;  %v1106_v60 = vpop.f32.mrf.mxu0 }
 0x187   : > { %v1370_v56 = vpop.f32.mrf.mxu3  ;;  %v1282_v59 = vadd.f32 %v1281_v55, %v1193_v54  ;;  %v1195_v61 = vpop.f32.mrf.mxu1 }
 0x188   : > { %v1196_v3 = vadd.f32 %v1195_v61, %v1106_v60 }
 0x189   : > { %v1371_v1 = vadd.f32 %v1370_v56, %v1282_v59  ;;  %1145 = vmatmul.bf16.gmra.mxu0 %v1923_v57  ;;  %v411_v57 = vld [vmem:[#allocation2 + $0x38] sm:$0xff] }
 0x18a   : > { %1234 = vmatmul.bf16.gmra.mxu1 %v1927_v58 }
 0x18b   : > { %v1434_v2 = vadd.f32 %v1371_v1, %v406_v0  ;;  %1323 = vmatmul.bf16.gmra.mxu2 %v1931_v62 }
 0x18c   : > { %1412 = vmatmul.bf16.gmra.mxu3 %v1935_v63 }
 0x18d   : > { %1466 = vst [vmem:[#allocation2 + $0xb8] sm:$0xff] %v1434_v2  ;;  %v412_v2 = vld [vmem:[#allocation2 + $0x58] sm:$0xff] }
 0x18e   : > { %v1284_v4 = vpop.f32.mrf.mxu2  ;;  %v1108_v7 = vpop.f32.mrf.mxu0 }
 0x18f   : > { %v1373_v5 = vpop.f32.mrf.mxu3  ;;  %v1285_v6 = vadd.f32 %v1284_v4, %v1196_v3  ;;  %v1197_v8 = vpop.f32.mrf.mxu1 }
 0x190   : > { %v1198_v20 = vadd.f32 %v1197_v8, %v1108_v7 }
 0x191   : > { %v1374_v10 = vadd.f32 %v1373_v5, %v1285_v6 }
 0x193   : > { %v1435_v13 = vadd.f32 %v1374_v10, %v407_v9 }
 0x195   : > { %1467 = vst [vmem:[#allocation2 + $0x60] sm:$0xff] %v1435_v13 }
 0x196   : > { %v1286_v21 = vpop.f32.mrf.mxu2  ;;  %v1111_v26 = vpop.f32.mrf.mxu0 }
 0x197   : > { %v1375_v22 = vpop.f32.mrf.mxu3  ;;  %v1287_v25 = vadd.f32 %v1286_v21, %v1198_v20  ;;  %v1200_v27 = vpop.f32.mrf.mxu1  ;;  %v414_v20 = vld [vmem:[#allocation2 + $0xc8] sm:$0xff] }
 0x198   : > { %v1201_v33 = vadd.f32 %v1200_v27, %v1111_v26 }
 0x199   : > { %v1376_v31 = vadd.f32 %v1375_v22, %v1287_v25  ;;  %1150 = vmatmul.bf16.gmra.mxu0 %v1939_v23 }
 0x19a   : > { %1239 = vmatmul.bf16.gmra.mxu1 %v1943_v24 }
 0x19b   : > { %v1436_v32 = vadd.f32 %v1376_v31, %v408_v30  ;;  %1328 = vmatmul.bf16.gmra.mxu2 %v1947_v28 }
 0x19c   : > { %1417 = vmatmul.bf16.gmra.mxu3 %v1951_v29  ;;  %v415_v29 = vld [vmem:[#allocation2 + $0xe0] sm:$0xff] }
 0x19d   : > { %1468 = vst [vmem:[#allocation2 + $0xf0] sm:$0xff] %v1436_v32 }
 0x19e   : > { %v1289_v34 = vpop.f32.mrf.mxu2  ;;  %v1113_v37 = vpop.f32.mrf.mxu0 }
 0x19f   : > { %v1378_v35 = vpop.f32.mrf.mxu3  ;;  %v1290_v36 = vadd.f32 %v1289_v34, %v1201_v33  ;;  %v1202_v38 = vpop.f32.mrf.mxu1 }
 0x1a0   : > { %v1203_v42 = vadd.f32 %v1202_v38, %v1113_v37  ;;  %v416_v38 = vld [vmem:[#allocation2 + $0x90] sm:$0xff] }
 0x1a1   : > { %v1379_v40 = vadd.f32 %v1378_v35, %v1290_v36 }
 0x1a3   : > { %v1437_v41 = vadd.f32 %v1379_v40, %v409_v39 }
 0x1a5   : > { %1469 = vst [vmem:[#allocation2 + $0x8] sm:$0xff] %v1437_v41 }
 0x1a6   : > { %v1291_v43 = vpop.f32.mrf.mxu2  ;;  %v1116_v46 = vpop.f32.mrf.mxu0 }
 0x1a7   : > { %v1380_v44 = vpop.f32.mrf.mxu3  ;;  %v1292_v45 = vadd.f32 %v1291_v43, %v1203_v42  ;;  %v1205_v47 = vpop.f32.mrf.mxu1 }
 0x1a8   : > { %v1206_v51 = vadd.f32 %v1205_v47, %v1116_v46  ;;  %v417_v47 = vld [vmem:[#allocation2 + $0x70] sm:$0xff] }
 0x1a9   : > { %v1381_v49 = vadd.f32 %v1380_v44, %v1292_v45 }
 0x1ab   : > { %v1438_v50 = vadd.f32 %v1381_v49, %v410_v48 }
 0x1ad   : > { %1470 = vst [vmem:[#allocation2 + $0x78] sm:$0xff] %v1438_v50 }
 0x1ae   : > { %v1294_v52 = vpop.f32.mrf.mxu2  ;;  %v1118_v55 = vpop.f32.mrf.mxu0 }
 0x1af   : > { %v1383_v53 = vpop.f32.mrf.mxu3  ;;  %v1295_v54 = vadd.f32 %v1294_v52, %v1206_v51  ;;  %v1207_v56 = vpop.f32.mrf.mxu1 }
 0x1b0   : > { %v1208_v60 = vadd.f32 %v1207_v56, %v1118_v55  ;;  %v418_v56 = vld [vmem:[#allocation2 + $0xc0] sm:$0xff] }
 0x1b1   : > { %v1384_v58 = vadd.f32 %v1383_v53, %v1295_v54 }
 0x1b3   : > { %v1439_v59 = vadd.f32 %v1384_v58, %v411_v57 }
 0x1b5   : > { %1471 = vst [vmem:[#allocation2 + $0x38] sm:$0xff] %v1439_v59 }
 0x1b6   : > { %v1296_v61 = vpop.f32.mrf.mxu2  ;;  %v1121_v0 = vpop.f32.mrf.mxu0 }
 0x1b7   : > { %v1385_v62 = vpop.f32.mrf.mxu3  ;;  %v1297_v63 = vadd.f32 %v1296_v61, %v1208_v60  ;;  %v1210_v1 = vpop.f32.mrf.mxu1 }
 0x1b8   : > { %v1211_v5 = vadd.f32 %v1210_v1, %v1121_v0  ;;  %v419_v1 = vld [vmem:[#allocation2 + $0xa8] sm:$0xff] }
 0x1b9   : > { %v1386_v3 = vadd.f32 %v1385_v62, %v1297_v63 }
 0x1bb   : > { %v1440_v4 = vadd.f32 %v1386_v3, %v412_v2 }
 0x1bd   : > { %1472 = vst [vmem:[#allocation2 + $0x58] sm:$0xff] %v1440_v4 }
 0x1be   : > { %v1299_v6 = vpop.f32.mrf.mxu2  ;;  %v1123_v9 = vpop.f32.mrf.mxu0 }
 0x1bf   : > { %v1388_v7 = vpop.f32.mrf.mxu3  ;;  %v1300_v8 = vadd.f32 %v1299_v6, %v1211_v5  ;;  %v1212_v10 = vpop.f32.mrf.mxu1 }
 0x1c0   : > { %v1213_v14 = vadd.f32 %v1212_v10, %v1123_v9  ;;  %v420_v10 = vld [vmem:[#allocation2 + $0xd0] sm:$0xff] }
 0x1c1   : > { %v1389_v12 = vadd.f32 %v1388_v7, %v1300_v8 }
 0x1c3   : > { %v1441_v13 = vadd.f32 %v1389_v12, %v413_v11 }
 0x1c5   : > { %1473 = vst [vmem:[#allocation2 + $0x40] sm:$0xff] %v1441_v13 }
 0x1c6   : > { %v1301_v15 = vpop.f32.mrf.mxu2  ;;  %v1126_v18 = vpop.f32.mrf.mxu0 }
 0x1c7   : > { %v1390_v16 = vpop.f32.mrf.mxu3  ;;  %v1302_v17 = vadd.f32 %v1301_v15, %v1213_v14  ;;  %v1215_v19 = vpop.f32.mrf.mxu1 }
 0x1c8   : > { %v1216_v23 = vadd.f32 %v1215_v19, %v1126_v18  ;;  %v421_v19 = vld [vmem:[#allocation2 + $0x10] sm:$0xff] }
 0x1c9   : > { %v1391_v21 = vadd.f32 %v1390_v16, %v1302_v17 }
 0x1cb   : > { %v1442_v22 = vadd.f32 %v1391_v21, %v414_v20 }
 0x1cd   : > { %1474 = vst [vmem:[#allocation2 + $0xc8] sm:$0xff] %v1442_v22 }
 0x1ce   : > { %v1304_v24 = vpop.f32.mrf.mxu2  ;;  %v1128_v27 = vpop.f32.mrf.mxu0 }
 0x1cf   : > { %v1393_v25 = vpop.f32.mrf.mxu3  ;;  %v1305_v26 = vadd.f32 %v1304_v24, %v1216_v23  ;;  %v1217_v28 = vpop.f32.mrf.mxu1 }
 0x1d0   : > { %v1218_v32 = vadd.f32 %v1217_v28, %v1128_v27  ;;  %v422_v28 = vld [vmem:[#allocation2 + $0x28] sm:$0xff] }
 0x1d1   : > { %v1394_v30 = vadd.f32 %v1393_v25, %v1305_v26 }
 0x1d3   : > { %v1443_v31 = vadd.f32 %v1394_v30, %v415_v29 }
 0x1d5   : > { %1475 = vst [vmem:[#allocation2 + $0xe0] sm:$0xff] %v1443_v31 }
 0x1d6   : > { %v1306_v33 = vpop.f32.mrf.mxu2  ;;  %v1131_v36 = vpop.f32.mrf.mxu0 }
 0x1d7   : > { %v1395_v34 = vpop.f32.mrf.mxu3  ;;  %v1307_v35 = vadd.f32 %v1306_v33, %v1218_v32  ;;  %v1220_v37 = vpop.f32.mrf.mxu1 }
 0x1d8   : > { %v1221_v41 = vadd.f32 %v1220_v37, %v1131_v36  ;;  %v423_v37 = vld [vmem:[#allocation2 + $0xa0] sm:$0xff] }
 0x1d9   : > { %v1396_v39 = vadd.f32 %v1395_v34, %v1307_v35 }
 0x1db   : > { %v1444_v40 = vadd.f32 %v1396_v39, %v416_v38 }
 0x1dd   : > { %1476 = vst [vmem:[#allocation2 + $0x90] sm:$0xff] %v1444_v40 }
 0x1de   : > { %v1309_v42 = vpop.f32.mrf.mxu2  ;;  %v1133_v45 = vpop.f32.mrf.mxu0 }
 0x1df   : > { %v1398_v43 = vpop.f32.mrf.mxu3  ;;  %v1310_v44 = vadd.f32 %v1309_v42, %v1221_v41  ;;  %v1222_v46 = vpop.f32.mrf.mxu1 }
 0x1e0   : > { %v1223_v50 = vadd.f32 %v1222_v46, %v1133_v45 }
 0x1e1   : > { %v1399_v48 = vadd.f32 %v1398_v43, %v1310_v44  ;;  %v424_v44 = vld [vmem:[#allocation2 + $0xf8] sm:$0xff] }
 0x1e3   : > { %v1445_v49 = vadd.f32 %v1399_v48, %v417_v47 }
 0x1e5   : > { %1477 = vst [vmem:[#allocation2 + $0x70] sm:$0xff] %v1445_v49 }
 0x1e6   : > { %v1311_v51 = vpop.f32.mrf.mxu2  ;;  %v1136_v54 = vpop.f32.mrf.mxu0 }
 0x1e7   : > { %v1400_v52 = vpop.f32.mrf.mxu3  ;;  %v1312_v53 = vadd.f32 %v1311_v51, %v1223_v50  ;;  %v1225_v55 = vpop.f32.mrf.mxu1 }
 0x1e8   : > { %v1226_v59 = vadd.f32 %v1225_v55, %v1136_v54 }
 0x1e9   : > { %v1401_v57 = vadd.f32 %v1400_v52, %v1312_v53  ;;  %v425_v53 = vld [vmem:[#allocation2 + $0x20] sm:$0xff] }
 0x1eb   : > { %v1446_v58 = vadd.f32 %v1401_v57, %v418_v56 }
 0x1ed   : > { %1478 = vst [vmem:[#allocation2 + $0xc0] sm:$0xff] %v1446_v58 }
 0x1ee   : > { %v1314_v60 = vpop.f32.mrf.mxu2  ;;  %v1138_v63 = vpop.f32.mrf.mxu0 }
 0x1ef   : > { %v1403_v61 = vpop.f32.mrf.mxu3  ;;  %v1315_v62 = vadd.f32 %v1314_v60, %v1226_v59  ;;  %v1227_v0 = vpop.f32.mrf.mxu1 }
 0x1f0   : > { %v1228_v4 = vadd.f32 %v1227_v0, %v1138_v63 }
 0x1f1   : > { %v1404_v2 = vadd.f32 %v1403_v61, %v1315_v62  ;;  %v426_v61 = vld [vmem:[#allocation2 + $0x98] sm:$0xff] }
 0x1f3   : > { %v1447_v3 = vadd.f32 %v1404_v2, %v419_v1 }
 0x1f5   : > { %1479 = vst [vmem:[#allocation2 + $0xa8] sm:$0xff] %v1447_v3 }
 0x1f6   : > { %v1316_v5 = vpop.f32.mrf.mxu2  ;;  %v1141_v8 = vpop.f32.mrf.mxu0 }
 0x1f7   : > { %v1405_v6 = vpop.f32.mrf.mxu3  ;;  %v1317_v7 = vadd.f32 %v1316_v5, %v1228_v4  ;;  %v1230_v9 = vpop.f32.mrf.mxu1 }
 0x1f8   : > { %v1231_v13 = vadd.f32 %v1230_v9, %v1141_v8 }
 0x1f9   : > { %v1406_v11 = vadd.f32 %v1405_v6, %v1317_v7 }
 0x1fb   : > { %v1448_v12 = vadd.f32 %v1406_v11, %v420_v10 }
 0x1fd   : > { %1480 = vst [vmem:[#allocation2 + $0xd0] sm:$0xff] %v1448_v12 }
 0x1fe   : > { %v1319_v14 = vpop.f32.mrf.mxu2  ;;  %v1143_v17 = vpop.f32.mrf.mxu0 }
 0x1ff   : > { %v1408_v15 = vpop.f32.mrf.mxu3  ;;  %v1320_v16 = vadd.f32 %v1319_v14, %v1231_v13  ;;  %v1232_v18 = vpop.f32.mrf.mxu1 }
 0x200   : > { %v1233_v22 = vadd.f32 %v1232_v18, %v1143_v17 }
 0x201   : > { %v1409_v20 = vadd.f32 %v1408_v15, %v1320_v16 }
 0x203   : > { %v1449_v21 = vadd.f32 %v1409_v20, %v421_v19 }
 0x205   : > { %1481 = vst [vmem:[#allocation2 + $0x10] sm:$0xff] %v1449_v21 }
 0x206   : > { %v1321_v23 = vpop.f32.mrf.mxu2  ;;  %v1146_v26 = vpop.f32.mrf.mxu0 }
 0x207   : > { %v1410_v24 = vpop.f32.mrf.mxu3  ;;  %v1322_v25 = vadd.f32 %v1321_v23, %v1233_v22  ;;  %v1235_v27 = vpop.f32.mrf.mxu1 }
 0x208   : > { %v1236_v31 = vadd.f32 %v1235_v27, %v1146_v26 }
 0x209   : > { %v1411_v29 = vadd.f32 %v1410_v24, %v1322_v25 }
 0x20b   : > { %v1450_v30 = vadd.f32 %v1411_v29, %v422_v28 }
 0x20d   : > { %1482 = vst [vmem:[#allocation2 + $0x28] sm:$0xff] %v1450_v30 }
 0x20e   : > { %v1324_v32 = vpop.f32.mrf.mxu2  ;;  %v1148_v35 = vpop.f32.mrf.mxu0 }
 0x20f   : > { %v1413_v33 = vpop.f32.mrf.mxu3  ;;  %v1325_v34 = vadd.f32 %v1324_v32, %v1236_v31  ;;  %v1237_v36 = vpop.f32.mrf.mxu1 }
 0x210   : > { %v1238_v40 = vadd.f32 %v1237_v36, %v1148_v35 }
 0x211   : > { %v1414_v38 = vadd.f32 %v1413_v33, %v1325_v34 }
 0x213   : > { %v1451_v39 = vadd.f32 %v1414_v38, %v423_v37 }
 0x215   : > { %1483 = vst [vmem:[#allocation2 + $0xa0] sm:$0xff] %v1451_v39 }
 0x216   : > { %v1326_v41 = vpop.f32.mrf.mxu2  ;;  %v1151_v45 = vpop.f32.mrf.mxu0 }
 0x217   : > { %v1415_v42 = vpop.f32.mrf.mxu3  ;;  %v1327_v43 = vadd.f32 %v1326_v41, %v1238_v40  ;;  %v1240_v46 = vpop.f32.mrf.mxu1 }
 0x218   : > { %v1241_v49 = vadd.f32 %v1240_v46, %v1151_v45 }
 0x219   : > { %v1416_v47 = vadd.f32 %v1415_v42, %v1327_v43 }
 0x21b   : > { %v1452_v48 = vadd.f32 %v1416_v47, %v424_v44 }
 0x21d   : > { %1484 = vst [vmem:[#allocation2 + $0xf8] sm:$0xff] %v1452_v48 }
 0x21e   : > { %v1329_v50 = vpop.f32.mrf.mxu2  ;;  %v1153_v55 = vpop.f32.mrf.mxu0 }
 0x21f   : > { %v1418_v51 = vpop.f32.mrf.mxu3  ;;  %v1330_v52 = vadd.f32 %v1329_v50, %v1241_v49  ;;  %v1242_v56 = vpop.f32.mrf.mxu1 }
 0x220   : > { %v1243_v58 = vadd.f32 %v1242_v56, %v1153_v55 }
 0x221   : > { %v1419_v54 = vadd.f32 %v1418_v51, %v1330_v52 }
 0x223   : > { %v1453_v57 = vadd.f32 %v1419_v54, %v425_v53 }
 0x225   : > { %1485 = vst [vmem:[#allocation2 + $0x20] sm:$0xff] %v1453_v57 }
 0x226   : > { %v1331_v59 = vpop.f32.mrf.mxu2 }
 0x227   : > { %v1332_v60 = vadd.f32 %v1331_v59, %v1243_v58  ;;  %v1420_v62 = vpop.f32.mrf.mxu3 }
 0x229   : > { %v1421_v63 = vadd.f32 %v1420_v62, %v1332_v60  ;;  %1490 = sbr.rel (%p2080_p13) target bundleno = 593 (0x251), region = 63 }
 0x22b   : > { %v1454_v0 = vadd.f32 %v1421_v63, %v426_v61 }
 0x22d   : > { %1486 = vst [vmem:[#allocation2 + $0x98] sm:$0xff] %v1454_v0 }
 0x22e   : > { %v1491_v1 = vld [vmem:[#allocation2 + $0xb0] sm:$0xff]  ;;  %v2689_v2 = vld [vmem:[%s2778_s2] ss:$0 sm:$0xff]  ;;  %v1493_v4 = vld [vmem:[#allocation2 + $0xd8] sm:$0xff] }
 0x22f   : > { %v1492_v3 = vld [vmem:[#allocation2] sm:$0xff]  ;;  %v1494_v5 = vld [vmem:[#allocation2 + $0x18] sm:$0xff]  ;;  %v1527_v6 = vadd.f32 %v2689_v2, %v1491_v1  ;;  %v1529_v8 = vadd.f32 %v2689_v2, %v1493_v4  ;;  %v1495_v9 = vld [vmem:[#allocation2 + $0x50] sm:$0xff] }
 0x230   : > { %v1528_v7 = vadd.f32 %v2689_v2, %v1492_v3  ;;  %v1496_v10 = vld [vmem:[#allocation2 + $0x68] sm:$0xff]  ;;  %v1530_v11 = vadd.f32 %v2689_v2, %v1494_v5  ;;  %v1497_v12 = vld [vmem:[#allocation2 + $0x30] sm:$0xff]  ;;  %v1531_v13 = vadd.f32 %v2689_v2, %v1495_v9  ;;  %v1499_v16 = vld [vmem:[#allocation2 + $0x80] sm:$0xff] }
 0x231   : > { %1559 = vst [vmem:[%s2520_s30] sm:$0xff] %v1527_v6  ;;  %v1498_v14 = vld [vmem:[#allocation2 + $0x48] sm:$0xff]  ;;  %v1532_v15 = vadd.f32 %v2689_v2, %v1496_v10  ;;  %v1533_v17 = vadd.f32 %v2689_v2, %v1497_v12  ;;  %v1535_v21 = vadd.f32 %v2689_v2, %v1499_v16  ;;  %v1502_v22 = vld [vmem:[#allocation2 + $0xb8] sm:$0xff]  ;;  %v1503_v24 = vld [vmem:[#allocation2 + $0x60] sm:$0xff] }
 0x232   : > { %1560 = vst [vmem:[%s2520_s30 + $0x8] sm:$0xff] %v1528_v7  ;;  %v1500_v18 = vld [vmem:[#allocation2 + $0x88] sm:$0xff]  ;;  %v1534_v19 = vadd.f32 %v2689_v2, %v1498_v14  ;;  %v1504_v26 = vld [vmem:[#allocation2 + $0xf0] sm:$0xff]  ;;  %v1538_v27 = vadd.f32 %v2689_v2, %v1502_v22  ;;  %v1539_v29 = vadd.f32 %v2689_v2, %v1503_v24  ;;  %v1506_v30 = vld [vmem:[#allocation2 + $0x78] sm:$0xff] }
 0x233   : > { %1561 = vst [vmem:[%s2520_s30 + $0x10] sm:$0xff] %v1529_v8  ;;  %v1501_v20 = vld [vmem:[#allocation2 + $0xe8] sm:$0xff]  ;;  %v1536_v23 = vadd.f32 %v2689_v2, %v1500_v18  ;;  %v1540_v31 = vadd.f32 %v2689_v2, %v1504_v26  ;;  %v1507_v32 = vld [vmem:[#allocation2 + $0x38] sm:$0xff]  ;;  %v1542_v35 = vadd.f32 %v2689_v2, %v1506_v30  ;;  %v1509_v36 = vld [vmem:[#allocation2 + $0x40] sm:$0xff] }
 0x234   : > { %1562 = vst [vmem:[%s2520_s30 + $0x18] sm:$0xff] %v1530_v11  ;;  %v1537_v25 = vadd.f32 %v2689_v2, %v1501_v20  ;;  %v1505_v28 = vld [vmem:[#allocation2 + $0x8] sm:$0xff]  ;;  %v1508_v34 = vld [vmem:[#allocation2 + $0x58] sm:$0xff]  ;;  %v1543_v37 = vadd.f32 %v2689_v2, %v1507_v32  ;;  %v1511_v40 = vld [vmem:[#allocation2 + $0xe0] sm:$0xff]  ;;  %v1545_v41 = vadd.f32 %v2689_v2, %v1509_v36 }
 0x235   : > { %1563 = vst [vmem:[%s2520_s30 + $0x20] sm:$0xff] %v1531_v13  ;;  %v1541_v33 = vadd.f32 %v2689_v2, %v1505_v28  ;;  %v1510_v38 = vld [vmem:[#allocation2 + $0xc8] sm:$0xff]  ;;  %v1544_v39 = vadd.f32 %v2689_v2, %v1508_v34  ;;  %v1512_v42 = vld [vmem:[#allocation2 + $0x90] sm:$0xff]  ;;  %v1547_v45 = vadd.f32 %v2689_v2, %v1511_v40  ;;  %v1514_v46 = vld [vmem:[#allocation2 + $0xc0] sm:$0xff] }
 0x236   : > { %1564 = vst [vmem:[%s2520_s30 + $0x28] sm:$0xff] %v1532_v15  ;;  %v1546_v43 = vadd.f32 %v2689_v2, %v1510_v38  ;;  %v1513_v44 = vld [vmem:[#allocation2 + $0x70] sm:$0xff]  ;;  %v1548_v47 = vadd.f32 %v2689_v2, %v1512_v42  ;;  %v1515_v48 = vld [vmem:[#allocation2 + $0xa8] sm:$0xff]  ;;  %v1550_v51 = vadd.f32 %v2689_v2, %v1514_v46  ;;  %v1519_v56 = vld [vmem:[#allocation2 + $0xa0] sm:$0xff] }
 0x237   : > { %1565 = vst [vmem:[%s2520_s30 + $0x30] sm:$0xff] %v1533_v17  ;;  %v1549_v49 = vadd.f32 %v2689_v2, %v1513_v44  ;;  %v1516_v50 = vld [vmem:[#allocation2 + $0xd0] sm:$0xff]  ;;  %v1551_v53 = vadd.f32 %v2689_v2, %v1515_v48  ;;  %v1518_v54 = vld [vmem:[#allocation2 + $0x28] sm:$0xff]  ;;  %v1520_v58 = vld [vmem:[#allocation2 + $0xf8] sm:$0xff]  ;;  %v1555_v61 = vadd.f32 %v2689_v2, %v1519_v56 }
 0x238   : > { %1566 = vst [vmem:[%s2520_s30 + $0x38] sm:$0xff] %v1534_v19  ;;  %v1517_v52 = vld [vmem:[#allocation2 + $0x10] sm:$0xff]  ;;  %v1552_v55 = vadd.f32 %v2689_v2, %v1516_v50  ;;  %v1554_v59 = vadd.f32 %v2689_v2, %v1518_v54  ;;  %v1521_v60 = vld [vmem:[#allocation2 + $0x20] sm:$0xff]  ;;  %v1522_v62 = vld [vmem:[#allocation2 + $0x98] sm:$0xff]  ;;  %v1556_v63 = vadd.f32 %v2689_v2, %v1520_v58 }
 0x239   : > { %1567 = vst [vmem:[%s2520_s30 + $0x40] sm:$0xff] %v1535_v21  ;;  %v1553_v57 = vadd.f32 %v2689_v2, %v1517_v52  ;;  %v1557_v0 = vadd.f32 %v2689_v2, %v1521_v60  ;;  %v1558_v1 = vadd.f32 %v2689_v2, %v1522_v62 }
 0x23a   : > { %1568 = vst [vmem:[%s2520_s30 + $0x48] sm:$0xff] %v1536_v23 }
 0x23b   : > { %1569 = vst [vmem:[%s2520_s30 + $0x50] sm:$0xff] %v1537_v25 }
 0x23c   : > { %1570 = vst [vmem:[%s2520_s30 + $0x58] sm:$0xff] %v1538_v27 }
 0x23d   : > { %1571 = vst [vmem:[%s2520_s30 + $0x60] sm:$0xff] %v1539_v29 }
 0x23e   : > { %1572 = vst [vmem:[%s2520_s30 + $0x68] sm:$0xff] %v1540_v31 }
 0x23f   : > { %1573 = vst [vmem:[%s2520_s30 + $0x70] sm:$0xff] %v1541_v33 }
 0x240   : > { %1574 = vst [vmem:[%s2520_s30 + $0x78] sm:$0xff] %v1542_v35 }
 0x241   : > { %1575 = vst [vmem:[%s2520_s30 + $0x80] sm:$0xff] %v1543_v37 }
 0x242   : > { %1576 = vst [vmem:[%s2520_s30 + $0x88] sm:$0xff] %v1544_v39 }
 0x243   : > { %1577 = vst [vmem:[%s2520_s30 + $0x90] sm:$0xff] %v1545_v41 }
 0x244   : > { %1578 = vst [vmem:[%s2520_s30 + $0x98] sm:$0xff] %v1546_v43 }
 0x245   : > { %1579 = vst [vmem:[%s2520_s30 + $0xa0] sm:$0xff] %v1547_v45 }
 0x246   : > { %1580 = vst [vmem:[%s2520_s30 + $0xa8] sm:$0xff] %v1548_v47 }
 0x247   : > { %1581 = vst [vmem:[%s2520_s30 + $0xb0] sm:$0xff] %v1549_v49 }
 0x248   : > { %1582 = vst [vmem:[%s2520_s30 + $0xb8] sm:$0xff] %v1550_v51 }
 0x249   : > { %1583 = vst [vmem:[%s2520_s30 + $0xc0] sm:$0xff] %v1551_v53 }
 0x24a   : > { %1584 = vst [vmem:[%s2520_s30 + $0xc8] sm:$0xff] %v1552_v55 }
 0x24b   : > { %1585 = vst [vmem:[%s2520_s30 + $0xd0] sm:$0xff] %v1553_v57 }
 0x24c   : > { %1586 = vst [vmem:[%s2520_s30 + $0xd8] sm:$0xff] %v1554_v59 }
 0x24d   : > { %1587 = vst [vmem:[%s2520_s30 + $0xe0] sm:$0xff] %v1555_v61 }
 0x24e   : > { %1588 = vst [vmem:[%s2520_s30 + $0xe8] sm:$0xff] %v1556_v63 }
 0x24f   : > { %1589 = vst [vmem:[%s2520_s30 + $0xf0] sm:$0xff] %v1557_v0 }
 0x250   : > { %1590 = vst [vmem:[%s2520_s30 + $0xf8] sm:$0xff] %v1558_v1 }
 0x251 PF: > { %s13_s18 = sadd.s32 1, %s2292_s18   ;;  %s2780_s12 = smov %s2272_s13 }
 0x252   : > { %p10_p0 = scmp.ge.s32.totalorder %s13_s18, 6   ;;  %s2781_s13 = smov %s2366_s25 }
 0x253   : > { %s2782_s14 = smov %s2284_s16  ;;  %s2783_s15 = smov %s2288_s17 }
 0x254   : > { %s2784_s16 = smov %s2787_s19  ;;  %s2785_s17 = smov %s2791_s20 }
 0x255   :  { %12 = sbr.rel (!%p10_p0) target bundleno = 4 (0x4), region = 101 }

// kernel: discriminator_forward.10
= control target key start
LH: loop header
LB: loop body
LE: loop exit
PB: predicated region body
PF: predicated region fallthrough
CT: control target
= control target key end

     0   :  { %s1049_s0 = inlined_call_operand.vmem [shape: f32[512,128], index: 0, kind: input, shape index: {}]   ;;  %s1050_s1 = inlined_call_operand.vmem [shape: f32[1,128], index: 1, kind: input, shape index: {}]   ;;  %s1051_s2 = inlined_call_operand.vmem [shape: f32[1,128], index: 2, kind: input, shape index: {}]   ;;  %s1052_s3 = inlined_call_operand.vmem [shape: bf16[512,128], index: 3, kind: output, shape index: {}]  }
   0x1   :  { %v14_v0 = vld [vmem:[%s1049_s0] sm:$0xff]  ;;  %v15_v1 = vld [vmem:[%s1049_s0 + $0x8] sm:$0xff]  ;;  %v16_v4 = vld [vmem:[%s1049_s0 + $0x10] sm:$0xff] }
   0x2   :  { %v632_v2 = vld [vmem:[%s1050_s1] ss:$0 sm:$0xff]  ;;  %v17_v5 = vld [vmem:[%s1049_s0 + $0x18] sm:$0xff]  ;;  %v19_v11 = vld [vmem:[%s1049_s0 + $0x28] sm:$0xff] }
   0x3   :  { %v637_v3 = vld [vmem:[%s1051_s2] ss:$0 sm:$0xff]  ;;  %v82_v7 = vmul.f32 %v632_v2, %v14_v0  ;;  %v83_v8 = vmul.f32 %v632_v2, %v15_v1  ;;  %v84_v9 = vmul.f32 %v632_v2, %v16_v4  ;;  %v85_v10 = vmul.f32 %v632_v2, %v17_v5  ;;  %v20_v12 = vld [vmem:[%s1049_s0 + $0x30] sm:$0xff]  ;;  %v21_v13 = vld [vmem:[%s1049_s0 + $0x38] sm:$0xff] }
   0x4   :  { %v18_v6 = vld [vmem:[%s1049_s0 + $0x20] sm:$0xff]  ;;  %v87_v15 = vmul.f32 %v632_v2, %v19_v11  ;;  %v88_v16 = vmul.f32 %v632_v2, %v20_v12  ;;  %v89_v17 = vmul.f32 %v632_v2, %v21_v13  ;;  %v23_v27 = vld [vmem:[%s1049_s0 + $0x48] sm:$0xff]  ;;  %v24_v32 = vld [vmem:[%s1049_s0 + $0x50] sm:$0xff] }
   0x5   :  { %v86_v14 = vmul.f32 %v632_v2, %v18_v6  ;;  %v150_v18 = vadd.f32 %v637_v3, %v82_v7  ;;  %v151_v19 = vadd.f32 %v637_v3, %v83_v8  ;;  %v152_v20 = vadd.f32 %v637_v3, %v84_v9  ;;  %v22_v26 = vld [vmem:[%s1049_s0 + $0x40] sm:$0xff]  ;;  %v25_v33 = vld [vmem:[%s1049_s0 + $0x58] sm:$0xff]  ;;  %v27_v39 = vld [vmem:[%s1049_s0 + $0x68] sm:$0xff] }
   0x6   :  { %v153_v21 = vadd.f32 %v637_v3, %v85_v10  ;;  %v155_v23 = vadd.f32 %v637_v3, %v87_v15  ;;  %v156_v24 = vadd.f32 %v637_v3, %v88_v16  ;;  %v157_v25 = vadd.f32 %v637_v3, %v89_v17  ;;  %v26_v38 = vld [vmem:[%s1049_s0 + $0x60] sm:$0xff]  ;;  %v28_v44 = vld [vmem:[%s1049_s0 + $0x70] sm:$0xff]  ;;  %v29_v45 = vld [vmem:[%s1049_s0 + $0x78] sm:$0xff] }
   0x7   :  { %v154_v22 = vadd.f32 %v637_v3, %v86_v14  ;;  %v214_v28 = vmax.f32 %v150_v18, 0.0  ;;  %v215_v29 = vmax.f32 %v151_v19, 0.0  ;;  %v216_v30 = vmax.f32 %v152_v20, 0.0  ;;  %v30_v58 = vld [vmem:[%s1049_s0 + $0x80] sm:$0xff]  ;;  %v31_v63 = vld [vmem:[%s1049_s0 + $0x88] sm:$0xff]  ;;  %v32_v6 = vld [vmem:[%s1049_s0 + $0x90] sm:$0xff] }
   0x8   :  { %v217_v31 = vmax.f32 %v153_v21, 0.0  ;;  %v219_v35 = vmax.f32 %v155_v23, 0.0  ;;  %v220_v36 = vmax.f32 %v156_v24, 0.0  ;;  %v221_v37 = vmax.f32 %v157_v25, 0.0  ;;  %v33_v7 = vld [vmem:[%s1049_s0 + $0x98] sm:$0xff]  ;;  %v34_v12 = vld [vmem:[%s1049_s0 + $0xa0] sm:$0xff] }
   0x9   :  { %v218_v34 = vmax.f32 %v154_v22, 0.0  ;;  %v413_v40 = vpack.c.bf16 %v215_v29, %v214_v28  ;;  %v90_v42 = vmul.f32 %v632_v2, %v22_v26  ;;  %v91_v43 = vmul.f32 %v632_v2, %v23_v27  ;;  %v35_v13 = vld [vmem:[%s1049_s0 + $0xa8] sm:$0xff]  ;;  %v36_v18 = vld [vmem:[%s1049_s0 + $0xb0] sm:$0xff]  ;;  %v37_v23 = vld [vmem:[%s1049_s0 + $0xb8] sm:$0xff] }
   0xa   :  { %v418_v41 = vpack.c.bf16 %v217_v31, %v216_v30  ;;  %v428_v47 = vpack.c.bf16 %v221_v37, %v220_v36  ;;  %v92_v48 = vmul.f32 %v632_v2, %v24_v32  ;;  %v93_v49 = vmul.f32 %v632_v2, %v25_v33  ;;  %v38_v28 = vld [vmem:[%s1049_s0 + $0xc0] sm:$0xff]  ;;  %v39_v37 = vld [vmem:[%s1049_s0 + $0xc8] sm:$0xff] }
   0xb   :  { %v423_v46 = vpack.c.bf16 %v219_v35, %v218_v34  ;;  %414 = vst [vmem:[%s1052_s3] sm:$0xff] %v413_v40   ;;  %v158_v50 = vadd.f32 %v637_v3, %v90_v42  ;;  %v159_v51 = vadd.f32 %v637_v3, %v91_v43  ;;  %v94_v52 = vmul.f32 %v632_v2, %v26_v38  ;;  %v40_v42 = vld [vmem:[%s1049_s0 + $0xd0] sm:$0xff]  ;;  %v41_v43 = vld [vmem:[%s1049_s0 + $0xd8] sm:$0xff] }
   0xc   :  { %v95_v53 = vmul.f32 %v632_v2, %v27_v39  ;;  %570 = vst [vmem:[%s1052_s3 + $0x8] sm:$0xff] %v418_v41   ;;  %v160_v54 = vadd.f32 %v637_v3, %v92_v48  ;;  %v161_v55 = vadd.f32 %v637_v3, %v93_v49  ;;  %v96_v56 = vmul.f32 %v632_v2, %v28_v44  ;;  %v42_v48 = vld [vmem:[%s1049_s0 + $0xe0] sm:$0xff]  ;;  %v43_v49 = vld [vmem:[%s1049_s0 + $0xe8] sm:$0xff] }
   0xd   :  { %v97_v57 = vmul.f32 %v632_v2, %v29_v45  ;;  %571 = vst [vmem:[%s1052_s3 + $0x10] sm:$0xff] %v423_v46   ;;  %v222_v59 = vmax.f32 %v158_v50, 0.0  ;;  %v223_v60 = vmax.f32 %v159_v51, 0.0  ;;  %v162_v61 = vadd.f32 %v637_v3, %v94_v52 }
   0xe   :  { %v163_v62 = vadd.f32 %v637_v3, %v95_v53  ;;  %572 = vst [vmem:[%s1052_s3 + $0x18] sm:$0xff] %v428_v47   ;;  %v224_v0 = vmax.f32 %v160_v54, 0.0  ;;  %v225_v1 = vmax.f32 %v161_v55, 0.0  ;;  %v164_v4 = vadd.f32 %v637_v3, %v96_v56  ;;  %v44_v54 = vld [vmem:[%s1049_s0 + $0xf0] sm:$0xff] }
   0xf   :  { %v165_v5 = vadd.f32 %v637_v3, %v97_v57  ;;  %v433_v8 = vpack.c.bf16 %v223_v60, %v222_v59  ;;  %v226_v9 = vmax.f32 %v162_v61, 0.0  ;;  %v98_v11 = vmul.f32 %v632_v2, %v30_v58  ;;  %v45_v59 = vld [vmem:[%s1049_s0 + $0xf8] sm:$0xff] }
  0x10   :  { %v227_v10 = vmax.f32 %v163_v62, 0.0  ;;  %v438_v14 = vpack.c.bf16 %v225_v1, %v224_v0  ;;  %v228_v15 = vmax.f32 %v164_v4, 0.0  ;;  %v99_v17 = vmul.f32 %v632_v2, %v31_v63  ;;  %v46_v0 = vld [vmem:[%s1049_s0 + $0x100] sm:$0xff] }
  0x11   :  { %v229_v16 = vmax.f32 %v165_v5, 0.0  ;;  %573 = vst [vmem:[%s1052_s3 + $0x20] sm:$0xff] %v433_v8   ;;  %v166_v20 = vadd.f32 %v637_v3, %v98_v11  ;;  %v100_v21 = vmul.f32 %v632_v2, %v32_v6  ;;  %v101_v22 = vmul.f32 %v632_v2, %v33_v7  ;;  %v47_v11 = vld [vmem:[%s1049_s0 + $0x108] sm:$0xff] }
  0x12   :  { %v443_v19 = vpack.c.bf16 %v227_v10, %v226_v9  ;;  %574 = vst [vmem:[%s1052_s3 + $0x28] sm:$0xff] %v438_v14   ;;  %v167_v25 = vadd.f32 %v637_v3, %v99_v17  ;;  %v102_v26 = vmul.f32 %v632_v2, %v34_v12  ;;  %v103_v27 = vmul.f32 %v632_v2, %v35_v13  ;;  %v49_v17 = vld [vmem:[%s1049_s0 + $0x118] sm:$0xff] }
  0x13   :  { %v448_v24 = vpack.c.bf16 %v229_v16, %v228_v15  ;;  %v230_v29 = vmax.f32 %v166_v20, 0.0  ;;  %v168_v30 = vadd.f32 %v637_v3, %v100_v21  ;;  %v169_v31 = vadd.f32 %v637_v3, %v101_v22  ;;  %v48_v16 = vld [vmem:[%s1049_s0 + $0x110] sm:$0xff]  ;;  %v50_v22 = vld [vmem:[%s1049_s0 + $0x120] sm:$0xff] }
  0x14   :  { %575 = vst [vmem:[%s1052_s3 + $0x30] sm:$0xff] %v443_v19   ;;  %v104_v32 = vmul.f32 %v632_v2, %v36_v18  ;;  %v231_v33 = vmax.f32 %v167_v25, 0.0  ;;  %v170_v34 = vadd.f32 %v637_v3, %v102_v26  ;;  %v171_v35 = vadd.f32 %v637_v3, %v103_v27 }
  0x15   :  { %576 = vst [vmem:[%s1052_s3 + $0x38] sm:$0xff] %v448_v24   ;;  %v105_v36 = vmul.f32 %v632_v2, %v37_v23  ;;  %v232_v38 = vmax.f32 %v168_v30, 0.0  ;;  %v233_v39 = vmax.f32 %v169_v31, 0.0  ;;  %v106_v41 = vmul.f32 %v632_v2, %v38_v28  ;;  %v51_v23 = vld [vmem:[%s1049_s0 + $0x128] sm:$0xff]  ;;  %v52_v28 = vld [vmem:[%s1049_s0 + $0x130] sm:$0xff] }
  0x16   :  { %v172_v40 = vadd.f32 %v637_v3, %v104_v32  ;;  %v453_v44 = vpack.c.bf16 %v231_v33, %v230_v29  ;;  %v234_v45 = vmax.f32 %v170_v34, 0.0  ;;  %v235_v46 = vmax.f32 %v171_v35, 0.0  ;;  %v53_v33 = vld [vmem:[%s1049_s0 + $0x138] sm:$0xff] }
  0x17   :  { %v173_v47 = vadd.f32 %v637_v3, %v105_v36  ;;  %v458_v50 = vpack.c.bf16 %v233_v39, %v232_v38  ;;  %v107_v52 = vmul.f32 %v632_v2, %v39_v37  ;;  %v174_v53 = vadd.f32 %v637_v3, %v106_v41  ;;  %v54_v38 = vld [vmem:[%s1049_s0 + $0x140] sm:$0xff] }
  0x18   :  { %v236_v51 = vmax.f32 %v172_v40, 0.0  ;;  %577 = vst [vmem:[%s1052_s3 + $0x40] sm:$0xff] %v453_v44   ;;  %v463_v55 = vpack.c.bf16 %v235_v46, %v234_v45  ;;  %v108_v57 = vmul.f32 %v632_v2, %v40_v42  ;;  %v109_v58 = vmul.f32 %v632_v2, %v41_v43 }
  0x19   :  { %v237_v56 = vmax.f32 %v173_v47, 0.0  ;;  %578 = vst [vmem:[%s1052_s3 + $0x48] sm:$0xff] %v458_v50   ;;  %v175_v60 = vadd.f32 %v637_v3, %v107_v52  ;;  %v238_v61 = vmax.f32 %v174_v53, 0.0  ;;  %v110_v62 = vmul.f32 %v632_v2, %v42_v48  ;;  %v55_v47 = vld [vmem:[%s1049_s0 + $0x148] sm:$0xff]  ;;  %v56_v52 = vld [vmem:[%s1049_s0 + $0x150] sm:$0xff]  ;;  %v57_v53 = vld [vmem:[%s1049_s0 + $0x158] sm:$0xff] }
  0x1a   :  { %v111_v63 = vmul.f32 %v632_v2, %v43_v49  ;;  %579 = vst [vmem:[%s1052_s3 + $0x50] sm:$0xff] %v463_v55   ;;  %v176_v4 = vadd.f32 %v637_v3, %v108_v57  ;;  %v177_v5 = vadd.f32 %v637_v3, %v109_v58  ;;  %v112_v6 = vmul.f32 %v632_v2, %v44_v54  ;;  %v58_v58 = vld [vmem:[%s1049_s0 + $0x160] sm:$0xff] }
  0x1b   :  { %v468_v1 = vpack.c.bf16 %v237_v56, %v236_v51  ;;  %v239_v7 = vmax.f32 %v175_v60, 0.0  ;;  %v178_v8 = vadd.f32 %v637_v3, %v110_v62  ;;  %v113_v10 = vmul.f32 %v632_v2, %v45_v59  ;;  %v59_v59 = vld [vmem:[%s1049_s0 + $0x168] sm:$0xff] }
  0x1c   :  { %v179_v9 = vadd.f32 %v637_v3, %v111_v63  ;;  %v240_v12 = vmax.f32 %v176_v4, 0.0  ;;  %v241_v13 = vmax.f32 %v177_v5, 0.0  ;;  %v180_v14 = vadd.f32 %v637_v3, %v112_v6 }
  0x1d   :  { %580 = vst [vmem:[%s1052_s3 + $0x58] sm:$0xff] %v468_v1   ;;  %v114_v15 = vmul.f32 %v632_v2, %v46_v0  ;;  %v473_v18 = vpack.c.bf16 %v239_v7, %v238_v61  ;;  %v242_v19 = vmax.f32 %v178_v8, 0.0  ;;  %v181_v21 = vadd.f32 %v637_v3, %v113_v10  ;;  %v60_v0 = vld [vmem:[%s1049_s0 + $0x170] sm:$0xff]  ;;  %v61_v7 = vld [vmem:[%s1049_s0 + $0x178] sm:$0xff] }
  0x1e   :  { %v243_v20 = vmax.f32 %v179_v9, 0.0  ;;  %v478_v24 = vpack.c.bf16 %v241_v13, %v240_v12  ;;  %v244_v25 = vmax.f32 %v180_v14, 0.0  ;;  %v115_v26 = vmul.f32 %v632_v2, %v47_v11  ;;  %v62_v12 = vld [vmem:[%s1049_s0 + $0x180] sm:$0xff] }
  0x1f   :  { %v182_v27 = vadd.f32 %v637_v3, %v114_v15  ;;  %581 = vst [vmem:[%s1052_s3 + $0x60] sm:$0xff] %v473_v18   ;;  %v245_v30 = vmax.f32 %v181_v21, 0.0  ;;  %v116_v31 = vmul.f32 %v632_v2, %v48_v16  ;;  %v117_v32 = vmul.f32 %v632_v2, %v49_v17  ;;  %v63_v21 = vld [vmem:[%s1049_s0 + $0x188] sm:$0xff] }
  0x20   :  { %v483_v29 = vpack.c.bf16 %v243_v20, %v242_v19  ;;  %582 = vst [vmem:[%s1052_s3 + $0x68] sm:$0xff] %v478_v24   ;;  %v183_v34 = vadd.f32 %v637_v3, %v115_v26  ;;  %v118_v36 = vmul.f32 %v632_v2, %v50_v22  ;;  %v119_v37 = vmul.f32 %v632_v2, %v51_v23  ;;  %v64_v26 = vld [vmem:[%s1049_s0 + $0x190] sm:$0xff] }
  0x21   :  { %v246_v35 = vmax.f32 %v182_v27, 0.0  ;;  %v488_v39 = vpack.c.bf16 %v245_v30, %v244_v25  ;;  %v184_v40 = vadd.f32 %v637_v3, %v116_v31  ;;  %v185_v41 = vadd.f32 %v637_v3, %v117_v32  ;;  %v65_v27 = vld [vmem:[%s1049_s0 + $0x198] sm:$0xff]  ;;  %v66_v32 = vld [vmem:[%s1049_s0 + $0x1a0] sm:$0xff] }
  0x22   :  { %583 = vst [vmem:[%s1052_s3 + $0x70] sm:$0xff] %v483_v29   ;;  %v120_v42 = vmul.f32 %v632_v2, %v52_v28  ;;  %v247_v43 = vmax.f32 %v183_v34, 0.0  ;;  %v186_v44 = vadd.f32 %v637_v3, %v118_v36  ;;  %v187_v45 = vadd.f32 %v637_v3, %v119_v37 }
  0x23   :  { %v121_v46 = vmul.f32 %v632_v2, %v53_v33  ;;  %584 = vst [vmem:[%s1052_s3 + $0x78] sm:$0xff] %v488_v39   ;;  %v248_v48 = vmax.f32 %v184_v40, 0.0  ;;  %v249_v49 = vmax.f32 %v185_v41, 0.0  ;;  %v122_v51 = vmul.f32 %v632_v2, %v54_v38  ;;  %v67_v33 = vld [vmem:[%s1049_s0 + $0x1a8] sm:$0xff]  ;;  %v68_v38 = vld [vmem:[%s1049_s0 + $0x1b0] sm:$0xff] }
  0x24   :  { %v188_v50 = vadd.f32 %v637_v3, %v120_v42  ;;  %v493_v54 = vpack.c.bf16 %v247_v43, %v246_v35  ;;  %v250_v55 = vmax.f32 %v186_v44, 0.0  ;;  %v251_v56 = vmax.f32 %v187_v45, 0.0  ;;  %v69_v43 = vld [vmem:[%s1049_s0 + $0x1b8] sm:$0xff] }
  0x25   :  { %v189_v57 = vadd.f32 %v637_v3, %v121_v46  ;;  %v498_v60 = vpack.c.bf16 %v249_v49, %v248_v48  ;;  %v123_v62 = vmul.f32 %v632_v2, %v55_v47  ;;  %v190_v63 = vadd.f32 %v637_v3, %v122_v51  ;;  %v70_v48 = vld [vmem:[%s1049_s0 + $0x1c0] sm:$0xff] }
  0x26   :  { %v252_v61 = vmax.f32 %v188_v50, 0.0  ;;  %585 = vst [vmem:[%s1052_s3 + $0x80] sm:$0xff] %v493_v54   ;;  %v503_v1 = vpack.c.bf16 %v251_v56, %v250_v55  ;;  %v124_v5 = vmul.f32 %v632_v2, %v56_v52  ;;  %v125_v6 = vmul.f32 %v632_v2, %v57_v53 }
  0x27   :  { %v253_v4 = vmax.f32 %v189_v57, 0.0  ;;  %586 = vst [vmem:[%s1052_s3 + $0x88] sm:$0xff] %v498_v60   ;;  %v191_v8 = vadd.f32 %v637_v3, %v123_v62  ;;  %v254_v9 = vmax.f32 %v190_v63, 0.0  ;;  %v126_v10 = vmul.f32 %v632_v2, %v58_v58  ;;  %v71_v57 = vld [vmem:[%s1049_s0 + $0x1c8] sm:$0xff]  ;;  %v72_v62 = vld [vmem:[%s1049_s0 + $0x1d0] sm:$0xff]  ;;  %v73_v63 = vld [vmem:[%s1049_s0 + $0x1d8] sm:$0xff] }
  0x28   :  { %v127_v11 = vmul.f32 %v632_v2, %v59_v59  ;;  %587 = vst [vmem:[%s1052_s3 + $0x90] sm:$0xff] %v503_v1   ;;  %v192_v14 = vadd.f32 %v637_v3, %v124_v5  ;;  %v193_v15 = vadd.f32 %v637_v3, %v125_v6  ;;  %v128_v16 = vmul.f32 %v632_v2, %v60_v0  ;;  %v74_v6 = vld [vmem:[%s1049_s0 + $0x1e0] sm:$0xff] }
  0x29   :  { %v508_v13 = vpack.c.bf16 %v253_v4, %v252_v61  ;;  %v255_v17 = vmax.f32 %v191_v8, 0.0  ;;  %v194_v18 = vadd.f32 %v637_v3, %v126_v10  ;;  %v129_v20 = vmul.f32 %v632_v2, %v61_v7  ;;  %v75_v7 = vld [vmem:[%s1049_s0 + $0x1e8] sm:$0xff] }
  0x2a   :  { %v195_v19 = vadd.f32 %v637_v3, %v127_v11  ;;  %v256_v22 = vmax.f32 %v192_v14, 0.0  ;;  %v257_v23 = vmax.f32 %v193_v15, 0.0  ;;  %v196_v24 = vadd.f32 %v637_v3, %v128_v16 }
  0x2b   :  { %588 = vst [vmem:[%s1052_s3 + $0x98] sm:$0xff] %v508_v13   ;;  %v130_v25 = vmul.f32 %v632_v2, %v62_v12  ;;  %v513_v28 = vpack.c.bf16 %v255_v17, %v254_v9  ;;  %v258_v29 = vmax.f32 %v194_v18, 0.0  ;;  %v197_v31 = vadd.f32 %v637_v3, %v129_v20  ;;  %v76_v12 = vld [vmem:[%s1049_s0 + $0x1f0] sm:$0xff]  ;;  %v77_v17 = vld [vmem:[%s1049_s0 + $0x1f8] sm:$0xff] }
  0x2c   :  { %v259_v30 = vmax.f32 %v195_v19, 0.0  ;;  %v518_v34 = vpack.c.bf16 %v257_v23, %v256_v22  ;;  %v260_v35 = vmax.f32 %v196_v24, 0.0  ;;  %v131_v36 = vmul.f32 %v632_v2, %v63_v21 }
  0x2d   :  { %v198_v37 = vadd.f32 %v637_v3, %v130_v25  ;;  %589 = vst [vmem:[%s1052_s3 + $0xa0] sm:$0xff] %v513_v28   ;;  %v261_v40 = vmax.f32 %v197_v31, 0.0  ;;  %v132_v41 = vmul.f32 %v632_v2, %v64_v26  ;;  %v133_v42 = vmul.f32 %v632_v2, %v65_v27 }
  0x2e   :  { %v523_v39 = vpack.c.bf16 %v259_v30, %v258_v29  ;;  %590 = vst [vmem:[%s1052_s3 + $0xa8] sm:$0xff] %v518_v34   ;;  %v199_v44 = vadd.f32 %v637_v3, %v131_v36  ;;  %v134_v46 = vmul.f32 %v632_v2, %v66_v32  ;;  %v135_v47 = vmul.f32 %v632_v2, %v67_v33 }
  0x2f   :  { %v262_v45 = vmax.f32 %v198_v37, 0.0  ;;  %v528_v49 = vpack.c.bf16 %v261_v40, %v260_v35  ;;  %v200_v50 = vadd.f32 %v637_v3, %v132_v41  ;;  %v201_v51 = vadd.f32 %v637_v3, %v133_v42 }
  0x30   :  { %591 = vst [vmem:[%s1052_s3 + $0xb0] sm:$0xff] %v523_v39   ;;  %v136_v52 = vmul.f32 %v632_v2, %v68_v38  ;;  %v263_v53 = vmax.f32 %v199_v44, 0.0  ;;  %v202_v54 = vadd.f32 %v637_v3, %v134_v46  ;;  %v203_v55 = vadd.f32 %v637_v3, %v135_v47 }
  0x31   :  { %v137_v56 = vmul.f32 %v632_v2, %v69_v43  ;;  %592 = vst [vmem:[%s1052_s3 + $0xb8] sm:$0xff] %v528_v49   ;;  %v264_v58 = vmax.f32 %v200_v50, 0.0  ;;  %v265_v59 = vmax.f32 %v201_v51, 0.0  ;;  %v138_v61 = vmul.f32 %v632_v2, %v70_v48 }
  0x32   :  { %v204_v60 = vadd.f32 %v637_v3, %v136_v52  ;;  %v533_v0 = vpack.c.bf16 %v263_v53, %v262_v45  ;;  %v266_v1 = vmax.f32 %v202_v54, 0.0  ;;  %v267_v4 = vmax.f32 %v203_v55, 0.0 }
  0x33   :  { %v205_v5 = vadd.f32 %v637_v3, %v137_v56  ;;  %v538_v8 = vpack.c.bf16 %v265_v59, %v264_v58  ;;  %v139_v10 = vmul.f32 %v632_v2, %v71_v57  ;;  %v206_v11 = vadd.f32 %v637_v3, %v138_v61 }
  0x34   :  { %v268_v9 = vmax.f32 %v204_v60, 0.0  ;;  %593 = vst [vmem:[%s1052_s3 + $0xc0] sm:$0xff] %v533_v0   ;;  %v543_v13 = vpack.c.bf16 %v267_v4, %v266_v1  ;;  %v140_v15 = vmul.f32 %v632_v2, %v72_v62  ;;  %v141_v16 = vmul.f32 %v632_v2, %v73_v63 }
  0x35   :  { %v269_v14 = vmax.f32 %v205_v5, 0.0  ;;  %594 = vst [vmem:[%s1052_s3 + $0xc8] sm:$0xff] %v538_v8   ;;  %v207_v18 = vadd.f32 %v637_v3, %v139_v10  ;;  %v270_v19 = vmax.f32 %v206_v11, 0.0  ;;  %v142_v20 = vmul.f32 %v632_v2, %v74_v6 }
  0x36   :  { %v143_v21 = vmul.f32 %v632_v2, %v75_v7  ;;  %595 = vst [vmem:[%s1052_s3 + $0xd0] sm:$0xff] %v543_v13   ;;  %v208_v23 = vadd.f32 %v637_v3, %v140_v15  ;;  %v209_v24 = vadd.f32 %v637_v3, %v141_v16  ;;  %v144_v25 = vmul.f32 %v632_v2, %v76_v12 }
  0x37   :  { %v548_v22 = vpack.c.bf16 %v269_v14, %v268_v9  ;;  %v271_v26 = vmax.f32 %v207_v18, 0.0  ;;  %v210_v27 = vadd.f32 %v637_v3, %v142_v20  ;;  %v145_v29 = vmul.f32 %v632_v2, %v77_v17 }
  0x38   :  { %v211_v28 = vadd.f32 %v637_v3, %v143_v21  ;;  %v272_v30 = vmax.f32 %v208_v23, 0.0  ;;  %v273_v31 = vmax.f32 %v209_v24, 0.0  ;;  %v212_v32 = vadd.f32 %v637_v3, %v144_v25 }
  0x39   :  { %596 = vst [vmem:[%s1052_s3 + $0xd8] sm:$0xff] %v548_v22   ;;  %v553_v33 = vpack.c.bf16 %v271_v26, %v270_v19  ;;  %v274_v34 = vmax.f32 %v210_v27, 0.0  ;;  %v213_v36 = vadd.f32 %v637_v3, %v145_v29 }
  0x3a   :  { %v275_v35 = vmax.f32 %v211_v28, 0.0  ;;  %v558_v37 = vpack.c.bf16 %v273_v31, %v272_v30  ;;  %v276_v38 = vmax.f32 %v212_v32, 0.0 }
  0x3b   :  { %597 = vst [vmem:[%s1052_s3 + $0xe0] sm:$0xff] %v553_v33   ;;  %v277_v39 = vmax.f32 %v213_v36, 0.0 }
  0x3c   :  { %v563_v2 = vpack.c.bf16 %v275_v35, %v274_v34  ;;  %598 = vst [vmem:[%s1052_s3 + $0xe8] sm:$0xff] %v558_v37  }
  0x3d   :  { %v568_v40 = vpack.c.bf16 %v277_v39, %v276_v38 }
  0x3e   :  { %599 = vst [vmem:[%s1052_s3 + $0xf0] sm:$0xff] %v563_v2  }
  0x3f   :  { %600 = vst [vmem:[%s1052_s3 + $0xf8] sm:$0xff] %v568_v40  }

// kernel: discriminator_forward.12
= control target key start
LH: loop header
LB: loop body
LE: loop exit
PB: predicated region body
PF: predicated region fallthrough
CT: control target
= control target key end

     0   :  { %s432_s0 = inlined_call_operand.vmem [shape: f32[128,256], index: 0, kind: input, shape index: {}]   ;;  %s433_s1 = inlined_call_operand.vmem [shape: f32[1,256], index: 1, kind: input, shape index: {}]   ;;  %s434_s2 = inlined_call_operand.vmem [shape: f32[1,256], index: 2, kind: input, shape index: {}]   ;;  %s435_s3 = inlined_call_operand.vmem [shape: bf16[128,256], index: 3, kind: output, shape index: {}]  }
   0x1   :  { %v14_v0 = vld [vmem:[%s432_s0] sm:$0xff]  ;;  %v15_v1 = vld [vmem:[%s432_s0 + $0x8] sm:$0xff]  ;;  %v16_v6 = vld [vmem:[%s432_s0 + $0x10] sm:$0xff] }
   0x2   :  { %v46_v2 = vld [vmem:[%s433_s1] sm:$0x3]  ;;  %v17_v7 = vld [vmem:[%s432_s0 + $0x18] sm:$0xff]  ;;  %v19_v11 = vld [vmem:[%s432_s0 + $0x28] sm:$0xff] }
   0x3   :  { %v219_v3 = vperm.slane %v46_v2, 0  ;;  %v221_v4 = vperm.slane %v46_v2, 1  ;;  %v84_v5 = vld [vmem:[%s434_s2] sm:$0x3]  ;;  %v20_v12 = vld [vmem:[%s432_s0 + $0x30] sm:$0xff]  ;;  %v21_v17 = vld [vmem:[%s432_s0 + $0x38] sm:$0xff] }
   0x4   :  { %v232_v8 = vperm.slane %v84_v5, 0  ;;  %v234_v9 = vperm.slane %v84_v5, 1  ;;  %v18_v10 = vld [vmem:[%s432_s0 + $0x20] sm:$0xff]  ;;  %v23_v31 = vld [vmem:[%s432_s0 + $0x48] sm:$0xff]  ;;  %v24_v36 = vld [vmem:[%s432_s0 + $0x50] sm:$0xff] }
   0x5   :  { %v52_v13 = vmul.f32 %v219_v3, %v14_v0  ;;  %v53_v14 = vmul.f32 %v221_v4, %v15_v1  ;;  %v54_v15 = vmul.f32 %v219_v3, %v16_v6  ;;  %v55_v16 = vmul.f32 %v221_v4, %v17_v7  ;;  %v22_v30 = vld [vmem:[%s432_s0 + $0x40] sm:$0xff]  ;;  %v25_v37 = vld [vmem:[%s432_s0 + $0x58] sm:$0xff]  ;;  %v27_v43 = vld [vmem:[%s432_s0 + $0x68] sm:$0xff] }
   0x6   :  { %v56_v18 = vmul.f32 %v219_v3, %v18_v10  ;;  %v57_v19 = vmul.f32 %v221_v4, %v19_v11  ;;  %v58_v20 = vmul.f32 %v219_v3, %v20_v12  ;;  %v59_v21 = vmul.f32 %v221_v4, %v21_v17  ;;  %v26_v42 = vld [vmem:[%s432_s0 + $0x60] sm:$0xff]  ;;  %v28_v48 = vld [vmem:[%s432_s0 + $0x70] sm:$0xff]  ;;  %v29_v49 = vld [vmem:[%s432_s0 + $0x78] sm:$0xff] }
   0x7   :  { %v90_v22 = vadd.f32 %v232_v8, %v52_v13  ;;  %v91_v23 = vadd.f32 %v234_v9, %v53_v14  ;;  %v92_v24 = vadd.f32 %v232_v8, %v54_v15  ;;  %v93_v25 = vadd.f32 %v234_v9, %v55_v16  ;;  %v30_v62 = vld [vmem:[%s432_s0 + $0x80] sm:$0xff]  ;;  %v31_v5 = vld [vmem:[%s432_s0 + $0x88] sm:$0xff]  ;;  %v32_v12 = vld [vmem:[%s432_s0 + $0x90] sm:$0xff] }
   0x8   :  { %v94_v26 = vadd.f32 %v232_v8, %v56_v18  ;;  %v95_v27 = vadd.f32 %v234_v9, %v57_v19  ;;  %v96_v28 = vadd.f32 %v232_v8, %v58_v20  ;;  %v97_v29 = vadd.f32 %v234_v9, %v59_v21  ;;  %v33_v13 = vld [vmem:[%s432_s0 + $0x98] sm:$0xff]  ;;  %v34_v18 = vld [vmem:[%s432_s0 + $0xa0] sm:$0xff]  ;;  %v35_v19 = vld [vmem:[%s432_s0 + $0xa8] sm:$0xff] }
   0x9   :  { %v122_v32 = vmax.f32 %v90_v22, 0.0  ;;  %v123_v33 = vmax.f32 %v91_v23, 0.0  ;;  %v124_v34 = vmax.f32 %v92_v24, 0.0  ;;  %v125_v35 = vmax.f32 %v93_v25, 0.0  ;;  %v36_v24 = vld [vmem:[%s432_s0 + $0xb0] sm:$0xff] }
   0xa   :  { %v126_v38 = vmax.f32 %v94_v26, 0.0  ;;  %v127_v39 = vmax.f32 %v95_v27, 0.0  ;;  %v128_v40 = vmax.f32 %v96_v28, 0.0  ;;  %v129_v41 = vmax.f32 %v97_v29, 0.0  ;;  %v37_v29 = vld [vmem:[%s432_s0 + $0xb8] sm:$0xff] }
   0xb   :  { %v154_v44 = vpack.c.bf16 %v123_v33, %v122_v32  ;;  %v155_v45 = vpack.c.bf16 %v125_v35, %v124_v34  ;;  %v60_v46 = vmul.f32 %v219_v3, %v22_v30  ;;  %v61_v47 = vmul.f32 %v221_v4, %v23_v31  ;;  %v38_v34 = vld [vmem:[%s432_s0 + $0xc0] sm:$0xff] }
   0xc   :  { %v156_v50 = vpack.c.bf16 %v127_v39, %v126_v38  ;;  %v157_v51 = vpack.c.bf16 %v129_v41, %v128_v40  ;;  %v62_v52 = vmul.f32 %v219_v3, %v24_v36  ;;  %v63_v53 = vmul.f32 %v221_v4, %v25_v37 }
   0xd   :  { %170 = vst [vmem:[%s435_s3] sm:$0xff] %v154_v44  ;;  %v98_v54 = vadd.f32 %v232_v8, %v60_v46  ;;  %v99_v55 = vadd.f32 %v234_v9, %v61_v47  ;;  %v64_v56 = vmul.f32 %v219_v3, %v26_v42  ;;  %v65_v57 = vmul.f32 %v221_v4, %v27_v43  ;;  %v39_v43 = vld [vmem:[%s432_s0 + $0xc8] sm:$0xff] }
   0xe   :  { %171 = vst [vmem:[%s435_s3 + $0x8] sm:$0xff] %v155_v45  ;;  %v100_v58 = vadd.f32 %v232_v8, %v62_v52  ;;  %v101_v59 = vadd.f32 %v234_v9, %v63_v53  ;;  %v66_v60 = vmul.f32 %v219_v3, %v28_v48  ;;  %v67_v61 = vmul.f32 %v221_v4, %v29_v49  ;;  %v40_v48 = vld [vmem:[%s432_s0 + $0xd0] sm:$0xff]  ;;  %v41_v49 = vld [vmem:[%s432_s0 + $0xd8] sm:$0xff] }
   0xf   :  { %172 = vst [vmem:[%s435_s3 + $0x10] sm:$0xff] %v156_v50  ;;  %v130_v63 = vmax.f32 %v98_v54, 0.0  ;;  %v131_v0 = vmax.f32 %v99_v55, 0.0  ;;  %v102_v1 = vadd.f32 %v232_v8, %v64_v56  ;;  %v103_v2 = vadd.f32 %v234_v9, %v65_v57  ;;  %v42_v54 = vld [vmem:[%s432_s0 + $0xe0] sm:$0xff]  ;;  %v43_v55 = vld [vmem:[%s432_s0 + $0xe8] sm:$0xff] }
  0x10   :  { %173 = vst [vmem:[%s435_s3 + $0x18] sm:$0xff] %v157_v51  ;;  %v132_v6 = vmax.f32 %v100_v58, 0.0  ;;  %v133_v7 = vmax.f32 %v101_v59, 0.0  ;;  %v104_v10 = vadd.f32 %v232_v8, %v66_v60  ;;  %v105_v11 = vadd.f32 %v234_v9, %v67_v61  ;;  %v44_v60 = vld [vmem:[%s432_s0 + $0xf0] sm:$0xff] }
  0x11   :  { %v158_v14 = vpack.c.bf16 %v131_v0, %v130_v63  ;;  %v134_v15 = vmax.f32 %v102_v1, 0.0  ;;  %v135_v16 = vmax.f32 %v103_v2, 0.0  ;;  %v68_v17 = vmul.f32 %v219_v3, %v30_v62  ;;  %v45_v1 = vld [vmem:[%s432_s0 + $0xf8] sm:$0xff] }
  0x12   :  { %v159_v20 = vpack.c.bf16 %v133_v7, %v132_v6  ;;  %v136_v21 = vmax.f32 %v104_v10, 0.0  ;;  %v137_v22 = vmax.f32 %v105_v11, 0.0  ;;  %v69_v23 = vmul.f32 %v221_v4, %v31_v5 }
  0x13   :  { %174 = vst [vmem:[%s435_s3 + $0x20] sm:$0xff] %v158_v14  ;;  %v160_v25 = vpack.c.bf16 %v135_v16, %v134_v15  ;;  %v106_v26 = vadd.f32 %v232_v8, %v68_v17  ;;  %v70_v27 = vmul.f32 %v219_v3, %v32_v12  ;;  %v71_v28 = vmul.f32 %v221_v4, %v33_v13 }
  0x14   :  { %175 = vst [vmem:[%s435_s3 + $0x28] sm:$0xff] %v159_v20  ;;  %v161_v30 = vpack.c.bf16 %v137_v22, %v136_v21  ;;  %v107_v31 = vadd.f32 %v234_v9, %v69_v23  ;;  %v72_v32 = vmul.f32 %v219_v3, %v34_v18  ;;  %v73_v33 = vmul.f32 %v221_v4, %v35_v19 }
  0x15   :  { %176 = vst [vmem:[%s435_s3 + $0x30] sm:$0xff] %v160_v25  ;;  %v138_v35 = vmax.f32 %v106_v26, 0.0  ;;  %v108_v36 = vadd.f32 %v232_v8, %v70_v27  ;;  %v109_v37 = vadd.f32 %v234_v9, %v71_v28  ;;  %v74_v38 = vmul.f32 %v219_v3, %v36_v24 }
  0x16   :  { %177 = vst [vmem:[%s435_s3 + $0x38] sm:$0xff] %v161_v30  ;;  %v139_v39 = vmax.f32 %v107_v31, 0.0  ;;  %v110_v40 = vadd.f32 %v232_v8, %v72_v32  ;;  %v111_v41 = vadd.f32 %v234_v9, %v73_v33  ;;  %v75_v42 = vmul.f32 %v221_v4, %v37_v29 }
  0x17   :  { %v140_v44 = vmax.f32 %v108_v36, 0.0  ;;  %v141_v45 = vmax.f32 %v109_v37, 0.0  ;;  %v112_v46 = vadd.f32 %v232_v8, %v74_v38  ;;  %v76_v47 = vmul.f32 %v219_v3, %v38_v34 }
  0x18   :  { %v162_v50 = vpack.c.bf16 %v139_v39, %v138_v35  ;;  %v142_v51 = vmax.f32 %v110_v40, 0.0  ;;  %v143_v52 = vmax.f32 %v111_v41, 0.0  ;;  %v113_v53 = vadd.f32 %v234_v9, %v75_v42 }
  0x19   :  { %v163_v56 = vpack.c.bf16 %v141_v45, %v140_v44  ;;  %v144_v57 = vmax.f32 %v112_v46, 0.0  ;;  %v77_v58 = vmul.f32 %v221_v4, %v39_v43  ;;  %v114_v59 = vadd.f32 %v232_v8, %v76_v47 }
  0x1a   :  { %178 = vst [vmem:[%s435_s3 + $0x40] sm:$0xff] %v162_v50  ;;  %v164_v61 = vpack.c.bf16 %v143_v52, %v142_v51  ;;  %v145_v62 = vmax.f32 %v113_v53, 0.0  ;;  %v78_v63 = vmul.f32 %v219_v3, %v40_v48  ;;  %v79_v0 = vmul.f32 %v221_v4, %v41_v49 }
  0x1b   :  { %179 = vst [vmem:[%s435_s3 + $0x48] sm:$0xff] %v163_v56  ;;  %v115_v2 = vadd.f32 %v234_v9, %v77_v58  ;;  %v146_v5 = vmax.f32 %v114_v59, 0.0  ;;  %v80_v6 = vmul.f32 %v219_v3, %v42_v54  ;;  %v81_v7 = vmul.f32 %v221_v4, %v43_v55 }
  0x1c   :  { %180 = vst [vmem:[%s435_s3 + $0x50] sm:$0xff] %v164_v61  ;;  %v165_v10 = vpack.c.bf16 %v145_v62, %v144_v57  ;;  %v116_v11 = vadd.f32 %v232_v8, %v78_v63  ;;  %v117_v12 = vadd.f32 %v234_v9, %v79_v0  ;;  %v82_v13 = vmul.f32 %v219_v3, %v44_v60 }
  0x1d   :  { %v147_v14 = vmax.f32 %v115_v2, 0.0  ;;  %v118_v15 = vadd.f32 %v232_v8, %v80_v6  ;;  %v119_v16 = vadd.f32 %v234_v9, %v81_v7  ;;  %v83_v17 = vmul.f32 %v221_v4, %v45_v1 }
  0x1e   :  { %181 = vst [vmem:[%s435_s3 + $0x58] sm:$0xff] %v165_v10  ;;  %v148_v18 = vmax.f32 %v116_v11, 0.0  ;;  %v149_v19 = vmax.f32 %v117_v12, 0.0  ;;  %v120_v20 = vadd.f32 %v232_v8, %v82_v13 }
  0x1f   :  { %v166_v21 = vpack.c.bf16 %v147_v14, %v146_v5  ;;  %v150_v22 = vmax.f32 %v118_v15, 0.0  ;;  %v151_v23 = vmax.f32 %v119_v16, 0.0  ;;  %v121_v3 = vadd.f32 %v234_v9, %v83_v17 }
  0x20   :  { %v167_v24 = vpack.c.bf16 %v149_v19, %v148_v18  ;;  %v152_v25 = vmax.f32 %v120_v20, 0.0 }
  0x21   :  { %182 = vst [vmem:[%s435_s3 + $0x60] sm:$0xff] %v166_v21  ;;  %v168_v4 = vpack.c.bf16 %v151_v23, %v150_v22  ;;  %v153_v26 = vmax.f32 %v121_v3, 0.0 }
  0x22   :  { %183 = vst [vmem:[%s435_s3 + $0x68] sm:$0xff] %v167_v24 }
  0x23   :  { %184 = vst [vmem:[%s435_s3 + $0x70] sm:$0xff] %v168_v4  ;;  %v169_v8 = vpack.c.bf16 %v153_v26, %v152_v25 }
  0x25   :  { %185 = vst [vmem:[%s435_s3 + $0x78] sm:$0xff] %v169_v8 }

// kernel: discriminator_forward.11
= control target key start
LH: loop header
LB: loop body
LE: loop exit
PB: predicated region body
PF: predicated region fallthrough
CT: control target
= control target key end

     0   :  { %s2192_s12 = smov 0   ;;  %s2194_s13 = smov 0   ;;  %s2786_s0 = inlined_call_operand.vmem [shape: bf16[128,2048], index: 0, kind: input, shape index: {}]   ;;  %s2787_s1 = inlined_call_operand.vmem [shape: bf16[2048,256], index: 1, kind: input, shape index: {}]   ;;  %s2788_s2 = inlined_call_operand.vmem [shape: f32[1,256], index: 2, kind: input, shape index: {}]   ;;  %s2789_s3 = inlined_call_operand.vmem [shape: f32[128,256], index: 3, kind: output, shape index: {}]  }
   0x1   :  { %s2196_s14 = smov 0   ;;  %s2198_s15 = smov 0  }
   0x2   :  { %s2200_s16 = smov 0  }
   0x3 LB: > { %s22_s17 = sadd.s32 1, %s2165_s15  ;;  %p41_p1 = scmp.ne.s32.totalorder %s2157_s13, %s2153_s12  ;;  %s2169_s16 = sphi %s2200_s16, %s13_s16   ;;  %s2165_s15 = sphi %s2198_s15, %s2793_s15   ;;  %s2161_s14 = sphi %s2196_s14, %s2792_s14   ;;  %s2157_s13 = sphi %s2194_s13, %s2791_s13   ;;  %s2153_s12 = sphi %s2192_s12, %s2790_s12  }
   0x4   : > { %p23_p0 = scmp.ge.s32.totalorder %s22_s17, 4  ;;  %p42_p2 = scmp.eq.s32.totalorder %s2169_s16, 0 }
   0x5   : > { %s34_s19 = sadd.s32 1, %s2157_s13  ;;  %p1593_p5 = scmp.ge.s32.totalorder %s2169_s16, 4 }
   0x6   : > { %s2795_s17 = smov (%p23_p0, %s22_s17), 0  ;;  %p43_p3 = por %p42_p2, %p41_p1 }
   0x7   : > { %s30_s18 = ssub.s32 %s2165_s15, %s2795_s17  ;;  %143 = sbr.rel (%p1593_p5) target bundleno = 48 (0x30), region = 20 }
   0x8   : > { %p32_p4 = scmp.eq.s32.totalorder %s30_s18, 0 }
   0xa   : > { %s2227_s20 = scalar_select %p32_p4, %s2157_s13, %s34_s19  }
   0xc   : > { %146 = sbr.rel (!%p43_p3) target bundleno = 48 (0x30), region = 24  ;;  %s148_s21 = sand.u32 (%p43_p3), 1, %s2157_s13  }
   0xd   : > { %s1992_s22 = sshll.u32 (%p43_p3), %s2165_s15, 4  ;;  %s1594_s23 = sshll.u32 (%p43_p3), %s148_s21, 8 }
   0xe   : > { %s2235_s26 = scalar_lea.vmem (%p43_p3), %s2786_s0, %s1992_s22  ;;  %s2240_s27 = scalar_lea.vmem (%p43_p3), [#allocation3], %s1594_s23 }
   0xf   : > { %v169_v0 = vld [vmem:[%s2235_s26] sm:$0xff] (%p43_p3)  ;;  %v171_v1 = vld [vmem:[%s2235_s26 + $0x8] sm:$0xff] (%p43_p3) }
  0x10   : > { %v173_v2 = vld [vmem:[%s2235_s26 + $0x40] sm:$0xff] (%p43_p3)  ;;  %170 = vst [vmem:[%s2240_s27] sm:$0xff] (%p43_p3), %v169_v0  ;;  %v175_v3 = vld [vmem:[%s2235_s26 + $0x48] sm:$0xff] (%p43_p3) }
  0x11   : > { %172 = vst [vmem:[%s2240_s27 + $0x8] sm:$0xff] %v171_v1  ;;  %v177_v4 = vld [vmem:[%s2235_s26 + $0x80] sm:$0xff]  ;;  %v179_v5 = vld [vmem:[%s2235_s26 + $0x88] sm:$0xff] }
  0x12   : > { %174 = vst [vmem:[%s2240_s27 + $0x10] sm:$0xff] %v173_v2  ;;  %v181_v6 = vld [vmem:[%s2235_s26 + $0xc0] sm:$0xff]  ;;  %v183_v7 = vld [vmem:[%s2235_s26 + $0xc8] sm:$0xff] }
  0x13   : > { %176 = vst [vmem:[%s2240_s27 + $0x18] sm:$0xff] %v175_v3  ;;  %v185_v8 = vld [vmem:[%s2235_s26 + $0x100] sm:$0xff]  ;;  %v187_v9 = vld [vmem:[%s2235_s26 + $0x108] sm:$0xff] }
  0x14   : > { %178 = vst [vmem:[%s2240_s27 + $0x20] sm:$0xff] %v177_v4  ;;  %v189_v10 = vld [vmem:[%s2235_s26 + $0x140] sm:$0xff]  ;;  %v191_v11 = vld [vmem:[%s2235_s26 + $0x148] sm:$0xff] }
  0x15   : > { %180 = vst [vmem:[%s2240_s27 + $0x28] sm:$0xff] %v179_v5  ;;  %v193_v12 = vld [vmem:[%s2235_s26 + $0x180] sm:$0xff]  ;;  %v195_v13 = vld [vmem:[%s2235_s26 + $0x188] sm:$0xff] }
  0x16   : > { %182 = vst [vmem:[%s2240_s27 + $0x30] sm:$0xff] %v181_v6  ;;  %v197_v14 = vld [vmem:[%s2235_s26 + $0x1c0] sm:$0xff]  ;;  %v199_v15 = vld [vmem:[%s2235_s26 + $0x1c8] sm:$0xff] }
  0x17   : > { %184 = vst [vmem:[%s2240_s27 + $0x38] sm:$0xff] %v183_v7  ;;  %v201_v16 = vld [vmem:[%s2235_s26 + $0x200] sm:$0xff]  ;;  %v203_v17 = vld [vmem:[%s2235_s26 + $0x208] sm:$0xff] }
  0x18   : > { %186 = vst [vmem:[%s2240_s27 + $0x40] sm:$0xff] %v185_v8  ;;  %v205_v18 = vld [vmem:[%s2235_s26 + $0x240] sm:$0xff]  ;;  %v207_v19 = vld [vmem:[%s2235_s26 + $0x248] sm:$0xff] }
  0x19   : > { %188 = vst [vmem:[%s2240_s27 + $0x48] sm:$0xff] %v187_v9  ;;  %v209_v20 = vld [vmem:[%s2235_s26 + $0x280] sm:$0xff]  ;;  %v211_v21 = vld [vmem:[%s2235_s26 + $0x288] sm:$0xff] }
  0x1a   : > { %190 = vst [vmem:[%s2240_s27 + $0x50] sm:$0xff] %v189_v10  ;;  %v213_v22 = vld [vmem:[%s2235_s26 + $0x2c0] sm:$0xff]  ;;  %v215_v23 = vld [vmem:[%s2235_s26 + $0x2c8] sm:$0xff] }
  0x1b   : > { %192 = vst [vmem:[%s2240_s27 + $0x58] sm:$0xff] %v191_v11  ;;  %v217_v24 = vld [vmem:[%s2235_s26 + $0x300] sm:$0xff]  ;;  %v219_v25 = vld [vmem:[%s2235_s26 + $0x308] sm:$0xff] }
  0x1c   : > { %194 = vst [vmem:[%s2240_s27 + $0x60] sm:$0xff] %v193_v12  ;;  %v221_v26 = vld [vmem:[%s2235_s26 + $0x340] sm:$0xff]  ;;  %v223_v27 = vld [vmem:[%s2235_s26 + $0x348] sm:$0xff] }
  0x1d   : > { %196 = vst [vmem:[%s2240_s27 + $0x68] sm:$0xff] %v195_v13  ;;  %v225_v28 = vld [vmem:[%s2235_s26 + $0x380] sm:$0xff]  ;;  %v227_v29 = vld [vmem:[%s2235_s26 + $0x388] sm:$0xff] }
  0x1e   : > { %198 = vst [vmem:[%s2240_s27 + $0x70] sm:$0xff] %v197_v14  ;;  %v229_v30 = vld [vmem:[%s2235_s26 + $0x3c0] sm:$0xff]  ;;  %v231_v31 = vld [vmem:[%s2235_s26 + $0x3c8] sm:$0xff] }
  0x1f   : > { %200 = vst [vmem:[%s2240_s27 + $0x78] sm:$0xff] %v199_v15 }
  0x20   : > { %202 = vst [vmem:[%s2240_s27 + $0x80] sm:$0xff] %v201_v16 }
  0x21   : > { %204 = vst [vmem:[%s2240_s27 + $0x88] sm:$0xff] %v203_v17 }
  0x22   : > { %206 = vst [vmem:[%s2240_s27 + $0x90] sm:$0xff] %v205_v18 }
  0x23   : > { %208 = vst [vmem:[%s2240_s27 + $0x98] sm:$0xff] %v207_v19 }
  0x24   : > { %210 = vst [vmem:[%s2240_s27 + $0xa0] sm:$0xff] %v209_v20 }
  0x25   : > { %212 = vst [vmem:[%s2240_s27 + $0xa8] sm:$0xff] %v211_v21 }
  0x26   : > { %214 = vst [vmem:[%s2240_s27 + $0xb0] sm:$0xff] %v213_v22 }
  0x27   : > { %216 = vst [vmem:[%s2240_s27 + $0xb8] sm:$0xff] %v215_v23 }
  0x28   : > { %218 = vst [vmem:[%s2240_s27 + $0xc0] sm:$0xff] %v217_v24 }
  0x29   : > { %220 = vst [vmem:[%s2240_s27 + $0xc8] sm:$0xff] %v219_v25 }
  0x2a   : > { %222 = vst [vmem:[%s2240_s27 + $0xd0] sm:$0xff] %v221_v26 }
  0x2b   : > { %224 = vst [vmem:[%s2240_s27 + $0xd8] sm:$0xff] %v223_v27 }
  0x2c   : > { %226 = vst [vmem:[%s2240_s27 + $0xe0] sm:$0xff] %v225_v28 }
  0x2d   : > { %228 = vst [vmem:[%s2240_s27 + $0xe8] sm:$0xff] %v227_v29 }
  0x2e   : > { %230 = vst [vmem:[%s2240_s27 + $0xf0] sm:$0xff] %v229_v30 }
  0x2f   : > { %232 = vst [vmem:[%s2240_s27 + $0xf8] sm:$0xff] %v231_v31 }
  0x30 PF: > { %p1597_p6 = scmp.ge.s32.totalorder %s2169_s16, 1  ;;  %p247_p7 = scmp.lt.s32.totalorder %s2169_s16, 5 }
  0x32   : > { %p248_p8 = pnand %p1597_p6, %p247_p7 }
  0x33   : > { %s254_s28 = sand.u32 (!%p248_p8), 1, %s2153_s12   ;;  %s1599_s29 = sshll.u32 (!%p248_p8), %s2161_s14, 6 }
  0x34   : > { %251 = sbr.rel (%p248_p8) target bundleno = 555 (0x22b), region = 51  ;;  %s1598_s30 = sshll.u32 (!%p248_p8), %s254_s28, 8 }
  0x35   : > { %p287_p9 = scmp.lt.s32.totalorder (!%p248_p8), %s1599_s29, 255  ;;  %s2312_s8 = scalar_lea.vmem (!%p248_p8), [#allocation3], %s1598_s30 }
  0x36   : > { %p1602_p10 = scmp.ne.s32.totalorder (!%p248_p8), %s2161_s14, 0 }
  0x39   : > { %s2797_s29 = smov (!%p287_p9, %s1599_s29), 255  ;;  %303 = sbr.rel (%p1602_p10) target bundleno = 95 (0x5f), region = 59 }
  0x3a   : > { %s1993_s4 = sshll.u32 %s2797_s29, 3 }
  0x3b   : > { %s2310_s7 = scalar_lea.vmem %s2787_s1, %s1993_s4 }
  0x3e   : > { %v2171_v32 = vmov 0.0  }
  0x3f   : > { %304 = vst [vmem:[#allocation2 + $0xb0] sm:$0xff] %v2171_v32 }
  0x40   : > { %305 = vst [vmem:[#allocation2] sm:$0xff] %v2171_v32 }
  0x41   : > { %306 = vst [vmem:[#allocation2 + $0xd8] sm:$0xff] %v2171_v32 }
  0x42   : > { %307 = vst [vmem:[#allocation2 + $0x18] sm:$0xff] %v2171_v32 }
  0x43   : > { %308 = vst [vmem:[#allocation2 + $0x50] sm:$0xff] %v2171_v32 }
  0x44   : > { %309 = vst [vmem:[#allocation2 + $0x68] sm:$0xff] %v2171_v32 }
  0x45   : > { %310 = vst [vmem:[#allocation2 + $0x30] sm:$0xff] %v2171_v32 }
  0x46   : > { %311 = vst [vmem:[#allocation2 + $0x48] sm:$0xff] %v2171_v32 }
  0x47   : > { %312 = vst [vmem:[#allocation2 + $0x80] sm:$0xff] %v2171_v32 }
  0x48   : > { %313 = vst [vmem:[#allocation2 + $0x88] sm:$0xff] %v2171_v32 }
  0x49   : > { %314 = vst [vmem:[#allocation2 + $0xe8] sm:$0xff] %v2171_v32 }
  0x4a   : > { %315 = vst [vmem:[#allocation2 + $0xb8] sm:$0xff] %v2171_v32 }
  0x4b   : > { %316 = vst [vmem:[#allocation2 + $0x60] sm:$0xff] %v2171_v32 }
  0x4c   : > { %317 = vst [vmem:[#allocation2 + $0xf0] sm:$0xff] %v2171_v32 }
  0x4d   : > { %318 = vst [vmem:[#allocation2 + $0x8] sm:$0xff] %v2171_v32 }
  0x4e   : > { %319 = vst [vmem:[#allocation2 + $0x78] sm:$0xff] %v2171_v32 }
  0x4f   : > { %320 = vst [vmem:[#allocation2 + $0x38] sm:$0xff] %v2171_v32 }
  0x50   : > { %321 = vst [vmem:[#allocation2 + $0x58] sm:$0xff] %v2171_v32 }
  0x51   : > { %322 = vst [vmem:[#allocation2 + $0x40] sm:$0xff] %v2171_v32 }
  0x52   : > { %323 = vst [vmem:[#allocation2 + $0xc8] sm:$0xff] %v2171_v32 }
  0x53   : > { %324 = vst [vmem:[#allocation2 + $0xe0] sm:$0xff] %v2171_v32 }
  0x54   : > { %325 = vst [vmem:[#allocation2 + $0x90] sm:$0xff] %v2171_v32 }
  0x55   : > { %326 = vst [vmem:[#allocation2 + $0x70] sm:$0xff] %v2171_v32 }
  0x56   : > { %327 = vst [vmem:[#allocation2 + $0xc0] sm:$0xff] %v2171_v32 }
  0x57   : > { %328 = vst [vmem:[#allocation2 + $0xa8] sm:$0xff] %v2171_v32 }
  0x58   : > { %329 = vst [vmem:[#allocation2 + $0xd0] sm:$0xff] %v2171_v32 }
  0x59   : > { %330 = vst [vmem:[#allocation2 + $0x10] sm:$0xff] %v2171_v32 }
  0x5a   : > { %331 = vst [vmem:[#allocation2 + $0x28] sm:$0xff] %v2171_v32 }
  0x5b   : > { %332 = vst [vmem:[#allocation2 + $0xa0] sm:$0xff] %v2171_v32 }
  0x5c   : > { %333 = vst [vmem:[#allocation2 + $0xf8] sm:$0xff] %v2171_v32 }
  0x5d   : > { %334 = vst [vmem:[#allocation2 + $0x20] sm:$0xff] %v2171_v32 }
  0x5e   : > { %335 = vst [vmem:[#allocation2 + $0x98] sm:$0xff] %v2171_v32 }
  0x5f PF: > { %v1789_v33 = vld [vmem:[%s2310_s7 + $0x70] sm:$0xf]  ;;  %v2041_v34 = vld [vmem:[%s2310_s7 + $0x74] sm:$0xf0]  ;;  %v1781_v44 = vld [vmem:[%s2310_s7 + $0x60] sm:$0xf] }
  0x60   : > { %v1853_v35 = vld [vmem:[%s2310_s7 + $0xf0] sm:$0xf]  ;;  %v1790_v36 = vor.u32 %v2041_v34, %v1789_v33  ;;  %v2057_v37 = vld [vmem:[%s2310_s7 + $0xf4] sm:$0xf0]  ;;  %v2039_v46 = vld [vmem:[%s2310_s7 + $0x64] sm:$0xf0] }
  0x61   : > { %v1917_v38 = vld [vmem:[%s2310_s7 + $0x170] sm:$0xf]  ;;  %v2073_v39 = vld [vmem:[%s2310_s7 + $0x174] sm:$0xf0]  ;;  %v1854_v40 = vor.u32 %v2057_v37, %v1853_v35  ;;  %v1845_v47 = vld [vmem:[%s2310_s7 + $0xe0] sm:$0xf]  ;;  %v1782_v49 = vor.u32 %v2039_v46, %v1781_v44 }
  0x62   : > { %v1918_v41 = vor.u32 %v2073_v39, %v1917_v38  ;;  %v1981_v42 = vld [vmem:[%s2310_s7 + $0x1f0] sm:$0xf]  ;;  %v2089_v43 = vld [vmem:[%s2310_s7 + $0x1f4] sm:$0xf0]  ;;  %944 = vmatpush.bf16.msra.mxu0 %v1790_v36  ;;  %v2055_v48 = vld [vmem:[%s2310_s7 + $0xe4] sm:$0xf0] }
  0x63   : > { %v1982_v45 = vor.u32 %v2089_v43, %v1981_v42  ;;  %993 = vmatpush.bf16.msra.mxu1 %v1854_v40  ;;  %v1846_v50 = vor.u32 %v2055_v48, %v1845_v47  ;;  %v1909_v51 = vld [vmem:[%s2310_s7 + $0x160] sm:$0xf]  ;;  %v2071_v52 = vld [vmem:[%s2310_s7 + $0x164] sm:$0xf0]  ;;  %v1773_v56 = vld [vmem:[%s2310_s7 + $0x50] sm:$0xf] }
  0x64   : > { %1042 = vmatpush.bf16.msra.mxu2 %v1918_v41  ;;  %v1973_v53 = vld [vmem:[%s2310_s7 + $0x1e0] sm:$0xf]  ;;  %v1910_v54 = vor.u32 %v2071_v52, %v1909_v51  ;;  %v2087_v55 = vld [vmem:[%s2310_s7 + $0x1e4] sm:$0xf0]  ;;  %v2037_v57 = vld [vmem:[%s2310_s7 + $0x54] sm:$0xf0] }
  0x65   : > { %1091 = vmatpush.bf16.msra.mxu3 %v1982_v45  ;;  %v1974_v58 = vor.u32 %v2087_v55, %v1973_v53  ;;  %v1837_v59 = vld [vmem:[%s2310_s7 + $0xd0] sm:$0xf]  ;;  %v2053_v60 = vld [vmem:[%s2310_s7 + $0xd4] sm:$0xf0]  ;;  %v1774_v62 = vor.u32 %v2037_v57, %v1773_v56  ;;  %v1765_v4 = vld [vmem:[%s2310_s7 + $0x40] sm:$0xf] }
  0x66   : > { %v1901_v61 = vld [vmem:[%s2310_s7 + $0x150] sm:$0xf]  ;;  %945 = vmatpush.bf16.msra.mxu0 %v1782_v49  ;;  %v2069_v63 = vld [vmem:[%s2310_s7 + $0x154] sm:$0xf0]  ;;  %v1838_v2 = vor.u32 %v2053_v60, %v1837_v59  ;;  %v2035_v5 = vld [vmem:[%s2310_s7 + $0x44] sm:$0xf0] }
  0x67   : > { %v1965_v0 = vld [vmem:[%s2310_s7 + $0x1d0] sm:$0xf]  ;;  %v2085_v1 = vld [vmem:[%s2310_s7 + $0x1d4] sm:$0xf0]  ;;  %994 = vmatpush.bf16.msra.mxu1 %v1846_v50  ;;  %v1902_v3 = vor.u32 %v2069_v63, %v1901_v61  ;;  %v1829_v6 = vld [vmem:[%s2310_s7 + $0xc0] sm:$0xf]  ;;  %v1766_v13 = vor.u32 %v2035_v5, %v1765_v4 }
  0x68   : > { %1043 = vmatpush.bf16.msra.mxu2 %v1910_v54  ;;  %v1966_v7 = vor.u32 %v2085_v1, %v1965_v0  ;;  %v2051_v8 = vld [vmem:[%s2310_s7 + $0xc4] sm:$0xf0]  ;;  %v1893_v9 = vld [vmem:[%s2310_s7 + $0x140] sm:$0xf]  ;;  %v1757_v16 = vld [vmem:[%s2310_s7 + $0x30] sm:$0xf] }
  0x69   : > { %1092 = vmatpush.bf16.msra.mxu3 %v1974_v58  ;;  %v2067_v10 = vld [vmem:[%s2310_s7 + $0x144] sm:$0xf0]  ;;  %v1957_v11 = vld [vmem:[%s2310_s7 + $0x1c0] sm:$0xf]  ;;  %v1830_v14 = vor.u32 %v2051_v8, %v1829_v6  ;;  %v2033_v17 = vld [vmem:[%s2310_s7 + $0x34] sm:$0xf0] }
  0x6a   : > { %v2083_v12 = vld [vmem:[%s2310_s7 + $0x1c4] sm:$0xf0]  ;;  %946 = vmatpush.bf16.msra.mxu0 %v1774_v62  ;;  %v1894_v15 = vor.u32 %v2067_v10, %v1893_v9  ;;  %v1821_v18 = vld [vmem:[%s2310_s7 + $0xb0] sm:$0xf]  ;;  %v2049_v20 = vld [vmem:[%s2310_s7 + $0xb4] sm:$0xf0]  ;;  %v1758_v25 = vor.u32 %v2033_v17, %v1757_v16 }
  0x6b   : > { %995 = vmatpush.bf16.msra.mxu1 %v1838_v2  ;;  %v1958_v19 = vor.u32 %v2083_v12, %v1957_v11  ;;  %v1885_v21 = vld [vmem:[%s2310_s7 + $0x130] sm:$0xf]  ;;  %v2065_v22 = vld [vmem:[%s2310_s7 + $0x134] sm:$0xf0]  ;;  %v1822_v26 = vor.u32 %v2049_v20, %v1821_v18  ;;  %v1749_v28 = vld [vmem:[%s2310_s7 + $0x20] sm:$0xf] }
  0x6c   : > { %1044 = vmatpush.bf16.msra.mxu2 %v1902_v3  ;;  %v1949_v23 = vld [vmem:[%s2310_s7 + $0x1b0] sm:$0xf]  ;;  %v2081_v24 = vld [vmem:[%s2310_s7 + $0x1b4] sm:$0xf0]  ;;  %v1886_v27 = vor.u32 %v2065_v22, %v1885_v21  ;;  %v2031_v29 = vld [vmem:[%s2310_s7 + $0x24] sm:$0xf0] }
  0x6d   : > { %1093 = vmatpush.bf16.msra.mxu3 %v1966_v7  ;;  %v1813_v30 = vld [vmem:[%s2310_s7 + $0xa0] sm:$0xf]  ;;  %v1950_v31 = vor.u32 %v2081_v24, %v1949_v23  ;;  %v2047_v32 = vld [vmem:[%s2310_s7 + $0xa4] sm:$0xf0]  ;;  %v1750_v37 = vor.u32 %v2031_v29, %v1749_v28  ;;  %v1741_v40 = vld [vmem:[%s2310_s7 + $0x10] sm:$0xf] }
  0x6e   : > { %947 = vmatpush.bf16.msra.mxu0 %v1766_v13  ;;  %v1877_v33 = vld [vmem:[%s2310_s7 + $0x120] sm:$0xf]  ;;  %v2063_v34 = vld [vmem:[%s2310_s7 + $0x124] sm:$0xf0]  ;;  %v1814_v38 = vor.u32 %v2047_v32, %v1813_v30  ;;  %v2029_v41 = vld [vmem:[%s2310_s7 + $0x14] sm:$0xf0] }
  0x6f   : > { %996 = vmatpush.bf16.msra.mxu1 %v1830_v14  ;;  %v1941_v35 = vld [vmem:[%s2310_s7 + $0x1a0] sm:$0xf]  ;;  %v2079_v36 = vld [vmem:[%s2310_s7 + $0x1a4] sm:$0xf0]  ;;  %v1878_v39 = vor.u32 %v2063_v34, %v1877_v33  ;;  %v1805_v42 = vld [vmem:[%s2310_s7 + $0x90] sm:$0xf]  ;;  %v1742_v50 = vor.u32 %v2029_v41, %v1741_v40 }
  0x70   : > { %1045 = vmatpush.bf16.msra.mxu2 %v1894_v15  ;;  %v1942_v43 = vor.u32 %v2079_v36, %v1941_v35  ;;  %v2045_v44 = vld [vmem:[%s2310_s7 + $0x94] sm:$0xf0]  ;;  %v1869_v45 = vld [vmem:[%s2310_s7 + $0x110] sm:$0xf]  ;;  %v1733_v49 = vld [vmem:[%s2310_s7] sm:$0xf] }
  0x71   : > { %1094 = vmatpush.bf16.msra.mxu3 %v1958_v19  ;;  %v2061_v46 = vld [vmem:[%s2310_s7 + $0x114] sm:$0xf0]  ;;  %v1933_v47 = vld [vmem:[%s2310_s7 + $0x190] sm:$0xf]  ;;  %v2027_v51 = vld [vmem:[%s2310_s7 + $0x4] sm:$0xf0]  ;;  %v1806_v54 = vor.u32 %v2045_v44, %v1805_v42 }
  0x72   : > { %948 = vmatpush.bf16.msra.mxu0 %v1758_v25  ;;  %v2077_v48 = vld [vmem:[%s2310_s7 + $0x194] sm:$0xf0]  ;;  %v1797_v52 = vld [vmem:[%s2310_s7 + $0x80] sm:$0xf]  ;;  %v2043_v53 = vld [vmem:[%s2310_s7 + $0x84] sm:$0xf0]  ;;  %v1870_v55 = vor.u32 %v2061_v46, %v1869_v45  ;;  %v1734_v3 = vor.u32 %v2027_v51, %v1733_v49 }
  0x73   : > { %997 = vmatpush.bf16.msra.mxu1 %v1822_v26  ;;  %v1861_v56 = vld [vmem:[%s2310_s7 + $0x100] sm:$0xf]  ;;  %v2059_v57 = vld [vmem:[%s2310_s7 + $0x104] sm:$0xf0]  ;;  %v1934_v59 = vor.u32 %v2077_v48, %v1933_v47  ;;  %v1996_v62 = vld [vmem:[%s2312_s8 + $0xc] sm:$0xf0]  ;;  %v1798_v7 = vor.u32 %v2043_v53, %v1797_v52 }
  0x74   : > { %1046 = vmatpush.bf16.msra.mxu2 %v1886_v27  ;;  %v1925_v58 = vld [vmem:[%s2310_s7 + $0x180] sm:$0xf]  ;;  %v2075_v60 = vld [vmem:[%s2310_s7 + $0x184] sm:$0xf0]  ;;  %v1994_v63 = vld [vmem:[%s2312_s8 + $0x4] sm:$0xf]  ;;  %v1862_v8 = vor.u32 %v2059_v57, %v1861_v56 }
  0x75   : > { %1095 = vmatpush.bf16.msra.mxu3 %v1950_v31  ;;  %v1605_v61 = vld [vmem:[%s2312_s8] sm:$0xf]  ;;  %v1607_v0 = vld [vmem:[%s2312_s8 + $0x10] sm:$0xf0]  ;;  %v1919_v2 = vld [vmem:[%s2310_s7 + $0x178] sm:$0xf0]  ;;  %v1926_v12 = vor.u32 %v2075_v60, %v1925_v58 }
  0x76   : > { %949 = vmatpush.bf16.msra.mxu0 %v1750_v37  ;;  %v2072_v1 = vld [vmem:[%s2310_s7 + $0x174] sm:$0xf]  ;;  %v1613_v4 = vld [vmem:[%s2312_s8 + $0x8] sm:$0xf]  ;;  %v1983_v6 = vld [vmem:[%s2310_s7 + $0x1f8] sm:$0xf0]  ;;  %v2394_v17 = vor.u32 %v1996_v62, %v1605_v61  ;;  %v2399_v22 = vor.u32 %v1994_v63, %v1607_v0 }
  0x77   : > { %998 = vmatpush.bf16.msra.mxu1 %v1814_v38  ;;  %v2088_v5 = vld [vmem:[%s2310_s7 + $0x1f4] sm:$0xf]  ;;  %v1997_v9 = vld [vmem:[%s2312_s8 + $0x14] sm:$0xf0]  ;;  %v1995_v10 = vld [vmem:[%s2312_s8 + $0xc] sm:$0xf]  ;;  %v1922_v13 = vor.u32 %v2072_v1, %v1919_v2 }
  0x78   : > { %1047 = vmatpush.bf16.msra.mxu2 %v1878_v39  ;;  %v1615_v11 = vld [vmem:[%s2312_s8 + $0x18] sm:$0xf0]  ;;  %v2040_v14 = vld [vmem:[%s2310_s7 + $0x74] sm:$0xf]  ;;  %v1986_v18 = vor.u32 %v2088_v5, %v1983_v6  ;;  %v2070_v20 = vld [vmem:[%s2310_s7 + $0x164] sm:$0xf]  ;;  %v2401_v23 = vor.u32 %v1997_v9, %v1613_v4 }
  0x79   : > { %1096 = vmatpush.bf16.msra.mxu3 %v1942_v43  ;;  %v1791_v15 = vld [vmem:[%s2310_s7 + $0x78] sm:$0xf0]  ;;  %v2056_v16 = vld [vmem:[%s2310_s7 + $0xf4] sm:$0xf]  ;;  %v1911_v21 = vld [vmem:[%s2310_s7 + $0x168] sm:$0xf0]  ;;  %v2405_v26 = vor.u32 %v1995_v10, %v1615_v11 }
  0x7a   : > { %950 = vmatpush.bf16.msra.mxu0 %v1742_v50  ;;  %v1855_v19 = vld [vmem:[%s2310_s7 + $0xf8] sm:$0xf0]  ;;  %v2086_v24 = vld [vmem:[%s2310_s7 + $0x1e4] sm:$0xf]  ;;  %v1975_v25 = vld [vmem:[%s2310_s7 + $0x1e8] sm:$0xf0]  ;;  %v1794_v27 = vor.u32 %v2040_v14, %v1791_v15  ;;  %v1914_v29 = vor.u32 %v2070_v20, %v1911_v21 }
  0x7b   : > { %999 = vmatpush.bf16.msra.mxu1 %v1806_v54  ;;  %v1858_v28 = vor.u32 %v2056_v16, %v1855_v19  ;;  %v2038_v30 = vld [vmem:[%s2310_s7 + $0x64] sm:$0xf]  ;;  %v1783_v31 = vld [vmem:[%s2310_s7 + $0x68] sm:$0xf0]  ;;  %v1978_v32 = vor.u32 %v2086_v24, %v1975_v25  ;;  %v2068_v36 = vld [vmem:[%s2310_s7 + $0x154] sm:$0xf] }
  0x7c   : > { %1048 = vmatpush.bf16.msra.mxu2 %v1870_v55  ;;  %v2054_v33 = vld [vmem:[%s2310_s7 + $0xe4] sm:$0xf]  ;;  %v1847_v34 = vld [vmem:[%s2310_s7 + $0xe8] sm:$0xf0]  ;;  %v1786_v35 = vor.u32 %v2038_v30, %v1783_v31  ;;  %v1903_v37 = vld [vmem:[%s2310_s7 + $0x158] sm:$0xf0] }
  0x7d   : > { %1097 = vmatpush.bf16.msra.mxu3 %v1934_v59  ;;  %v2084_v38 = vld [vmem:[%s2310_s7 + $0x1d4] sm:$0xf]  ;;  %v1850_v39 = vor.u32 %v2054_v33, %v1847_v34  ;;  %v1906_v40 = vor.u32 %v2068_v36, %v1903_v37  ;;  %v1967_v41 = vld [vmem:[%s2310_s7 + $0x1d8] sm:$0xf0]  ;;  %v1621_v49 = vld [vmem:[%s2312_s8 + $0x20] sm:$0xf] }
  0x7e   : > { %951 = vmatpush.bf16.msra.mxu0 %v1734_v3  ;;  %v2036_v42 = vld [vmem:[%s2310_s7 + $0x54] sm:$0xf]  ;;  %v1775_v43 = vld [vmem:[%s2310_s7 + $0x58] sm:$0xf0]  ;;  %v1970_v44 = vor.u32 %v2084_v38, %v1967_v41  ;;  %v2000_v50 = vld [vmem:[%s2312_s8 + $0x2c] sm:$0xf0] }
  0x7f   : > { %1000 = vmatpush.bf16.msra.mxu1 %v1798_v7  ;;  %v2052_v45 = vld [vmem:[%s2310_s7 + $0xd4] sm:$0xf]  ;;  %v1839_v46 = vld [vmem:[%s2310_s7 + $0xd8] sm:$0xf0]  ;;  %v1778_v47 = vor.u32 %v2036_v42, %v1775_v43  ;;  %v1998_v51 = vld [vmem:[%s2312_s8 + $0x24] sm:$0xf]  ;;  %v2431_v57 = vor.u32 %v2000_v50, %v1621_v49 }
  0x80   : > { %1049 = vmatpush.bf16.msra.mxu2 %v1862_v8  ;;  %v1842_v48 = vor.u32 %v2052_v45, %v1839_v46  ;;  %v1623_v52 = vld [vmem:[%s2312_s8 + $0x30] sm:$0xf0]  ;;  %v1629_v53 = vld [vmem:[%s2312_s8 + $0x28] sm:$0xf]  ;;  %v2001_v54 = vld [vmem:[%s2312_s8 + $0x34] sm:$0xf0] }
  0x81   : > { %1098 = vmatpush.bf16.msra.mxu3 %v1926_v12  ;;  %952 = vmatmul.bf16.vlgmr.msra.gmra.mxu0 %v2394_v17  ;;  %v1999_v55 = vld [vmem:[%s2312_s8 + $0x2c] sm:$0xf]  ;;  %v1631_v56 = vld [vmem:[%s2312_s8 + $0x38] sm:$0xf0]  ;;  %v2433_v58 = vor.u32 %v1998_v51, %v1623_v52  ;;  %v2435_v59 = vor.u32 %v2001_v54, %v1629_v53  ;;  %v2066_v61 = vld [vmem:[%s2310_s7 + $0x144] sm:$0xf] }
  0x82   : > { %1001 = vmatmul.bf16.vlgmr.msra.gmra.mxu1 %v2399_v22  ;;  %1140 = vmatpush.bf16.msrb.mxu0 %v1794_v27  ;;  %v2437_v60 = vor.u32 %v1999_v55, %v1631_v56  ;;  %v1895_v62 = vld [vmem:[%s2310_s7 + $0x148] sm:$0xf0]  ;;  %v2082_v63 = vld [vmem:[%s2310_s7 + $0x1c4] sm:$0xf]  ;;  %v1637_v9 = vld [vmem:[%s2312_s8 + $0x40] sm:$0xf] }
  0x83   : > { %1050 = vmatmul.bf16.vlgmr.msra.gmra.mxu2 %v2401_v23  ;;  %1189 = vmatpush.bf16.msrb.mxu1 %v1858_v28  ;;  %v1898_v0 = vor.u32 %v2066_v61, %v1895_v62  ;;  %v1959_v1 = vld [vmem:[%s2310_s7 + $0x1c8] sm:$0xf0]  ;;  %v2034_v2 = vld [vmem:[%s2310_s7 + $0x44] sm:$0xf]  ;;  %v2004_v10 = vld [vmem:[%s2312_s8 + $0x4c] sm:$0xf0] }
  0x84   : > { %1238 = vmatpush.bf16.msrb.mxu2 %v1922_v13  ;;  %1099 = vmatmul.bf16.vlgmr.msra.gmra.mxu3 %v2405_v26  ;;  %v1767_v3 = vld [vmem:[%s2310_s7 + $0x48] sm:$0xf0]  ;;  %v1962_v4 = vor.u32 %v2082_v63, %v1959_v1  ;;  %v2050_v6 = vld [vmem:[%s2310_s7 + $0xc4] sm:$0xf]  ;;  %v1639_v12 = vld [vmem:[%s2312_s8 + $0x50] sm:$0xf0] }
  0x85   : > { %1287 = vmatpush.bf16.msrb.mxu3 %v1986_v18  ;;  %v1770_v5 = vor.u32 %v2034_v2, %v1767_v3  ;;  %v1831_v7 = vld [vmem:[%s2310_s7 + $0xc8] sm:$0xf0]  ;;  %v2002_v11 = vld [vmem:[%s2312_s8 + $0x44] sm:$0xf]  ;;  %v1645_v13 = vld [vmem:[%s2312_s8 + $0x48] sm:$0xf]  ;;  %v2459_v18 = vor.u32 %v2004_v10, %v1637_v9 }
  0x86   : > { %1141 = vmatpush.bf16.msrb.mxu0 %v1786_v35  ;;  %v1834_v8 = vor.u32 %v2050_v6, %v1831_v7  ;;  %v2005_v14 = vld [vmem:[%s2312_s8 + $0x54] sm:$0xf0]  ;;  %v2003_v15 = vld [vmem:[%s2312_s8 + $0x4c] sm:$0xf]  ;;  %v1647_v16 = vld [vmem:[%s2312_s8 + $0x58] sm:$0xf0]  ;;  %v2461_v19 = vor.u32 %v2002_v11, %v1639_v12 }
  0x87   : > { %1190 = vmatpush.bf16.msrb.mxu1 %v1850_v39  ;;  %v2463_v20 = vor.u32 %v2005_v14, %v1645_v13  ;;  %v2465_v21 = vor.u32 %v2003_v15, %v1647_v16  ;;  %v2064_v24 = vld [vmem:[%s2310_s7 + $0x134] sm:$0xf]  ;;  %v1887_v25 = vld [vmem:[%s2310_s7 + $0x138] sm:$0xf0]  ;;  %v1653_v37 = vld [vmem:[%s2312_s8 + $0x60] sm:$0xf] }
  0x88   : > { %1239 = vmatpush.bf16.msrb.mxu2 %v1914_v29  ;;  %v2080_v27 = vld [vmem:[%s2310_s7 + $0x1b4] sm:$0xf]  ;;  %v1890_v28 = vor.u32 %v2064_v24, %v1887_v25  ;;  %v1951_v29 = vld [vmem:[%s2310_s7 + $0x1b8] sm:$0xf0]  ;;  %v2008_v38 = vld [vmem:[%s2312_s8 + $0x6c] sm:$0xf0] }
  0x89   : > { %1288 = vmatpush.bf16.msrb.mxu3 %v1978_v32  ;;  %v2032_v30 = vld [vmem:[%s2310_s7 + $0x34] sm:$0xf]  ;;  %v1759_v31 = vld [vmem:[%s2310_s7 + $0x38] sm:$0xf0]  ;;  %v1954_v32 = vor.u32 %v2080_v27, %v1951_v29  ;;  %v2006_v39 = vld [vmem:[%s2312_s8 + $0x64] sm:$0xf]  ;;  %v2487_v45 = vor.u32 %v2008_v38, %v1653_v37 }
  0x8a   : > { %1142 = vmatpush.bf16.msrb.mxu0 %v1778_v47  ;;  %v1762_v33 = vor.u32 %v2032_v30, %v1759_v31  ;;  %v2048_v34 = vld [vmem:[%s2310_s7 + $0xb4] sm:$0xf]  ;;  %v1823_v35 = vld [vmem:[%s2310_s7 + $0xb8] sm:$0xf0]  ;;  %v1661_v41 = vld [vmem:[%s2312_s8 + $0x68] sm:$0xf] }
  0x8b   : > { %1191 = vmatpush.bf16.msrb.mxu1 %v1842_v48  ;;  %v1826_v36 = vor.u32 %v2048_v34, %v1823_v35  ;;  %v2009_v42 = vld [vmem:[%s2312_s8 + $0x74] sm:$0xf0]  ;;  %v2007_v43 = vld [vmem:[%s2312_s8 + $0x6c] sm:$0xf]  ;;  %v2062_v49 = vld [vmem:[%s2310_s7 + $0x124] sm:$0xf] }
  0x8c   : > { %1240 = vmatpush.bf16.msrb.mxu2 %v1906_v40  ;;  %v1655_v40 = vld [vmem:[%s2312_s8 + $0x70] sm:$0xf0]  ;;  %v2491_v47 = vor.u32 %v2009_v42, %v1661_v41  ;;  %v1879_v50 = vld [vmem:[%s2310_s7 + $0x128] sm:$0xf0]  ;;  %v2078_v51 = vld [vmem:[%s2310_s7 + $0x1a4] sm:$0xf] }
  0x8d   : > { %1289 = vmatpush.bf16.msrb.mxu3 %v1970_v44  ;;  %v1663_v44 = vld [vmem:[%s2312_s8 + $0x78] sm:$0xf0]  ;;  %v2489_v46 = vor.u32 %v2006_v39, %v1655_v40  ;;  %v1882_v52 = vor.u32 %v2062_v49, %v1879_v50  ;;  %v1943_v53 = vld [vmem:[%s2310_s7 + $0x1a8] sm:$0xf0]  ;;  %v2030_v54 = vld [vmem:[%s2310_s7 + $0x24] sm:$0xf] }
  0x8e   : > { %1143 = vmatpush.bf16.msrb.mxu0 %v1770_v5  ;;  %v2493_v48 = vor.u32 %v2007_v43, %v1663_v44  ;;  %v1751_v55 = vld [vmem:[%s2310_s7 + $0x28] sm:$0xf0]  ;;  %v1946_v56 = vor.u32 %v2078_v51, %v1943_v53  ;;  %v2046_v62 = vld [vmem:[%s2310_s7 + $0xa4] sm:$0xf]  ;;  %v1669_v1 = vld [vmem:[%s2312_s8 + $0x80] sm:$0xf] }
  0x8f   : > { %1192 = vmatpush.bf16.msrb.mxu1 %v1834_v8  ;;  %v1754_v61 = vor.u32 %v2030_v54, %v1751_v55  ;;  %v1815_v63 = vld [vmem:[%s2310_s7 + $0xa8] sm:$0xf0]  ;;  %v2012_v2 = vld [vmem:[%s2312_s8 + $0x8c] sm:$0xf0]  ;;  %v2010_v3 = vld [vmem:[%s2312_s8 + $0x84] sm:$0xf] }
  0x90   : > { %1241 = vmatpush.bf16.msrb.mxu2 %v1898_v0  ;;  %v1818_v0 = vor.u32 %v2046_v62, %v1815_v63  ;;  %v1677_v5 = vld [vmem:[%s2312_s8 + $0x88] sm:$0xf]  ;;  %v2013_v6 = vld [vmem:[%s2312_s8 + $0x94] sm:$0xf0]  ;;  %v2011_v7 = vld [vmem:[%s2312_s8 + $0x8c] sm:$0xf]  ;;  %v2515_v9 = vor.u32 %v2012_v2, %v1669_v1 }
  0x91   : > { %957 = vmatmul.bf16.gmra.mxu0 %v2431_v57  ;;  %1290 = vmatpush.bf16.msrb.mxu3 %v1962_v4  ;;  %v1671_v4 = vld [vmem:[%s2312_s8 + $0x90] sm:$0xf0]  ;;  %v1679_v8 = vld [vmem:[%s2312_s8 + $0x98] sm:$0xf0]  ;;  %v2519_v11 = vor.u32 %v2013_v6, %v1677_v5  ;;  %v2016_v34 = vld [vmem:[%s2312_s8 + $0xac] sm:$0xf0] }
  0x92   : > { %1006 = vmatmul.bf16.gmra.mxu1 %v2433_v58  ;;  %1144 = vmatpush.bf16.msrb.mxu0 %v1762_v33  ;;  %v2517_v10 = vor.u32 %v2010_v3, %v1671_v4  ;;  %v2521_v12 = vor.u32 %v2011_v7, %v1679_v8  ;;  %v2060_v13 = vld [vmem:[%s2310_s7 + $0x114] sm:$0xf]  ;;  %v1871_v14 = vld [vmem:[%s2310_s7 + $0x118] sm:$0xf0]  ;;  %v1685_v33 = vld [vmem:[%s2312_s8 + $0xa0] sm:$0xf] }
  0x93   : > { %1055 = vmatmul.bf16.gmra.mxu2 %v2435_v59  ;;  %1193 = vmatpush.bf16.msrb.mxu1 %v1826_v36  ;;  %v2076_v15 = vld [vmem:[%s2310_s7 + $0x194] sm:$0xf]  ;;  %v1874_v16 = vor.u32 %v2060_v13, %v1871_v14  ;;  %v1935_v24 = vld [vmem:[%s2310_s7 + $0x198] sm:$0xf0]  ;;  %v2014_v35 = vld [vmem:[%s2312_s8 + $0xa4] sm:$0xf]  ;;  %v2543_v41 = vor.u32 %v2016_v34, %v1685_v33 }
  0x94   : > { %1104 = vmatmul.bf16.gmra.mxu3 %v2437_v60  ;;  %1242 = vmatpush.bf16.msrb.mxu2 %v1890_v28  ;;  %v2028_v25 = vld [vmem:[%s2310_s7 + $0x14] sm:$0xf]  ;;  %v1743_v27 = vld [vmem:[%s2310_s7 + $0x18] sm:$0xf0]  ;;  %v1938_v28 = vor.u32 %v2076_v15, %v1935_v24  ;;  %v1693_v37 = vld [vmem:[%s2312_s8 + $0xa8] sm:$0xf] }
  0x95   : > { %1291 = vmatpush.bf16.msrb.mxu3 %v1954_v32  ;;  %v1746_v29 = vor.u32 %v2028_v25, %v1743_v27  ;;  %v2044_v30 = vld [vmem:[%s2310_s7 + $0x94] sm:$0xf]  ;;  %v1807_v31 = vld [vmem:[%s2310_s7 + $0x98] sm:$0xf0]  ;;  %v2017_v38 = vld [vmem:[%s2312_s8 + $0xb4] sm:$0xf0] }
  0x96   : > { %1145 = vmatpush.bf16.msrb.mxu0 %v1754_v61  ;;  %v1810_v32 = vor.u32 %v2044_v30, %v1807_v31  ;;  %v1687_v36 = vld [vmem:[%s2312_s8 + $0xb0] sm:$0xf0]  ;;  %v2015_v39 = vld [vmem:[%s2312_s8 + $0xac] sm:$0xf]  ;;  %v1695_v40 = vld [vmem:[%s2312_s8 + $0xb8] sm:$0xf0]  ;;  %v2547_v43 = vor.u32 %v2017_v38, %v1693_v37 }
  0x97   : > { %1194 = vmatpush.bf16.msrb.mxu1 %v1818_v0  ;;  %v2545_v42 = vor.u32 %v2014_v35, %v1687_v36  ;;  %v2549_v44 = vor.u32 %v2015_v39, %v1695_v40  ;;  %v2058_v49 = vld [vmem:[%s2310_s7 + $0x104] sm:$0xf]  ;;  %v1863_v50 = vld [vmem:[%s2310_s7 + $0x108] sm:$0xf0]  ;;  %v1701_v1 = vld [vmem:[%s2312_s8 + $0xc0] sm:$0xf] }
  0x98   : > { %1243 = vmatpush.bf16.msrb.mxu2 %v1882_v52  ;;  %v2074_v51 = vld [vmem:[%s2310_s7 + $0x184] sm:$0xf]  ;;  %v1866_v52 = vor.u32 %v2058_v49, %v1863_v50  ;;  %v1927_v53 = vld [vmem:[%s2310_s7 + $0x188] sm:$0xf0]  ;;  %v2020_v2 = vld [vmem:[%s2312_s8 + $0xcc] sm:$0xf0] }
  0x99   : > { %1292 = vmatpush.bf16.msrb.mxu3 %v1946_v56  ;;  %v2026_v54 = vld [vmem:[%s2310_s7 + $0x4] sm:$0xf]  ;;  %v1735_v55 = vld [vmem:[%s2310_s7 + $0x8] sm:$0xf0]  ;;  %v1930_v56 = vor.u32 %v2074_v51, %v1927_v53  ;;  %v1703_v4 = vld [vmem:[%s2312_s8 + $0xd0] sm:$0xf0]  ;;  %v2571_v13 = vor.u32 %v2020_v2, %v1701_v1 }
  0x9a   : > { %1146 = vmatpush.bf16.msrb.mxu0 %v1746_v29  ;;  %v1738_v61 = vor.u32 %v2026_v54, %v1735_v55  ;;  %v2042_v62 = vld [vmem:[%s2310_s7 + $0x84] sm:$0xf]  ;;  %v1799_v63 = vld [vmem:[%s2310_s7 + $0x88] sm:$0xf0]  ;;  %v1709_v5 = vld [vmem:[%s2312_s8 + $0xc8] sm:$0xf] }
  0x9b   : > { %1195 = vmatpush.bf16.msrb.mxu1 %v1810_v32  ;;  %v1802_v0 = vor.u32 %v2042_v62, %v1799_v63  ;;  %v2018_v3 = vld [vmem:[%s2312_s8 + $0xc4] sm:$0xf]  ;;  %v2021_v6 = vld [vmem:[%s2312_s8 + $0xd4] sm:$0xf0]  ;;  %v2019_v7 = vld [vmem:[%s2312_s8 + $0xcc] sm:$0xf] }
  0x9c   : > { %1244 = vmatpush.bf16.msrb.mxu2 %v1874_v16  ;;  %v1711_v8 = vld [vmem:[%s2312_s8 + $0xd8] sm:$0xf0]  ;;  %v2573_v14 = vor.u32 %v2018_v3, %v1703_v4  ;;  %v2575_v15 = vor.u32 %v2021_v6, %v1709_v5  ;;  %v1717_v24 = vld [vmem:[%s2312_s8 + $0xe0] sm:$0xf]  ;;  %v2024_v25 = vld [vmem:[%s2312_s8 + $0xec] sm:$0xf0] }
  0x9d   : > { %1293 = vmatpush.bf16.msrb.mxu3 %v1938_v28  ;;  %v2577_v16 = vor.u32 %v2019_v7, %v1711_v8  ;;  %v2022_v27 = vld [vmem:[%s2312_s8 + $0xe4] sm:$0xf]  ;;  %v1719_v28 = vld [vmem:[%s2312_s8 + $0xf0] sm:$0xf0]  ;;  %v1725_v29 = vld [vmem:[%s2312_s8 + $0xe8] sm:$0xf]  ;;  %v2591_v33 = vor.u32 %v2024_v25, %v1717_v24 }
  0x9e   : > { %1147 = vmatpush.bf16.msrb.mxu0 %v1738_v61  ;;  %v2025_v30 = vld [vmem:[%s2312_s8 + $0xf4] sm:$0xf0]  ;;  %v2023_v31 = vld [vmem:[%s2312_s8 + $0xec] sm:$0xf]  ;;  %v1727_v32 = vld [vmem:[%s2312_s8 + $0xf8] sm:$0xf0]  ;;  %v2593_v34 = vor.u32 %v2022_v27, %v1719_v28 }
  0x9f   : > { %1196 = vmatpush.bf16.msrb.mxu1 %v1802_v0  ;;  %v2595_v35 = vor.u32 %v2025_v30, %v1725_v29  ;;  %v2597_v36 = vor.u32 %v2023_v31, %v1727_v32  ;;  %v338_v0 = vld [vmem:[#allocation2 + $0xd8] sm:$0xff]  ;;  %v340_v6 = vld [vmem:[#allocation2 + $0x50] sm:$0xff]  ;;  %p1987_p11 = scmp.ne.s32.totalorder %s2161_s14, 3 }
  0xa0   : > { %1245 = vmatpush.bf16.msrb.mxu2 %v1866_v52  ;;  %v336_v52 = vld [vmem:[#allocation2 + $0xb0] sm:$0xff] }
  0xa1   : > { %962 = vmatmul.bf16.gmra.mxu0 %v2459_v18  ;;  %1294 = vmatpush.bf16.msrb.mxu3 %v1930_v56 }
  0xa2   : > { %1011 = vmatmul.bf16.gmra.mxu1 %v2461_v19 }
  0xa3   : > { %1060 = vmatmul.bf16.gmra.mxu2 %v2463_v20 }
  0xa4   : > { %1109 = vmatmul.bf16.gmra.mxu3 %v2465_v21 }
  0xb1   : > { %967 = vmatmul.bf16.gmra.mxu0 %v2487_v45 }
  0xb2   : > { %1016 = vmatmul.bf16.gmra.mxu1 %v2489_v46 }
  0xb3   : > { %1065 = vmatmul.bf16.gmra.mxu2 %v2491_v47 }
  0xb4   : > { %1114 = vmatmul.bf16.gmra.mxu3 %v2493_v48 }
  0xc1   : > { %972 = vmatmul.bf16.gmra.mxu0 %v2515_v9 }
  0xc2   : > { %1021 = vmatmul.bf16.gmra.mxu1 %v2517_v10 }
  0xc3   : > { %1070 = vmatmul.bf16.gmra.mxu2 %v2519_v11 }
  0xc4   : > { %1119 = vmatmul.bf16.gmra.mxu3 %v2521_v12 }
  0xd1   : > { %977 = vmatmul.bf16.gmra.mxu0 %v2543_v41 }
  0xd2   : > { %1026 = vmatmul.bf16.gmra.mxu1 %v2545_v42 }
  0xd3   : > { %1075 = vmatmul.bf16.gmra.mxu2 %v2547_v43 }
  0xd4   : > { %1124 = vmatmul.bf16.gmra.mxu3 %v2549_v44 }
  0xe1   : > { %982 = vmatmul.bf16.gmra.mxu0 %v2571_v13 }
  0xe2   : > { %1031 = vmatmul.bf16.gmra.mxu1 %v2573_v14 }
  0xe3   : > { %1080 = vmatmul.bf16.gmra.mxu2 %v2575_v15 }
  0xe4   : > { %1129 = vmatmul.bf16.gmra.mxu3 %v2577_v16 }
  0xf1   : > { %987 = vmatmul.bf16.gmra.mxu0 %v2591_v33 }
  0xf2   : > { %1036 = vmatmul.bf16.gmra.mxu1 %v2593_v34 }
  0xf3   : > { %1085 = vmatmul.bf16.gmra.mxu2 %v2595_v35 }
  0xf4   : > { %1134 = vmatmul.bf16.gmra.mxu3 %v2597_v36 }
  0xfe   : > { %v953_v37 = vpop.f32.mrf.mxu0 }
  0xff   : > { %v1002_v38 = vpop.f32.mrf.mxu1 }
 0x100   : > { %v1003_v39 = vadd.f32 %v1002_v38, %v953_v37 }
 0x101   : > { %1148 = vmatmul.bf16.vlgmr.msrb.gmra.mxu0 %v2394_v17 }
 0x102   : > { %1197 = vmatmul.bf16.vlgmr.msrb.gmra.mxu1 %v2399_v22 }
 0x103   : > { %1246 = vmatmul.bf16.vlgmr.msrb.gmra.mxu2 %v2401_v23 }
 0x104   : > { %1295 = vmatmul.bf16.vlgmr.msrb.gmra.mxu3 %v2405_v26 }
 0x106   : > { %v1051_v40 = vpop.f32.mrf.mxu2  ;;  %v955_v51 = vpop.f32.mrf.mxu0 }
 0x107   : > { %v1052_v49 = vadd.f32 %v1051_v40, %v1003_v39  ;;  %v1100_v50 = vpop.f32.mrf.mxu3  ;;  %v1004_v53 = vpop.f32.mrf.mxu1  ;;  %v344_v40 = vld [vmem:[#allocation2 + $0x80] sm:$0xff] }
 0x108   : > { %v1005_v56 = vadd.f32 %v1004_v53, %v955_v51 }
 0x109   : > { %v1101_v54 = vadd.f32 %v1100_v50, %v1052_v49 }
 0x10b   : > { %v1336_v55 = vadd.f32 %v1101_v54, %v336_v52 }
 0x10d   : > { %1368 = vst [vmem:[#allocation2 + $0xb0] sm:$0xff] %v1336_v55 }
 0x10e   : > { %v1053_v61 = vpop.f32.mrf.mxu2  ;;  %v958_v63 = vpop.f32.mrf.mxu0 }
 0x10f   : > { %v1054_v62 = vadd.f32 %v1053_v61, %v1005_v56  ;;  %v1102_v17 = vpop.f32.mrf.mxu3  ;;  %v1007_v22 = vpop.f32.mrf.mxu1 }
 0x110   : > { %v1008_v26 = vadd.f32 %v1007_v22, %v958_v63  ;;  %v348_v22 = vld [vmem:[#allocation2 + $0x60] sm:$0xff] }
 0x111   : > { %v1103_v1 = vadd.f32 %v1102_v17, %v1054_v62  ;;  %1153 = vmatmul.bf16.gmra.mxu0 %v2431_v57 }
 0x112   : > { %1202 = vmatmul.bf16.gmra.mxu1 %v2433_v58  ;;  %v342_v58 = vld [vmem:[#allocation2 + $0x30] sm:$0xff] }
 0x113   : > { %v1338_v23 = vadd.f32 %v1103_v1, %v338_v0  ;;  %1251 = vmatmul.bf16.gmra.mxu2 %v2435_v59 }
 0x114   : > { %1300 = vmatmul.bf16.gmra.mxu3 %v2437_v60 }
 0x115   : > { %1370 = vst [vmem:[#allocation2 + $0xd8] sm:$0xff] %v1338_v23 }
 0x116   : > { %v1056_v2 = vpop.f32.mrf.mxu2  ;;  %v960_v5 = vpop.f32.mrf.mxu0 }
 0x117   : > { %v1057_v3 = vadd.f32 %v1056_v2, %v1008_v26  ;;  %v1105_v4 = vpop.f32.mrf.mxu3  ;;  %v1009_v7 = vpop.f32.mrf.mxu1 }
 0x118   : > { %v1010_v25 = vadd.f32 %v1009_v7, %v960_v5 }
 0x119   : > { %v1106_v8 = vadd.f32 %v1105_v4, %v1057_v3 }
 0x11b   : > { %v1340_v24 = vadd.f32 %v1106_v8, %v340_v6 }
 0x11d   : > { %1372 = vst [vmem:[#allocation2 + $0x50] sm:$0xff] %v1340_v24 }
 0x11e   : > { %v1058_v57 = vpop.f32.mrf.mxu2  ;;  %v963_v29 = vpop.f32.mrf.mxu0 }
 0x11f   : > { %v1059_v27 = vadd.f32 %v1058_v57, %v1010_v25  ;;  %v1107_v28 = vpop.f32.mrf.mxu3  ;;  %v1012_v30 = vpop.f32.mrf.mxu1 }
 0x120   : > { %v1013_v31 = vadd.f32 %v1012_v30, %v963_v29 }
 0x121   : > { %v1108_v59 = vadd.f32 %v1107_v28, %v1059_v27  ;;  %1158 = vmatmul.bf16.gmra.mxu0 %v2459_v18  ;;  %v352_v27 = vld [vmem:[#allocation2 + $0x38] sm:$0xff] }
 0x122   : > { %1207 = vmatmul.bf16.gmra.mxu1 %v2461_v19  ;;  %v346_v19 = vld [vmem:[#allocation2 + $0xe8] sm:$0xff] }
 0x123   : > { %v1342_v60 = vadd.f32 %v1108_v59, %v342_v58  ;;  %1256 = vmatmul.bf16.gmra.mxu2 %v2463_v20 }
 0x124   : > { %1305 = vmatmul.bf16.gmra.mxu3 %v2465_v21 }
 0x125   : > { %1374 = vst [vmem:[#allocation2 + $0x30] sm:$0xff] %v1342_v60 }
 0x126   : > { %v1061_v32 = vpop.f32.mrf.mxu2  ;;  %v965_v39 = vpop.f32.mrf.mxu0 }
 0x127   : > { %v1062_v37 = vadd.f32 %v1061_v32, %v1013_v31  ;;  %v1110_v38 = vpop.f32.mrf.mxu3  ;;  %v1014_v49 = vpop.f32.mrf.mxu1 }
 0x128   : > { %v1015_v52 = vadd.f32 %v1014_v49, %v965_v39 }
 0x129   : > { %v1111_v50 = vadd.f32 %v1110_v38, %v1062_v37 }
 0x12b   : > { %v1344_v51 = vadd.f32 %v1111_v50, %v344_v40  ;;  %v356_v50 = vld [vmem:[#allocation2 + $0xe0] sm:$0xff] }
 0x12d   : > { %1376 = vst [vmem:[#allocation2 + $0x80] sm:$0xff] %v1344_v51 }
 0x12e   : > { %v1063_v18 = vpop.f32.mrf.mxu2  ;;  %v968_v55 = vpop.f32.mrf.mxu0 }
 0x12f   : > { %v1064_v53 = vadd.f32 %v1063_v18, %v1015_v52  ;;  %v1112_v54 = vpop.f32.mrf.mxu3  ;;  %v1017_v56 = vpop.f32.mrf.mxu1 }
 0x130   : > { %v1018_v61 = vadd.f32 %v1017_v56, %v968_v55 }
 0x131   : > { %v1113_v20 = vadd.f32 %v1112_v54, %v1064_v53  ;;  %1163 = vmatmul.bf16.gmra.mxu0 %v2487_v45 }
 0x132   : > { %1212 = vmatmul.bf16.gmra.mxu1 %v2489_v46  ;;  %v350_v46 = vld [vmem:[#allocation2 + $0x8] sm:$0xff] }
 0x133   : > { %v1346_v21 = vadd.f32 %v1113_v20, %v346_v19  ;;  %1261 = vmatmul.bf16.gmra.mxu2 %v2491_v47 }
 0x134   : > { %1310 = vmatmul.bf16.gmra.mxu3 %v2493_v48 }
 0x135   : > { %1378 = vst [vmem:[#allocation2 + $0xe8] sm:$0xff] %v1346_v21 }
 0x136   : > { %v1066_v62 = vpop.f32.mrf.mxu2  ;;  %v970_v0 = vpop.f32.mrf.mxu0 }
 0x137   : > { %v1067_v17 = vadd.f32 %v1066_v62, %v1018_v61  ;;  %v1115_v63 = vpop.f32.mrf.mxu3  ;;  %v1019_v1 = vpop.f32.mrf.mxu1 }
 0x138   : > { %v1020_v2 = vadd.f32 %v1019_v1, %v970_v0 }
 0x139   : > { %v1116_v23 = vadd.f32 %v1115_v63, %v1067_v17  ;;  %v360_v63 = vld [vmem:[#allocation2 + $0xa8] sm:$0xff] }
 0x13b   : > { %v1348_v26 = vadd.f32 %v1116_v23, %v348_v22 }
 0x13d   : > { %1380 = vst [vmem:[#allocation2 + $0x60] sm:$0xff] %v1348_v26 }
 0x13e   : > { %v1068_v45 = vpop.f32.mrf.mxu2  ;;  %v973_v5 = vpop.f32.mrf.mxu0 }
 0x13f   : > { %v1069_v3 = vadd.f32 %v1068_v45, %v1020_v2  ;;  %v1117_v4 = vpop.f32.mrf.mxu3  ;;  %v1022_v6 = vpop.f32.mrf.mxu1 }
 0x140   : > { %v1023_v7 = vadd.f32 %v1022_v6, %v973_v5 }
 0x141   : > { %v1118_v47 = vadd.f32 %v1117_v4, %v1069_v3  ;;  %1168 = vmatmul.bf16.gmra.mxu0 %v2515_v9 }
 0x142   : > { %1217 = vmatmul.bf16.gmra.mxu1 %v2517_v10  ;;  %v354_v10 = vld [vmem:[#allocation2 + $0x40] sm:$0xff] }
 0x143   : > { %v1350_v48 = vadd.f32 %v1118_v47, %v350_v46  ;;  %1266 = vmatmul.bf16.gmra.mxu2 %v2519_v11 }
 0x144   : > { %1315 = vmatmul.bf16.gmra.mxu3 %v2521_v12 }
 0x145   : > { %1382 = vst [vmem:[#allocation2 + $0x8] sm:$0xff] %v1350_v48  ;;  %v364_v48 = vld [vmem:[#allocation2 + $0xa0] sm:$0xff] }
 0x146   : > { %v1071_v8 = vpop.f32.mrf.mxu2  ;;  %v975_v57 = vpop.f32.mrf.mxu0 }
 0x147   : > { %v1072_v24 = vadd.f32 %v1071_v8, %v1023_v7  ;;  %v1120_v25 = vpop.f32.mrf.mxu3  ;;  %v1024_v28 = vpop.f32.mrf.mxu1 }
 0x148   : > { %v1025_v30 = vadd.f32 %v1024_v28, %v975_v57 }
 0x149   : > { %v1121_v29 = vadd.f32 %v1120_v25, %v1072_v24 }
 0x14b   : > { %v1352_v58 = vadd.f32 %v1121_v29, %v352_v27 }
 0x14d   : > { %1384 = vst [vmem:[#allocation2 + $0x38] sm:$0xff] %v1352_v58 }
 0x14e   : > { %v1073_v9 = vpop.f32.mrf.mxu2  ;;  %v978_v31 = vpop.f32.mrf.mxu0 }
 0x14f   : > { %v1074_v59 = vadd.f32 %v1073_v9, %v1025_v30  ;;  %v1122_v60 = vpop.f32.mrf.mxu3  ;;  %v1027_v32 = vpop.f32.mrf.mxu1 }
 0x150   : > { %v1028_v37 = vadd.f32 %v1027_v32, %v978_v31  ;;  %v337_v31 = vld [vmem:[#allocation2] sm:$0xff] }
 0x151   : > { %v1123_v11 = vadd.f32 %v1122_v60, %v1074_v59  ;;  %1173 = vmatmul.bf16.gmra.mxu0 %v2543_v41 }
 0x152   : > { %1222 = vmatmul.bf16.gmra.mxu1 %v2545_v42  ;;  %v358_v42 = vld [vmem:[#allocation2 + $0x70] sm:$0xff] }
 0x153   : > { %v1354_v12 = vadd.f32 %v1123_v11, %v354_v10  ;;  %1271 = vmatmul.bf16.gmra.mxu2 %v2547_v43 }
 0x154   : > { %1320 = vmatmul.bf16.gmra.mxu3 %v2549_v44 }
 0x155   : > { %1386 = vst [vmem:[#allocation2 + $0x40] sm:$0xff] %v1354_v12 }
 0x156   : > { %v1076_v38 = vpop.f32.mrf.mxu2  ;;  %v980_v49 = vpop.f32.mrf.mxu0 }
 0x157   : > { %v1077_v39 = vadd.f32 %v1076_v38, %v1028_v37  ;;  %v1125_v40 = vpop.f32.mrf.mxu3  ;;  %v1029_v51 = vpop.f32.mrf.mxu1 }
 0x158   : > { %v1030_v53 = vadd.f32 %v1029_v51, %v980_v49  ;;  %v339_v49 = vld [vmem:[#allocation2 + $0x18] sm:$0xff] }
 0x159   : > { %v1126_v52 = vadd.f32 %v1125_v40, %v1077_v39 }
 0x15b   : > { %v1356_v18 = vadd.f32 %v1126_v52, %v356_v50 }
 0x15d   : > { %1388 = vst [vmem:[#allocation2 + $0xe0] sm:$0xff] %v1356_v18 }
 0x15e   : > { %v1078_v41 = vpop.f32.mrf.mxu2  ;;  %v983_v19 = vpop.f32.mrf.mxu0 }
 0x15f   : > { %v1079_v54 = vadd.f32 %v1078_v41, %v1030_v53  ;;  %v1127_v55 = vpop.f32.mrf.mxu3  ;;  %v1032_v56 = vpop.f32.mrf.mxu1 }
 0x160   : > { %v1033_v20 = vadd.f32 %v1032_v56, %v983_v19  ;;  %v341_v19 = vld [vmem:[#allocation2 + $0x68] sm:$0xff] }
 0x161   : > { %v1128_v43 = vadd.f32 %v1127_v55, %v1079_v54  ;;  %1178 = vmatmul.bf16.gmra.mxu0 %v2571_v13 }
 0x162   : > { %1227 = vmatmul.bf16.gmra.mxu1 %v2573_v14  ;;  %v362_v14 = vld [vmem:[#allocation2 + $0x10] sm:$0xff] }
 0x163   : > { %v1358_v44 = vadd.f32 %v1128_v43, %v358_v42  ;;  %1276 = vmatmul.bf16.gmra.mxu2 %v2575_v15 }
 0x164   : > { %1325 = vmatmul.bf16.gmra.mxu3 %v2577_v16 }
 0x165   : > { %1390 = vst [vmem:[#allocation2 + $0x70] sm:$0xff] %v1358_v44 }
 0x166   : > { %v1081_v21 = vpop.f32.mrf.mxu2  ;;  %v985_v17 = vpop.f32.mrf.mxu0 }
 0x167   : > { %v1082_v61 = vadd.f32 %v1081_v21, %v1033_v20  ;;  %v1130_v62 = vpop.f32.mrf.mxu3  ;;  %v1034_v0 = vpop.f32.mrf.mxu1 }
 0x168   : > { %v1035_v23 = vadd.f32 %v1034_v0, %v985_v17  ;;  %v343_v17 = vld [vmem:[#allocation2 + $0x48] sm:$0xff] }
 0x169   : > { %v1131_v22 = vadd.f32 %v1130_v62, %v1082_v61 }
 0x16b   : > { %v1360_v1 = vadd.f32 %v1131_v22, %v360_v63 }
 0x16d   : > { %1392 = vst [vmem:[#allocation2 + $0xa8] sm:$0xff] %v1360_v1 }
 0x16e   : > { %v1083_v13 = vpop.f32.mrf.mxu2  ;;  %v988_v45 = vpop.f32.mrf.mxu0 }
 0x16f   : > { %v1084_v26 = vadd.f32 %v1083_v13, %v1035_v23  ;;  %v1132_v2 = vpop.f32.mrf.mxu3  ;;  %v1037_v3 = vpop.f32.mrf.mxu1 }
 0x170   : > { %v1038_v4 = vadd.f32 %v1037_v3, %v988_v45  ;;  %v345_v45 = vld [vmem:[#allocation2 + $0x88] sm:$0xff] }
 0x171   : > { %v1133_v15 = vadd.f32 %v1132_v2, %v1084_v26  ;;  %1183 = vmatmul.bf16.gmra.mxu0 %v2591_v33 }
 0x172   : > { %1232 = vmatmul.bf16.gmra.mxu1 %v2593_v34  ;;  %v366_v34 = vld [vmem:[#allocation2 + $0x20] sm:$0xff] }
 0x173   : > { %v1362_v16 = vadd.f32 %v1133_v15, %v362_v14  ;;  %1281 = vmatmul.bf16.gmra.mxu2 %v2595_v35 }
 0x174   : > { %1330 = vmatmul.bf16.gmra.mxu3 %v2597_v36 }
 0x175   : > { %1394 = vst [vmem:[#allocation2 + $0x10] sm:$0xff] %v1362_v16 }
 0x176   : > { %v1086_v5 = vpop.f32.mrf.mxu2  ;;  %v990_v47 = vpop.f32.mrf.mxu0 }
 0x177   : > { %v1087_v46 = vadd.f32 %v1086_v5, %v1038_v4  ;;  %v1135_v6 = vpop.f32.mrf.mxu3  ;;  %v1039_v7 = vpop.f32.mrf.mxu1 }
 0x178   : > { %v1040_v25 = vadd.f32 %v1039_v7, %v990_v47  ;;  %v347_v47 = vld [vmem:[#allocation2 + $0xb8] sm:$0xff] }
 0x179   : > { %v1136_v8 = vadd.f32 %v1135_v6, %v1087_v46 }
 0x17b   : > { %v1364_v24 = vadd.f32 %v1136_v8, %v364_v48 }
 0x17d   : > { %1396 = vst [vmem:[#allocation2 + $0xa0] sm:$0xff] %v1364_v24 }
 0x17e   : > { %v1088_v33 = vpop.f32.mrf.mxu2  ;;  %v1149_v28 = vpop.f32.mrf.mxu0 }
 0x17f   : > { %v1089_v57 = vadd.f32 %v1088_v33, %v1040_v25  ;;  %v1137_v27 = vpop.f32.mrf.mxu3  ;;  %v1198_v29 = vpop.f32.mrf.mxu1 }
 0x180   : > { %v1199_v36 = vadd.f32 %v1198_v29, %v1149_v28  ;;  %v349_v28 = vld [vmem:[#allocation2 + $0xf0] sm:$0xff] }
 0x181   : > { %v1138_v35 = vadd.f32 %v1137_v27, %v1089_v57 }
 0x183   : > { %v1366_v58 = vadd.f32 %v1138_v35, %v366_v34 }
 0x185   : > { %1398 = vst [vmem:[#allocation2 + $0x20] sm:$0xff] %v1366_v58 }
 0x186   : > { %v1247_v30 = vpop.f32.mrf.mxu2  ;;  %v1151_v60 = vpop.f32.mrf.mxu0 }
 0x187   : > { %v1248_v9 = vadd.f32 %v1247_v30, %v1199_v36  ;;  %v1296_v59 = vpop.f32.mrf.mxu3  ;;  %v1200_v10 = vpop.f32.mrf.mxu1 }
 0x188   : > { %v1201_v12 = vadd.f32 %v1200_v10, %v1151_v60  ;;  %v351_v60 = vld [vmem:[#allocation2 + $0x78] sm:$0xff] }
 0x189   : > { %v1297_v32 = vadd.f32 %v1296_v59, %v1248_v9 }
 0x18b   : > { %v1337_v11 = vadd.f32 %v1297_v32, %v337_v31 }
 0x18d   : > { %1369 = vst [vmem:[#allocation2] sm:$0xff] %v1337_v11 }
 0x18e   : > { %v1249_v37 = vpop.f32.mrf.mxu2  ;;  %v1154_v40 = vpop.f32.mrf.mxu0 }
 0x18f   : > { %v1250_v38 = vadd.f32 %v1249_v37, %v1201_v12  ;;  %v1298_v39 = vpop.f32.mrf.mxu3  ;;  %v1203_v50 = vpop.f32.mrf.mxu1 }
 0x190   : > { %v1204_v18 = vadd.f32 %v1203_v50, %v1154_v40  ;;  %v353_v40 = vld [vmem:[#allocation2 + $0x58] sm:$0xff] }
 0x191   : > { %v1299_v51 = vadd.f32 %v1298_v39, %v1250_v38 }
 0x193   : > { %v1339_v52 = vadd.f32 %v1299_v51, %v339_v49 }
 0x195   : > { %1371 = vst [vmem:[#allocation2 + $0x18] sm:$0xff] %v1339_v52 }
 0x196   : > { %v1252_v53 = vpop.f32.mrf.mxu2  ;;  %v1156_v55 = vpop.f32.mrf.mxu0 }
 0x197   : > { %v1253_v41 = vadd.f32 %v1252_v53, %v1204_v18  ;;  %v1301_v54 = vpop.f32.mrf.mxu3  ;;  %v1205_v42 = vpop.f32.mrf.mxu1 }
 0x198   : > { %v1206_v44 = vadd.f32 %v1205_v42, %v1156_v55  ;;  %v355_v55 = vld [vmem:[#allocation2 + $0xc8] sm:$0xff] }
 0x199   : > { %v1302_v56 = vadd.f32 %v1301_v54, %v1253_v41 }
 0x19b   : > { %v1341_v43 = vadd.f32 %v1302_v56, %v341_v19 }
 0x19d   : > { %1373 = vst [vmem:[#allocation2 + $0x68] sm:$0xff] %v1341_v43 }
 0x19e   : > { %v1254_v20 = vpop.f32.mrf.mxu2  ;;  %v1159_v62 = vpop.f32.mrf.mxu0 }
 0x19f   : > { %v1255_v21 = vadd.f32 %v1254_v20, %v1206_v44  ;;  %v1303_v61 = vpop.f32.mrf.mxu3  ;;  %v1208_v63 = vpop.f32.mrf.mxu1 }
 0x1a0   : > { %v1209_v1 = vadd.f32 %v1208_v63, %v1159_v62  ;;  %v357_v62 = vld [vmem:[#allocation2 + $0x90] sm:$0xff] }
 0x1a1   : > { %v1304_v0 = vadd.f32 %v1303_v61, %v1255_v21 }
 0x1a3   : > { %v1343_v22 = vadd.f32 %v1304_v0, %v343_v17 }
 0x1a5   : > { %1375 = vst [vmem:[#allocation2 + $0x48] sm:$0xff] %v1343_v22 }
 0x1a6   : > { %v1257_v23 = vpop.f32.mrf.mxu2  ;;  %v1161_v2 = vpop.f32.mrf.mxu0 }
 0x1a7   : > { %v1258_v13 = vadd.f32 %v1257_v23, %v1209_v1  ;;  %v1306_v26 = vpop.f32.mrf.mxu3  ;;  %v1210_v14 = vpop.f32.mrf.mxu1 }
 0x1a8   : > { %v1211_v16 = vadd.f32 %v1210_v14, %v1161_v2  ;;  %v359_v2 = vld [vmem:[#allocation2 + $0xc0] sm:$0xff] }
 0x1a9   : > { %v1307_v3 = vadd.f32 %v1306_v26, %v1258_v13 }
 0x1ab   : > { %v1345_v15 = vadd.f32 %v1307_v3, %v345_v45 }
 0x1ad   : > { %1377 = vst [vmem:[#allocation2 + $0x88] sm:$0xff] %v1345_v15 }
 0x1ae   : > { %v1259_v4 = vpop.f32.mrf.mxu2  ;;  %v1164_v6 = vpop.f32.mrf.mxu0 }
 0x1af   : > { %v1260_v5 = vadd.f32 %v1259_v4, %v1211_v16  ;;  %v1308_v46 = vpop.f32.mrf.mxu3  ;;  %v1213_v48 = vpop.f32.mrf.mxu1 }
 0x1b0   : > { %v1214_v24 = vadd.f32 %v1213_v48, %v1164_v6  ;;  %v361_v6 = vld [vmem:[#allocation2 + $0xd0] sm:$0xff] }
 0x1b1   : > { %v1309_v7 = vadd.f32 %v1308_v46, %v1260_v5 }
 0x1b3   : > { %v1347_v8 = vadd.f32 %v1309_v7, %v347_v47 }
 0x1b5   : > { %1379 = vst [vmem:[#allocation2 + $0xb8] sm:$0xff] %v1347_v8 }
 0x1b6   : > { %v1262_v25 = vpop.f32.mrf.mxu2  ;;  %v1166_v27 = vpop.f32.mrf.mxu0 }
 0x1b7   : > { %v1263_v33 = vadd.f32 %v1262_v25, %v1214_v24  ;;  %v1311_v57 = vpop.f32.mrf.mxu3  ;;  %v1215_v34 = vpop.f32.mrf.mxu1 }
 0x1b8   : > { %v1216_v58 = vadd.f32 %v1215_v34, %v1166_v27 }
 0x1b9   : > { %v1312_v29 = vadd.f32 %v1311_v57, %v1263_v33  ;;  %v363_v57 = vld [vmem:[#allocation2 + $0x28] sm:$0xff] }
 0x1bb   : > { %v1349_v35 = vadd.f32 %v1312_v29, %v349_v28 }
 0x1bd   : > { %1381 = vst [vmem:[#allocation2 + $0xf0] sm:$0xff] %v1349_v35 }
 0x1be   : > { %v1264_v36 = vpop.f32.mrf.mxu2  ;;  %v1169_v59 = vpop.f32.mrf.mxu0 }
 0x1bf   : > { %v1265_v30 = vadd.f32 %v1264_v36, %v1216_v58  ;;  %v1313_v9 = vpop.f32.mrf.mxu3  ;;  %v1218_v31 = vpop.f32.mrf.mxu1 }
 0x1c0   : > { %v1219_v11 = vadd.f32 %v1218_v31, %v1169_v59 }
 0x1c1   : > { %v1314_v10 = vadd.f32 %v1313_v9, %v1265_v30  ;;  %v365_v9 = vld [vmem:[#allocation2 + $0xf8] sm:$0xff] }
 0x1c3   : > { %v1351_v32 = vadd.f32 %v1314_v10, %v351_v60 }
 0x1c5   : > { %1383 = vst [vmem:[#allocation2 + $0x78] sm:$0xff] %v1351_v32 }
 0x1c6   : > { %v1267_v12 = vpop.f32.mrf.mxu2  ;;  %v1171_v39 = vpop.f32.mrf.mxu0 }
 0x1c7   : > { %v1268_v37 = vadd.f32 %v1267_v12, %v1219_v11  ;;  %v1316_v38 = vpop.f32.mrf.mxu3  ;;  %v1220_v49 = vpop.f32.mrf.mxu1 }
 0x1c8   : > { %v1221_v52 = vadd.f32 %v1220_v49, %v1171_v39 }
 0x1c9   : > { %v1317_v50 = vadd.f32 %v1316_v38, %v1268_v37  ;;  %v367_v37 = vld [vmem:[#allocation2 + $0x98] sm:$0xff] }
 0x1cb   : > { %v1353_v51 = vadd.f32 %v1317_v50, %v353_v40 }
 0x1cd   : > { %1385 = vst [vmem:[#allocation2 + $0x58] sm:$0xff] %v1353_v51 }
 0x1ce   : > { %v1269_v18 = vpop.f32.mrf.mxu2  ;;  %v1174_v54 = vpop.f32.mrf.mxu0 }
 0x1cf   : > { %v1270_v53 = vadd.f32 %v1269_v18, %v1221_v52  ;;  %v1318_v41 = vpop.f32.mrf.mxu3  ;;  %v1223_v19 = vpop.f32.mrf.mxu1 }
 0x1d0   : > { %v1224_v43 = vadd.f32 %v1223_v19, %v1174_v54 }
 0x1d1   : > { %v1319_v42 = vadd.f32 %v1318_v41, %v1270_v53 }
 0x1d3   : > { %v1355_v56 = vadd.f32 %v1319_v42, %v355_v55 }
 0x1d5   : > { %1387 = vst [vmem:[#allocation2 + $0xc8] sm:$0xff] %v1355_v56 }
 0x1d6   : > { %v1272_v44 = vpop.f32.mrf.mxu2  ;;  %v1176_v61 = vpop.f32.mrf.mxu0 }
 0x1d7   : > { %v1273_v20 = vadd.f32 %v1272_v44, %v1224_v43  ;;  %v1321_v21 = vpop.f32.mrf.mxu3  ;;  %v1225_v17 = vpop.f32.mrf.mxu1 }
 0x1d8   : > { %v1226_v22 = vadd.f32 %v1225_v17, %v1176_v61 }
 0x1d9   : > { %v1322_v63 = vadd.f32 %v1321_v21, %v1273_v20 }
 0x1db   : > { %v1357_v0 = vadd.f32 %v1322_v63, %v357_v62 }
 0x1dd   : > { %1389 = vst [vmem:[#allocation2 + $0x90] sm:$0xff] %v1357_v0 }
 0x1de   : > { %v1274_v1 = vpop.f32.mrf.mxu2  ;;  %v1179_v26 = vpop.f32.mrf.mxu0 }
 0x1df   : > { %v1275_v23 = vadd.f32 %v1274_v1, %v1226_v22  ;;  %v1323_v13 = vpop.f32.mrf.mxu3  ;;  %v1228_v45 = vpop.f32.mrf.mxu1 }
 0x1e0   : > { %v1229_v15 = vadd.f32 %v1228_v45, %v1179_v26 }
 0x1e1   : > { %v1324_v14 = vadd.f32 %v1323_v13, %v1275_v23 }
 0x1e3   : > { %v1359_v3 = vadd.f32 %v1324_v14, %v359_v2 }
 0x1e5   : > { %1391 = vst [vmem:[#allocation2 + $0xc0] sm:$0xff] %v1359_v3 }
 0x1e6   : > { %v1277_v16 = vpop.f32.mrf.mxu2  ;;  %v1181_v46 = vpop.f32.mrf.mxu0 }
 0x1e7   : > { %v1278_v4 = vadd.f32 %v1277_v16, %v1229_v15  ;;  %v1326_v5 = vpop.f32.mrf.mxu3  ;;  %v1230_v47 = vpop.f32.mrf.mxu1 }
 0x1e8   : > { %v1231_v8 = vadd.f32 %v1230_v47, %v1181_v46 }
 0x1e9   : > { %v1327_v48 = vadd.f32 %v1326_v5, %v1278_v4 }
 0x1eb   : > { %v1361_v7 = vadd.f32 %v1327_v48, %v361_v6 }
 0x1ed   : > { %1393 = vst [vmem:[#allocation2 + $0xd0] sm:$0xff] %v1361_v7 }
 0x1ee   : > { %v1279_v24 = vpop.f32.mrf.mxu2  ;;  %v1184_v27 = vpop.f32.mrf.mxu0 }
 0x1ef   : > { %v1280_v25 = vadd.f32 %v1279_v24, %v1231_v8  ;;  %v1328_v33 = vpop.f32.mrf.mxu3  ;;  %v1233_v28 = vpop.f32.mrf.mxu1 }
 0x1f0   : > { %v1234_v35 = vadd.f32 %v1233_v28, %v1184_v27 }
 0x1f1   : > { %v1329_v34 = vadd.f32 %v1328_v33, %v1280_v25 }
 0x1f3   : > { %v1363_v29 = vadd.f32 %v1329_v34, %v363_v57 }
 0x1f5   : > { %1395 = vst [vmem:[#allocation2 + $0x28] sm:$0xff] %v1363_v29 }
 0x1f6   : > { %v1282_v58 = vpop.f32.mrf.mxu2  ;;  %v1186_v60 = vpop.f32.mrf.mxu0 }
 0x1f7   : > { %v1283_v36 = vadd.f32 %v1282_v58, %v1234_v35  ;;  %v1331_v30 = vpop.f32.mrf.mxu3  ;;  %v1235_v31 = vpop.f32.mrf.mxu1 }
 0x1f8   : > { %v1236_v32 = vadd.f32 %v1235_v31, %v1186_v60 }
 0x1f9   : > { %v1332_v59 = vadd.f32 %v1331_v30, %v1283_v36 }
 0x1fb   : > { %v1365_v10 = vadd.f32 %v1332_v59, %v365_v9 }
 0x1fd   : > { %1397 = vst [vmem:[#allocation2 + $0xf8] sm:$0xff] %v1365_v10 }
 0x1fe   : > { %v1284_v11 = vpop.f32.mrf.mxu2 }
 0x1ff   : > { %v1285_v12 = vadd.f32 %v1284_v11, %v1236_v32  ;;  %v1333_v38 = vpop.f32.mrf.mxu3 }
 0x201   : > { %v1334_v39 = vadd.f32 %v1333_v38, %v1285_v12  ;;  %1403 = sbr.rel (%p1987_p11) target bundleno = 555 (0x22b), region = 63 }
 0x203   : > { %v1367_v40 = vadd.f32 %v1334_v39, %v367_v37 }
 0x205   : > { %1399 = vst [vmem:[#allocation2 + $0x98] sm:$0xff] %v1367_v40 }
 0x206   : > { %v1404_v49 = vld [vmem:[#allocation2 + $0xb0] sm:$0xff]  ;;  %v1436_v50 = vld [vmem:[%s2788_s2] sm:$0x3]  ;;  %v1406_v53 = vld [vmem:[#allocation2 + $0xd8] sm:$0xff] }
 0x207   : > { %v1405_v51 = vld [vmem:[#allocation2] sm:$0xff]  ;;  %v2639_v52 = vperm.slane %v1436_v50, 0  ;;  %v2641_v18 = vperm.slane %v1436_v50, 1  ;;  %v1407_v41 = vld [vmem:[#allocation2 + $0x18] sm:$0xff]  ;;  %v1408_v54 = vld [vmem:[#allocation2 + $0x50] sm:$0xff] }
 0x208   : > { %v1409_v56 = vld [vmem:[#allocation2 + $0x68] sm:$0xff]  ;;  %v1410_v44 = vld [vmem:[#allocation2 + $0x30] sm:$0xff]  ;;  %v1412_v62 = vld [vmem:[#allocation2 + $0x80] sm:$0xff] }
 0x209   : > { %v1442_v55 = vadd.f32 %v2639_v52, %v1404_v49  ;;  %v1443_v19 = vadd.f32 %v2641_v18, %v1405_v51  ;;  %v1444_v42 = vadd.f32 %v2639_v52, %v1406_v53  ;;  %v1445_v43 = vadd.f32 %v2641_v18, %v1407_v41  ;;  %v1411_v21 = vld [vmem:[#allocation2 + $0x48] sm:$0xff]  ;;  %v1415_v23 = vld [vmem:[#allocation2 + $0xb8] sm:$0xff]  ;;  %v1416_v26 = vld [vmem:[#allocation2 + $0x60] sm:$0xff] }
 0x20a   : > { %v1446_v20 = vadd.f32 %v2639_v52, %v1408_v54  ;;  %v1447_v61 = vadd.f32 %v2641_v18, %v1409_v56  ;;  %v1448_v17 = vadd.f32 %v2639_v52, %v1410_v44  ;;  %v1413_v63 = vld [vmem:[#allocation2 + $0x88] sm:$0xff]  ;;  %v1449_v0 = vadd.f32 %v2641_v18, %v1411_v21  ;;  %v1417_v45 = vld [vmem:[#allocation2 + $0xf0] sm:$0xff]  ;;  %v1419_v16 = vld [vmem:[#allocation2 + $0x78] sm:$0xff] }
 0x20b   : > { %1474 = vst [vmem:[%s2789_s3] sm:$0xff] %v1442_v55  ;;  %v1414_v22 = vld [vmem:[#allocation2 + $0xe8] sm:$0xff]  ;;  %v1450_v1 = vadd.f32 %v2639_v52, %v1412_v62  ;;  %v1451_v13 = vadd.f32 %v2641_v18, %v1413_v63  ;;  %v1453_v14 = vadd.f32 %v2641_v18, %v1415_v23  ;;  %v1454_v15 = vadd.f32 %v2639_v52, %v1416_v26  ;;  %v1420_v5 = vld [vmem:[#allocation2 + $0x38] sm:$0xff]  ;;  %v1422_v48 = vld [vmem:[#allocation2 + $0x40] sm:$0xff] }
 0x20c   : > { %1475 = vst [vmem:[%s2789_s3 + $0x8] sm:$0xff] %v1443_v19  ;;  %v1452_v2 = vadd.f32 %v2639_v52, %v1414_v22  ;;  %v1418_v3 = vld [vmem:[#allocation2 + $0x8] sm:$0xff]  ;;  %v1455_v4 = vadd.f32 %v2641_v18, %v1417_v45  ;;  %v1421_v6 = vld [vmem:[#allocation2 + $0x58] sm:$0xff]  ;;  %v1457_v47 = vadd.f32 %v2641_v18, %v1419_v16  ;;  %v1458_v7 = vadd.f32 %v2639_v52, %v1420_v5  ;;  %v1424_v25 = vld [vmem:[#allocation2 + $0xe0] sm:$0xff] }
 0x20d   : > { %1476 = vst [vmem:[%s2789_s3 + $0x10] sm:$0xff] %v1444_v42  ;;  %v1456_v46 = vadd.f32 %v2639_v52, %v1418_v3  ;;  %v1423_v8 = vld [vmem:[#allocation2 + $0xc8] sm:$0xff]  ;;  %v1459_v24 = vadd.f32 %v2641_v18, %v1421_v6  ;;  %v1460_v33 = vadd.f32 %v2639_v52, %v1422_v48  ;;  %v1425_v57 = vld [vmem:[#allocation2 + $0x90] sm:$0xff]  ;;  %v1462_v34 = vadd.f32 %v2639_v52, %v1424_v25  ;;  %v1427_v29 = vld [vmem:[#allocation2 + $0xc0] sm:$0xff] }
 0x20e   : > { %1477 = vst [vmem:[%s2789_s3 + $0x18] sm:$0xff] %v1445_v43  ;;  %v1461_v27 = vadd.f32 %v2641_v18, %v1423_v8  ;;  %v1426_v28 = vld [vmem:[#allocation2 + $0x70] sm:$0xff]  ;;  %v1463_v35 = vadd.f32 %v2641_v18, %v1425_v57  ;;  %v1428_v58 = vld [vmem:[#allocation2 + $0xa8] sm:$0xff]  ;;  %v1465_v9 = vadd.f32 %v2641_v18, %v1427_v29  ;;  %v1432_v32 = vld [vmem:[#allocation2 + $0xa0] sm:$0xff] }
 0x20f   : > { %1478 = vst [vmem:[%s2789_s3 + $0x20] sm:$0xff] %v1446_v20  ;;  %v1464_v36 = vadd.f32 %v2639_v52, %v1426_v28  ;;  %v1429_v30 = vld [vmem:[#allocation2 + $0xd0] sm:$0xff]  ;;  %v1466_v60 = vadd.f32 %v2639_v52, %v1428_v58  ;;  %v1431_v31 = vld [vmem:[#allocation2 + $0x28] sm:$0xff]  ;;  %v1433_v12 = vld [vmem:[#allocation2 + $0xf8] sm:$0xff]  ;;  %v1470_v39 = vadd.f32 %v2639_v52, %v1432_v32 }
 0x210   : > { %1479 = vst [vmem:[%s2789_s3 + $0x28] sm:$0xff] %v1447_v61  ;;  %v1430_v59 = vld [vmem:[#allocation2 + $0x10] sm:$0xff]  ;;  %v1467_v10 = vadd.f32 %v2641_v18, %v1429_v30  ;;  %v1469_v37 = vadd.f32 %v2641_v18, %v1431_v31  ;;  %v1434_v38 = vld [vmem:[#allocation2 + $0x20] sm:$0xff]  ;;  %v1435_v40 = vld [vmem:[#allocation2 + $0x98] sm:$0xff]  ;;  %v1471_v49 = vadd.f32 %v2641_v18, %v1433_v12 }
 0x211   : > { %1480 = vst [vmem:[%s2789_s3 + $0x30] sm:$0xff] %v1448_v17  ;;  %v1468_v11 = vadd.f32 %v2639_v52, %v1430_v59  ;;  %v1472_v50 = vadd.f32 %v2639_v52, %v1434_v38  ;;  %v1473_v51 = vadd.f32 %v2641_v18, %v1435_v40 }
 0x212   : > { %1481 = vst [vmem:[%s2789_s3 + $0x38] sm:$0xff] %v1449_v0 }
 0x213   : > { %1482 = vst [vmem:[%s2789_s3 + $0x40] sm:$0xff] %v1450_v1 }
 0x214   : > { %1483 = vst [vmem:[%s2789_s3 + $0x48] sm:$0xff] %v1451_v13 }
 0x215   : > { %1484 = vst [vmem:[%s2789_s3 + $0x50] sm:$0xff] %v1452_v2 }
 0x216   : > { %1485 = vst [vmem:[%s2789_s3 + $0x58] sm:$0xff] %v1453_v14 }
 0x217   : > { %1486 = vst [vmem:[%s2789_s3 + $0x60] sm:$0xff] %v1454_v15 }
 0x218   : > { %1487 = vst [vmem:[%s2789_s3 + $0x68] sm:$0xff] %v1455_v4 }
 0x219   : > { %1488 = vst [vmem:[%s2789_s3 + $0x70] sm:$0xff] %v1456_v46 }
 0x21a   : > { %1489 = vst [vmem:[%s2789_s3 + $0x78] sm:$0xff] %v1457_v47 }
 0x21b   : > { %1490 = vst [vmem:[%s2789_s3 + $0x80] sm:$0xff] %v1458_v7 }
 0x21c   : > { %1491 = vst [vmem:[%s2789_s3 + $0x88] sm:$0xff] %v1459_v24 }
 0x21d   : > { %1492 = vst [vmem:[%s2789_s3 + $0x90] sm:$0xff] %v1460_v33 }
 0x21e   : > { %1493 = vst [vmem:[%s2789_s3 + $0x98] sm:$0xff] %v1461_v27 }
 0x21f   : > { %1494 = vst [vmem:[%s2789_s3 + $0xa0] sm:$0xff] %v1462_v34 }
 0x220   : > { %1495 = vst [vmem:[%s2789_s3 + $0xa8] sm:$0xff] %v1463_v35 }
 0x221   : > { %1496 = vst [vmem:[%s2789_s3 + $0xb0] sm:$0xff] %v1464_v36 }
 0x222   : > { %1497 = vst [vmem:[%s2789_s3 + $0xb8] sm:$0xff] %v1465_v9 }
 0x223   : > { %1498 = vst [vmem:[%s2789_s3 + $0xc0] sm:$0xff] %v1466_v60 }
 0x224   : > { %1499 = vst [vmem:[%s2789_s3 + $0xc8] sm:$0xff] %v1467_v10 }
 0x225   : > { %1500 = vst [vmem:[%s2789_s3 + $0xd0] sm:$0xff] %v1468_v11 }
 0x226   : > { %1501 = vst [vmem:[%s2789_s3 + $0xd8] sm:$0xff] %v1469_v37 }
 0x227   : > { %1502 = vst [vmem:[%s2789_s3 + $0xe0] sm:$0xff] %v1470_v39 }
 0x228   : > { %1503 = vst [vmem:[%s2789_s3 + $0xe8] sm:$0xff] %v1471_v49 }
 0x229   : > { %1504 = vst [vmem:[%s2789_s3 + $0xf0] sm:$0xff] %v1472_v50 }
 0x22a   : > { %1505 = vst [vmem:[%s2789_s3 + $0xf8] sm:$0xff] %v1473_v51 }
 0x22b PF: > { %s13_s16 = sadd.s32 1, %s2169_s16   ;;  %s2790_s12 = smov %s2157_s13 }
 0x22c   : > { %p10_p12 = scmp.ge.s32.totalorder %s13_s16, 6   ;;  %s2791_s13 = smov %s2227_s20 }
 0x22d   : > { %s2792_s14 = smov %s2165_s15  ;;  %s2793_s15 = smov %s2795_s17 }
 0x22e   :  { %12 = sbr.rel (!%p10_p12) target bundleno = 3 (0x3), region = 101 }

// kernel: discriminator_forward.14
= control target key start
LH: loop header
LB: loop body
LE: loop exit
PB: predicated region body
PF: predicated region fallthrough
CT: control target
= control target key end

     0   :  { %s222_s0 = inlined_call_operand.vmem [shape: f32[32,512], index: 0, kind: input, shape index: {}]   ;;  %s223_s1 = inlined_call_operand.vmem [shape: f32[1,512], index: 1, kind: input, shape index: {}]   ;;  %s224_s2 = inlined_call_operand.vmem [shape: f32[1,512], index: 2, kind: input, shape index: {}]   ;;  %s225_s3 = inlined_call_operand.vmem [shape: bf16[32,512], index: 3, kind: output, shape index: {}]  }
   0x1   :  { %v14_v0 = vld [vmem:[%s222_s0] sm:$0xff]  ;;  %v15_v1 = vld [vmem:[%s222_s0 + $0x8] sm:$0xff]  ;;  %v16_v6 = vld [vmem:[%s222_s0 + $0x10] sm:$0xff] }
   0x2   :  { %v30_v2 = vld [vmem:[%s223_s1] sm:$0xf]  ;;  %v17_v7 = vld [vmem:[%s222_s0 + $0x18] sm:$0xff]  ;;  %v19_v13 = vld [vmem:[%s222_s0 + $0x28] sm:$0xff] }
   0x3   :  { %v32_v3 = vperm.slane %v30_v2, 0  ;;  %v33_v4 = vperm.slane %v30_v2, 1  ;;  %v56_v5 = vld [vmem:[%s224_s2] sm:$0xf]  ;;  %v34_v10 = vperm.slane %v30_v2, 2  ;;  %v35_v11 = vperm.slane %v30_v2, 3 }
   0x4   :  { %v58_v8 = vperm.slane %v56_v5, 0  ;;  %v156_v9 = vperm.slane %v56_v5, 1  ;;  %v18_v12 = vld [vmem:[%s222_s0 + $0x20] sm:$0xff]  ;;  %v60_v16 = vperm.slane %v56_v5, 2  ;;  %v61_v17 = vperm.slane %v56_v5, 3  ;;  %v20_v18 = vld [vmem:[%s222_s0 + $0x30] sm:$0xff] }
   0x5   :  { %v40_v14 = vmul.f32 %v32_v3, %v14_v0  ;;  %v41_v15 = vmul.f32 %v33_v4, %v15_v1  ;;  %v21_v19 = vld [vmem:[%s222_s0 + $0x38] sm:$0xff]  ;;  %v42_v20 = vmul.f32 %v34_v10, %v16_v6  ;;  %v43_v21 = vmul.f32 %v35_v11, %v17_v7  ;;  %v22_v32 = vld [vmem:[%s222_s0 + $0x40] sm:$0xff]  ;;  %v23_v37 = vld [vmem:[%s222_s0 + $0x48] sm:$0xff] }
   0x6   :  { %v44_v22 = vmul.f32 %v32_v3, %v18_v12  ;;  %v45_v23 = vmul.f32 %v33_v4, %v19_v13  ;;  %v46_v26 = vmul.f32 %v34_v10, %v20_v18  ;;  %v47_v27 = vmul.f32 %v35_v11, %v21_v19  ;;  %v24_v38 = vld [vmem:[%s222_s0 + $0x50] sm:$0xff]  ;;  %v25_v43 = vld [vmem:[%s222_s0 + $0x58] sm:$0xff]  ;;  %v26_v44 = vld [vmem:[%s222_s0 + $0x60] sm:$0xff] }
   0x7   :  { %v66_v24 = vadd.f32 %v58_v8, %v40_v14  ;;  %v67_v25 = vadd.f32 %v156_v9, %v41_v15  ;;  %v68_v28 = vadd.f32 %v60_v16, %v42_v20  ;;  %v69_v29 = vadd.f32 %v61_v17, %v43_v21  ;;  %v27_v49 = vld [vmem:[%s222_s0 + $0x68] sm:$0xff]  ;;  %v28_v50 = vld [vmem:[%s222_s0 + $0x70] sm:$0xff]  ;;  %v29_v55 = vld [vmem:[%s222_s0 + $0x78] sm:$0xff] }
   0x8   :  { %v70_v30 = vadd.f32 %v58_v8, %v44_v22  ;;  %v71_v31 = vadd.f32 %v156_v9, %v45_v23  ;;  %v72_v35 = vadd.f32 %v60_v16, %v46_v26  ;;  %v73_v36 = vadd.f32 %v61_v17, %v47_v27 }
   0x9   :  { %v82_v33 = vmax.f32 %v66_v24, 0.0  ;;  %v83_v34 = vmax.f32 %v67_v25, 0.0  ;;  %v84_v39 = vmax.f32 %v68_v28, 0.0  ;;  %v85_v40 = vmax.f32 %v69_v29, 0.0 }
   0xa   :  { %v86_v41 = vmax.f32 %v70_v30, 0.0  ;;  %v87_v42 = vmax.f32 %v71_v31, 0.0  ;;  %v88_v46 = vmax.f32 %v72_v35, 0.0  ;;  %v89_v47 = vmax.f32 %v73_v36, 0.0 }
   0xb   :  { %v98_v45 = vpack.c.bf16 %v83_v34, %v82_v33  ;;  %v48_v48 = vmul.f32 %v32_v3, %v22_v32  ;;  %v99_v51 = vpack.c.bf16 %v85_v40, %v84_v39  ;;  %v49_v53 = vmul.f32 %v33_v4, %v23_v37 }
   0xc   :  { %v100_v52 = vpack.c.bf16 %v87_v42, %v86_v41  ;;  %v50_v54 = vmul.f32 %v34_v10, %v24_v38  ;;  %v101_v56 = vpack.c.bf16 %v89_v47, %v88_v46  ;;  %v51_v58 = vmul.f32 %v35_v11, %v25_v43 }
   0xd   :  { %106 = vst [vmem:[%s225_s3] sm:$0xff] %v98_v45  ;;  %v74_v57 = vadd.f32 %v58_v8, %v48_v48  ;;  %v52_v59 = vmul.f32 %v32_v3, %v26_v44  ;;  %v75_v60 = vadd.f32 %v156_v9, %v49_v53  ;;  %v53_v62 = vmul.f32 %v33_v4, %v27_v49 }
   0xe   :  { %107 = vst [vmem:[%s225_s3 + $0x8] sm:$0xff] %v99_v51  ;;  %v76_v61 = vadd.f32 %v60_v16, %v50_v54  ;;  %v54_v63 = vmul.f32 %v34_v10, %v28_v50  ;;  %v77_v1 = vadd.f32 %v61_v17, %v51_v58  ;;  %v55_v5 = vmul.f32 %v35_v11, %v29_v55 }
   0xf   :  { %108 = vst [vmem:[%s225_s3 + $0x10] sm:$0xff] %v100_v52  ;;  %v90_v0 = vmax.f32 %v74_v57, 0.0  ;;  %v78_v2 = vadd.f32 %v58_v8, %v52_v59  ;;  %v91_v3 = vmax.f32 %v75_v60, 0.0  ;;  %v79_v7 = vadd.f32 %v156_v9, %v53_v62 }
  0x10   :  { %109 = vst [vmem:[%s225_s3 + $0x18] sm:$0xff] %v101_v56  ;;  %v92_v6 = vmax.f32 %v76_v61, 0.0  ;;  %v80_v12 = vadd.f32 %v60_v16, %v54_v63  ;;  %v93_v13 = vmax.f32 %v77_v1, 0.0  ;;  %v81_v10 = vadd.f32 %v61_v17, %v55_v5 }
  0x11   :  { %v94_v4 = vmax.f32 %v78_v2, 0.0  ;;  %v102_v14 = vpack.c.bf16 %v91_v3, %v90_v0  ;;  %v95_v15 = vmax.f32 %v79_v7, 0.0 }
  0x12   :  { %v96_v18 = vmax.f32 %v80_v12, 0.0  ;;  %v103_v19 = vpack.c.bf16 %v93_v13, %v92_v6  ;;  %v97_v20 = vmax.f32 %v81_v10, 0.0 }
  0x13   :  { %110 = vst [vmem:[%s225_s3 + $0x20] sm:$0xff] %v102_v14  ;;  %v104_v8 = vpack.c.bf16 %v95_v15, %v94_v4 }
  0x14   :  { %111 = vst [vmem:[%s225_s3 + $0x28] sm:$0xff] %v103_v19  ;;  %v105_v11 = vpack.c.bf16 %v97_v20, %v96_v18 }
  0x15   :  { %112 = vst [vmem:[%s225_s3 + $0x30] sm:$0xff] %v104_v8 }
  0x16   :  { %113 = vst [vmem:[%s225_s3 + $0x38] sm:$0xff] %v105_v11 }

// kernel: discriminator_forward.13
= control target key start
LH: loop header
LB: loop body
LE: loop exit
PB: predicated region body
PF: predicated region fallthrough
CT: control target
= control target key end

     0   :  { %s2388_s12 = smov 0   ;;  %s2390_s13 = smov 0   ;;  %s2830_s0 = inlined_call_operand.vmem [shape: bf16[32,4096], index: 0, kind: input, shape index: {}]   ;;  %s2831_s1 = inlined_call_operand.vmem [shape: bf16[4096,512], index: 1, kind: input, shape index: {}]   ;;  %s2832_s2 = inlined_call_operand.vmem [shape: f32[1,512], index: 2, kind: input, shape index: {}]   ;;  %s2833_s3 = inlined_call_operand.vmem [shape: f32[32,512], index: 3, kind: output, shape index: {}]  }
   0x1   :  { %s2392_s14 = smov 0   ;;  %s2394_s15 = smov 0  }
   0x2   :  { %s2396_s16 = smov 0  }
   0x3 LB: > { %s22_s17 = sadd.s32 1, %s2361_s15  ;;  %p41_p1 = scmp.ne.s32.totalorder %s2353_s13, %s2349_s12  ;;  %s2365_s16 = sphi %s2396_s16, %s13_s16   ;;  %s2361_s15 = sphi %s2394_s15, %s2837_s15   ;;  %s2357_s14 = sphi %s2392_s14, %s2836_s14   ;;  %s2353_s13 = sphi %s2390_s13, %s2835_s13   ;;  %s2349_s12 = sphi %s2388_s12, %s2834_s12  }
   0x4   : > { %p23_p0 = scmp.ge.s32.totalorder %s22_s17, 8  ;;  %p42_p2 = scmp.eq.s32.totalorder %s2365_s16, 0 }
   0x5   : > { %s34_s19 = sadd.s32 1, %s2353_s13  ;;  %p1589_p5 = scmp.ge.s32.totalorder %s2365_s16, 8 }
   0x6   : > { %s2839_s17 = smov (%p23_p0, %s22_s17), 0  ;;  %p43_p3 = por %p42_p2, %p41_p1 }
   0x7   : > { %s30_s18 = ssub.s32 %s2361_s15, %s2839_s17  ;;  %143 = sbr.rel (%p1589_p5) target bundleno = 24 (0x18), region = 20 }
   0x8   : > { %p32_p4 = scmp.eq.s32.totalorder %s30_s18, 0 }
   0xa   : > { %s2423_s20 = scalar_select %p32_p4, %s2353_s13, %s34_s19  }
   0xc   : > { %146 = sbr.rel (!%p43_p3) target bundleno = 24 (0x18), region = 24  ;;  %s148_s21 = sand.u32 (%p43_p3), 1, %s2353_s13  }
   0xd   : > { %s2148_s22 = sshll.u32 (%p43_p3), %s2361_s15, 4  ;;  %s1590_s23 = sshll.u32 (%p43_p3), %s148_s21, 6 }
   0xe   : > { %s156_s26 = scalar_lea.vmem (%p43_p3), %s2830_s0, %s2148_s22  ;;  %s150_s27 = scalar_lea.vmem (%p43_p3), [#allocation3], %s1590_s23 }
   0xf   : > { %v169_v0 = vld [vmem:[%s156_s26] sm:$0xff] (%p43_p3)  ;;  %v171_v1 = vld [vmem:[%s156_s26 + $0x8] sm:$0xff] (%p43_p3) }
  0x10   : > { %v173_v2 = vld [vmem:[%s156_s26 + $0x80] sm:$0xff] (%p43_p3)  ;;  %170 = vst [vmem:[%s150_s27] sm:$0xff] (%p43_p3), %v169_v0  ;;  %v175_v3 = vld [vmem:[%s156_s26 + $0x88] sm:$0xff] (%p43_p3) }
  0x11   : > { %172 = vst [vmem:[%s150_s27 + $0x8] sm:$0xff] %v171_v1  ;;  %v177_v4 = vld [vmem:[%s156_s26 + $0x100] sm:$0xff]  ;;  %v179_v5 = vld [vmem:[%s156_s26 + $0x108] sm:$0xff] }
  0x12   : > { %174 = vst [vmem:[%s150_s27 + $0x10] sm:$0xff] %v173_v2  ;;  %v181_v6 = vld [vmem:[%s156_s26 + $0x180] sm:$0xff]  ;;  %v183_v7 = vld [vmem:[%s156_s26 + $0x188] sm:$0xff] }
  0x13   : > { %176 = vst [vmem:[%s150_s27 + $0x18] sm:$0xff] %v175_v3 }
  0x14   : > { %178 = vst [vmem:[%s150_s27 + $0x20] sm:$0xff] %v177_v4 }
  0x15   : > { %180 = vst [vmem:[%s150_s27 + $0x28] sm:$0xff] %v179_v5 }
  0x16   : > { %182 = vst [vmem:[%s150_s27 + $0x30] sm:$0xff] %v181_v6 }
  0x17   : > { %184 = vst [vmem:[%s150_s27 + $0x38] sm:$0xff] %v183_v7 }
  0x18 PF: > { %p1593_p6 = scmp.ge.s32.totalorder %s2365_s16, 1  ;;  %p199_p7 = scmp.lt.s32.totalorder %s2365_s16, 9 }
  0x1a   : > { %p200_p8 = pnand %p1593_p6, %p199_p7 }
  0x1b   : > { %s206_s28 = sand.u32 (!%p200_p8), 1, %s2349_s12   ;;  %s1595_s29 = sshll.u32 (!%p200_p8), %s2357_s14, 6 }
  0x1c   : > { %203 = sbr.rel (%p200_p8) target bundleno = 372 (0x174), region = 51  ;;  %s1594_s30 = sshll.u32 (!%p200_p8), %s206_s28, 6 }
  0x1d   : > { %p239_p9 = scmp.lt.s32.totalorder (!%p200_p8), %s1595_s29, 511  ;;  %s2440_s8 = scalar_lea.vmem (!%p200_p8), [#allocation3], %s1594_s30 }
  0x1e   : > { %p1598_p10 = scmp.ne.s32.totalorder (!%p200_p8), %s2357_s14, 0 }
  0x21   : > { %s2841_s29 = smov (!%p239_p9, %s1595_s29), 511  ;;  %255 = sbr.rel (%p1598_p10) target bundleno = 55 (0x37), region = 59 }
  0x22   : > { %s2149_s4 = sshll.u32 %s2841_s29, 4 }
  0x23   : > { %s2438_s7 = scalar_lea.vmem %s2831_s1, %s2149_s4 }
  0x26   : > { %v2367_v8 = vmov 0.0  }
  0x27   : > { %256 = vst [vmem:[#allocation2 + $0x30] sm:$0xff] %v2367_v8 }
  0x28   : > { %257 = vst [vmem:[#allocation2] sm:$0xff] %v2367_v8 }
  0x29   : > { %258 = vst [vmem:[#allocation2 + $0x58] sm:$0xff] %v2367_v8 }
  0x2a   : > { %259 = vst [vmem:[#allocation2 + $0x18] sm:$0xff] %v2367_v8 }
  0x2b   : > { %260 = vst [vmem:[#allocation2 + $0x50] sm:$0xff] %v2367_v8 }
  0x2c   : > { %261 = vst [vmem:[#allocation2 + $0x68] sm:$0xff] %v2367_v8 }
  0x2d   : > { %262 = vst [vmem:[#allocation2 + $0x8] sm:$0xff] %v2367_v8 }
  0x2e   : > { %263 = vst [vmem:[#allocation2 + $0x48] sm:$0xff] %v2367_v8 }
  0x2f   : > { %264 = vst [vmem:[#allocation2 + $0x40] sm:$0xff] %v2367_v8 }
  0x30   : > { %265 = vst [vmem:[#allocation2 + $0x20] sm:$0xff] %v2367_v8 }
  0x31   : > { %266 = vst [vmem:[#allocation2 + $0x10] sm:$0xff] %v2367_v8 }
  0x32   : > { %267 = vst [vmem:[#allocation2 + $0x38] sm:$0xff] %v2367_v8 }
  0x33   : > { %268 = vst [vmem:[#allocation2 + $0x60] sm:$0xff] %v2367_v8 }
  0x34   : > { %269 = vst [vmem:[#allocation2 + $0x70] sm:$0xff] %v2367_v8 }
  0x35   : > { %270 = vst [vmem:[#allocation2 + $0x78] sm:$0xff] %v2367_v8 }
  0x36   : > { %271 = vst [vmem:[#allocation2 + $0x28] sm:$0xff] %v2367_v8 }
  0x37 PF: > { %v1745_v9 = vld [vmem:[%s2438_s7 + $0xe0] sm:$0xf]  ;;  %v2188_v10 = vld [vmem:[%s2438_s7 + $0xec] sm:$0xf0]  ;;  %p2143_p11 = scmp.ne.s32.totalorder %s2357_s14, 7 }
  0x38   : > { %v1873_v11 = vld [vmem:[%s2438_s7 + $0x1e0] sm:$0xf]  ;;  %v1746_v12 = vor.u32 %v2188_v10, %v1745_v9  ;;  %v2220_v13 = vld [vmem:[%s2438_s7 + $0x1ec] sm:$0xf0] }
  0x39   : > { %v2001_v14 = vld [vmem:[%s2438_s7 + $0x2e0] sm:$0xf]  ;;  %v2252_v15 = vld [vmem:[%s2438_s7 + $0x2ec] sm:$0xf0]  ;;  %v1874_v16 = vor.u32 %v2220_v13, %v1873_v11 }
  0x3a   : > { %v2002_v17 = vor.u32 %v2252_v15, %v2001_v14  ;;  %v2129_v18 = vld [vmem:[%s2438_s7 + $0x3e0] sm:$0xf]  ;;  %v2284_v19 = vld [vmem:[%s2438_s7 + $0x3ec] sm:$0xf0]  ;;  %1104 = vmatpush.bf16.msra.mxu0 %v1746_v12 }
  0x3b   : > { %v1729_v20 = vld [vmem:[%s2438_s7 + $0xc0] sm:$0xf]  ;;  %v2130_v21 = vor.u32 %v2284_v19, %v2129_v18  ;;  %v2184_v22 = vld [vmem:[%s2438_s7 + $0xcc] sm:$0xf0]  ;;  %1123 = vmatpush.bf16.msra.mxu1 %v1874_v16 }
  0x3c   : > { %v1857_v23 = vld [vmem:[%s2438_s7 + $0x1c0] sm:$0xf]  ;;  %v2216_v24 = vld [vmem:[%s2438_s7 + $0x1cc] sm:$0xf0]  ;;  %1142 = vmatpush.bf16.msra.mxu2 %v2002_v17  ;;  %v1730_v25 = vor.u32 %v2184_v22, %v1729_v20 }
  0x3d   : > { %v1858_v26 = vor.u32 %v2216_v24, %v1857_v23  ;;  %v1985_v27 = vld [vmem:[%s2438_s7 + $0x2c0] sm:$0xf]  ;;  %v2248_v28 = vld [vmem:[%s2438_s7 + $0x2cc] sm:$0xf0]  ;;  %1161 = vmatpush.bf16.msra.mxu3 %v2130_v21 }
  0x3e   : > { %v2113_v29 = vld [vmem:[%s2438_s7 + $0x3c0] sm:$0xf]  ;;  %v1986_v30 = vor.u32 %v2248_v28, %v1985_v27  ;;  %v2280_v31 = vld [vmem:[%s2438_s7 + $0x3cc] sm:$0xf0]  ;;  %1105 = vmatpush.bf16.msra.mxu0 %v1730_v25 }
  0x3f   : > { %v1713_v32 = vld [vmem:[%s2438_s7 + $0xa0] sm:$0xf]  ;;  %v2180_v33 = vld [vmem:[%s2438_s7 + $0xac] sm:$0xf0]  ;;  %v2114_v34 = vor.u32 %v2280_v31, %v2113_v29  ;;  %1124 = vmatpush.bf16.msra.mxu1 %v1858_v26 }
  0x40   : > { %v1841_v35 = vld [vmem:[%s2438_s7 + $0x1a0] sm:$0xf]  ;;  %v2212_v36 = vld [vmem:[%s2438_s7 + $0x1ac] sm:$0xf0]  ;;  %v1714_v38 = vor.u32 %v2180_v33, %v1713_v32  ;;  %1143 = vmatpush.bf16.msra.mxu2 %v1986_v30 }
  0x41   : > { %v1969_v37 = vld [vmem:[%s2438_s7 + $0x2a0] sm:$0xf]  ;;  %v2244_v39 = vld [vmem:[%s2438_s7 + $0x2ac] sm:$0xf0]  ;;  %v1842_v42 = vor.u32 %v2212_v36, %v1841_v35  ;;  %1162 = vmatpush.bf16.msra.mxu3 %v2114_v34 }
  0x42   : > { %v2097_v40 = vld [vmem:[%s2438_s7 + $0x3a0] sm:$0xf]  ;;  %v2276_v41 = vld [vmem:[%s2438_s7 + $0x3ac] sm:$0xf0]  ;;  %v1970_v43 = vor.u32 %v2244_v39, %v1969_v37  ;;  %1106 = vmatpush.bf16.msra.mxu0 %v1714_v38  ;;  %v2150_v39 = vld [vmem:[%s2440_s8 + $0x4] sm:$0xf] }
  0x43   : > { %v1697_v44 = vld [vmem:[%s2438_s7 + $0x80] sm:$0xf]  ;;  %v2176_v45 = vld [vmem:[%s2438_s7 + $0x8c] sm:$0xf0]  ;;  %v2098_v47 = vor.u32 %v2276_v41, %v2097_v40  ;;  %1125 = vmatpush.bf16.msra.mxu1 %v1842_v42  ;;  %v1603_v40 = vld [vmem:[%s2440_s8 + $0x10] sm:$0xf0] }
  0x44   : > { %v1825_v46 = vld [vmem:[%s2438_s7 + $0x180] sm:$0xf]  ;;  %v2208_v48 = vld [vmem:[%s2438_s7 + $0x18c] sm:$0xf0]  ;;  %v1698_v53 = vor.u32 %v2176_v45, %v1697_v44  ;;  %1144 = vmatpush.bf16.msra.mxu2 %v1970_v43  ;;  %v2250_v41 = vld [vmem:[%s2438_s7 + $0x2e4] sm:$0xf] }
  0x45   : > { %v1953_v49 = vld [vmem:[%s2438_s7 + $0x280] sm:$0xf]  ;;  %v2240_v50 = vld [vmem:[%s2438_s7 + $0x28c] sm:$0xf0]  ;;  %v1826_v54 = vor.u32 %v2208_v48, %v1825_v46  ;;  %1163 = vmatpush.bf16.msra.mxu3 %v2098_v47  ;;  %v2003_v42 = vld [vmem:[%s2438_s7 + $0x2f0] sm:$0xf0] }
  0x46   : > { %v2081_v51 = vld [vmem:[%s2438_s7 + $0x380] sm:$0xf]  ;;  %v2272_v52 = vld [vmem:[%s2438_s7 + $0x38c] sm:$0xf0]  ;;  %v1954_v55 = vor.u32 %v2240_v50, %v1953_v49  ;;  %1107 = vmatpush.bf16.msra.mxu0 %v1698_v53  ;;  %v1609_v44 = vld [vmem:[%s2440_s8 + $0x8] sm:$0xf]  ;;  %v2006_v53 = vor.u32 %v2250_v41, %v2003_v42 }
  0x47   : > { %v1681_v56 = vld [vmem:[%s2438_s7 + $0x60] sm:$0xf]  ;;  %v2172_v57 = vld [vmem:[%s2438_s7 + $0x6c] sm:$0xf0]  ;;  %v2082_v59 = vor.u32 %v2272_v52, %v2081_v51  ;;  %1126 = vmatpush.bf16.msra.mxu1 %v1826_v54  ;;  %v2218_v45 = vld [vmem:[%s2438_s7 + $0x1e4] sm:$0xf] }
  0x48   : > { %v1809_v58 = vld [vmem:[%s2438_s7 + $0x160] sm:$0xf]  ;;  %v2204_v60 = vld [vmem:[%s2438_s7 + $0x16c] sm:$0xf0]  ;;  %v1682_v1 = vor.u32 %v2172_v57, %v1681_v56  ;;  %1145 = vmatpush.bf16.msra.mxu2 %v1954_v55  ;;  %v1875_v46 = vld [vmem:[%s2438_s7 + $0x1f0] sm:$0xf0] }
  0x49   : > { %v1937_v61 = vld [vmem:[%s2438_s7 + $0x260] sm:$0xf]  ;;  %v2236_v62 = vld [vmem:[%s2438_s7 + $0x26c] sm:$0xf0]  ;;  %v1810_v2 = vor.u32 %v2204_v60, %v1809_v58  ;;  %1164 = vmatpush.bf16.msra.mxu3 %v2082_v59  ;;  %v2153_v49 = vld [vmem:[%s2440_s8 + $0x14] sm:$0xf0]  ;;  %v1878_v58 = vor.u32 %v2218_v45, %v1875_v46 }
  0x4a   : > { %v2065_v63 = vld [vmem:[%s2438_s7 + $0x360] sm:$0xf]  ;;  %v2268_v0 = vld [vmem:[%s2438_s7 + $0x36c] sm:$0xf0]  ;;  %v1938_v3 = vor.u32 %v2236_v62, %v1937_v61  ;;  %1108 = vmatpush.bf16.msra.mxu0 %v1682_v1  ;;  %v2151_v50 = vld [vmem:[%s2440_s8 + $0xc] sm:$0xf]  ;;  %v2527_v62 = vor.u32 %v2150_v39, %v1603_v40 }
  0x4b   : > { %v1665_v4 = vld [vmem:[%s2438_s7 + $0x40] sm:$0xf]  ;;  %v2168_v5 = vld [vmem:[%s2438_s7 + $0x4c] sm:$0xf0]  ;;  %v2066_v7 = vor.u32 %v2268_v0, %v2065_v63  ;;  %1127 = vmatpush.bf16.msra.mxu1 %v1810_v2  ;;  %v1611_v51 = vld [vmem:[%s2440_s8 + $0x18] sm:$0xf0]  ;;  %v2529_v63 = vor.u32 %v2153_v49, %v1609_v44 }
  0x4c   : > { %v1793_v6 = vld [vmem:[%s2438_s7 + $0x140] sm:$0xf]  ;;  %v2200_v8 = vld [vmem:[%s2438_s7 + $0x14c] sm:$0xf0]  ;;  %v1666_v13 = vor.u32 %v2168_v5, %v1665_v4  ;;  %1146 = vmatpush.bf16.msra.mxu2 %v1938_v3  ;;  %v2186_v54 = vld [vmem:[%s2438_s7 + $0xe4] sm:$0xf]  ;;  %v2533_v2 = vor.u32 %v2151_v50, %v1611_v51 }
  0x4d   : > { %v1921_v9 = vld [vmem:[%s2438_s7 + $0x240] sm:$0xf]  ;;  %v2232_v10 = vld [vmem:[%s2438_s7 + $0x24c] sm:$0xf0]  ;;  %v1794_v14 = vor.u32 %v2200_v8, %v1793_v6  ;;  %1165 = vmatpush.bf16.msra.mxu3 %v2066_v7  ;;  %v1747_v55 = vld [vmem:[%s2438_s7 + $0xf0] sm:$0xf0] }
  0x4e   : > { %v2049_v11 = vld [vmem:[%s2438_s7 + $0x340] sm:$0xf]  ;;  %v2264_v12 = vld [vmem:[%s2438_s7 + $0x34c] sm:$0xf0]  ;;  %v1922_v15 = vor.u32 %v2232_v10, %v1921_v9  ;;  %1109 = vmatpush.bf16.msra.mxu0 %v1666_v13  ;;  %v2282_v56 = vld [vmem:[%s2438_s7 + $0x3e4] sm:$0xf]  ;;  %v1750_v3 = vor.u32 %v2186_v54, %v1747_v55 }
  0x4f   : > { %v1649_v16 = vld [vmem:[%s2438_s7 + $0x20] sm:$0xf]  ;;  %v2164_v17 = vld [vmem:[%s2438_s7 + $0x2c] sm:$0xf0]  ;;  %v2050_v19 = vor.u32 %v2264_v12, %v2049_v11  ;;  %1128 = vmatpush.bf16.msra.mxu1 %v1794_v14  ;;  %v2131_v59 = vld [vmem:[%s2438_s7 + $0x3f0] sm:$0xf0] }
  0x50   : > { %v1777_v18 = vld [vmem:[%s2438_s7 + $0x120] sm:$0xf]  ;;  %v2196_v20 = vld [vmem:[%s2438_s7 + $0x12c] sm:$0xf0]  ;;  %v1650_v26 = vor.u32 %v2164_v17, %v1649_v16  ;;  %1147 = vmatpush.bf16.msra.mxu2 %v1922_v15  ;;  %v2246_v60 = vld [vmem:[%s2438_s7 + $0x2c4] sm:$0xf]  ;;  %v2134_v4 = vor.u32 %v2282_v56, %v2131_v59 }
  0x51   : > { %v1905_v21 = vld [vmem:[%s2438_s7 + $0x220] sm:$0xf]  ;;  %v2228_v22 = vld [vmem:[%s2438_s7 + $0x22c] sm:$0xf0]  ;;  %v1778_v30 = vor.u32 %v2196_v20, %v1777_v18  ;;  %1166 = vmatpush.bf16.msra.mxu3 %v2050_v19  ;;  %v1987_v61 = vld [vmem:[%s2438_s7 + $0x2d0] sm:$0xf0] }
  0x52   : > { %v2033_v23 = vld [vmem:[%s2438_s7 + $0x320] sm:$0xf]  ;;  %v2260_v24 = vld [vmem:[%s2438_s7 + $0x32c] sm:$0xf0]  ;;  %v1906_v31 = vor.u32 %v2228_v22, %v1905_v21  ;;  %1110 = vmatpush.bf16.msra.mxu0 %v1650_v26  ;;  %v2214_v0 = vld [vmem:[%s2438_s7 + $0x1c4] sm:$0xf]  ;;  %v1990_v5 = vor.u32 %v2246_v60, %v1987_v61 }
  0x53   : > { %v1633_v25 = vld [vmem:[%s2438_s7] sm:$0xf]  ;;  %v2160_v27 = vld [vmem:[%s2438_s7 + $0xc] sm:$0xf0]  ;;  %v2034_v35 = vor.u32 %v2260_v24, %v2033_v23  ;;  %1129 = vmatpush.bf16.msra.mxu1 %v1778_v30  ;;  %v1859_v1 = vld [vmem:[%s2438_s7 + $0x1d0] sm:$0xf0] }
  0x54   : > { %v1761_v28 = vld [vmem:[%s2438_s7 + $0x100] sm:$0xf]  ;;  %v2192_v29 = vld [vmem:[%s2438_s7 + $0x10c] sm:$0xf0]  ;;  %v1634_v43 = vor.u32 %v2160_v27, %v1633_v25  ;;  %1148 = vmatpush.bf16.msra.mxu2 %v1906_v31  ;;  %v2182_v6 = vld [vmem:[%s2438_s7 + $0xc4] sm:$0xf]  ;;  %v1862_v9 = vor.u32 %v2214_v0, %v1859_v1 }
  0x55   : > { %v1889_v32 = vld [vmem:[%s2438_s7 + $0x200] sm:$0xf]  ;;  %v2224_v33 = vld [vmem:[%s2438_s7 + $0x20c] sm:$0xf0]  ;;  %v1762_v47 = vor.u32 %v2192_v29, %v1761_v28  ;;  %1167 = vmatpush.bf16.msra.mxu3 %v2034_v35  ;;  %v1731_v7 = vld [vmem:[%s2438_s7 + $0xd0] sm:$0xf0] }
  0x56   : > { %v2017_v34 = vld [vmem:[%s2438_s7 + $0x300] sm:$0xf]  ;;  %v2256_v36 = vld [vmem:[%s2438_s7 + $0x30c] sm:$0xf0]  ;;  %v1890_v48 = vor.u32 %v2224_v33, %v1889_v32  ;;  %1111 = vmatpush.bf16.msra.mxu0 %v1634_v43  ;;  %v2278_v8 = vld [vmem:[%s2438_s7 + $0x3c4] sm:$0xf]  ;;  %v1734_v15 = vor.u32 %v2182_v6, %v1731_v7 }
  0x57   : > { %v1601_v37 = vld [vmem:[%s2440_s8] sm:$0xf]  ;;  %v2152_v38 = vld [vmem:[%s2440_s8 + $0xc] sm:$0xf0]  ;;  %v2018_v52 = vor.u32 %v2256_v36, %v2017_v34  ;;  %1130 = vmatpush.bf16.msra.mxu1 %v1762_v47  ;;  %v2115_v10 = vld [vmem:[%s2438_s7 + $0x3d0] sm:$0xf0] }
  0x58   : > { %v2522_v57 = vor.u32 %v2152_v38, %v1601_v37  ;;  %1149 = vmatpush.bf16.msra.mxu2 %v1890_v48  ;;  %v2242_v11 = vld [vmem:[%s2438_s7 + $0x2a4] sm:$0xf]  ;;  %v1971_v12 = vld [vmem:[%s2438_s7 + $0x2b0] sm:$0xf0]  ;;  %v2118_v16 = vor.u32 %v2278_v8, %v2115_v10  ;;  %v1617_v34 = vld [vmem:[%s2440_s8 + $0x20] sm:$0xf] }
  0x59   : > { %1168 = vmatpush.bf16.msra.mxu3 %v2018_v52  ;;  %v2210_v13 = vld [vmem:[%s2438_s7 + $0x1a4] sm:$0xf]  ;;  %v1843_v14 = vld [vmem:[%s2438_s7 + $0x1b0] sm:$0xf0]  ;;  %v1974_v17 = vor.u32 %v2242_v11, %v1971_v12  ;;  %v2156_v35 = vld [vmem:[%s2440_s8 + $0x2c] sm:$0xf0] }
  0x5a   : > { %1112 = vmatmul.bf16.vlgmr.msra.gmra.mxu0 %v2522_v57  ;;  %1131 = vmatmul.bf16.vlgmr.msra.gmra.mxu1 %v2527_v62  ;;  %v2178_v18 = vld [vmem:[%s2438_s7 + $0xa4] sm:$0xf]  ;;  %v1715_v19 = vld [vmem:[%s2438_s7 + $0xb0] sm:$0xf0]  ;;  %v1846_v21 = vor.u32 %v2210_v13, %v1843_v14  ;;  %v1625_v41 = vld [vmem:[%s2440_s8 + $0x28] sm:$0xf] }
  0x5b   : > { %1199 = vmatpush.bf16.msrb.mxu1 %v1878_v58  ;;  %1150 = vmatmul.bf16.vlgmr.msra.gmra.mxu2 %v2529_v63  ;;  %v2274_v20 = vld [vmem:[%s2438_s7 + $0x3a4] sm:$0xf]  ;;  %v2099_v22 = vld [vmem:[%s2438_s7 + $0x3b0] sm:$0xf0]  ;;  %v1718_v27 = vor.u32 %v2178_v18, %v1715_v19  ;;  %v2157_v45 = vld [vmem:[%s2440_s8 + $0x34] sm:$0xf0] }
  0x5c   : > { %1218 = vmatpush.bf16.msrb.mxu2 %v2006_v53  ;;  %1169 = vmatmul.bf16.vlgmr.msra.gmra.mxu3 %v2533_v2  ;;  %v2238_v23 = vld [vmem:[%s2438_s7 + $0x284] sm:$0xf]  ;;  %v1955_v24 = vld [vmem:[%s2438_s7 + $0x290] sm:$0xf0]  ;;  %v2102_v31 = vor.u32 %v2274_v20, %v2099_v22  ;;  %v2155_v46 = vld [vmem:[%s2440_s8 + $0x2c] sm:$0xf]  ;;  %v2574_v53 = vor.u32 %v2156_v35, %v1617_v34  ;;  %v2581_v60 = vor.u32 %v2157_v45, %v1625_v41 }
  0x5d   : > { %1180 = vmatpush.bf16.msrb.mxu0 %v1750_v3  ;;  %1237 = vmatpush.bf16.msrb.mxu3 %v2134_v4  ;;  %v2206_v25 = vld [vmem:[%s2438_s7 + $0x184] sm:$0xf]  ;;  %v1827_v26 = vld [vmem:[%s2438_s7 + $0x190] sm:$0xf0]  ;;  %v1958_v32 = vor.u32 %v2238_v23, %v1955_v24  ;;  %v1627_v47 = vld [vmem:[%s2440_s8 + $0x38] sm:$0xf0] }
  0x5e   : > { %v2174_v28 = vld [vmem:[%s2438_s7 + $0x84] sm:$0xf]  ;;  %v1699_v29 = vld [vmem:[%s2438_s7 + $0x90] sm:$0xf0]  ;;  %v1830_v36 = vor.u32 %v2206_v25, %v1827_v26  ;;  %v2585_v1 = vor.u32 %v2155_v46, %v1627_v47  ;;  %v2189_v41 = vld [vmem:[%s2438_s7 + $0xf4] sm:$0xf0] }
  0x5f   : > { %1200 = vmatpush.bf16.msrb.mxu1 %v1862_v9  ;;  %v2270_v30 = vld [vmem:[%s2438_s7 + $0x384] sm:$0xf]  ;;  %v2083_v33 = vld [vmem:[%s2438_s7 + $0x390] sm:$0xf0]  ;;  %v1702_v44 = vor.u32 %v2174_v28, %v1699_v29  ;;  %v2253_v28 = vld [vmem:[%s2438_s7 + $0x2f4] sm:$0xf0] }
  0x60   : > { %1219 = vmatpush.bf16.msrb.mxu2 %v1990_v5  ;;  %v2154_v37 = vld [vmem:[%s2440_s8 + $0x24] sm:$0xf]  ;;  %v1619_v38 = vld [vmem:[%s2440_s8 + $0x30] sm:$0xf0]  ;;  %v2086_v48 = vor.u32 %v2270_v30, %v2083_v33  ;;  %v1993_v45 = vld [vmem:[%s2438_s7 + $0x2c8] sm:$0xf] }
  0x61   : > { %1181 = vmatpush.bf16.msrb.mxu0 %v1734_v15  ;;  %1238 = vmatpush.bf16.msrb.mxu3 %v2118_v16  ;;  %v2234_v39 = vld [vmem:[%s2438_s7 + $0x264] sm:$0xf]  ;;  %v1939_v40 = vld [vmem:[%s2438_s7 + $0x270] sm:$0xf0]  ;;  %v2579_v59 = vor.u32 %v2154_v37, %v1619_v38  ;;  %v2249_v46 = vld [vmem:[%s2438_s7 + $0x2d4] sm:$0xf0] }
  0x62   : > { %v2202_v42 = vld [vmem:[%s2438_s7 + $0x164] sm:$0xf]  ;;  %v1811_v43 = vld [vmem:[%s2438_s7 + $0x170] sm:$0xf0]  ;;  %v1942_v49 = vor.u32 %v2234_v39, %v1939_v40  ;;  %v1753_v40 = vld [vmem:[%s2438_s7 + $0xe8] sm:$0xf] }
  0x63   : > { %1201 = vmatpush.bf16.msrb.mxu1 %v1846_v21  ;;  %v2170_v50 = vld [vmem:[%s2438_s7 + $0x64] sm:$0xf]  ;;  %v1683_v51 = vld [vmem:[%s2438_s7 + $0x70] sm:$0xf0]  ;;  %v1814_v54 = vor.u32 %v2202_v42, %v1811_v43  ;;  %v2137_v42 = vld [vmem:[%s2438_s7 + $0x3e8] sm:$0xf] }
  0x64   : > { %1220 = vmatpush.bf16.msrb.mxu2 %v1974_v17  ;;  %v2266_v52 = vld [vmem:[%s2438_s7 + $0x364] sm:$0xf]  ;;  %v2067_v55 = vld [vmem:[%s2438_s7 + $0x370] sm:$0xf0]  ;;  %v1686_v3 = vor.u32 %v2170_v50, %v1683_v51  ;;  %v1737_v50 = vld [vmem:[%s2438_s7 + $0xc8] sm:$0xf] }
  0x65   : > { %1182 = vmatpush.bf16.msrb.mxu0 %v1718_v27  ;;  %1239 = vmatpush.bf16.msrb.mxu3 %v2102_v31  ;;  %v2230_v56 = vld [vmem:[%s2438_s7 + $0x244] sm:$0xf]  ;;  %v1923_v58 = vld [vmem:[%s2438_s7 + $0x250] sm:$0xf0]  ;;  %v2070_v4 = vor.u32 %v2266_v52, %v2067_v55  ;;  %v2009_v27 = vld [vmem:[%s2438_s7 + $0x2e8] sm:$0xf] }
  0x66   : > { %v2198_v61 = vld [vmem:[%s2438_s7 + $0x144] sm:$0xf]  ;;  %v1795_v0 = vld [vmem:[%s2438_s7 + $0x150] sm:$0xf0]  ;;  %v1926_v5 = vor.u32 %v2230_v56, %v1923_v58  ;;  %v1881_v31 = vld [vmem:[%s2438_s7 + $0x1e8] sm:$0xf]  ;;  %v2010_v39 = vor.u32 %v2253_v28, %v2009_v27 }
  0x67   : > { %1202 = vmatpush.bf16.msrb.mxu1 %v1830_v36  ;;  %v2166_v6 = vld [vmem:[%s2438_s7 + $0x44] sm:$0xf]  ;;  %v1667_v7 = vld [vmem:[%s2438_s7 + $0x50] sm:$0xf0]  ;;  %v1798_v9 = vor.u32 %v2198_v61, %v1795_v0  ;;  %v2185_v51 = vld [vmem:[%s2438_s7 + $0xd4] sm:$0xf0] }
  0x68   : > { %1221 = vmatpush.bf16.msrb.mxu2 %v1958_v32  ;;  %v2262_v8 = vld [vmem:[%s2438_s7 + $0x344] sm:$0xf]  ;;  %v2051_v10 = vld [vmem:[%s2438_s7 + $0x350] sm:$0xf0]  ;;  %v1670_v15 = vor.u32 %v2166_v6, %v1667_v7  ;;  %v2221_v32 = vld [vmem:[%s2438_s7 + $0x1f4] sm:$0xf0] }
  0x69   : > { %1183 = vmatpush.bf16.msrb.mxu0 %v1702_v44  ;;  %1240 = vmatpush.bf16.msrb.mxu3 %v2086_v48  ;;  %v2226_v11 = vld [vmem:[%s2438_s7 + $0x224] sm:$0xf]  ;;  %v1907_v12 = vld [vmem:[%s2438_s7 + $0x230] sm:$0xf0]  ;;  %v2054_v17 = vor.u32 %v2262_v8, %v2051_v10  ;;  %v1882_v43 = vor.u32 %v2221_v32, %v1881_v31  ;;  %v2285_v44 = vld [vmem:[%s2438_s7 + $0x3f4] sm:$0xf0] }
  0x6a   : > { %1117 = vmatmul.bf16.gmra.mxu0 %v2574_v53  ;;  %1136 = vmatmul.bf16.gmra.mxu1 %v2579_v59  ;;  %v2194_v13 = vld [vmem:[%s2438_s7 + $0x124] sm:$0xf]  ;;  %v1779_v14 = vld [vmem:[%s2438_s7 + $0x130] sm:$0xf0]  ;;  %v1910_v18 = vor.u32 %v2226_v11, %v1907_v12  ;;  %v2138_v52 = vor.u32 %v2285_v44, %v2137_v42  ;;  %v1865_v55 = vld [vmem:[%s2438_s7 + $0x1c8] sm:$0xf] }
  0x6b   : > { %1203 = vmatpush.bf16.msrb.mxu1 %v1814_v54  ;;  %1155 = vmatmul.bf16.gmra.mxu2 %v2581_v60  ;;  %v2162_v16 = vld [vmem:[%s2438_s7 + $0x24] sm:$0xf]  ;;  %v1651_v19 = vld [vmem:[%s2438_s7 + $0x30] sm:$0xf0]  ;;  %v1782_v22 = vor.u32 %v2194_v13, %v1779_v14  ;;  %v1994_v54 = vor.u32 %v2249_v46, %v1993_v45  ;;  %v2217_v56 = vld [vmem:[%s2438_s7 + $0x1d4] sm:$0xf0] }
  0x6c   : > { %1222 = vmatpush.bf16.msrb.mxu2 %v1942_v49  ;;  %1174 = vmatmul.bf16.gmra.mxu3 %v2585_v1  ;;  %v2258_v20 = vld [vmem:[%s2438_s7 + $0x324] sm:$0xf]  ;;  %v2035_v21 = vld [vmem:[%s2438_s7 + $0x330] sm:$0xf0]  ;;  %v1654_v29 = vor.u32 %v2162_v16, %v1651_v19  ;;  %v1754_v49 = vor.u32 %v2189_v41, %v1753_v40  ;;  %v2121_v58 = vld [vmem:[%s2438_s7 + $0x3c8] sm:$0xf] }
  0x6d   : > { %1184 = vmatpush.bf16.msrb.mxu0 %v1686_v3  ;;  %1241 = vmatpush.bf16.msrb.mxu3 %v2070_v4  ;;  %v2222_v23 = vld [vmem:[%s2438_s7 + $0x204] sm:$0xf]  ;;  %v1891_v24 = vld [vmem:[%s2438_s7 + $0x210] sm:$0xf0]  ;;  %v2038_v33 = vor.u32 %v2258_v20, %v2035_v21  ;;  %v2281_v61 = vld [vmem:[%s2438_s7 + $0x3d4] sm:$0xf0]  ;;  %v1738_v4 = vor.u32 %v2185_v51, %v1737_v50 }
  0x6e   : > { %v2190_v25 = vld [vmem:[%s2438_s7 + $0x104] sm:$0xf]  ;;  %v1763_v26 = vld [vmem:[%s2438_s7 + $0x110] sm:$0xf0]  ;;  %v1894_v34 = vor.u32 %v2222_v23, %v1891_v24  ;;  %v1977_v0 = vld [vmem:[%s2438_s7 + $0x2a8] sm:$0xf]  ;;  %v2122_v8 = vor.u32 %v2281_v61, %v2121_v58 }
  0x6f   : > { %1204 = vmatpush.bf16.msrb.mxu1 %v1798_v9  ;;  %v2158_v30 = vld [vmem:[%s2438_s7 + $0x4] sm:$0xf]  ;;  %v1635_v35 = vld [vmem:[%s2438_s7 + $0x10] sm:$0xf0]  ;;  %v1766_v38 = vor.u32 %v2190_v25, %v1763_v26  ;;  %v2245_v3 = vld [vmem:[%s2438_s7 + $0x2b4] sm:$0xf0] }
  0x70   : > { %1223 = vmatpush.bf16.msrb.mxu2 %v1926_v5  ;;  %v2254_v36 = vld [vmem:[%s2438_s7 + $0x304] sm:$0xf]  ;;  %v2019_v37 = vld [vmem:[%s2438_s7 + $0x310] sm:$0xf0]  ;;  %v1638_v47 = vor.u32 %v2158_v30, %v1635_v35  ;;  %v1866_v5 = vor.u32 %v2217_v56, %v1865_v55  ;;  %v1721_v6 = vld [vmem:[%s2438_s7 + $0xa8] sm:$0xf]  ;;  %v1978_v9 = vor.u32 %v2245_v3, %v1977_v0 }
  0x71   : > { %1185 = vmatpush.bf16.msrb.mxu0 %v1670_v15  ;;  %1242 = vmatpush.bf16.msrb.mxu3 %v2054_v17  ;;  %v2022_v48 = vor.u32 %v2254_v36, %v2019_v37  ;;  %v2181_v7 = vld [vmem:[%s2438_s7 + $0xb4] sm:$0xf0]  ;;  %v1849_v10 = vld [vmem:[%s2438_s7 + $0x1a8] sm:$0xf] }
  0x72   : > { %v2213_v11 = vld [vmem:[%s2438_s7 + $0x1b4] sm:$0xf0]  ;;  %v2105_v12 = vld [vmem:[%s2438_s7 + $0x3a8] sm:$0xf]  ;;  %v1722_v16 = vor.u32 %v2181_v7, %v1721_v6 }
  0x73   : > { %1205 = vmatpush.bf16.msrb.mxu1 %v1782_v22  ;;  %v2277_v13 = vld [vmem:[%s2438_s7 + $0x3b4] sm:$0xf0]  ;;  %v1961_v14 = vld [vmem:[%s2438_s7 + $0x288] sm:$0xf]  ;;  %v1850_v17 = vor.u32 %v2213_v11, %v1849_v10 }
  0x74   : > { %1224 = vmatpush.bf16.msrb.mxu2 %v1910_v18  ;;  %v2241_v15 = vld [vmem:[%s2438_s7 + $0x294] sm:$0xf0]  ;;  %v1705_v18 = vld [vmem:[%s2438_s7 + $0x88] sm:$0xf]  ;;  %v2106_v20 = vor.u32 %v2277_v13, %v2105_v12 }
  0x75   : > { %1186 = vmatpush.bf16.msrb.mxu0 %v1654_v29  ;;  %1243 = vmatpush.bf16.msrb.mxu3 %v2038_v33  ;;  %v2177_v19 = vld [vmem:[%s2438_s7 + $0x94] sm:$0xf0]  ;;  %v1962_v21 = vor.u32 %v2241_v15, %v1961_v14  ;;  %v1833_v22 = vld [vmem:[%s2438_s7 + $0x188] sm:$0xf] }
  0x76   : > { %v2209_v23 = vld [vmem:[%s2438_s7 + $0x194] sm:$0xf0]  ;;  %v2089_v24 = vld [vmem:[%s2438_s7 + $0x388] sm:$0xf]  ;;  %v1706_v28 = vor.u32 %v2177_v19, %v1705_v18 }
  0x77   : > { %1206 = vmatpush.bf16.msrb.mxu1 %v1766_v38  ;;  %v2273_v25 = vld [vmem:[%s2438_s7 + $0x394] sm:$0xf0]  ;;  %v1945_v26 = vld [vmem:[%s2438_s7 + $0x268] sm:$0xf]  ;;  %v1834_v29 = vor.u32 %v2209_v23, %v1833_v22  ;;  %v1755_v22 = vld [vmem:[%s2438_s7 + $0xf8] sm:$0xf0] }
  0x78   : > { %1225 = vmatpush.bf16.msrb.mxu2 %v1894_v34  ;;  %v2237_v27 = vld [vmem:[%s2438_s7 + $0x274] sm:$0xf0]  ;;  %v1689_v30 = vld [vmem:[%s2438_s7 + $0x68] sm:$0xf]  ;;  %v2090_v32 = vor.u32 %v2273_v25, %v2089_v24  ;;  %v2219_v23 = vld [vmem:[%s2438_s7 + $0x1ec] sm:$0xf] }
  0x79   : > { %1187 = vmatpush.bf16.msrb.mxu0 %v1638_v47  ;;  %1244 = vmatpush.bf16.msrb.mxu3 %v2022_v48  ;;  %v2173_v31 = vld [vmem:[%s2438_s7 + $0x74] sm:$0xf0]  ;;  %v1946_v33 = vor.u32 %v2237_v27, %v1945_v26  ;;  %v1817_v34 = vld [vmem:[%s2438_s7 + $0x168] sm:$0xf]  ;;  %v1883_v24 = vld [vmem:[%s2438_s7 + $0x1f8] sm:$0xf0] }
  0x7a   : > { %1207 = vmatmul.bf16.vlgmr.msrb.gmra.mxu1 %v2527_v62  ;;  %v2205_v35 = vld [vmem:[%s2438_s7 + $0x174] sm:$0xf0]  ;;  %v2073_v36 = vld [vmem:[%s2438_s7 + $0x368] sm:$0xf]  ;;  %v1690_v40 = vor.u32 %v2173_v31, %v1689_v30  ;;  %v2283_v25 = vld [vmem:[%s2438_s7 + $0x3ec] sm:$0xf] }
  0x7b   : > { %1275 = vmatpush.bf16.msra.mxu1 %v1882_v43  ;;  %1226 = vmatmul.bf16.vlgmr.msrb.gmra.mxu2 %v2529_v63  ;;  %v2269_v37 = vld [vmem:[%s2438_s7 + $0x374] sm:$0xf0]  ;;  %v1929_v38 = vld [vmem:[%s2438_s7 + $0x248] sm:$0xf]  ;;  %v1818_v41 = vor.u32 %v2205_v35, %v1817_v34  ;;  %v2139_v26 = vld [vmem:[%s2438_s7 + $0x3f8] sm:$0xf0] }
  0x7c   : > { %1294 = vmatpush.bf16.msra.mxu2 %v2010_v39  ;;  %1188 = vmatmul.bf16.vlgmr.msrb.gmra.mxu0 %v2522_v57  ;;  %v2233_v39 = vld [vmem:[%s2438_s7 + $0x254] sm:$0xf0]  ;;  %v1673_v42 = vld [vmem:[%s2438_s7 + $0x48] sm:$0xf]  ;;  %v2074_v44 = vor.u32 %v2269_v37, %v2073_v36  ;;  %v1995_v30 = vld [vmem:[%s2438_s7 + $0x2d8] sm:$0xf0]  ;;  %v2142_v34 = vor.u32 %v2283_v25, %v2139_v26 }
  0x7d   : > { %1256 = vmatpush.bf16.msra.mxu0 %v1754_v49  ;;  %1313 = vmatpush.bf16.msra.mxu3 %v2138_v52  ;;  %v2169_v43 = vld [vmem:[%s2438_s7 + $0x54] sm:$0xf0]  ;;  %v1930_v45 = vor.u32 %v2233_v39, %v1929_v38  ;;  %v1801_v46 = vld [vmem:[%s2438_s7 + $0x148] sm:$0xf]  ;;  %v2183_v35 = vld [vmem:[%s2438_s7 + $0xcc] sm:$0xf] }
  0x7e   : > { %1245 = vmatmul.bf16.vlgmr.msrb.gmra.mxu3 %v2533_v2  ;;  %v2201_v47 = vld [vmem:[%s2438_s7 + $0x154] sm:$0xf0]  ;;  %v2057_v48 = vld [vmem:[%s2438_s7 + $0x348] sm:$0xf]  ;;  %v1674_v52 = vor.u32 %v2169_v43, %v1673_v42  ;;  %v1739_v36 = vld [vmem:[%s2438_s7 + $0xd8] sm:$0xf0] }
  0x7f   : > { %1276 = vmatpush.bf16.msra.mxu1 %v1866_v5  ;;  %v2265_v49 = vld [vmem:[%s2438_s7 + $0x354] sm:$0xf0]  ;;  %v1913_v50 = vld [vmem:[%s2438_s7 + $0x228] sm:$0xf]  ;;  %v2215_v38 = vld [vmem:[%s2438_s7 + $0x1cc] sm:$0xf] }
  0x80   : > { %1295 = vmatpush.bf16.msra.mxu2 %v1994_v54  ;;  %v2229_v51 = vld [vmem:[%s2438_s7 + $0x234] sm:$0xf0]  ;;  %v1802_v54 = vor.u32 %v2201_v47, %v1801_v46  ;;  %v1657_v55 = vld [vmem:[%s2438_s7 + $0x28] sm:$0xf]  ;;  %v2058_v58 = vor.u32 %v2265_v49, %v2057_v48  ;;  %v1867_v39 = vld [vmem:[%s2438_s7 + $0x1d8] sm:$0xf0] }
  0x81   : > { %1257 = vmatpush.bf16.msra.mxu0 %v1738_v4  ;;  %1314 = vmatpush.bf16.msra.mxu3 %v2122_v8  ;;  %v2165_v56 = vld [vmem:[%s2438_s7 + $0x34] sm:$0xf0]  ;;  %v1914_v61 = vor.u32 %v2229_v51, %v1913_v50  ;;  %v1785_v0 = vld [vmem:[%s2438_s7 + $0x128] sm:$0xf]  ;;  %v2251_v8 = vld [vmem:[%s2438_s7 + $0x2ec] sm:$0xf]  ;;  %v1870_v47 = vor.u32 %v2215_v38, %v1867_v39 }
  0x82   : > { %v2197_v3 = vld [vmem:[%s2438_s7 + $0x134] sm:$0xf0]  ;;  %v2041_v4 = vld [vmem:[%s2438_s7 + $0x328] sm:$0xf]  ;;  %v1658_v10 = vor.u32 %v2165_v56, %v1657_v55  ;;  %v2123_v42 = vld [vmem:[%s2438_s7 + $0x3d8] sm:$0xf0] }
  0x83   : > { %1277 = vmatpush.bf16.msra.mxu1 %v1850_v17  ;;  %v2261_v5 = vld [vmem:[%s2438_s7 + $0x334] sm:$0xf0]  ;;  %v1897_v6 = vld [vmem:[%s2438_s7 + $0x208] sm:$0xf]  ;;  %v1786_v11 = vor.u32 %v2197_v3, %v1785_v0  ;;  %v2243_v43 = vld [vmem:[%s2438_s7 + $0x2ac] sm:$0xf] }
  0x84   : > { %1296 = vmatpush.bf16.msra.mxu2 %v1978_v9  ;;  %v2225_v7 = vld [vmem:[%s2438_s7 + $0x214] sm:$0xf0]  ;;  %v2011_v9 = vld [vmem:[%s2438_s7 + $0x2f8] sm:$0xf0]  ;;  %v1641_v12 = vld [vmem:[%s2438_s7 + $0x8] sm:$0xf]  ;;  %v2042_v15 = vor.u32 %v2261_v5, %v2041_v4 }
  0x85   : > { %1258 = vmatpush.bf16.msra.mxu0 %v1722_v16  ;;  %1315 = vmatpush.bf16.msra.mxu3 %v2106_v20  ;;  %v2161_v13 = vld [vmem:[%s2438_s7 + $0x14] sm:$0xf0]  ;;  %v1769_v14 = vld [vmem:[%s2438_s7 + $0x108] sm:$0xf]  ;;  %v1898_v16 = vor.u32 %v2225_v7, %v1897_v6  ;;  %v2014_v20 = vor.u32 %v2251_v8, %v2011_v9  ;;  %v1723_v46 = vld [vmem:[%s2438_s7 + $0xb8] sm:$0xf0] }
  0x86   : > { %v2193_v17 = vld [vmem:[%s2438_s7 + $0x114] sm:$0xf0]  ;;  %v2025_v18 = vld [vmem:[%s2438_s7 + $0x308] sm:$0xf]  ;;  %v1642_v27 = vor.u32 %v2161_v13, %v1641_v12  ;;  %v2211_v49 = vld [vmem:[%s2438_s7 + $0x1ac] sm:$0xf] }
  0x87   : > { %1278 = vmatpush.bf16.msra.mxu1 %v1834_v29  ;;  %v2257_v19 = vld [vmem:[%s2438_s7 + $0x314] sm:$0xf0]  ;;  %v2247_v29 = vld [vmem:[%s2438_s7 + $0x2cc] sm:$0xf]  ;;  %v1851_v50 = vld [vmem:[%s2438_s7 + $0x1b8] sm:$0xf0] }
  0x88   : > { %1297 = vmatpush.bf16.msra.mxu2 %v1962_v21  ;;  %v2187_v21 = vld [vmem:[%s2438_s7 + $0xec] sm:$0xf]  ;;  %v2026_v31 = vor.u32 %v2257_v19, %v2025_v18  ;;  %v1998_v37 = vor.u32 %v2247_v29, %v1995_v30  ;;  %v2107_v55 = vld [vmem:[%s2438_s7 + $0x3b8] sm:$0xf0]  ;;  %v1854_v3 = vor.u32 %v2211_v49, %v1851_v50 }
  0x89   : > { %1259 = vmatpush.bf16.msra.mxu0 %v1706_v28  ;;  %1316 = vmatpush.bf16.msra.mxu3 %v2090_v32  ;;  %v1770_v28 = vor.u32 %v2193_v17, %v1769_v14  ;;  %v1758_v32 = vor.u32 %v2187_v21, %v1755_v22  ;;  %v2239_v56 = vld [vmem:[%s2438_s7 + $0x28c] sm:$0xf]  ;;  %v1707_v0 = vld [vmem:[%s2438_s7 + $0x98] sm:$0xf0] }
  0x8a   : > { %1212 = vmatmul.bf16.gmra.mxu1 %v2579_v59  ;;  %v2207_v5 = vld [vmem:[%s2438_s7 + $0x18c] sm:$0xf]  ;;  %v1835_v6 = vld [vmem:[%s2438_s7 + $0x198] sm:$0xf0] }
  0x8b   : > { %1279 = vmatpush.bf16.msra.mxu1 %v1818_v41  ;;  %1231 = vmatmul.bf16.gmra.mxu2 %v2581_v60  ;;  %v2279_v41 = vld [vmem:[%s2438_s7 + $0x3cc] sm:$0xf]  ;;  %v1947_v12 = vld [vmem:[%s2438_s7 + $0x278] sm:$0xf0] }
  0x8c   : > { %1298 = vmatpush.bf16.msra.mxu2 %v1946_v33  ;;  %1193 = vmatmul.bf16.gmra.mxu0 %v2574_v53  ;;  %v1886_v33 = vor.u32 %v2219_v23, %v1883_v24  ;;  %v2126_v48 = vor.u32 %v2279_v41, %v2123_v42  ;;  %v2271_v9 = vld [vmem:[%s2438_s7 + $0x38c] sm:$0xf]  ;;  %v1691_v14 = vld [vmem:[%s2438_s7 + $0x78] sm:$0xf0] }
  0x8d   : > { %1260 = vmatpush.bf16.msra.mxu0 %v1690_v40  ;;  %1317 = vmatpush.bf16.msra.mxu3 %v2074_v44  ;;  %v1742_v40 = vor.u32 %v2183_v35, %v1739_v36  ;;  %v1979_v44 = vld [vmem:[%s2438_s7 + $0x2b8] sm:$0xf0]  ;;  %v2171_v13 = vld [vmem:[%s2438_s7 + $0x6c] sm:$0xf] }
  0x8e   : > { %1250 = vmatmul.bf16.gmra.mxu3 %v2585_v1  ;;  %v1982_v51 = vor.u32 %v2243_v43, %v1979_v44  ;;  %v2203_v17 = vld [vmem:[%s2438_s7 + $0x16c] sm:$0xf]  ;;  %v1819_v18 = vld [vmem:[%s2438_s7 + $0x178] sm:$0xf0] }
  0x8f   : > { %1280 = vmatpush.bf16.msra.mxu1 %v1802_v54  ;;  %v2275_v54 = vld [vmem:[%s2438_s7 + $0x3ac] sm:$0xf]  ;;  %v2075_v22 = vld [vmem:[%s2438_s7 + $0x378] sm:$0xf0] }
  0x90   : > { %1299 = vmatpush.bf16.msra.mxu2 %v1930_v45  ;;  %v2179_v45 = vld [vmem:[%s2438_s7 + $0xac] sm:$0xf]  ;;  %v2110_v4 = vor.u32 %v2275_v54, %v2107_v55  ;;  %v1931_v24 = vld [vmem:[%s2438_s7 + $0x258] sm:$0xf0] }
  0x91   : > { %1261 = vmatpush.bf16.msra.mxu0 %v1674_v52  ;;  %1318 = vmatpush.bf16.msra.mxu3 %v2058_v58  ;;  %v1726_v52 = vor.u32 %v2179_v45, %v1723_v46  ;;  %v1963_v58 = vld [vmem:[%s2438_s7 + $0x298] sm:$0xf0]  ;;  %v2267_v21 = vld [vmem:[%s2438_s7 + $0x36c] sm:$0xf] }
  0x92   : > { %v1966_v7 = vor.u32 %v2239_v56, %v1963_v58  ;;  %v2231_v23 = vld [vmem:[%s2438_s7 + $0x24c] sm:$0xf]  ;;  %v1675_v26 = vld [vmem:[%s2438_s7 + $0x58] sm:$0xf0] }
  0x93   : > { %1281 = vmatpush.bf16.msra.mxu1 %v1786_v11  ;;  %v2235_v11 = vld [vmem:[%s2438_s7 + $0x26c] sm:$0xf]  ;;  %v1803_v30 = vld [vmem:[%s2438_s7 + $0x158] sm:$0xf0] }
  0x94   : > { %1300 = vmatpush.bf16.msra.mxu2 %v1914_v61  ;;  %v2175_v61 = vld [vmem:[%s2438_s7 + $0x8c] sm:$0xf]  ;;  %v1950_v19 = vor.u32 %v2235_v11, %v1947_v12  ;;  %v1915_v36 = vld [vmem:[%s2438_s7 + $0x238] sm:$0xf0] }
  0x95   : > { %1262 = vmatpush.bf16.msra.mxu0 %v1658_v10  ;;  %1319 = vmatpush.bf16.msra.mxu3 %v2042_v15  ;;  %v1710_v8 = vor.u32 %v2175_v61, %v1707_v0  ;;  %v2091_v10 = vld [vmem:[%s2438_s7 + $0x398] sm:$0xf0]  ;;  %v1838_v15 = vor.u32 %v2207_v5, %v1835_v6  ;;  %v2167_v25 = vld [vmem:[%s2438_s7 + $0x4c] sm:$0xf] }
  0x96   : > { %v2199_v29 = vld [vmem:[%s2438_s7 + $0x14c] sm:$0xf]  ;;  %v1659_v38 = vld [vmem:[%s2438_s7 + $0x38] sm:$0xf0] }
  0x97   : > { %1282 = vmatpush.bf16.msra.mxu1 %v1770_v28  ;;  %v2078_v28 = vor.u32 %v2267_v21, %v2075_v22  ;;  %v2227_v35 = vld [vmem:[%s2438_s7 + $0x22c] sm:$0xf]  ;;  %v1806_v39 = vor.u32 %v2199_v29, %v1803_v30  ;;  %v1787_v42 = vld [vmem:[%s2438_s7 + $0x138] sm:$0xf0]  ;;  %v280_v22 = vld [vmem:[#allocation2 + $0x40] sm:$0xff] }
  0x98   : > { %1301 = vmatpush.bf16.msra.mxu2 %v1898_v16  ;;  %v2094_v16 = vor.u32 %v2271_v9, %v2091_v10  ;;  %v2195_v41 = vld [vmem:[%s2438_s7 + $0x12c] sm:$0xf]  ;;  %v1918_v43 = vor.u32 %v2227_v35, %v1915_v36  ;;  %v2043_v46 = vld [vmem:[%s2438_s7 + $0x338] sm:$0xf0]  ;;  %v284_v30 = vld [vmem:[#allocation2 + $0x60] sm:$0xff] }
  0x99   : > { %1263 = vmatpush.bf16.msra.mxu0 %v1642_v27  ;;  %1320 = vmatpush.bf16.msra.mxu3 %v2026_v31  ;;  %v1822_v27 = vor.u32 %v2203_v17, %v1819_v18  ;;  %v1934_v31 = vor.u32 %v2231_v23, %v1931_v24  ;;  %v2259_v45 = vld [vmem:[%s2438_s7 + $0x32c] sm:$0xf]  ;;  %v1643_v50 = vld [vmem:[%s2438_s7 + $0x18] sm:$0xf0] }
  0x9a   : > { %1283 = vmatmul.bf16.vlgmr.msra.gmra.mxu1 %v2527_v62  ;;  %v2159_v49 = vld [vmem:[%s2438_s7 + $0xc] sm:$0xf]  ;;  %v1771_v58 = vld [vmem:[%s2438_s7 + $0x118] sm:$0xf0] }
  0x9b   : > { %1351 = vmatpush.bf16.msrb.mxu1 %v1886_v33  ;;  %1302 = vmatmul.bf16.vlgmr.msra.gmra.mxu2 %v2529_v63  ;;  %v2263_v33 = vld [vmem:[%s2438_s7 + $0x34c] sm:$0xf]  ;;  %v1646_v56 = vor.u32 %v2159_v49, %v1643_v50  ;;  %v2027_v0 = vld [vmem:[%s2438_s7 + $0x318] sm:$0xf0] }
  0x9c   : > { %1370 = vmatpush.bf16.msrb.mxu2 %v2014_v20  ;;  %1264 = vmatmul.bf16.vlgmr.msra.gmra.mxu0 %v2522_v57  ;;  %v1694_v20 = vor.u32 %v2171_v13, %v1691_v14  ;;  %v2191_v54 = vld [vmem:[%s2438_s7 + $0x10c] sm:$0xf] }
  0x9d   : > { %1332 = vmatpush.bf16.msrb.mxu0 %v1758_v32  ;;  %1389 = vmatpush.bf16.msrb.mxu3 %v2142_v34  ;;  %v1678_v32 = vor.u32 %v2167_v25, %v1675_v26  ;;  %v2059_v34 = vld [vmem:[%s2438_s7 + $0x358] sm:$0xf0]  ;;  %v2255_v61 = vld [vmem:[%s2438_s7 + $0x30c] sm:$0xf] }
  0x9e   : > { %1321 = vmatmul.bf16.vlgmr.msra.gmra.mxu3 %v2533_v2  ;;  %v277_v50 = vld [vmem:[#allocation2 + $0x68] sm:$0xff] }
  0x9f   : > { %1352 = vmatpush.bf16.msrb.mxu1 %v1870_v47  ;;  %v2223_v47 = vld [vmem:[%s2438_s7 + $0x20c] sm:$0xf] }
  0xa0   : > { %1371 = vmatpush.bf16.msrb.mxu2 %v1998_v37  ;;  %v2163_v37 = vld [vmem:[%s2438_s7 + $0x2c] sm:$0xf] }
  0xa1   : > { %1333 = vmatpush.bf16.msrb.mxu0 %v1742_v40  ;;  %1390 = vmatpush.bf16.msrb.mxu3 %v2126_v48  ;;  %v2062_v40 = vor.u32 %v2263_v33, %v2059_v34  ;;  %v1662_v44 = vor.u32 %v2163_v37, %v1659_v38  ;;  %v1899_v48 = vld [vmem:[%s2438_s7 + $0x218] sm:$0xf0] }
  0xa2   : > { %v1902_v55 = vor.u32 %v2223_v47, %v1899_v48 }
  0xa3   : > { %1353 = vmatpush.bf16.msrb.mxu1 %v1854_v3  ;;  %v1774_v3 = vor.u32 %v2191_v54, %v1771_v58 }
  0xa4   : > { %1372 = vmatpush.bf16.msrb.mxu2 %v1982_v51  ;;  %v1790_v51 = vor.u32 %v2195_v41, %v1787_v42  ;;  %v273_v41 = vld [vmem:[#allocation2] sm:$0xff] }
  0xa5   : > { %1334 = vmatpush.bf16.msrb.mxu0 %v1726_v52  ;;  %1391 = vmatpush.bf16.msrb.mxu3 %v2110_v4  ;;  %v2046_v52 = vor.u32 %v2259_v45, %v2043_v46  ;;  %v2030_v4 = vor.u32 %v2255_v61, %v2027_v0 }
  0xa7   : > { %1354 = vmatpush.bf16.msrb.mxu1 %v1838_v15 }
  0xa8   : > { %1373 = vmatpush.bf16.msrb.mxu2 %v1966_v7 }
  0xa9   : > { %1335 = vmatpush.bf16.msrb.mxu0 %v1710_v8  ;;  %1392 = vmatpush.bf16.msrb.mxu3 %v2094_v16 }
  0xaa   : > { %1288 = vmatmul.bf16.gmra.mxu1 %v2579_v59 }
  0xab   : > { %1355 = vmatpush.bf16.msrb.mxu1 %v1822_v27  ;;  %1307 = vmatmul.bf16.gmra.mxu2 %v2581_v60 }
  0xac   : > { %1374 = vmatpush.bf16.msrb.mxu2 %v1950_v19  ;;  %1269 = vmatmul.bf16.gmra.mxu0 %v2574_v53 }
  0xad   : > { %1336 = vmatpush.bf16.msrb.mxu0 %v1694_v20  ;;  %1393 = vmatpush.bf16.msrb.mxu3 %v2078_v28 }
  0xae   : > { %1326 = vmatmul.bf16.gmra.mxu3 %v2585_v1 }
  0xaf   : > { %1356 = vmatpush.bf16.msrb.mxu1 %v1806_v39 }
  0xb0   : > { %1375 = vmatpush.bf16.msrb.mxu2 %v1934_v31 }
  0xb1   : > { %1337 = vmatpush.bf16.msrb.mxu0 %v1678_v32  ;;  %1394 = vmatpush.bf16.msrb.mxu3 %v2062_v40 }
  0xb3   : > { %1357 = vmatpush.bf16.msrb.mxu1 %v1790_v51 }
  0xb4   : > { %1376 = vmatpush.bf16.msrb.mxu2 %v1918_v43 }
  0xb5   : > { %1338 = vmatpush.bf16.msrb.mxu0 %v1662_v44  ;;  %1395 = vmatpush.bf16.msrb.mxu3 %v2046_v52 }
  0xb7   : > { %1358 = vmatpush.bf16.msrb.mxu1 %v1774_v3  ;;  %v281_v3 = vld [vmem:[#allocation2 + $0x20] sm:$0xff] }
  0xb8   : > { %1377 = vmatpush.bf16.msrb.mxu2 %v1902_v55 }
  0xb9   : > { %1339 = vmatpush.bf16.msrb.mxu0 %v1646_v56  ;;  %1396 = vmatpush.bf16.msrb.mxu3 %v2030_v4 }
  0xba   : > { %1359 = vmatmul.bf16.vlgmr.msrb.gmra.mxu1 %v2527_v62  ;;  %v272_v62 = vld [vmem:[#allocation2 + $0x30] sm:$0xff] }
  0xbb   : > { %1378 = vmatmul.bf16.vlgmr.msrb.gmra.mxu2 %v2529_v63 }
  0xbc   : > { %1340 = vmatmul.bf16.vlgmr.msrb.gmra.mxu0 %v2522_v57 }
  0xbe   : > { %1397 = vmatmul.bf16.vlgmr.msrb.gmra.mxu3 %v2533_v2 }
  0xca   : > { %1364 = vmatmul.bf16.gmra.mxu1 %v2579_v59 }
  0xcb   : > { %1383 = vmatmul.bf16.gmra.mxu2 %v2581_v60  ;;  %v276_v60 = vld [vmem:[#allocation2 + $0x50] sm:$0xff] }
  0xcc   : > { %1345 = vmatmul.bf16.gmra.mxu0 %v2574_v53 }
  0xce   : > { %1402 = vmatmul.bf16.gmra.mxu3 %v2585_v1 }
  0xd7   : > { %v1113_v5 = vpop.f32.mrf.mxu0  ;;  %v1132_v6 = vpop.f32.mrf.mxu1 }
  0xd8   : > { %v1133_v7 = vadd.f32 %v1132_v6, %v1113_v5 }
  0xde   : > { %v1151_v8 = vpop.f32.mrf.mxu2 }
  0xdf   : > { %v1152_v9 = vadd.f32 %v1151_v8, %v1133_v7  ;;  %v1170_v57 = vpop.f32.mrf.mxu3  ;;  %v1115_v10 = vpop.f32.mrf.mxu0 }
  0xe0   : > { %v1134_v11 = vpop.f32.mrf.mxu1 }
  0xe1   : > { %v1171_v63 = vadd.f32 %v1170_v57, %v1152_v9  ;;  %v1135_v2 = vadd.f32 %v1134_v11, %v1115_v10 }
  0xe3   : > { %v1408_v12 = vadd.f32 %v1171_v63, %v272_v62  ;;  %v285_v62 = vld [vmem:[#allocation2 + $0x70] sm:$0xff] }
  0xe5   : > { %1424 = vst [vmem:[#allocation2 + $0x30] sm:$0xff] %v1408_v12 }
  0xe6   : > { %v1153_v53 = vpop.f32.mrf.mxu2 }
  0xe7   : > { %v1154_v13 = vadd.f32 %v1153_v53, %v1135_v2  ;;  %v1172_v59 = vpop.f32.mrf.mxu3  ;;  %v1118_v14 = vpop.f32.mrf.mxu0 }
  0xe8   : > { %v1137_v15 = vpop.f32.mrf.mxu1 }
  0xe9   : > { %v1173_v1 = vadd.f32 %v1172_v59, %v1154_v13  ;;  %v1138_v17 = vadd.f32 %v1137_v15, %v1118_v14 }
  0xeb   : > { %v1412_v16 = vadd.f32 %v1173_v1, %v276_v60  ;;  %v274_v60 = vld [vmem:[#allocation2 + $0x58] sm:$0xff] }
  0xed   : > { %1428 = vst [vmem:[#allocation2 + $0x50] sm:$0xff] %v1412_v16 }
  0xee   : > { %v1156_v18 = vpop.f32.mrf.mxu2 }
  0xef   : > { %v1157_v19 = vadd.f32 %v1156_v18, %v1138_v17  ;;  %v1175_v20 = vpop.f32.mrf.mxu3  ;;  %v1120_v21 = vpop.f32.mrf.mxu0 }
  0xf0   : > { %v1139_v23 = vpop.f32.mrf.mxu1 }
  0xf1   : > { %v1176_v24 = vadd.f32 %v1175_v20, %v1157_v19  ;;  %v1140_v26 = vadd.f32 %v1139_v23, %v1120_v21 }
  0xf3   : > { %v1416_v25 = vadd.f32 %v1176_v24, %v280_v22  ;;  %v278_v22 = vld [vmem:[#allocation2 + $0x8] sm:$0xff] }
  0xf5   : > { %1432 = vst [vmem:[#allocation2 + $0x40] sm:$0xff] %v1416_v25 }
  0xf6   : > { %v1158_v27 = vpop.f32.mrf.mxu2 }
  0xf7   : > { %v1159_v28 = vadd.f32 %v1158_v27, %v1140_v26  ;;  %v1177_v29 = vpop.f32.mrf.mxu3 }
  0xf8   : > { %v1208_v32 = vpop.f32.mrf.mxu1 }
  0xf9   : > { %v1189_v31 = vpop.f32.mrf.mxu0  ;;  %v1178_v33 = vadd.f32 %v1177_v29, %v1159_v28 }
  0xfa   : > { %v1209_v35 = vadd.f32 %v1208_v32, %v1189_v31  ;;  %v282_v31 = vld [vmem:[#allocation2 + $0x10] sm:$0xff] }
  0xfb   : > { %v1420_v34 = vadd.f32 %v1178_v33, %v284_v30 }
  0xfd   : > { %1436 = vst [vmem:[#allocation2 + $0x60] sm:$0xff] %v1420_v34 }
  0xfe   : > { %v1227_v36 = vpop.f32.mrf.mxu2 }
  0xff   : > { %v1228_v38 = vadd.f32 %v1227_v36, %v1209_v35 }
 0x100   : > { %v1210_v40 = vpop.f32.mrf.mxu1 }
 0x101   : > { %v1246_v37 = vpop.f32.mrf.mxu3  ;;  %v1191_v39 = vpop.f32.mrf.mxu0 }
 0x102   : > { %v1247_v42 = vadd.f32 %v1246_v37, %v1228_v38  ;;  %v1211_v44 = vadd.f32 %v1210_v40, %v1191_v39  ;;  %v286_v40 = vld [vmem:[#allocation2 + $0x78] sm:$0xff] }
 0x104   : > { %v1409_v43 = vadd.f32 %v1247_v42, %v273_v41 }
 0x106   : > { %1425 = vst [vmem:[#allocation2] sm:$0xff] %v1409_v43  ;;  %v1229_v45 = vpop.f32.mrf.mxu2 }
 0x107   : > { %v1230_v47 = vadd.f32 %v1229_v45, %v1211_v44 }
 0x108   : > { %v1213_v49 = vpop.f32.mrf.mxu1 }
 0x109   : > { %v1248_v46 = vpop.f32.mrf.mxu3  ;;  %v1194_v48 = vpop.f32.mrf.mxu0 }
 0x10a   : > { %v1249_v51 = vadd.f32 %v1248_v46, %v1230_v47  ;;  %v1214_v54 = vadd.f32 %v1213_v49, %v1194_v48  ;;  %v275_v49 = vld [vmem:[#allocation2 + $0x18] sm:$0xff] }
 0x10c   : > { %v1413_v52 = vadd.f32 %v1249_v51, %v277_v50 }
 0x10e   : > { %1429 = vst [vmem:[#allocation2 + $0x68] sm:$0xff] %v1413_v52  ;;  %v1232_v55 = vpop.f32.mrf.mxu2 }
 0x10f   : > { %v1233_v58 = vadd.f32 %v1232_v55, %v1214_v54 }
 0x110   : > { %v1215_v0 = vpop.f32.mrf.mxu1 }
 0x111   : > { %v1251_v56 = vpop.f32.mrf.mxu3  ;;  %v1196_v61 = vpop.f32.mrf.mxu0 }
 0x112   : > { %v1252_v4 = vadd.f32 %v1251_v56, %v1233_v58  ;;  %v1216_v6 = vadd.f32 %v1215_v0, %v1196_v61  ;;  %v279_v58 = vld [vmem:[#allocation2 + $0x48] sm:$0xff] }
 0x114   : > { %v1417_v5 = vadd.f32 %v1252_v4, %v281_v3 }
 0x116   : > { %1433 = vst [vmem:[#allocation2 + $0x20] sm:$0xff] %v1417_v5  ;;  %v1234_v7 = vpop.f32.mrf.mxu2 }
 0x117   : > { %v1235_v9 = vadd.f32 %v1234_v7, %v1216_v6 }
 0x118   : > { %v1284_v10 = vpop.f32.mrf.mxu1 }
 0x119   : > { %v1253_v8 = vpop.f32.mrf.mxu3  ;;  %v1265_v57 = vpop.f32.mrf.mxu0 }
 0x11a   : > { %v1254_v11 = vadd.f32 %v1253_v8, %v1235_v9  ;;  %v1285_v12 = vadd.f32 %v1284_v10, %v1265_v57  ;;  %v283_v9 = vld [vmem:[#allocation2 + $0x38] sm:$0xff] }
 0x11c   : > { %v1421_v63 = vadd.f32 %v1254_v11, %v285_v62 }
 0x11e   : > { %1437 = vst [vmem:[#allocation2 + $0x70] sm:$0xff] %v1421_v63  ;;  %v1303_v2 = vpop.f32.mrf.mxu2 }
 0x11f   : > { %v1304_v13 = vadd.f32 %v1303_v2, %v1285_v12 }
 0x120   : > { %v1286_v14 = vpop.f32.mrf.mxu1 }
 0x121   : > { %v1322_v53 = vpop.f32.mrf.mxu3  ;;  %v1267_v59 = vpop.f32.mrf.mxu0 }
 0x122   : > { %v1323_v15 = vadd.f32 %v1322_v53, %v1304_v13  ;;  %v1287_v16 = vadd.f32 %v1286_v14, %v1267_v59  ;;  %v287_v53 = vld [vmem:[#allocation2 + $0x28] sm:$0xff] }
 0x124   : > { %v1410_v1 = vadd.f32 %v1323_v15, %v274_v60 }
 0x126   : > { %1426 = vst [vmem:[#allocation2 + $0x58] sm:$0xff] %v1410_v1  ;;  %v1305_v17 = vpop.f32.mrf.mxu2 }
 0x127   : > { %v1306_v19 = vadd.f32 %v1305_v17, %v1287_v16 }
 0x128   : > { %v1289_v21 = vpop.f32.mrf.mxu1 }
 0x129   : > { %v1324_v18 = vpop.f32.mrf.mxu3  ;;  %v1270_v20 = vpop.f32.mrf.mxu0 }
 0x12a   : > { %v1325_v23 = vadd.f32 %v1324_v18, %v1306_v19  ;;  %v1290_v25 = vadd.f32 %v1289_v21, %v1270_v20 }
 0x12c   : > { %v1414_v24 = vadd.f32 %v1325_v23, %v278_v22 }
 0x12e   : > { %1430 = vst [vmem:[#allocation2 + $0x8] sm:$0xff] %v1414_v24  ;;  %v1308_v26 = vpop.f32.mrf.mxu2 }
 0x12f   : > { %v1309_v28 = vadd.f32 %v1308_v26, %v1290_v25 }
 0x130   : > { %v1291_v30 = vpop.f32.mrf.mxu1 }
 0x131   : > { %v1327_v27 = vpop.f32.mrf.mxu3  ;;  %v1272_v29 = vpop.f32.mrf.mxu0 }
 0x132   : > { %v1328_v32 = vadd.f32 %v1327_v27, %v1309_v28  ;;  %v1292_v34 = vadd.f32 %v1291_v30, %v1272_v29 }
 0x134   : > { %v1418_v33 = vadd.f32 %v1328_v32, %v282_v31 }
 0x136   : > { %1434 = vst [vmem:[#allocation2 + $0x10] sm:$0xff] %v1418_v33  ;;  %v1310_v35 = vpop.f32.mrf.mxu2 }
 0x137   : > { %v1311_v37 = vadd.f32 %v1310_v35, %v1292_v34 }
 0x138   : > { %v1360_v39 = vpop.f32.mrf.mxu1 }
 0x139   : > { %v1329_v36 = vpop.f32.mrf.mxu3  ;;  %v1341_v38 = vpop.f32.mrf.mxu0 }
 0x13a   : > { %v1330_v41 = vadd.f32 %v1329_v36, %v1311_v37  ;;  %v1361_v43 = vadd.f32 %v1360_v39, %v1341_v38 }
 0x13c   : > { %v1422_v42 = vadd.f32 %v1330_v41, %v286_v40 }
 0x13e   : > { %1438 = vst [vmem:[#allocation2 + $0x78] sm:$0xff] %v1422_v42  ;;  %v1379_v44 = vpop.f32.mrf.mxu2 }
 0x13f   : > { %v1380_v46 = vadd.f32 %v1379_v44, %v1361_v43 }
 0x140   : > { %v1362_v48 = vpop.f32.mrf.mxu1 }
 0x141   : > { %v1398_v45 = vpop.f32.mrf.mxu3  ;;  %v1343_v47 = vpop.f32.mrf.mxu0 }
 0x142   : > { %v1399_v50 = vadd.f32 %v1398_v45, %v1380_v46  ;;  %v1363_v52 = vadd.f32 %v1362_v48, %v1343_v47 }
 0x144   : > { %v1411_v51 = vadd.f32 %v1399_v50, %v275_v49 }
 0x146   : > { %1427 = vst [vmem:[#allocation2 + $0x18] sm:$0xff] %v1411_v51  ;;  %v1381_v54 = vpop.f32.mrf.mxu2 }
 0x147   : > { %v1382_v56 = vadd.f32 %v1381_v54, %v1363_v52 }
 0x148   : > { %v1365_v0 = vpop.f32.mrf.mxu1 }
 0x149   : > { %v1400_v55 = vpop.f32.mrf.mxu3  ;;  %v1346_v61 = vpop.f32.mrf.mxu0 }
 0x14a   : > { %v1401_v3 = vadd.f32 %v1400_v55, %v1382_v56  ;;  %v1366_v5 = vadd.f32 %v1365_v0, %v1346_v61 }
 0x14c   : > { %v1415_v4 = vadd.f32 %v1401_v3, %v279_v58 }
 0x14e   : > { %1431 = vst [vmem:[#allocation2 + $0x48] sm:$0xff] %v1415_v4  ;;  %v1384_v6 = vpop.f32.mrf.mxu2 }
 0x14f   : > { %v1385_v8 = vadd.f32 %v1384_v6, %v1366_v5 }
 0x150   : > { %v1367_v62 = vpop.f32.mrf.mxu1 }
 0x151   : > { %v1403_v7 = vpop.f32.mrf.mxu3  ;;  %v1348_v10 = vpop.f32.mrf.mxu0 }
 0x152   : > { %v1404_v57 = vadd.f32 %v1403_v7, %v1385_v8  ;;  %v1368_v63 = vadd.f32 %v1367_v62, %v1348_v10 }
 0x154   : > { %v1419_v11 = vadd.f32 %v1404_v57, %v283_v9 }
 0x156   : > { %1435 = vst [vmem:[#allocation2 + $0x38] sm:$0xff] %v1419_v11  ;;  %v1386_v12 = vpop.f32.mrf.mxu2 }
 0x157   : > { %v1387_v2 = vadd.f32 %v1386_v12, %v1368_v63 }
 0x159   : > { %v1405_v13 = vpop.f32.mrf.mxu3 }
 0x15a   : > { %v1406_v59 = vadd.f32 %v1405_v13, %v1387_v2  ;;  %1443 = sbr.rel (%p2143_p11) target bundleno = 372 (0x174), region = 63 }
 0x15c   : > { %v1423_v14 = vadd.f32 %v1406_v59, %v287_v53 }
 0x15e   : > { %1439 = vst [vmem:[#allocation2 + $0x28] sm:$0xff] %v1423_v14 }
 0x15f   : > { %v1444_v60 = vld [vmem:[#allocation2 + $0x30] sm:$0xff]  ;;  %v1460_v15 = vld [vmem:[%s2832_s2] sm:$0xf]  ;;  %v1446_v18 = vld [vmem:[#allocation2 + $0x58] sm:$0xff] }
 0x160   : > { %v1445_v1 = vld [vmem:[#allocation2] sm:$0xff]  ;;  %v1462_v16 = vperm.slane %v1460_v15, 0  ;;  %v1463_v17 = vperm.slane %v1460_v15, 1  ;;  %v1464_v19 = vperm.slane %v1460_v15, 2  ;;  %v1447_v20 = vld [vmem:[#allocation2 + $0x18] sm:$0xff]  ;;  %v1465_v21 = vperm.slane %v1460_v15, 3 }
 0x161   : > { %v1448_v22 = vld [vmem:[#allocation2 + $0x50] sm:$0xff]  ;;  %v1449_v26 = vld [vmem:[#allocation2 + $0x68] sm:$0xff]  ;;  %v1452_v32 = vld [vmem:[#allocation2 + $0x40] sm:$0xff] }
 0x162   : > { %v1470_v23 = vadd.f32 %v1462_v16, %v1444_v60  ;;  %v1471_v24 = vadd.f32 %v1463_v17, %v1445_v1  ;;  %v1472_v25 = vadd.f32 %v1464_v19, %v1446_v18  ;;  %v1473_v27 = vadd.f32 %v1465_v21, %v1447_v20  ;;  %v1450_v28 = vld [vmem:[#allocation2 + $0x8] sm:$0xff]  ;;  %v1453_v34 = vld [vmem:[#allocation2 + $0x20] sm:$0xff]  ;;  %v1454_v36 = vld [vmem:[#allocation2 + $0x10] sm:$0xff] }
 0x163   : > { %v1474_v29 = vadd.f32 %v1462_v16, %v1448_v22  ;;  %v1451_v30 = vld [vmem:[#allocation2 + $0x48] sm:$0xff]  ;;  %v1475_v31 = vadd.f32 %v1463_v17, %v1449_v26  ;;  %v1476_v33 = vadd.f32 %v1464_v19, %v1450_v28  ;;  %v1478_v37 = vadd.f32 %v1462_v16, %v1452_v32  ;;  %v1455_v38 = vld [vmem:[#allocation2 + $0x38] sm:$0xff]  ;;  %v1456_v40 = vld [vmem:[#allocation2 + $0x60] sm:$0xff] }
 0x164   : > { %1486 = vst [vmem:[%s2833_s3] sm:$0xff] %v1470_v23  ;;  %v1477_v35 = vadd.f32 %v1465_v21, %v1451_v30  ;;  %v1479_v39 = vadd.f32 %v1463_v17, %v1453_v34  ;;  %v1480_v41 = vadd.f32 %v1464_v19, %v1454_v36  ;;  %v1457_v42 = vld [vmem:[#allocation2 + $0x70] sm:$0xff]  ;;  %v1481_v43 = vadd.f32 %v1465_v21, %v1455_v38  ;;  %v1458_v44 = vld [vmem:[#allocation2 + $0x78] sm:$0xff] }
 0x165   : > { %1487 = vst [vmem:[%s2833_s3 + $0x8] sm:$0xff] %v1471_v24  ;;  %v1482_v45 = vadd.f32 %v1462_v16, %v1456_v40  ;;  %v1459_v46 = vld [vmem:[#allocation2 + $0x28] sm:$0xff]  ;;  %v1483_v47 = vadd.f32 %v1463_v17, %v1457_v42  ;;  %v1484_v48 = vadd.f32 %v1464_v19, %v1458_v44 }
 0x166   : > { %1488 = vst [vmem:[%s2833_s3 + $0x10] sm:$0xff] %v1472_v25  ;;  %v1485_v49 = vadd.f32 %v1465_v21, %v1459_v46 }
 0x167   : > { %1489 = vst [vmem:[%s2833_s3 + $0x18] sm:$0xff] %v1473_v27 }
 0x168   : > { %1490 = vst [vmem:[%s2833_s3 + $0x20] sm:$0xff] %v1474_v29 }
 0x169   : > { %1491 = vst [vmem:[%s2833_s3 + $0x28] sm:$0xff] %v1475_v31 }
 0x16a   : > { %1492 = vst [vmem:[%s2833_s3 + $0x30] sm:$0xff] %v1476_v33 }
 0x16b   : > { %1493 = vst [vmem:[%s2833_s3 + $0x38] sm:$0xff] %v1477_v35 }
 0x16c   : > { %1494 = vst [vmem:[%s2833_s3 + $0x40] sm:$0xff] %v1478_v37 }
 0x16d   : > { %1495 = vst [vmem:[%s2833_s3 + $0x48] sm:$0xff] %v1479_v39 }
 0x16e   : > { %1496 = vst [vmem:[%s2833_s3 + $0x50] sm:$0xff] %v1480_v41 }
 0x16f   : > { %1497 = vst [vmem:[%s2833_s3 + $0x58] sm:$0xff] %v1481_v43 }
 0x170   : > { %1498 = vst [vmem:[%s2833_s3 + $0x60] sm:$0xff] %v1482_v45 }
 0x171   : > { %1499 = vst [vmem:[%s2833_s3 + $0x68] sm:$0xff] %v1483_v47 }
 0x172   : > { %1500 = vst [vmem:[%s2833_s3 + $0x70] sm:$0xff] %v1484_v48 }
 0x173   : > { %1501 = vst [vmem:[%s2833_s3 + $0x78] sm:$0xff] %v1485_v49 }
 0x174 PF: > { %s13_s16 = sadd.s32 1, %s2365_s16   ;;  %s2834_s12 = smov %s2353_s13 }
 0x175   : > { %p10_p12 = scmp.ge.s32.totalorder %s13_s16, 10   ;;  %s2835_s13 = smov %s2423_s20 }
 0x176   : > { %s2836_s14 = smov %s2361_s15  ;;  %s2837_s15 = smov %s2839_s17 }
 0x177   :  { %12 = sbr.rel (!%p10_p12) target bundleno = 3 (0x3), region = 101 }

// kernel: discriminator_forward.15
= control target key start
LH: loop header
LB: loop body
LE: loop exit
PB: predicated region body
PF: predicated region fallthrough
CT: control target
= control target key end

     0   :  { %s894_s12 = smov 0   ;;  %s896_s13 = smov 0   ;;  %s981_s0 = inlined_call_operand.vmem [shape: bf16[2,8192], index: 0, kind: input, shape index: {}]   ;;  %s982_s1 = inlined_call_operand.vmem [shape: bf16[8192,128], index: 1, kind: input, shape index: {}]   ;;  %s983_s2 = inlined_call_operand.vmem [shape: f32[1,128], index: 2, kind: input, shape index: {}]   ;;  %s984_s3 = inlined_call_operand.vmem [shape: f32[2,128], index: 3, kind: output, shape index: {}]  }
   0x1   :  { %s898_s14 = smov 0  }
   0x2 LB: > { %s22_s15 = sadd.s32 1, %s867_s13  ;;  %p650_p0 = scmp.ge.s32.totalorder %s871_s14, 1  ;;  %s871_s14 = sphi %s898_s14, %s13_s14   ;;  %s867_s13 = sphi %s896_s13, %s986_s13   ;;  %s863_s12 = sphi %s894_s12, %s985_s12  }
   0x3   : > { %p23_p1 = scmp.ge.s32.totalorder %s22_s15, 16  ;;  %p166_p2 = scmp.lt.s32.totalorder %s871_s14, 17 }
   0x5   : > { %s988_s15 = smov (%p23_p1, %s22_s15), 0  ;;  %p167_p3 = pnand %p650_p0, %p166_p2 }
   0x6   : > { %s651_s16 = sshll.u32 (!%p167_p3), %s863_s12, 2  ;;  %s652_s17 = sshll.u32 (!%p167_p3), %s863_s12, 6 }
   0x7   : > { %170 = sbr.rel (%p167_p3) target bundleno = 234 (0xea), region = 32  ;;  %p200_p4 = scmp.lt.s32.totalorder (!%p167_p3), %s651_s16, 63 }
   0x8   : > { %p207_p5 = scmp.lt.s32.totalorder (!%p167_p3), %s652_s17, 1023  ;;  %p654_p6 = scmp.ne.s32.totalorder (!%p167_p3), %s863_s12, 0 }
   0xc   : > { %s990_s16 = smov (!%p200_p4, %s651_s16), 63  ;;  %s992_s17 = smov (!%p207_p5, %s652_s17), 1023 }
   0xd   : > { %s204_s20 = scalar_lea.vmem %s981_s0, %s990_s16  ;;  %s653_s21 = sshll.u32 %s992_s17, 2 }
   0xe   : > { %s925_s24 = scalar_lea.vmem %s982_s1, %s653_s21  ;;  %219 = sbr.rel (%p654_p6) target bundleno = 21 (0x15), region = 36 }
  0x13   : > { %v873_v0 = vmov 0.0  }
  0x14   : > { %220 = vst [vmem:[#allocation2] sm:$0x3] %v873_v0 }
  0x15 PF: > { %v794_v1 = vld [vmem:[%s925_s24 + $0x38] sm:$0xff]  ;;  %v793_v5 = vld [vmem:[%s925_s24 + $0x30] sm:$0xff]  ;;  %v792_v9 = vld [vmem:[%s925_s24 + $0x28] sm:$0xff]  ;;  %p783_p7 = scmp.ne.s32.totalorder %s863_s12, 15 }
  0x16   : > { %v802_v2 = vld [vmem:[%s925_s24 + $0x78] sm:$0xff]  ;;  %489 = vmatpush.bf16.msra.mxu0 %v794_v1  ;;  %v801_v6 = vld [vmem:[%s925_s24 + $0x70] sm:$0xff]  ;;  %v800_v10 = vld [vmem:[%s925_s24 + $0x68] sm:$0xff] }
  0x17   : > { %v810_v3 = vld [vmem:[%s925_s24 + $0xb8] sm:$0xff]  ;;  %502 = vmatpush.bf16.msra.mxu1 %v802_v2  ;;  %v809_v7 = vld [vmem:[%s925_s24 + $0xb0] sm:$0xff]  ;;  %v808_v11 = vld [vmem:[%s925_s24 + $0xa8] sm:$0xff] }
  0x18   : > { %v818_v4 = vld [vmem:[%s925_s24 + $0xf8] sm:$0xff]  ;;  %515 = vmatpush.bf16.msra.mxu2 %v810_v3  ;;  %v817_v8 = vld [vmem:[%s925_s24 + $0xf0] sm:$0xff]  ;;  %v816_v12 = vld [vmem:[%s925_s24 + $0xe8] sm:$0xff] }
  0x19   : > { %528 = vmatpush.bf16.msra.mxu3 %v818_v4  ;;  %v791_v13 = vld [vmem:[%s925_s24 + $0x20] sm:$0xff]  ;;  %v790_v18 = vld [vmem:[%s925_s24 + $0x18] sm:$0xff]  ;;  %v789_v22 = vld [vmem:[%s925_s24 + $0x10] sm:$0xff] }
  0x1a   : > { %490 = vmatpush.bf16.msra.mxu0 %v793_v5  ;;  %v799_v14 = vld [vmem:[%s925_s24 + $0x60] sm:$0xff]  ;;  %v798_v19 = vld [vmem:[%s925_s24 + $0x58] sm:$0xff]  ;;  %v797_v23 = vld [vmem:[%s925_s24 + $0x50] sm:$0xff] }
  0x1b   : > { %503 = vmatpush.bf16.msra.mxu1 %v801_v6  ;;  %v222_v15 = vld [vmem:[%s204_s20] sm:$0xf]  ;;  %v806_v20 = vld [vmem:[%s925_s24 + $0x98] sm:$0xff]  ;;  %v805_v24 = vld [vmem:[%s925_s24 + $0x90] sm:$0xff] }
  0x1c   : > { %516 = vmatpush.bf16.msra.mxu2 %v809_v7  ;;  %v807_v16 = vld [vmem:[%s925_s24 + $0xa0] sm:$0xff]  ;;  %288 = vst [vmem:[#allocation1] ss:$9 sm:$0xff] %v222_v15  ;;  %v814_v21 = vld [vmem:[%s925_s24 + $0xd8] sm:$0xff]  ;;  %v813_v25 = vld [vmem:[%s925_s24 + $0xd0] sm:$0xff] }
  0x1d   : > { %529 = vmatpush.bf16.msra.mxu3 %v817_v8  ;;  %v815_v17 = vld [vmem:[%s925_s24 + $0xe0] sm:$0xff]  ;;  %v788_v26 = vld [vmem:[%s925_s24 + $0x8] sm:$0xff] }
  0x1e   : > { %491 = vmatpush.bf16.msra.mxu0 %v792_v9  ;;  %v796_v27 = vld [vmem:[%s925_s24 + $0x48] sm:$0xff]  ;;  %v787_v30 = vld [vmem:[%s925_s24] sm:$0xff] }
  0x1f   : > { %504 = vmatpush.bf16.msra.mxu1 %v800_v10  ;;  %v804_v28 = vld [vmem:[%s925_s24 + $0x88] sm:$0xff]  ;;  %v795_v31 = vld [vmem:[%s925_s24 + $0x40] sm:$0xff] }
  0x20   : > { %517 = vmatpush.bf16.msra.mxu2 %v808_v11  ;;  %v812_v29 = vld [vmem:[%s925_s24 + $0xc8] sm:$0xff]  ;;  %v803_v32 = vld [vmem:[%s925_s24 + $0x80] sm:$0xff] }
  0x21   : > { %530 = vmatpush.bf16.msra.mxu3 %v816_v12  ;;  %v811_v33 = vld [vmem:[%s925_s24 + $0xc0] sm:$0xff]  ;;  %v221_v46 = vld [vmem:[#allocation2] sm:$0x3] }
  0x22   : > { %492 = vmatpush.bf16.msra.mxu0 %v791_v13 }
  0x23   : > { %505 = vmatpush.bf16.msra.mxu1 %v799_v14  ;;  %v289_v34 = vld [vmem:[#allocation1] sm:$0xff]  ;;  %v290_v35 = vld [vmem:[#allocation1 + $0x9] sm:$0xff]  ;;  %v291_v36 = vld [vmem:[#allocation1 + $0x12] sm:$0xff] }
  0x24   : > { %518 = vmatpush.bf16.msra.mxu2 %v807_v16  ;;  %v292_v37 = vld [vmem:[#allocation1 + $0x1b] sm:$0xff] }
  0x25   : > { %531 = vmatpush.bf16.msra.mxu3 %v815_v17 }
  0x26   : > { %493 = vmatpush.bf16.msra.mxu0 %v790_v18 }
  0x27   : > { %506 = vmatpush.bf16.msra.mxu1 %v798_v19 }
  0x28   : > { %519 = vmatpush.bf16.msra.mxu2 %v806_v20 }
  0x29   : > { %532 = vmatpush.bf16.msra.mxu3 %v814_v21 }
  0x2a   : > { %494 = vmatpush.bf16.msra.mxu0 %v789_v22 }
  0x2b   : > { %507 = vmatpush.bf16.msra.mxu1 %v797_v23 }
  0x2c   : > { %520 = vmatpush.bf16.msra.mxu2 %v805_v24 }
  0x2d   : > { %533 = vmatpush.bf16.msra.mxu3 %v813_v25 }
  0x2e   : > { %495 = vmatpush.bf16.msra.mxu0 %v788_v26 }
  0x2f   : > { %508 = vmatpush.bf16.msra.mxu1 %v796_v27 }
  0x30   : > { %521 = vmatpush.bf16.msra.mxu2 %v804_v28 }
  0x31   : > { %534 = vmatpush.bf16.msra.mxu3 %v812_v29 }
  0x32   : > { %496 = vmatpush.bf16.msra.mxu0 %v787_v30 }
  0x33   : > { %509 = vmatpush.bf16.msra.mxu1 %v795_v31 }
  0x34   : > { %522 = vmatpush.bf16.msra.mxu2 %v803_v32 }
  0x35   : > { %535 = vmatpush.bf16.msra.mxu3 %v811_v33  ;;  %497 = vmatmul.bf16.vlgmr.msra.gmra.mxu0 %v289_v34 }
  0x36   : > { %510 = vmatmul.bf16.vlgmr.msra.gmra.mxu1 %v290_v35 }
  0x37   : > { %523 = vmatmul.bf16.vlgmr.msra.gmra.mxu2 %v291_v36 }
  0x38   : > { %536 = vmatmul.bf16.vlgmr.msra.gmra.mxu3 %v292_v37 }
  0xb2   : > { %v498_v38 = vpop.f32.mrf.mxu0 }
  0xb3   : > { %v511_v39 = vpop.f32.mrf.mxu1 }
  0xb4   : > { %v512_v40 = vadd.f32 %v511_v39, %v498_v38 }
  0xba   : > { %v524_v41 = vpop.f32.mrf.mxu2  ;;  %v500_v44 = vpop.f32.mrf.mxu0 }
  0xbb   : > { %v537_v42 = vpop.f32.mrf.mxu3  ;;  %v525_v43 = vadd.f32 %v524_v41, %v512_v40  ;;  %v513_v45 = vpop.f32.mrf.mxu1 }
  0xbd   : > { %v538_v47 = vadd.f32 %v537_v42, %v525_v43 }
  0xbf   : > { %v541_v48 = vadd.f32 %v538_v47, %v221_v46  ;;  %546 = sbr.rel (%p783_p7) target bundleno = 234 (0xea), region = 40 }
  0xc1   : > { %542 = vst [vmem:[#allocation2] sm:$0x3] %v541_v48 }
  0xc2   : > { %v526_v49 = vpop.f32.mrf.mxu2 }
  0xc3   : > { %v539_v50 = vpop.f32.mrf.mxu3 }
  0xc4   : > { %v844_v52 = vld [vmem:[%s983_s2] ss:$0 sm:$0xff] }
  0xc8   : > { %v547_v51 = vld [vmem:[#allocation2] sm:$0x3] }
  0xc9   : > { %v552_v53 = vadd.f32 %v844_v52, %v547_v51 }
  0xcb   : > { %v553_v54 = vsub.f32 0.0, %v552_v53 }
  0xcd   : > { %v554_v55 = vmul.f32 1.442695, %v553_v54 }
  0xcf   : > { %845 = vpow2.f32 %v554_v55 }
  0xd5   : > { %v846_v56 = vpop.eup %845 }
  0xd6   : > { %v556_v57 = vadd.f32 1.0, %v846_v56 }
  0xd8   : > { %847 = vrcp.f32 %v556_v57  ;;  %v568_v60 = vand.u32 2147483648, %v556_v57  ;;  %vm562_vm0 = vweird.f32 %v556_v57  ;;  %v566_v62 = vand.u32 2147483647, %v556_v57 }
  0xda   : > { %v569_v0 = vor.u32 1.1754944e-38, %v568_v60  ;;  %vm567_vm3 = vcmp.eq.f32.partialorder %v566_v62, 8.507059e+37 }
  0xde   : > { %v848_v58 = vpop.eup %847 }
  0xdf   : > { %v558_v59 = vmul.f32 %v848_v58, %v556_v57  ;;  %vm563_vm1 = vweird.f32 %v848_v58 }
  0xe0   : > { %vm564_vm2 = vmor %vm562_vm0, %vm563_vm1 }
  0xe1   : > { %v559_v61 = vsub.f32 1.0, %v558_v59 }
  0xe3   : > { %v560_v63 = vmul.f32 %v848_v58, %v559_v61 }
  0xe5   : > { %v561_v1 = vadd.f32 %v848_v58, %v560_v63 }
  0xe7   : > { %v565_v2 = vsel %vm564_vm2, %v848_v58, %v561_v1 }
  0xe8   : > { %v570_v3 = vsel %vm567_vm3, %v569_v0, %v565_v2 }
  0xe9   : > { %572 = vst [vmem:[%s984_s3] sm:$0x3] %v570_v3 }
  0xea PF: > { %s13_s14 = sadd.s32 1, %s871_s14   ;;  %s985_s12 = smov %s867_s13 }
  0xeb   : > { %p10_p8 = scmp.ge.s32.totalorder %s13_s14, 18   ;;  %s986_s13 = smov %s988_s15 }
  0xed   :  { %12 = sbr.rel (!%p10_p8) target bundleno = 2 (0x2), region = 73 }

</bundles_post_ra>
